<compile_context>
chip_gen: v6e
topology: v6e:2x2x1
jax: 0.10.0
libtpu: 0.0.40
codegen_flags: <defaults>
</compile_context>

<pallas_src>
import functools

import jax
import jax.numpy as jnp
from jax.experimental import pallas as pl
from jax.experimental.pallas import tpu as pltpu

EPS = 1e-5
LANE = 128                       # TPU lane width; channel padding target


def _ceil_to(x, m):
    return ((x + m - 1) // m) * m


def _vmem_limit_bytes():
    """Per-generation scoped-VMEM budget (review: don't hard-cap at 32 MiB)."""
    try:
        cap = int(pltpu.get_tpu_info().vmem_capacity_bytes)
    except Exception:
        cap = 64 * 1024 * 1024   # conservative fallback (safe on every gen)
    # ~75% of per-core VMEM, clamped to [32 MiB, 96 MiB].
    return max(32 * 1024 * 1024, min((cap * 3) // 4, 96 * 1024 * 1024))


# ---------------------------------------------------------------------------
# Kernel bodies
# ---------------------------------------------------------------------------
def _conv3x3_body(x_store, mask, w_ref, b_ref, y_ref, stats_ref, xpad_ref,
                  *, H, W):
    """3x3 same-padding conv of one image + per-image BN partial statistics.

    x_store:   (H*WP, Cin_p) bf16, WP = W+2; row layout [x(i,0..W-1), 0, 0].
    mask:      (H*WP, Cout_p) f32, 1.0 on real columns, 0.0 on the 2 pads.
    w_ref:     (9, Cin_p, Cout_p) bf16 per-tap weights (tap-major).
    b_ref:     (1, Cout_p) f32 bias (zero in padded lanes).
    y_ref:     (1, H*WP, Cout_p) bf16 raw conv output (pre-BN), same layout.
    stats_ref: (1, 8, Cout_p) f32; rows 0/1 = [sum, sum_of_squares].
    xpad_ref:  (R, Cin_p) bf16 persistent scratch, R >= H*WP + 2*WP + 2.
    """
    WP = W + 2
    HWP = H * WP
    R, cin_p = xpad_ref.shape
    cout_p = y_ref.shape[-1]
    top = WP + 1
    tail = R - top - HWP

    # Zero-pad border bands (cheap, every step -> safe under 'parallel'),
    # then one contiguous interior store.  Together with the two zero columns
    # already present in each stored row this reproduces the full (H+2, W+2)
    # zero halo without any concatenates.
    xpad_ref[pl.ds(0, top), :] = jnp.zeros((top, cin_p), xpad_ref.dtype)
    xpad_ref[pl.ds(top + HWP, tail), :] = jnp.zeros((tail, cin_p),
                                                    xpad_ref.dtype)
    xpad_ref[pl.ds(top, HWP), :] = x_store

    # Nine accumulating MXU dots over shifted contiguous windows (full lanes).
    acc = jnp.zeros((HWP, cout_p), jnp.float32)
    for kh in range(3):
        for kw in range(3):
            tap = xpad_ref[pl.ds(kh * WP + kw, HWP), :]
            acc = acc + jnp.dot(tap, w_ref[kh * 3 + kw],
                                preferred_element_type=jnp.float32)

    y = (acc + b_ref[...]) * mask                 # zero the 2 garbage columns

    s0 = jnp.sum(y, axis=0, keepdims=True)        # (1, Cout_p)
    s1 = jnp.sum(y * y, axis=0, keepdims=True)    # (1, Cout_p)
    stats_ref[0] = jnp.concatenate(
        [s0, s1, jnp.zeros((6, cout_p), jnp.float32)], axis=0)

    y_ref[0] = y.astype(y_ref.dtype)              # bf16 HBM intermediate


def _conv_kernel(x_ref, mask_ref, w_ref, b_ref, y_ref, stats_ref, xpad_ref,
                 *, H, W):
    _conv3x3_body(x_ref[0], mask_ref[...], w_ref, b_ref, y_ref, stats_ref,
                  xpad_ref, H=H, W=W)


def _act_conv_kernel(x_ref, scale_ref, shift_ref, mask_ref, w_ref, b_ref,
                     y_ref, stats_ref, xpad_ref, *, H, W):
    # Fused BN-apply + ReLU of the previous layer (full-lane f32 VPU math)
    # feeding straight into this layer's conv: one bf16 HBM round trip.
    mask = mask_ref[...]
    x = x_ref[0].astype(jnp.float32)
    x_act = jnp.maximum(x * scale_ref[...] + shift_ref[...], 0.0) * mask
    _conv3x3_body(x_act.astype(jnp.bfloat16), mask, w_ref, b_ref, y_ref,
                  stats_ref, xpad_ref, H=H, W=W)


def _bn_relu_kernel(y_ref, scale_ref, shift_ref, o_ref):
    # Final BN2-apply + ReLU: 2-op full-lane VPU pass, bf16 in / f32 out.
    o_ref[0] = jnp.maximum(
        y_ref[0].astype(jnp.float32) * scale_ref[...] + shift_ref[...], 0.0)


# ---------------------------------------------------------------------------
# pallas_call wrappers
# ---------------------------------------------------------------------------
def _conv_layer(x_flat, mask, w_pad, b_pad, pre_scale=None, pre_shift=None,
                *, H, W, cp_in, cp_out):
    """One Conv3x3 (optionally fused with the preceding BN+ReLU) over N."""
    N, HWP, _ = x_flat.shape
    WP = W + 2
    R = _ceil_to(HWP + 2 * WP + 2, 8)     # scratch rows (tap overrun + align)

    x_spec = pl.BlockSpec((1, HWP, cp_in), lambda n: (n, 0, 0))
    m_spec = pl.BlockSpec((HWP, cp_out), lambda n: (0, 0))
    w_spec = pl.BlockSpec((9, cp_in, cp_out), lambda n: (0, 0, 0))
    b_spec = pl.BlockSpec((1, cp_out), lambda n: (0, 0))

    if pre_scale is None:
        kern = functools.partial(_conv_kernel, H=H, W=W)
        in_specs = [x_spec, m_spec, w_spec, b_spec]
        args = (x_flat, mask, w_pad, b_pad)
    else:
        assert cp_in == cp_out            # conv2 in UTnet_conv: in_c == out_c
        kern = functools.partial(_act_conv_kernel, H=H, W=W)
        s_spec = pl.BlockSpec((1, cp_in), lambda n: (0, 0))
        in_specs = [x_spec, s_spec, s_spec, m_spec, w_spec, b_spec]
        args = (x_flat, pre_scale, pre_shift, mask, w_pad, b_pad)

    return pl.pallas_call(
        kern,
        out_shape=(jax.ShapeDtypeStruct((N, HWP, cp_out), jnp.bfloat16),
                   jax.ShapeDtypeStruct((N, 8, cp_out), jnp.float32)),
        grid_spec=pltpu.PrefetchScalarGridSpec(
            num_scalar_prefetch=0,
            grid=(N,),
            in_specs=in_specs,
            out_specs=(
                pl.BlockSpec((1, HWP, cp_out), lambda n: (n, 0, 0)),
                pl.BlockSpec((1, 8, cp_out), lambda n: (n, 0, 0)),
            ),
            scratch_shapes=[pltpu.VMEM((R, cp_in), jnp.bfloat16)],
        ),
        compiler_params=pltpu.CompilerParams(
            dimension_semantics=("parallel",),
            vmem_limit_bytes=_vmem_limit_bytes()),
    )(*args)


def _bn_relu_apply(y_raw, scale_pad, shift_pad):
    N, HWP, cp = y_raw.shape
    return pl.pallas_call(
        _bn_relu_kernel,
        out_shape=jax.ShapeDtypeStruct((N, HWP, cp), jnp.float32),
        grid_spec=pltpu.PrefetchScalarGridSpec(
            num_scalar_prefetch=0,
            grid=(N,),
            in_specs=[
                pl.BlockSpec((1, HWP, cp), lambda n: (n, 0, 0)),
                pl.BlockSpec((1, cp), lambda n: (0, 0)),
                pl.BlockSpec((1, cp), lambda n: (0, 0)),
            ],
            out_specs=pl.BlockSpec((1, HWP, cp), lambda n: (n, 0, 0)),
        ),
        compiler_params=pltpu.CompilerParams(
            dimension_semantics=("parallel",),
            vmem_limit_bytes=_vmem_limit_bytes()),
    )(y_raw, scale_pad, shift_pad)


# ---------------------------------------------------------------------------
# Parameter prep + full forward
# ---------------------------------------------------------------------------
def _prep_weight(w_hwio, cp_in, cp_out):
    kh, kw, cin, cout = w_hwio.shape
    w = w_hwio.reshape(kh * kw, cin, cout).astype(jnp.float32)
    w = jnp.pad(w, ((0, 0), (0, cp_in - cin), (0, cp_out - cout)))
    return w.astype(jnp.bfloat16)       # bf16 MXU inputs, f32 accumulation


def _pad_lanes(v, cp):
    return jnp.pad(v.astype(jnp.float32), (0, cp - v.shape[0]))[None, :]


def _bn_scale_shift(stats, gamma, beta, count, cout):
    s = jnp.sum(stats, axis=0)                  # reduce per-image partials
    mean = s[0, :cout] / count
    var = s[1, :cout] / count - mean * mean     # biased variance (BN training)
    scale = gamma * jax.lax.rsqrt(var + EPS)
    shift = beta - mean * scale
    return scale, shift


@jax.jit
def utnet_conv_forward(x_nchw, w1, b1, g1, beta1, w2, b2, g2, beta2):
    N, cin, H, W = x_nchw.shape
    cout = w1.shape[-1]
    WP = W + 2
    HWP = H * WP
    cp_in1 = _ceil_to(cin, LANE)
    cp = _ceil_to(cout, LANE)
    count = N * H * W

    # NCHW -> NHWC, pad the two trailing spatial columns + channel lanes, and
    # cast to bf16 once so the kernel only ever touches full-lane bf16 slabs.
    x = jnp.transpose(x_nchw, (0, 2, 3, 1)).astype(jnp.float32)
    x = jnp.pad(x, ((0, 0), (0, 0), (0, 2), (0, cp_in1 - cin)))
    x_flat = x.reshape(N, HWP, cp_in1).astype(jnp.bfloat16)

    # 0/1 mask for the two pad columns of each stored row (full-lane f32).
    col_valid = (jnp.arange(WP) < W).astype(jnp.float32)
    mask = jnp.broadcast_to(col_valid[None, :, None], (H, WP, cp))
    mask = mask.reshape(HWP, cp)

    w1p = _prep_weight(w1, cp_in1, cp)
    w2p = _prep_weight(w2, cp, cp)
    b1p, b2p = _pad_lanes(b1, cp), _pad_lanes(b2, cp)

    # Layer 1: conv + BN batch-stat partials.
    y1, st1 = _conv_layer(x_flat, mask, w1p, b1p,
                          H=H, W=W, cp_in=cp_in1, cp_out=cp)
    s1, t1 = _bn_scale_shift(st1, g1, beta1, count, cout)

    # Layer 2: BN1-apply + ReLU fused into the conv, then conv + stats.
    y2, st2 = _conv_layer(y1, mask, w2p, b2p,
                          _pad_lanes(s1, cp), _pad_lanes(t1, cp),
                          H=H, W=W, cp_in=cp, cp_out=cp)
    s2, t2 = _bn_scale_shift(st2, g2, beta2, count, cout)

    # Final BN2-apply + ReLU (f32 output), then strip padding and go NCHW.
    out_flat = _bn_relu_apply(y2, _pad_lanes(s2, cp), _pad_lanes(t2, cp))
    out = out_flat.reshape(N, H, WP, cp)[:, :, :W, :cout]
    return jnp.transpose(out, (0, 3, 1, 2))


# ---------------------------------------------------------------------------
# Pure-JAX reference (lax conv) used for the correctness check.
# ---------------------------------------------------------------------------
def reference_forward(x_nchw, w1, b1, g1, beta1, w2, b2, g2, beta2):
    def layer(x, w_hwio, b, gamma, beta):
        w_oihw = jnp.transpose(w_hwio, (3, 2, 0, 1))
        y = jax.lax.conv_general_dilated(
            x, w_oihw, (1, 1), ((1, 1), (1, 1)),
            dimension_numbers=("NCHW", "OIHW", "NCHW"))
        y = y + b[None, :, None, None]
        mean = y.mean(axis=(0, 2, 3))
        var = y.var(axis=(0, 2, 3))
        y = (y - mean[None, :, None, None]) * \
            jax.lax.rsqrt(var + EPS)[None, :, None, None]
        y = y * gamma[None, :, None, None] + beta[None, :, None, None]
        return jnp.maximum(y, 0.0)

    h = layer(x_nchw, w1, b1, g1, beta1)
    return layer(h, w2, b2, g2, beta2)


if __name__ == "__main__":
    N, in_c, out_c, H, W = 2, 4, 8, 16, 16
    key = jax.random.PRNGKey(0)
    ks = jax.random.split(key, 9)

    x = jax.random.normal(ks[0], (N, in_c, H, W), jnp.float32)

    # Deterministic synthetic parameters (HWIO conv weights).
    w1 = jax.random.normal(ks[1], (3, 3, in_c, out_c), jnp.float32) * 0.1
    b1 = jax.random.normal(ks[2], (out_c,), jnp.float32) * 0.1
    g1 = 1.0 + 0.1 * jax.random.normal(ks[3], (out_c,), jnp.float32)
    beta1 = 0.1 * jax.random.normal(ks[4], (out_c,), jnp.float32)
    w2 = jax.random.normal(ks[5], (3, 3, out_c, out_c), jnp.float32) * 0.1
    b2 = jax.random.normal(ks[6], (out_c,), jnp.float32) * 0.1
    g2 = 1.0 + 0.1 * jax.random.normal(ks[7], (out_c,), jnp.float32)
    beta2 = 0.1 * jax.random.normal(ks[8], (out_c,), jnp.float32)

    out = jax.block_until_ready(
        utnet_conv_forward(x, w1, b1, g1, beta1, w2, b2, g2, beta2))
    ref = jax.block_until_ready(
        reference_forward(x, w1, b1, g1, beta1, w2, b2, g2, beta2))

    assert out.shape == (N, out_c, H, W), out.shape
    max_err = float(jnp.max(jnp.abs(out - ref)))
    # bf16 MXU inputs + bf16 HBM intermediates vs an all-f32 reference on
    # O(1) values: worst-case abs error budget ~5e-2, so assert at 1e-1.
    assert max_err < 1e-1, f"max abs error {max_err}"
    print("KERNEL_OK")
</pallas_src>

<mosaic_0001>
module attributes {stable_mosaic.version = 11 : i64} {
  func.func @_conv_kernel(%arg0: i32, %arg1: memref<1x288x128xbf16, #tpu.memory_space<vmem>>, %arg2: memref<288x128xf32, #tpu.memory_space<vmem>>, %arg3: memref<9x128x128xbf16, #tpu.memory_space<vmem>>, %arg4: memref<1x128xf32, #tpu.memory_space<vmem>>, %arg5: memref<1x288x128xbf16, #tpu.memory_space<vmem>>, %arg6: memref<1x8x128xf32, #tpu.memory_space<vmem>>, %arg7: memref<328x128xbf16, #tpu.memory_space<vmem>>) attributes {dimension_semantics = [#tpu.dimension_semantics<parallel>], iteration_bounds = array<i64: 2>, scalar_prefetch = 0 : i64, scratch_operands = 1 : i64, tpu.core_type = #tpu.core_type<tc>, window_params = [{transform_indices = @transform_0, window_bounds = array<i64: 1, 288, 128>}, {pipeline_mode = #tpu.pipeline_mode<synchronous>, transform_indices = @transform_1, window_bounds = array<i64: 288, 128>}, {pipeline_mode = #tpu.pipeline_mode<synchronous>, transform_indices = @transform_2, window_bounds = array<i64: 9, 128, 128>}, {pipeline_mode = #tpu.pipeline_mode<synchronous>, transform_indices = @transform_3, window_bounds = array<i64: 1, 128>}, {transform_indices = @transform_4, window_bounds = array<i64: 1, 288, 128>}, {transform_indices = @transform_5, window_bounds = array<i64: 1, 8, 128>}]} {
    %c0 = arith.constant 0 : index
    %c0_0 = arith.constant 0 : index
    %c0_1 = arith.constant 0 : index
    %0 = vector.load %arg1[%c0, %c0_0, %c0_1] : memref<1x288x128xbf16, #tpu.memory_space<vmem>>, vector<1x288x128xbf16>
    %1 = vector.shape_cast %0 : vector<1x288x128xbf16> to vector<288x128xbf16>
    %c0_2 = arith.constant 0 : index
    %c0_3 = arith.constant 0 : index
    %2 = vector.load %arg2[%c0_2, %c0_3] : memref<288x128xf32, #tpu.memory_space<vmem>>, vector<288x128xf32>
    %cst = arith.constant 0.000000e+00 : bf16
    %3 = vector.broadcast %cst : bf16 to vector<19x128xbf16>
    %c0_4 = arith.constant 0 : index
    %c0_5 = arith.constant 0 : index
    %4 = vector.load %arg7[%c0_4, %c0_5] : memref<328x128xbf16, #tpu.memory_space<vmem>>, vector<19x128xbf16>
    tpu.vector_store %arg7[%c0_4, %c0_5], %3 {strides = array<i32>} : memref<328x128xbf16, #tpu.memory_space<vmem>>, vector<19x128xbf16>,
    %cst_6 = arith.constant 0.000000e+00 : bf16
    %5 = vector.broadcast %cst_6 : bf16 to vector<21x128xbf16>
    %c307 = arith.constant 307 : index
    %c0_7 = arith.constant 0 : index
    %6 = vector.load %arg7[%c307, %c0_7] : memref<328x128xbf16, #tpu.memory_space<vmem>>, vector<21x128xbf16>
    tpu.vector_store %arg7[%c307, %c0_7], %5 {strides = array<i32>} : memref<328x128xbf16, #tpu.memory_space<vmem>>, vector<21x128xbf16>,
    %c19 = arith.constant 19 : index
    %c0_8 = arith.constant 0 : index
    %7 = vector.load %arg7[%c19, %c0_8] : memref<328x128xbf16, #tpu.memory_space<vmem>>, vector<288x128xbf16>
    tpu.vector_store %arg7[%c19, %c0_8], %1 {strides = array<i32>} : memref<328x128xbf16, #tpu.memory_space<vmem>>, vector<288x128xbf16>,
    %cst_9 = arith.constant 0.000000e+00 : f32
    %8 = vector.broadcast %cst_9 : f32 to vector<288x128xf32>
    %c0_10 = arith.constant 0 : index
    %c0_11 = arith.constant 0 : index
    %9 = vector.load %arg7[%c0_10, %c0_11] : memref<328x128xbf16, #tpu.memory_space<vmem>>, vector<288x128xbf16>
    %c0_12 = arith.constant 0 : index
    %c0_13 = arith.constant 0 : index
    %c0_14 = arith.constant 0 : index
    %10 = vector.load %arg3[%c0_12, %c0_13, %c0_14] : memref<9x128x128xbf16, #tpu.memory_space<vmem>>, vector<1x128x128xbf16>
    %11 = vector.shape_cast %10 : vector<1x128x128xbf16> to vector<128x128xbf16>
    %cst_15 = arith.constant dense<0.000000e+00> : vector<288x128xf32>
    %12 = tpu.matmul %9, %11, %cst_15 {dimension_numbers = #tpu.dot_dimension_numbers<[1], [0], [0], [1], [0, 0, 1, 1], [], []>} : vector<288x128xbf16>, vector<128x128xbf16>, vector<288x128xf32> -> vector<288x128xf32>
    %13 = arith.addf %8, %12 : vector<288x128xf32>
    %c1 = arith.constant 1 : index
    %c0_16 = arith.constant 0 : index
    %14 = vector.load %arg7[%c1, %c0_16] : memref<328x128xbf16, #tpu.memory_space<vmem>>, vector<288x128xbf16>
    %c1_17 = arith.constant 1 : index
    %c0_18 = arith.constant 0 : index
    %c0_19 = arith.constant 0 : index
    %15 = vector.load %arg3[%c1_17, %c0_18, %c0_19] : memref<9x128x128xbf16, #tpu.memory_space<vmem>>, vector<1x128x128xbf16>
    %16 = vector.shape_cast %15 : vector<1x128x128xbf16> to vector<128x128xbf16>
    %cst_20 = arith.constant dense<0.000000e+00> : vector<288x128xf32>
    %17 = tpu.matmul %14, %16, %cst_20 {dimension_numbers = #tpu.dot_dimension_numbers<[1], [0], [0], [1], [0, 0, 1, 1], [], []>} : vector<288x128xbf16>, vector<128x128xbf16>, vector<288x128xf32> -> vector<288x128xf32>
    %18 = arith.addf %13, %17 : vector<288x128xf32>
    %c2 = arith.constant 2 : index
    %c0_21 = arith.constant 0 : index
    %19 = vector.load %arg7[%c2, %c0_21] : memref<328x128xbf16, #tpu.memory_space<vmem>>, vector<288x128xbf16>
    %c2_22 = arith.constant 2 : index
    %c0_23 = arith.constant 0 : index
    %c0_24 = arith.constant 0 : index
    %20 = vector.load %arg3[%c2_22, %c0_23, %c0_24] : memref<9x128x128xbf16, #tpu.memory_space<vmem>>, vector<1x128x128xbf16>
    %21 = vector.shape_cast %20 : vector<1x128x128xbf16> to vector<128x128xbf16>
    %cst_25 = arith.constant dense<0.000000e+00> : vector<288x128xf32>
    %22 = tpu.matmul %19, %21, %cst_25 {dimension_numbers = #tpu.dot_dimension_numbers<[1], [0], [0], [1], [0, 0, 1, 1], [], []>} : vector<288x128xbf16>, vector<128x128xbf16>, vector<288x128xf32> -> vector<288x128xf32>
    %23 = arith.addf %18, %22 : vector<288x128xf32>
    %c18 = arith.constant 18 : index
    %c0_26 = arith.constant 0 : index
    %24 = vector.load %arg7[%c18, %c0_26] : memref<328x128xbf16, #tpu.memory_space<vmem>>, vector<288x128xbf16>
    %c3 = arith.constant 3 : index
    %c0_27 = arith.constant 0 : index
    %c0_28 = arith.constant 0 : index
    %25 = vector.load %arg3[%c3, %c0_27, %c0_28] : memref<9x128x128xbf16, #tpu.memory_space<vmem>>, vector<1x128x128xbf16>
    %26 = vector.shape_cast %25 : vector<1x128x128xbf16> to vector<128x128xbf16>
    %cst_29 = arith.constant dense<0.000000e+00> : vector<288x128xf32>
    %27 = tpu.matmul %24, %26, %cst_29 {dimension_numbers = #tpu.dot_dimension_numbers<[1], [0], [0], [1], [0, 0, 1, 1], [], []>} : vector<288x128xbf16>, vector<128x128xbf16>, vector<288x128xf32> -> vector<288x128xf32>
    %28 = arith.addf %23, %27 : vector<288x128xf32>
    %c19_30 = arith.constant 19 : index
    %c0_31 = arith.constant 0 : index
    %29 = vector.load %arg7[%c19_30, %c0_31] : memref<328x128xbf16, #tpu.memory_space<vmem>>, vector<288x128xbf16>
    %c4 = arith.constant 4 : index
    %c0_32 = arith.constant 0 : index
    %c0_33 = arith.constant 0 : index
    %30 = vector.load %arg3[%c4, %c0_32, %c0_33] : memref<9x128x128xbf16, #tpu.memory_space<vmem>>, vector<1x128x128xbf16>
    %31 = vector.shape_cast %30 : vector<1x128x128xbf16> to vector<128x128xbf16>
    %cst_34 = arith.constant dense<0.000000e+00> : vector<288x128xf32>
    %32 = tpu.matmul %29, %31, %cst_34 {dimension_numbers = #tpu.dot_dimension_numbers<[1], [0], [0], [1], [0, 0, 1, 1], [], []>} : vector<288x128xbf16>, vector<128x128xbf16>, vector<288x128xf32> -> vector<288x128xf32>
    %33 = arith.addf %28, %32 : vector<288x128xf32>
    %c20 = arith.constant 20 : index
    %c0_35 = arith.constant 0 : index
    %34 = vector.load %arg7[%c20, %c0_35] : memref<328x128xbf16, #tpu.memory_space<vmem>>, vector<288x128xbf16>
    %c5 = arith.constant 5 : index
    %c0_36 = arith.constant 0 : index
    %c0_37 = arith.constant 0 : index
    %35 = vector.load %arg3[%c5, %c0_36, %c0_37] : memref<9x128x128xbf16, #tpu.memory_space<vmem>>, vector<1x128x128xbf16>
    %36 = vector.shape_cast %35 : vector<1x128x128xbf16> to vector<128x128xbf16>
    %cst_38 = arith.constant dense<0.000000e+00> : vector<288x128xf32>
    %37 = tpu.matmul %34, %36, %cst_38 {dimension_numbers = #tpu.dot_dimension_numbers<[1], [0], [0], [1], [0, 0, 1, 1], [], []>} : vector<288x128xbf16>, vector<128x128xbf16>, vector<288x128xf32> -> vector<288x128xf32>
    %38 = arith.addf %33, %37 : vector<288x128xf32>
    %c36 = arith.constant 36 : index
    %c0_39 = arith.constant 0 : index
    %39 = vector.load %arg7[%c36, %c0_39] : memref<328x128xbf16, #tpu.memory_space<vmem>>, vector<288x128xbf16>
    %c6 = arith.constant 6 : index
    %c0_40 = arith.constant 0 : index
    %c0_41 = arith.constant 0 : index
    %40 = vector.load %arg3[%c6, %c0_40, %c0_41] : memref<9x128x128xbf16, #tpu.memory_space<vmem>>, vector<1x128x128xbf16>
    %41 = vector.shape_cast %40 : vector<1x128x128xbf16> to vector<128x128xbf16>
    %cst_42 = arith.constant dense<0.000000e+00> : vector<288x128xf32>
    %42 = tpu.matmul %39, %41, %cst_42 {dimension_numbers = #tpu.dot_dimension_numbers<[1], [0], [0], [1], [0, 0, 1, 1], [], []>} : vector<288x128xbf16>, vector<128x128xbf16>, vector<288x128xf32> -> vector<288x128xf32>
    %43 = arith.addf %38, %42 : vector<288x128xf32>
    %c37 = arith.constant 37 : index
    %c0_43 = arith.constant 0 : index
    %44 = vector.load %arg7[%c37, %c0_43] : memref<328x128xbf16, #tpu.memory_space<vmem>>, vector<288x128xbf16>
    %c7 = arith.constant 7 : index
    %c0_44 = arith.constant 0 : index
    %c0_45 = arith.constant 0 : index
    %45 = vector.load %arg3[%c7, %c0_44, %c0_45] : memref<9x128x128xbf16, #tpu.memory_space<vmem>>, vector<1x128x128xbf16>
    %46 = vector.shape_cast %45 : vector<1x128x128xbf16> to vector<128x128xbf16>
    %cst_46 = arith.constant dense<0.000000e+00> : vector<288x128xf32>
    %47 = tpu.matmul %44, %46, %cst_46 {dimension_numbers = #tpu.dot_dimension_numbers<[1], [0], [0], [1], [0, 0, 1, 1], [], []>} : vector<288x128xbf16>, vector<128x128xbf16>, vector<288x128xf32> -> vector<288x128xf32>
    %48 = arith.addf %43, %47 : vector<288x128xf32>
    %c38 = arith.constant 38 : index
    %c0_47 = arith.constant 0 : index
    %49 = vector.load %arg7[%c38, %c0_47] : memref<328x128xbf16, #tpu.memory_space<vmem>>, vector<288x128xbf16>
    %c8 = arith.constant 8 : index
    %c0_48 = arith.constant 0 : index
    %c0_49 = arith.constant 0 : index
    %50 = vector.load %arg3[%c8, %c0_48, %c0_49] : memref<9x128x128xbf16, #tpu.memory_space<vmem>>, vector<1x128x128xbf16>
    %51 = vector.shape_cast %50 : vector<1x128x128xbf16> to vector<128x128xbf16>
    %cst_50 = arith.constant dense<0.000000e+00> : vector<288x128xf32>
    %52 = tpu.matmul %49, %51, %cst_50 {dimension_numbers = #tpu.dot_dimension_numbers<[1], [0], [0], [1], [0, 0, 1, 1], [], []>} : vector<288x128xbf16>, vector<128x128xbf16>, vector<288x128xf32> -> vector<288x128xf32>
    %53 = arith.addf %48, %52 : vector<288x128xf32>
    %c0_51 = arith.constant 0 : index
    %c0_52 = arith.constant 0 : index
    %54 = vector.load %arg4[%c0_51, %c0_52] : memref<1x128xf32, #tpu.memory_space<vmem>>, vector<1x128xf32>
    %55 = vector.broadcast %54 : vector<1x128xf32> to vector<288x128xf32>
    %56 = arith.addf %53, %55 : vector<288x128xf32>
    %57 = arith.mulf %56, %2 : vector<288x128xf32>
    %cst_53 = arith.constant dense<0.000000e+00> : vector<128xf32>
    %58 = vector.multi_reduction <add>, %57, %cst_53 [0] : vector<288x128xf32> to vector<128xf32>
    %59 = vector.shape_cast %58 : vector<128xf32> to vector<1x128xf32>
    %60 = arith.mulf %57, %57 : vector<288x128xf32>
    %cst_54 = arith.constant dense<0.000000e+00> : vector<128xf32>
    %61 = vector.multi_reduction <add>, %60, %cst_54 [0] : vector<288x128xf32> to vector<128xf32>
    %62 = vector.shape_cast %61 : vector<128xf32> to vector<1x128xf32>
    %cst_55 = arith.constant 0.000000e+00 : f32
    %63 = vector.broadcast %cst_55 : f32 to vector<6x128xf32>
    %64 = tpu.concatenate %59, %62, %63 in 0 : vector<1x128xf32>, vector<1x128xf32>, vector<6x128xf32> -> vector<8x128xf32>
    %c0_56 = arith.constant 0 : index
    %c0_57 = arith.constant 0 : index
    %c0_58 = arith.constant 0 : index
    %65 = vector.load %arg6[%c0_56, %c0_57, %c0_58] : memref<1x8x128xf32, #tpu.memory_space<vmem>>, vector<1x8x128xf32>
    %66 = vector.shape_cast %65 : vector<1x8x128xf32> to vector<8x128xf32>
    %67 = vector.shape_cast %64 : vector<8x128xf32> to vector<1x8x128xf32>
    tpu.vector_store %arg6[%c0_56, %c0_57, %c0_58], %67 {strides = array<i32>} : memref<1x8x128xf32, #tpu.memory_space<vmem>>, vector<1x8x128xf32>,
    %68 = arith.truncf %57 : vector<288x128xf32> to vector<288x128xbf16>
    %c0_59 = arith.constant 0 : index
    %c0_60 = arith.constant 0 : index
    %c0_61 = arith.constant 0 : index
    %69 = vector.load %arg5[%c0_59, %c0_60, %c0_61] : memref<1x288x128xbf16, #tpu.memory_space<vmem>>, vector<1x288x128xbf16>
    %70 = vector.shape_cast %69 : vector<1x288x128xbf16> to vector<288x128xbf16>
    %71 = vector.shape_cast %68 : vector<288x128xbf16> to vector<1x288x128xbf16>
    tpu.vector_store %arg5[%c0_59, %c0_60, %c0_61], %71 {strides = array<i32>} : memref<1x288x128xbf16, #tpu.memory_space<vmem>>, vector<1x288x128xbf16>,
    return
  }
  func.func @transform_0(%arg0: i32) -> (i32, i32, i32) {
    %c0_i32 = arith.constant 0 : i32
    %c0_i32_0 = arith.constant 0 : i32
    %c0_i32_1 = arith.constant 0 : i32
    return %arg0, %c0_i32, %c0_i32_0 : i32, i32, i32
  }
  func.func @transform_1(%arg0: i32) -> (i32, i32) {
    %c0_i32 = arith.constant 0 : i32
    %c0_i32_0 = arith.constant 0 : i32
    %c0_i32_1 = arith.constant 0 : i32
    return %c0_i32, %c0_i32_0 : i32, i32
  }
  func.func @transform_2(%arg0: i32) -> (i32, i32, i32) {
    %c0_i32 = arith.constant 0 : i32
    %c0_i32_0 = arith.constant 0 : i32
    %c0_i32_1 = arith.constant 0 : i32
    %c0_i32_2 = arith.constant 0 : i32
    return %c0_i32, %c0_i32_0, %c0_i32_1 : i32, i32, i32
  }
  func.func @transform_3(%arg0: i32) -> (i32, i32) {
    %c0_i32 = arith.constant 0 : i32
    %c0_i32_0 = arith.constant 0 : i32
    %c0_i32_1 = arith.constant 0 : i32
    return %c0_i32, %c0_i32_0 : i32, i32
  }
  func.func @transform_4(%arg0: i32) -> (i32, i32, i32) {
    %c0_i32 = arith.constant 0 : i32
    %c0_i32_0 = arith.constant 0 : i32
    %c0_i32_1 = arith.constant 0 : i32
    return %arg0, %c0_i32, %c0_i32_0 : i32, i32, i32
  }
  func.func @transform_5(%arg0: i32) -> (i32, i32, i32) {
    %c0_i32 = arith.constant 0 : i32
    %c0_i32_0 = arith.constant 0 : i32
    %c0_i32_1 = arith.constant 0 : i32
    return %arg0, %c0_i32, %c0_i32_0 : i32, i32, i32
  }
}

module attributes {stable_mosaic.version = 11 : i64} {
  func.func @_bn_relu_kernel(%arg0: i32, %arg1: memref<1x288x128xbf16, #tpu.memory_space<vmem>>, %arg2: memref<1x128xf32, #tpu.memory_space<vmem>>, %arg3: memref<1x128xf32, #tpu.memory_space<vmem>>, %arg4: memref<1x288x128xf32, #tpu.memory_space<vmem>>) attributes {dimension_semantics = [#tpu.dimension_semantics<parallel>], iteration_bounds = array<i64: 2>, scalar_prefetch = 0 : i64, scratch_operands = 0 : i64, tpu.core_type = #tpu.core_type<tc>, window_params = [{transform_indices = @transform_0, window_bounds = array<i64: 1, 288, 128>}, {pipeline_mode = #tpu.pipeline_mode<synchronous>, transform_indices = @transform_1, window_bounds = array<i64: 1, 128>}, {pipeline_mode = #tpu.pipeline_mode<synchronous>, transform_indices = @transform_2, window_bounds = array<i64: 1, 128>}, {transform_indices = @transform_3, window_bounds = array<i64: 1, 288, 128>}]} {
    %c0 = arith.constant 0 : index
    %c0_0 = arith.constant 0 : index
    %c0_1 = arith.constant 0 : index
    %0 = vector.load %arg1[%c0, %c0_0, %c0_1] : memref<1x288x128xbf16, #tpu.memory_space<vmem>>, vector<1x288x128xbf16>
    %1 = vector.shape_cast %0 : vector<1x288x128xbf16> to vector<288x128xbf16>
    %2 = arith.extf %1 : vector<288x128xbf16> to vector<288x128xf32>
    %c0_2 = arith.constant 0 : index
    %c0_3 = arith.constant 0 : index
    %3 = vector.load %arg2[%c0_2, %c0_3] : memref<1x128xf32, #tpu.memory_space<vmem>>, vector<1x128xf32>
    %4 = vector.broadcast %3 : vector<1x128xf32> to vector<288x128xf32>
    %5 = arith.mulf %2, %4 : vector<288x128xf32>
    %c0_4 = arith.constant 0 : index
    %c0_5 = arith.constant 0 : index
    %6 = vector.load %arg3[%c0_4, %c0_5] : memref<1x128xf32, #tpu.memory_space<vmem>>, vector<1x128xf32>
    %7 = vector.broadcast %6 : vector<1x128xf32> to vector<288x128xf32>
    %8 = arith.addf %5, %7 : vector<288x128xf32>
    %cst = arith.constant 0.000000e+00 : f32
    %9 = vector.broadcast %cst : f32 to vector<288x128xf32>
    %10 = arith.maximumf %8, %9 : vector<288x128xf32>
    %c0_6 = arith.constant 0 : index
    %c0_7 = arith.constant 0 : index
    %c0_8 = arith.constant 0 : index
    %11 = vector.load %arg4[%c0_6, %c0_7, %c0_8] : memref<1x288x128xf32, #tpu.memory_space<vmem>>, vector<1x288x128xf32>
    %12 = vector.shape_cast %11 : vector<1x288x128xf32> to vector<288x128xf32>
    %13 = vector.shape_cast %10 : vector<288x128xf32> to vector<1x288x128xf32>
    tpu.vector_store %arg4[%c0_6, %c0_7, %c0_8], %13 {strides = array<i32>} : memref<1x288x128xf32, #tpu.memory_space<vmem>>, vector<1x288x128xf32>,
    return
  }
  func.func @transform_0(%arg0: i32) -> (i32, i32, i32) {
    %c0_i32 = arith.constant 0 : i32
    %c0_i32_0 = arith.constant 0 : i32
    %c0_i32_1 = arith.constant 0 : i32
    return %arg0, %c0_i32, %c0_i32_0 : i32, i32, i32
  }
  func.func @transform_1(%arg0: i32) -> (i32, i32) {
    %c0_i32 = arith.constant 0 : i32
    %c0_i32_0 = arith.constant 0 : i32
    %c0_i32_1 = arith.constant 0 : i32
    return %c0_i32, %c0_i32_0 : i32, i32
  }
  func.func @transform_2(%arg0: i32) -> (i32, i32) {
    %c0_i32 = arith.constant 0 : i32
    %c0_i32_0 = arith.constant 0 : i32
    %c0_i32_1 = arith.constant 0 : i32
    return %c0_i32, %c0_i32_0 : i32, i32
  }
  func.func @transform_3(%arg0: i32) -> (i32, i32, i32) {
    %c0_i32 = arith.constant 0 : i32
    %c0_i32_0 = arith.constant 0 : i32
    %c0_i32_1 = arith.constant 0 : i32
    return %arg0, %c0_i32, %c0_i32_0 : i32, i32, i32
  }
}

module attributes {stable_mosaic.version = 11 : i64} {
  func.func @_act_conv_kernel(%arg0: i32, %arg1: memref<1x288x128xbf16, #tpu.memory_space<vmem>>, %arg2: memref<1x128xf32, #tpu.memory_space<vmem>>, %arg3: memref<1x128xf32, #tpu.memory_space<vmem>>, %arg4: memref<288x128xf32, #tpu.memory_space<vmem>>, %arg5: memref<9x128x128xbf16, #tpu.memory_space<vmem>>, %arg6: memref<1x128xf32, #tpu.memory_space<vmem>>, %arg7: memref<1x288x128xbf16, #tpu.memory_space<vmem>>, %arg8: memref<1x8x128xf32, #tpu.memory_space<vmem>>, %arg9: memref<328x128xbf16, #tpu.memory_space<vmem>>) attributes {dimension_semantics = [#tpu.dimension_semantics<parallel>], iteration_bounds = array<i64: 2>, scalar_prefetch = 0 : i64, scratch_operands = 1 : i64, tpu.core_type = #tpu.core_type<tc>, window_params = [{transform_indices = @transform_0, window_bounds = array<i64: 1, 288, 128>}, {pipeline_mode = #tpu.pipeline_mode<synchronous>, transform_indices = @transform_1, window_bounds = array<i64: 1, 128>}, {pipeline_mode = #tpu.pipeline_mode<synchronous>, transform_indices = @transform_2, window_bounds = array<i64: 1, 128>}, {pipeline_mode = #tpu.pipeline_mode<synchronous>, transform_indices = @transform_3, window_bounds = array<i64: 288, 128>}, {pipeline_mode = #tpu.pipeline_mode<synchronous>, transform_indices = @transform_4, window_bounds = array<i64: 9, 128, 128>}, {pipeline_mode = #tpu.pipeline_mode<synchronous>, transform_indices = @transform_5, window_bounds = array<i64: 1, 128>}, {transform_indices = @transform_6, window_bounds = array<i64: 1, 288, 128>}, {transform_indices = @transform_7, window_bounds = array<i64: 1, 8, 128>}]} {
    %c0 = arith.constant 0 : index
    %c0_0 = arith.constant 0 : index
    %0 = vector.load %arg4[%c0, %c0_0] : memref<288x128xf32, #tpu.memory_space<vmem>>, vector<288x128xf32>
    %c0_1 = arith.constant 0 : index
    %c0_2 = arith.constant 0 : index
    %c0_3 = arith.constant 0 : index
    %1 = vector.load %arg1[%c0_1, %c0_2, %c0_3] : memref<1x288x128xbf16, #tpu.memory_space<vmem>>, vector<1x288x128xbf16>
    %2 = vector.shape_cast %1 : vector<1x288x128xbf16> to vector<288x128xbf16>
    %3 = arith.extf %2 : vector<288x128xbf16> to vector<288x128xf32>
    %c0_4 = arith.constant 0 : index
    %c0_5 = arith.constant 0 : index
    %4 = vector.load %arg2[%c0_4, %c0_5] : memref<1x128xf32, #tpu.memory_space<vmem>>, vector<1x128xf32>
    %5 = vector.broadcast %4 : vector<1x128xf32> to vector<288x128xf32>
    %6 = arith.mulf %3, %5 : vector<288x128xf32>
    %c0_6 = arith.constant 0 : index
    %c0_7 = arith.constant 0 : index
    %7 = vector.load %arg3[%c0_6, %c0_7] : memref<1x128xf32, #tpu.memory_space<vmem>>, vector<1x128xf32>
    %8 = vector.broadcast %7 : vector<1x128xf32> to vector<288x128xf32>
    %9 = arith.addf %6, %8 : vector<288x128xf32>
    %cst = arith.constant 0.000000e+00 : f32
    %10 = vector.broadcast %cst : f32 to vector<288x128xf32>
    %11 = arith.maximumf %9, %10 : vector<288x128xf32>
    %12 = arith.mulf %11, %0 : vector<288x128xf32>
    %13 = arith.truncf %12 : vector<288x128xf32> to vector<288x128xbf16>
    %cst_8 = arith.constant 0.000000e+00 : bf16
    %14 = vector.broadcast %cst_8 : bf16 to vector<19x128xbf16>
    %c0_9 = arith.constant 0 : index
    %c0_10 = arith.constant 0 : index
    %15 = vector.load %arg9[%c0_9, %c0_10] : memref<328x128xbf16, #tpu.memory_space<vmem>>, vector<19x128xbf16>
    tpu.vector_store %arg9[%c0_9, %c0_10], %14 {strides = array<i32>} : memref<328x128xbf16, #tpu.memory_space<vmem>>, vector<19x128xbf16>,
    %cst_11 = arith.constant 0.000000e+00 : bf16
    %16 = vector.broadcast %cst_11 : bf16 to vector<21x128xbf16>
    %c307 = arith.constant 307 : index
    %c0_12 = arith.constant 0 : index
    %17 = vector.load %arg9[%c307, %c0_12] : memref<328x128xbf16, #tpu.memory_space<vmem>>, vector<21x128xbf16>
    tpu.vector_store %arg9[%c307, %c0_12], %16 {strides = array<i32>} : memref<328x128xbf16, #tpu.memory_space<vmem>>, vector<21x128xbf16>,
    %c19 = arith.constant 19 : index
    %c0_13 = arith.constant 0 : index
    %18 = vector.load %arg9[%c19, %c0_13] : memref<328x128xbf16, #tpu.memory_space<vmem>>, vector<288x128xbf16>
    tpu.vector_store %arg9[%c19, %c0_13], %13 {strides = array<i32>} : memref<328x128xbf16, #tpu.memory_space<vmem>>, vector<288x128xbf16>,
    %cst_14 = arith.constant 0.000000e+00 : f32
    %19 = vector.broadcast %cst_14 : f32 to vector<288x128xf32>
    %c0_15 = arith.constant 0 : index
    %c0_16 = arith.constant 0 : index
    %20 = vector.load %arg9[%c0_15, %c0_16] : memref<328x128xbf16, #tpu.memory_space<vmem>>, vector<288x128xbf16>
    %c0_17 = arith.constant 0 : index
    %c0_18 = arith.constant 0 : index
    %c0_19 = arith.constant 0 : index
    %21 = vector.load %arg5[%c0_17, %c0_18, %c0_19] : memref<9x128x128xbf16, #tpu.memory_space<vmem>>, vector<1x128x128xbf16>
    %22 = vector.shape_cast %21 : vector<1x128x128xbf16> to vector<128x128xbf16>
    %cst_20 = arith.constant dense<0.000000e+00> : vector<288x128xf32>
    %23 = tpu.matmul %20, %22, %cst_20 {dimension_numbers = #tpu.dot_dimension_numbers<[1], [0], [0], [1], [0, 0, 1, 1], [], []>} : vector<288x128xbf16>, vector<128x128xbf16>, vector<288x128xf32> -> vector<288x128xf32>
    %24 = arith.addf %19, %23 : vector<288x128xf32>
    %c1 = arith.constant 1 : index
    %c0_21 = arith.constant 0 : index
    %25 = vector.load %arg9[%c1, %c0_21] : memref<328x128xbf16, #tpu.memory_space<vmem>>, vector<288x128xbf16>
    %c1_22 = arith.constant 1 : index
    %c0_23 = arith.constant 0 : index
    %c0_24 = arith.constant 0 : index
    %26 = vector.load %arg5[%c1_22, %c0_23, %c0_24] : memref<9x128x128xbf16, #tpu.memory_space<vmem>>, vector<1x128x128xbf16>
    %27 = vector.shape_cast %26 : vector<1x128x128xbf16> to vector<128x128xbf16>
    %cst_25 = arith.constant dense<0.000000e+00> : vector<288x128xf32>
    %28 = tpu.matmul %25, %27, %cst_25 {dimension_numbers = #tpu.dot_dimension_numbers<[1], [0], [0], [1], [0, 0, 1, 1], [], []>} : vector<288x128xbf16>, vector<128x128xbf16>, vector<288x128xf32> -> vector<288x128xf32>
    %29 = arith.addf %24, %28 : vector<288x128xf32>
    %c2 = arith.constant 2 : index
    %c0_26 = arith.constant 0 : index
    %30 = vector.load %arg9[%c2, %c0_26] : memref<328x128xbf16, #tpu.memory_space<vmem>>, vector<288x128xbf16>
    %c2_27 = arith.constant 2 : index
    %c0_28 = arith.constant 0 : index
    %c0_29 = arith.constant 0 : index
    %31 = vector.load %arg5[%c2_27, %c0_28, %c0_29] : memref<9x128x128xbf16, #tpu.memory_space<vmem>>, vector<1x128x128xbf16>
    %32 = vector.shape_cast %31 : vector<1x128x128xbf16> to vector<128x128xbf16>
    %cst_30 = arith.constant dense<0.000000e+00> : vector<288x128xf32>
    %33 = tpu.matmul %30, %32, %cst_30 {dimension_numbers = #tpu.dot_dimension_numbers<[1], [0], [0], [1], [0, 0, 1, 1], [], []>} : vector<288x128xbf16>, vector<128x128xbf16>, vector<288x128xf32> -> vector<288x128xf32>
    %34 = arith.addf %29, %33 : vector<288x128xf32>
    %c18 = arith.constant 18 : index
    %c0_31 = arith.constant 0 : index
    %35 = vector.load %arg9[%c18, %c0_31] : memref<328x128xbf16, #tpu.memory_space<vmem>>, vector<288x128xbf16>
    %c3 = arith.constant 3 : index
    %c0_32 = arith.constant 0 : index
    %c0_33 = arith.constant 0 : index
    %36 = vector.load %arg5[%c3, %c0_32, %c0_33] : memref<9x128x128xbf16, #tpu.memory_space<vmem>>, vector<1x128x128xbf16>
    %37 = vector.shape_cast %36 : vector<1x128x128xbf16> to vector<128x128xbf16>
    %cst_34 = arith.constant dense<0.000000e+00> : vector<288x128xf32>
    %38 = tpu.matmul %35, %37, %cst_34 {dimension_numbers = #tpu.dot_dimension_numbers<[1], [0], [0], [1], [0, 0, 1, 1], [], []>} : vector<288x128xbf16>, vector<128x128xbf16>, vector<288x128xf32> -> vector<288x128xf32>
    %39 = arith.addf %34, %38 : vector<288x128xf32>
    %c19_35 = arith.constant 19 : index
    %c0_36 = arith.constant 0 : index
    %40 = vector.load %arg9[%c19_35, %c0_36] : memref<328x128xbf16, #tpu.memory_space<vmem>>, vector<288x128xbf16>
    %c4 = arith.constant 4 : index
    %c0_37 = arith.constant 0 : index
    %c0_38 = arith.constant 0 : index
    %41 = vector.load %arg5[%c4, %c0_37, %c0_38] : memref<9x128x128xbf16, #tpu.memory_space<vmem>>, vector<1x128x128xbf16>
    %42 = vector.shape_cast %41 : vector<1x128x128xbf16> to vector<128x128xbf16>
    %cst_39 = arith.constant dense<0.000000e+00> : vector<288x128xf32>
    %43 = tpu.matmul %40, %42, %cst_39 {dimension_numbers = #tpu.dot_dimension_numbers<[1], [0], [0], [1], [0, 0, 1, 1], [], []>} : vector<288x128xbf16>, vector<128x128xbf16>, vector<288x128xf32> -> vector<288x128xf32>
    %44 = arith.addf %39, %43 : vector<288x128xf32>
    %c20 = arith.constant 20 : index
    %c0_40 = arith.constant 0 : index
    %45 = vector.load %arg9[%c20, %c0_40] : memref<328x128xbf16, #tpu.memory_space<vmem>>, vector<288x128xbf16>
    %c5 = arith.constant 5 : index
    %c0_41 = arith.constant 0 : index
    %c0_42 = arith.constant 0 : index
    %46 = vector.load %arg5[%c5, %c0_41, %c0_42] : memref<9x128x128xbf16, #tpu.memory_space<vmem>>, vector<1x128x128xbf16>
    %47 = vector.shape_cast %46 : vector<1x128x128xbf16> to vector<128x128xbf16>
    %cst_43 = arith.constant dense<0.000000e+00> : vector<288x128xf32>
    %48 = tpu.matmul %45, %47, %cst_43 {dimension_numbers = #tpu.dot_dimension_numbers<[1], [0], [0], [1], [0, 0, 1, 1], [], []>} : vector<288x128xbf16>, vector<128x128xbf16>, vector<288x128xf32> -> vector<288x128xf32>
    %49 = arith.addf %44, %48 : vector<288x128xf32>
    %c36 = arith.constant 36 : index
    %c0_44 = arith.constant 0 : index
    %50 = vector.load %arg9[%c36, %c0_44] : memref<328x128xbf16, #tpu.memory_space<vmem>>, vector<288x128xbf16>
    %c6 = arith.constant 6 : index
    %c0_45 = arith.constant 0 : index
    %c0_46 = arith.constant 0 : index
    %51 = vector.load %arg5[%c6, %c0_45, %c0_46] : memref<9x128x128xbf16, #tpu.memory_space<vmem>>, vector<1x128x128xbf16>
    %52 = vector.shape_cast %51 : vector<1x128x128xbf16> to vector<128x128xbf16>
    %cst_47 = arith.constant dense<0.000000e+00> : vector<288x128xf32>
    %53 = tpu.matmul %50, %52, %cst_47 {dimension_numbers = #tpu.dot_dimension_numbers<[1], [0], [0], [1], [0, 0, 1, 1], [], []>} : vector<288x128xbf16>, vector<128x128xbf16>, vector<288x128xf32> -> vector<288x128xf32>
    %54 = arith.addf %49, %53 : vector<288x128xf32>
    %c37 = arith.constant 37 : index
    %c0_48 = arith.constant 0 : index
    %55 = vector.load %arg9[%c37, %c0_48] : memref<328x128xbf16, #tpu.memory_space<vmem>>, vector<288x128xbf16>
    %c7 = arith.constant 7 : index
    %c0_49 = arith.constant 0 : index
    %c0_50 = arith.constant 0 : index
    %56 = vector.load %arg5[%c7, %c0_49, %c0_50] : memref<9x128x128xbf16, #tpu.memory_space<vmem>>, vector<1x128x128xbf16>
    %57 = vector.shape_cast %56 : vector<1x128x128xbf16> to vector<128x128xbf16>
    %cst_51 = arith.constant dense<0.000000e+00> : vector<288x128xf32>
    %58 = tpu.matmul %55, %57, %cst_51 {dimension_numbers = #tpu.dot_dimension_numbers<[1], [0], [0], [1], [0, 0, 1, 1], [], []>} : vector<288x128xbf16>, vector<128x128xbf16>, vector<288x128xf32> -> vector<288x128xf32>
    %59 = arith.addf %54, %58 : vector<288x128xf32>
    %c38 = arith.constant 38 : index
    %c0_52 = arith.constant 0 : index
    %60 = vector.load %arg9[%c38, %c0_52] : memref<328x128xbf16, #tpu.memory_space<vmem>>, vector<288x128xbf16>
    %c8 = arith.constant 8 : index
    %c0_53 = arith.constant 0 : index
    %c0_54 = arith.constant 0 : index
    %61 = vector.load %arg5[%c8, %c0_53, %c0_54] : memref<9x128x128xbf16, #tpu.memory_space<vmem>>, vector<1x128x128xbf16>
    %62 = vector.shape_cast %61 : vector<1x128x128xbf16> to vector<128x128xbf16>
    %cst_55 = arith.constant dense<0.000000e+00> : vector<288x128xf32>
    %63 = tpu.matmul %60, %62, %cst_55 {dimension_numbers = #tpu.dot_dimension_numbers<[1], [0], [0], [1], [0, 0, 1, 1], [], []>} : vector<288x128xbf16>, vector<128x128xbf16>, vector<288x128xf32> -> vector<288x128xf32>
    %64 = arith.addf %59, %63 : vector<288x128xf32>
    %c0_56 = arith.constant 0 : index
    %c0_57 = arith.constant 0 : index
    %65 = vector.load %arg6[%c0_56, %c0_57] : memref<1x128xf32, #tpu.memory_space<vmem>>, vector<1x128xf32>
    %66 = vector.broadcast %65 : vector<1x128xf32> to vector<288x128xf32>
    %67 = arith.addf %64, %66 : vector<288x128xf32>
    %68 = arith.mulf %67, %0 : vector<288x128xf32>
    %cst_58 = arith.constant dense<0.000000e+00> : vector<128xf32>
    %69 = vector.multi_reduction <add>, %68, %cst_58 [0] : vector<288x128xf32> to vector<128xf32>
    %70 = vector.shape_cast %69 : vector<128xf32> to vector<1x128xf32>
    %71 = arith.mulf %68, %68 : vector<288x128xf32>
    %cst_59 = arith.constant dense<0.000000e+00> : vector<128xf32>
    %72 = vector.multi_reduction <add>, %71, %cst_59 [0] : vector<288x128xf32> to vector<128xf32>
    %73 = vector.shape_cast %72 : vector<128xf32> to vector<1x128xf32>
    %cst_60 = arith.constant 0.000000e+00 : f32
    %74 = vector.broadcast %cst_60 : f32 to vector<6x128xf32>
    %75 = tpu.concatenate %70, %73, %74 in 0 : vector<1x128xf32>, vector<1x128xf32>, vector<6x128xf32> -> vector<8x128xf32>
    %c0_61 = arith.constant 0 : index
    %c0_62 = arith.constant 0 : index
    %c0_63 = arith.constant 0 : index
    %76 = vector.load %arg8[%c0_61, %c0_62, %c0_63] : memref<1x8x128xf32, #tpu.memory_space<vmem>>, vector<1x8x128xf32>
    %77 = vector.shape_cast %76 : vector<1x8x128xf32> to vector<8x128xf32>
    %78 = vector.shape_cast %75 : vector<8x128xf32> to vector<1x8x128xf32>
    tpu.vector_store %arg8[%c0_61, %c0_62, %c0_63], %78 {strides = array<i32>} : memref<1x8x128xf32, #tpu.memory_space<vmem>>, vector<1x8x128xf32>,
    %79 = arith.truncf %68 : vector<288x128xf32> to vector<288x128xbf16>
    %c0_64 = arith.constant 0 : index
    %c0_65 = arith.constant 0 : index
    %c0_66 = arith.constant 0 : index
    %80 = vector.load %arg7[%c0_64, %c0_65, %c0_66] : memref<1x288x128xbf16, #tpu.memory_space<vmem>>, vector<1x288x128xbf16>
    %81 = vector.shape_cast %80 : vector<1x288x128xbf16> to vector<288x128xbf16>
    %82 = vector.shape_cast %79 : vector<288x128xbf16> to vector<1x288x128xbf16>
    tpu.vector_store %arg7[%c0_64, %c0_65, %c0_66], %82 {strides = array<i32>} : memref<1x288x128xbf16, #tpu.memory_space<vmem>>, vector<1x288x128xbf16>,
    return
  }
  func.func @transform_0(%arg0: i32) -> (i32, i32, i32) {
    %c0_i32 = arith.constant 0 : i32
    %c0_i32_0 = arith.constant 0 : i32
    %c0_i32_1 = arith.constant 0 : i32
    return %arg0, %c0_i32, %c0_i32_0 : i32, i32, i32
  }
  func.func @transform_1(%arg0: i32) -> (i32, i32) {
    %c0_i32 = arith.constant 0 : i32
    %c0_i32_0 = arith.constant 0 : i32
    %c0_i32_1 = arith.constant 0 : i32
    return %c0_i32, %c0_i32_0 : i32, i32
  }
  func.func @transform_2(%arg0: i32) -> (i32, i32) {
    %c0_i32 = arith.constant 0 : i32
    %c0_i32_0 = arith.constant 0 : i32
    %c0_i32_1 = arith.constant 0 : i32
    return %c0_i32, %c0_i32_0 : i32, i32
  }
  func.func @transform_3(%arg0: i32) -> (i32, i32) {
    %c0_i32 = arith.constant 0 : i32
    %c0_i32_0 = arith.constant 0 : i32
    %c0_i32_1 = arith.constant 0 : i32
    return %c0_i32, %c0_i32_0 : i32, i32
  }
  func.func @transform_4(%arg0: i32) -> (i32, i32, i32) {
    %c0_i32 = arith.constant 0 : i32
    %c0_i32_0 = arith.constant 0 : i32
    %c0_i32_1 = arith.constant 0 : i32
    %c0_i32_2 = arith.constant 0 : i32
    return %c0_i32, %c0_i32_0, %c0_i32_1 : i32, i32, i32
  }
  func.func @transform_5(%arg0: i32) -> (i32, i32) {
    %c0_i32 = arith.constant 0 : i32
    %c0_i32_0 = arith.constant 0 : i32
    %c0_i32_1 = arith.constant 0 : i32
    return %c0_i32, %c0_i32_0 : i32, i32
  }
  func.func @transform_6(%arg0: i32) -> (i32, i32, i32) {
    %c0_i32 = arith.constant 0 : i32
    %c0_i32_0 = arith.constant 0 : i32
    %c0_i32_1 = arith.constant 0 : i32
    return %arg0, %c0_i32, %c0_i32_0 : i32, i32, i32
  }
  func.func @transform_7(%arg0: i32) -> (i32, i32, i32) {
    %c0_i32 = arith.constant 0 : i32
    %c0_i32_0 = arith.constant 0 : i32
    %c0_i32_1 = arith.constant 0 : i32
    return %arg0, %c0_i32, %c0_i32_0 : i32, i32, i32
  }
}

</mosaic_0001>

<bundles_post_ra>
// kernel: utnet_conv_forward.5
= control target key start
LH: loop header
LB: loop body
LE: loop exit
PB: predicated region body
PF: predicated region fallthrough
CT: control target
= control target key end

     0   :  { %s594_s12 = smov 0   ;;  %s755_s0 = inlined_call_operand.vmem [shape: bf16[2,288,128], index: 0, kind: input, shape index: {}]   ;;  %s756_s1 = inlined_call_operand.vmem [shape: f32[1,128], index: 1, kind: input, shape index: {}]   ;;  %s757_s2 = inlined_call_operand.vmem [shape: f32[1,128], index: 2, kind: input, shape index: {}]   ;;  %s758_s3 = inlined_call_operand.vmem [shape: f32[2,288,128], index: 3, kind: output, shape index: {}]  }
   0x1 LB: > { %s456_s13 = sadd.s32 4294967295, %s572_s12   ;;  %p460_p0 = scmp.ge.s32.totalorder %s572_s12, 1  ;;  %s572_s12 = sphi %s594_s12, %s13_s12  }
   0x2   : > { %p137_p1 = scmp.lt.s32.totalorder %s572_s12, 3 }
   0x4   : > { %p138_p2 = pnand %p460_p0, %p137_p1 }
   0x5   : > { %p161_p3 = scmp.lt.s32.totalorder (!%p138_p2), %s456_s13, 1 }
   0x6   : > { %141 = sbr.rel (%p138_p2) target bundleno = 57 (0x39), region = 32 }
   0xb   : > { %s760_s13 = smov (!%p161_p3, %s456_s13), 1  ;;  %v613_v0 = vld [vmem:[%s756_s1] ss:$0 sm:$0xff] }
   0xc   : > { %s556_s14 = smul.u32 144, %s760_s13  ;;  %v623_v9 = vld [vmem:[%s757_s2] ss:$0 sm:$0xff] }
   0xd   : > { %s557_s20 = smul.u32 288, %s760_s13 }
   0xe   : > { %s608_s17 = scalar_lea.vmem %s755_s0, %s556_s14 }
   0xf   : > { %v468_v1 = vld [vmem:[%s608_s17] sm:$0xff]   ;;  %v539_v2 = vld [vmem:[%s608_s17 + $0x8] sm:$0xff]   ;;  %v540_v3 = vld [vmem:[%s608_s17 + $0x10] sm:$0xff]   ;;  %s640_s25 = scalar_lea.vmem %s758_s3, %s557_s20 }
  0x10   : > { %v469_v4 = vunpack.c.l.bf16 %v468_v1  ;;  %v470_v5 = vunpack.c.h.bf16 %v468_v1  ;;  %v473_v6 = vunpack.c.l.bf16 %v539_v2  ;;  %v474_v7 = vunpack.c.h.bf16 %v539_v2  ;;  %v541_v8 = vld [vmem:[%s608_s17 + $0x18] sm:$0xff]   ;;  %v542_v30 = vld [vmem:[%s608_s17 + $0x20] sm:$0xff]   ;;  %v543_v31 = vld [vmem:[%s608_s17 + $0x28] sm:$0xff]  }
  0x11   : > { %v477_v10 = vunpack.c.l.bf16 %v540_v3  ;;  %v478_v11 = vunpack.c.h.bf16 %v540_v3  ;;  %v481_v12 = vunpack.c.l.bf16 %v541_v8  ;;  %v482_v13 = vunpack.c.h.bf16 %v541_v8  ;;  %v544_v36 = vld [vmem:[%s608_s17 + $0x30] sm:$0xff]   ;;  %v545_v37 = vld [vmem:[%s608_s17 + $0x38] sm:$0xff]   ;;  %v546_v3 = vld [vmem:[%s608_s17 + $0x40] sm:$0xff]  }
  0x12   : > { %v250_v14 = vmul.f32 %v469_v4, %v613_v0  ;;  %v251_v15 = vmul.f32 %v470_v5, %v613_v0  ;;  %v252_v16 = vmul.f32 %v473_v6, %v613_v0  ;;  %v253_v17 = vmul.f32 %v474_v7, %v613_v0  ;;  %v547_v4 = vld [vmem:[%s608_s17 + $0x48] sm:$0xff]  }
  0x13   : > { %v254_v18 = vmul.f32 %v477_v10, %v613_v0  ;;  %v255_v19 = vmul.f32 %v478_v11, %v613_v0  ;;  %v256_v20 = vmul.f32 %v481_v12, %v613_v0  ;;  %v257_v21 = vmul.f32 %v482_v13, %v613_v0  ;;  %v548_v10 = vld [vmem:[%s608_s17 + $0x50] sm:$0xff]   ;;  %v549_v11 = vld [vmem:[%s608_s17 + $0x58] sm:$0xff]  }
  0x14   : > { %v293_v22 = vadd.f32 %v623_v9, %v250_v14  ;;  %v294_v23 = vadd.f32 %v623_v9, %v251_v15  ;;  %v295_v24 = vadd.f32 %v623_v9, %v252_v16  ;;  %v296_v25 = vadd.f32 %v623_v9, %v253_v17 }
  0x15   : > { %v297_v26 = vadd.f32 %v623_v9, %v254_v18  ;;  %v298_v27 = vadd.f32 %v623_v9, %v255_v19  ;;  %v299_v28 = vadd.f32 %v623_v9, %v256_v20  ;;  %v300_v29 = vadd.f32 %v623_v9, %v257_v21 }
  0x16   : > { %v329_v32 = vmax.f32 %v293_v22, 0.0  ;;  %v330_v33 = vmax.f32 %v294_v23, 0.0  ;;  %v331_v34 = vmax.f32 %v295_v24, 0.0  ;;  %v332_v35 = vmax.f32 %v296_v25, 0.0 }
  0x17   : > { %v333_v38 = vmax.f32 %v297_v26, 0.0  ;;  %v334_v39 = vmax.f32 %v298_v27, 0.0  ;;  %v335_v40 = vmax.f32 %v299_v28, 0.0  ;;  %v336_v41 = vmax.f32 %v300_v29, 0.0 }
  0x18   : > { %365 = vst [vmem:[%s640_s25] sm:$0xff] %v329_v32  ;;  %366 = vst [vmem:[%s640_s25 + $0x8] sm:$0xff] %v330_v33  ;;  %v485_v42 = vunpack.c.l.bf16 %v542_v30  ;;  %v486_v43 = vunpack.c.h.bf16 %v542_v30  ;;  %v489_v44 = vunpack.c.l.bf16 %v543_v31  ;;  %v490_v45 = vunpack.c.h.bf16 %v543_v31 }
  0x19   : > { %367 = vst [vmem:[%s640_s25 + $0x10] sm:$0xff] %v331_v34  ;;  %368 = vst [vmem:[%s640_s25 + $0x18] sm:$0xff] %v332_v35  ;;  %v493_v46 = vunpack.c.l.bf16 %v544_v36  ;;  %v494_v47 = vunpack.c.h.bf16 %v544_v36  ;;  %v497_v48 = vunpack.c.l.bf16 %v545_v37  ;;  %v498_v49 = vunpack.c.h.bf16 %v545_v37 }
  0x1a   : > { %369 = vst [vmem:[%s640_s25 + $0x20] sm:$0xff] %v333_v38  ;;  %370 = vst [vmem:[%s640_s25 + $0x28] sm:$0xff] %v334_v39  ;;  %v258_v50 = vmul.f32 %v485_v42, %v613_v0  ;;  %v259_v51 = vmul.f32 %v486_v43, %v613_v0  ;;  %v260_v52 = vmul.f32 %v489_v44, %v613_v0  ;;  %v501_v16 = vunpack.c.l.bf16 %v546_v3 }
  0x1b   : > { %371 = vst [vmem:[%s640_s25 + $0x30] sm:$0xff] %v335_v40  ;;  %372 = vst [vmem:[%s640_s25 + $0x38] sm:$0xff] %v336_v41  ;;  %v261_v53 = vmul.f32 %v490_v45, %v613_v0  ;;  %v262_v54 = vmul.f32 %v493_v46, %v613_v0  ;;  %v263_v55 = vmul.f32 %v494_v47, %v613_v0  ;;  %v502_v17 = vunpack.c.h.bf16 %v546_v3  ;;  %v550_v40 = vld [vmem:[%s608_s17 + $0x60] sm:$0xff]   ;;  %v551_v41 = vld [vmem:[%s608_s17 + $0x68] sm:$0xff]  }
  0x1c   : > { %v264_v56 = vmul.f32 %v497_v48, %v613_v0  ;;  %v265_v57 = vmul.f32 %v498_v49, %v613_v0  ;;  %v301_v58 = vadd.f32 %v623_v9, %v258_v50  ;;  %v302_v59 = vadd.f32 %v623_v9, %v259_v51  ;;  %v552_v46 = vld [vmem:[%s608_s17 + $0x70] sm:$0xff]   ;;  %v553_v47 = vld [vmem:[%s608_s17 + $0x78] sm:$0xff]  }
  0x1d   : > { %v303_v60 = vadd.f32 %v623_v9, %v260_v52  ;;  %v304_v61 = vadd.f32 %v623_v9, %v261_v53  ;;  %v305_v62 = vadd.f32 %v623_v9, %v262_v54  ;;  %v306_v63 = vadd.f32 %v623_v9, %v263_v55 }
  0x1e   : > { %v307_v1 = vadd.f32 %v623_v9, %v264_v56  ;;  %v308_v2 = vadd.f32 %v623_v9, %v265_v57  ;;  %v337_v5 = vmax.f32 %v301_v58, 0.0  ;;  %v338_v6 = vmax.f32 %v302_v59, 0.0 }
  0x1f   : > { %v339_v7 = vmax.f32 %v303_v60, 0.0  ;;  %v340_v8 = vmax.f32 %v304_v61, 0.0  ;;  %v341_v12 = vmax.f32 %v305_v62, 0.0  ;;  %v342_v13 = vmax.f32 %v306_v63, 0.0 }
  0x20   : > { %v343_v14 = vmax.f32 %v307_v1, 0.0  ;;  %v344_v15 = vmax.f32 %v308_v2, 0.0  ;;  %373 = vst [vmem:[%s640_s25 + $0x40] sm:$0xff] %v337_v5  ;;  %374 = vst [vmem:[%s640_s25 + $0x48] sm:$0xff] %v338_v6  ;;  %v505_v18 = vunpack.c.l.bf16 %v547_v4  ;;  %v506_v19 = vunpack.c.h.bf16 %v547_v4 }
  0x21   : > { %375 = vst [vmem:[%s640_s25 + $0x50] sm:$0xff] %v339_v7  ;;  %376 = vst [vmem:[%s640_s25 + $0x58] sm:$0xff] %v340_v8  ;;  %v509_v20 = vunpack.c.l.bf16 %v548_v10  ;;  %v510_v21 = vunpack.c.h.bf16 %v548_v10  ;;  %v513_v22 = vunpack.c.l.bf16 %v549_v11  ;;  %v514_v23 = vunpack.c.h.bf16 %v549_v11 }
  0x22   : > { %377 = vst [vmem:[%s640_s25 + $0x60] sm:$0xff] %v341_v12  ;;  %378 = vst [vmem:[%s640_s25 + $0x68] sm:$0xff] %v342_v13  ;;  %v266_v24 = vmul.f32 %v501_v16, %v613_v0  ;;  %v267_v25 = vmul.f32 %v502_v17, %v613_v0  ;;  %v268_v26 = vmul.f32 %v505_v18, %v613_v0  ;;  %v517_v52 = vunpack.c.l.bf16 %v550_v40 }
  0x23   : > { %379 = vst [vmem:[%s640_s25 + $0x70] sm:$0xff] %v343_v14  ;;  %380 = vst [vmem:[%s640_s25 + $0x78] sm:$0xff] %v344_v15  ;;  %v269_v27 = vmul.f32 %v506_v19, %v613_v0  ;;  %v270_v28 = vmul.f32 %v509_v20, %v613_v0  ;;  %v271_v29 = vmul.f32 %v510_v21, %v613_v0  ;;  %v518_v53 = vunpack.c.h.bf16 %v550_v40  ;;  %v554_v14 = vld [vmem:[%s608_s17 + $0x80] sm:$0xff]   ;;  %v555_v15 = vld [vmem:[%s608_s17 + $0x88] sm:$0xff]  }
  0x24   : > { %v272_v30 = vmul.f32 %v513_v22, %v613_v0  ;;  %v273_v31 = vmul.f32 %v514_v23, %v613_v0  ;;  %v309_v32 = vadd.f32 %v623_v9, %v266_v24  ;;  %v310_v33 = vadd.f32 %v623_v9, %v267_v25 }
  0x25   : > { %v311_v34 = vadd.f32 %v623_v9, %v268_v26  ;;  %v312_v35 = vadd.f32 %v623_v9, %v269_v27  ;;  %v313_v36 = vadd.f32 %v623_v9, %v270_v28  ;;  %v314_v37 = vadd.f32 %v623_v9, %v271_v29 }
  0x26   : > { %v315_v38 = vadd.f32 %v623_v9, %v272_v30  ;;  %v316_v39 = vadd.f32 %v623_v9, %v273_v31  ;;  %v345_v42 = vmax.f32 %v309_v32, 0.0  ;;  %v346_v43 = vmax.f32 %v310_v33, 0.0 }
  0x27   : > { %v347_v44 = vmax.f32 %v311_v34, 0.0  ;;  %v348_v45 = vmax.f32 %v312_v35, 0.0  ;;  %v349_v48 = vmax.f32 %v313_v36, 0.0  ;;  %v350_v49 = vmax.f32 %v314_v37, 0.0 }
  0x28   : > { %v351_v50 = vmax.f32 %v315_v38, 0.0  ;;  %v352_v51 = vmax.f32 %v316_v39, 0.0  ;;  %381 = vst [vmem:[%s640_s25 + $0x80] sm:$0xff] %v345_v42  ;;  %382 = vst [vmem:[%s640_s25 + $0x88] sm:$0xff] %v346_v43  ;;  %v521_v54 = vunpack.c.l.bf16 %v551_v41  ;;  %v522_v55 = vunpack.c.h.bf16 %v551_v41 }
  0x29   : > { %383 = vst [vmem:[%s640_s25 + $0x90] sm:$0xff] %v347_v44  ;;  %384 = vst [vmem:[%s640_s25 + $0x98] sm:$0xff] %v348_v45  ;;  %v525_v56 = vunpack.c.l.bf16 %v552_v46  ;;  %v526_v57 = vunpack.c.h.bf16 %v552_v46  ;;  %v529_v58 = vunpack.c.l.bf16 %v553_v47  ;;  %v530_v59 = vunpack.c.h.bf16 %v553_v47 }
  0x2a   : > { %385 = vst [vmem:[%s640_s25 + $0xa0] sm:$0xff] %v349_v48  ;;  %386 = vst [vmem:[%s640_s25 + $0xa8] sm:$0xff] %v350_v49  ;;  %v274_v60 = vmul.f32 %v517_v52, %v613_v0  ;;  %v275_v61 = vmul.f32 %v518_v53, %v613_v0  ;;  %v276_v62 = vmul.f32 %v521_v54, %v613_v0  ;;  %v533_v24 = vunpack.c.l.bf16 %v554_v14 }
  0x2b   : > { %387 = vst [vmem:[%s640_s25 + $0xb0] sm:$0xff] %v351_v50  ;;  %388 = vst [vmem:[%s640_s25 + $0xb8] sm:$0xff] %v352_v51  ;;  %v277_v63 = vmul.f32 %v522_v55, %v613_v0  ;;  %v278_v1 = vmul.f32 %v525_v56, %v613_v0  ;;  %v279_v2 = vmul.f32 %v526_v57, %v613_v0  ;;  %v534_v25 = vunpack.c.h.bf16 %v554_v14 }
  0x2c   : > { %v280_v3 = vmul.f32 %v529_v58, %v613_v0  ;;  %v281_v4 = vmul.f32 %v530_v59, %v613_v0  ;;  %v317_v5 = vadd.f32 %v623_v9, %v274_v60  ;;  %v318_v6 = vadd.f32 %v623_v9, %v275_v61 }
  0x2d   : > { %v319_v7 = vadd.f32 %v623_v9, %v276_v62  ;;  %v320_v8 = vadd.f32 %v623_v9, %v277_v63  ;;  %v321_v10 = vadd.f32 %v623_v9, %v278_v1  ;;  %v322_v11 = vadd.f32 %v623_v9, %v279_v2 }
  0x2e   : > { %v323_v12 = vadd.f32 %v623_v9, %v280_v3  ;;  %v324_v13 = vadd.f32 %v623_v9, %v281_v4  ;;  %v353_v16 = vmax.f32 %v317_v5, 0.0  ;;  %v354_v17 = vmax.f32 %v318_v6, 0.0 }
  0x2f   : > { %v355_v18 = vmax.f32 %v319_v7, 0.0  ;;  %v356_v19 = vmax.f32 %v320_v8, 0.0  ;;  %v357_v20 = vmax.f32 %v321_v10, 0.0  ;;  %v358_v21 = vmax.f32 %v322_v11, 0.0 }
  0x30   : > { %v359_v22 = vmax.f32 %v323_v12, 0.0  ;;  %v360_v23 = vmax.f32 %v324_v13, 0.0  ;;  %389 = vst [vmem:[%s640_s25 + $0xc0] sm:$0xff] %v353_v16  ;;  %390 = vst [vmem:[%s640_s25 + $0xc8] sm:$0xff] %v354_v17  ;;  %v537_v26 = vunpack.c.l.bf16 %v555_v15  ;;  %v538_v27 = vunpack.c.h.bf16 %v555_v15 }
  0x31   : > { %391 = vst [vmem:[%s640_s25 + $0xd0] sm:$0xff] %v355_v18  ;;  %392 = vst [vmem:[%s640_s25 + $0xd8] sm:$0xff] %v356_v19  ;;  %v282_v28 = vmul.f32 %v533_v24, %v613_v0  ;;  %v283_v29 = vmul.f32 %v534_v25, %v613_v0 }
  0x32   : > { %393 = vst [vmem:[%s640_s25 + $0xe0] sm:$0xff] %v357_v20  ;;  %394 = vst [vmem:[%s640_s25 + $0xe8] sm:$0xff] %v358_v21  ;;  %v284_v30 = vmul.f32 %v537_v26, %v613_v0  ;;  %v285_v31 = vmul.f32 %v538_v27, %v613_v0 }
  0x33   : > { %395 = vst [vmem:[%s640_s25 + $0xf0] sm:$0xff] %v359_v22  ;;  %396 = vst [vmem:[%s640_s25 + $0xf8] sm:$0xff] %v360_v23  ;;  %v325_v32 = vadd.f32 %v623_v9, %v282_v28  ;;  %v326_v33 = vadd.f32 %v623_v9, %v283_v29 }
  0x34   : > { %v327_v34 = vadd.f32 %v623_v9, %v284_v30  ;;  %v328_v35 = vadd.f32 %v623_v9, %v285_v31 }
  0x35   : > { %v361_v36 = vmax.f32 %v325_v32, 0.0  ;;  %v362_v37 = vmax.f32 %v326_v33, 0.0 }
  0x36   : > { %v363_v38 = vmax.f32 %v327_v34, 0.0  ;;  %v364_v39 = vmax.f32 %v328_v35, 0.0 }
  0x37   : > { %397 = vst [vmem:[%s640_s25 + $0x100] sm:$0xff] %v361_v36  ;;  %398 = vst [vmem:[%s640_s25 + $0x108] sm:$0xff] %v362_v37 }
  0x38   : > { %399 = vst [vmem:[%s640_s25 + $0x110] sm:$0xff] %v363_v38  ;;  %400 = vst [vmem:[%s640_s25 + $0x118] sm:$0xff] %v364_v39 }
  0x39 PF: > { %s13_s12 = sadd.s32 1, %s572_s12  }
  0x3a   : > { %p10_p4 = scmp.ge.s32.totalorder %s13_s12, 4  }
  0x3c   :  { %12 = sbr.rel (!%p10_p4) target bundleno = 1 (0x1), region = 62 }

// kernel: utnet_conv_forward.3
= control target key start
LH: loop header
LB: loop body
LE: loop exit
PB: predicated region body
PF: predicated region fallthrough
CT: control target
= control target key end

     0   :  { %s6270_s18 = smov 0   ;;  %s8005_s0 = inlined_call_operand.vmem [shape: bf16[2,288,128], index: 0, kind: input, shape index: {}]   ;;  %s8006_s1 = inlined_call_operand.vmem [shape: f32[288,128], index: 1, kind: input, shape index: {}]   ;;  %s8007_s2 = inlined_call_operand.vmem [shape: bf16[9,128,128], index: 2, kind: input, shape index: {}]   ;;  %s8008_s3 = inlined_call_operand.vmem [shape: f32[1,128], index: 3, kind: input, shape index: {}]   ;;  %s8009_s4 = inlined_call_operand.vmem [shape: bf16[2,288,128], index: 4, kind: output, shape index: {0}]   ;;  %s8010_s5 = inlined_call_operand.vmem [shape: f32[2,8,128], index: 5, kind: output, shape index: {1}]  }
   0x1 LB: > { %s4912_s19 = sadd.s32 4294967295, %s6237_s18   ;;  %p4916_p0 = scmp.ge.s32.totalorder %s6237_s18, 1  ;;  %s6237_s18 = sphi %s6270_s18, %s16_s18  }
   0x2   : > { %p190_p1 = scmp.lt.s32.totalorder %s6237_s18, 3 }
   0x4   : > { %p191_p2 = pnand %p4916_p0, %p190_p1 }
   0x6   : > { %194 = sbr.rel (%p191_p2) target bundleno = 634 (0x27a), region = 36 }
   0xb   : > { %v6092_v0 = vld [vmem:[%s8007_s2 + $0x78] sm:$0xff]   ;;  %p222_p3 = scmp.lt.s32.totalorder %s4912_s19, 1  ;;  %v6093_v1 = vld [vmem:[%s8007_s2 + $0x70] sm:$0xff]   ;;  %v6239_v2 = vmov 0   ;;  %v6094_v3 = vld [vmem:[%s8007_s2 + $0x68] sm:$0xff]   ;;  %vm311_vm1 = vcmask 1041408  }
   0xc   : > { %6066 = vmatprep.subr.bf16.mxu1 %v6092_v0  ;;  %5598 = vmatprep.subr.bf16.mxu0 %v6092_v0  ;;  %309 = vst [vmem:[#allocation2] sm:$0xf] %v6239_v2  ;;  %310 = vst [vmem:[#allocation2 + $0x4] sm:$0xf] %v6239_v2  ;;  %v6095_v4 = vld [vmem:[%s8007_s2 + $0x60] sm:$0xff]   ;;  %v6096_v9 = vld [vmem:[%s8007_s2 + $0x58] sm:$0xff]  }
   0xd   : > { %s8102_s19 = smov (!%p222_p3, %s4912_s19), 1  ;;  %323 = vst [vmem:[#allocation2 + $0x9c] sm:$0xf] %v6239_v2  ;;  %324 = vst [vmem:[#allocation2 + $0xa0] sm:$0xf] %v6239_v2  ;;  %6074 = vmatpush3.bf16.msra.mxu1 %v6092_v0  ;;  %5599 = vmatpush3.bf16.msra.mxu0 %v6092_v0  ;;  %vm317_vm4 = vcmask 1043457  }
   0xe   : > { %6067 = vmatprep.subr.bf16.mxu1 %v6093_v1  ;;  %5600 = vmatprep.subr.bf16.mxu0 %v6093_v1  ;;  %s6082_s26 = smul.u32 144, %s8102_s19  ;;  %vm312_vm0 = vsmask.f32 1280  ;;  %vm325_vm2 = vsmask.f32 5392  ;;  %v6097_v36 = vld [vmem:[%s8007_s2 + $0x50] sm:$0xff]  }
   0xf   : > { %vm6313_vm3 = vmor %vm312_vm0, %vm325_vm2  ;;  %v314_v46 = vld [vmem:[#allocation2 + $0x8] sm:$0x3]  ;;  %vm318_vm6 = vsmask.f32 7942  ;;  %vm927_vm7 = vsmask.f32 7424 }
  0x10   : > { %s6295_s29 = scalar_lea.vmem %s8005_s0, %s6082_s26  ;;  %vm6324_vm5 = vmand %vm311_vm1, %vm312_vm0  ;;  %v6098_v59 = vld [vmem:[%s8007_s2 + $0x48] sm:$0xff]   ;;  %vm1583_vm9 = vcmask 1046528   ;;  %vm2855_vm10 = vcmask 1045504   ;;  %vm2384_vm11 = vsmask.f32 6400  ;;  %vm4127_vm12 = vcmask 1044480   ;;  %s7819_s28 = scalar_lea.vmem %s8009_s4, %s6082_s26 }
  0x11   : > { %6075 = vmatpush3.bf16.msra.mxu1 %v6093_v1  ;;  %5601 = vmatpush3.bf16.msra.mxu0 %v6093_v1  ;;  %v250_v5 = vld [vmem:[%s6295_s29 + $0x34] sm:$0xf]  ;;  %v251_v6 = vld [vmem:[%s6295_s29 + $0x38] sm:$0xf]  ;;  %v252_v7 = vld [vmem:[%s6295_s29 + $0x3c] sm:$0xf] }
  0x12   : > { %6068 = vmatprep.subr.bf16.mxu1 %v6094_v3  ;;  %5602 = vmatprep.subr.bf16.mxu0 %v6094_v3  ;;  %v253_v8 = vld [vmem:[%s6295_s29 + $0x40] sm:$0xf]  ;;  %v457_v10 = vshrl.u32 %v250_v5, 16  ;;  %v460_v11 = vshll.u32 %v250_v5, 16  ;;  %v467_v12 = vshrl.u32 %v251_v6, 16  ;;  %v470_v14 = vshll.u32 %v251_v6, 16  ;;  %vm6373_vm8 = vmand %vm317_vm4, %vm318_vm6 }
  0x13   : > { %v254_v13 = vld [vmem:[%s6295_s29 + $0x44] sm:$0xf]  ;;  %v477_v15 = vshrl.u32 %v252_v7, 16  ;;  %v480_v16 = vshll.u32 %v252_v7, 16  ;;  %v487_v17 = vshrl.u32 %v253_v8, 16  ;;  %v490_v21 = vshll.u32 %v253_v8, 16 }
  0x14   : > { %v459_v18 = vrot.slane %v457_v10, 6  ;;  %v462_v19 = vrot.slane %v460_v11, 7  ;;  %v469_v20 = vrot.slane %v467_v12, 6  ;;  %v255_v22 = vld [vmem:[%s6295_s29 + $0x48] sm:$0xf]  ;;  %v472_v23 = vrot.slane %v470_v14, 7 }
  0x15   : > { %6076 = vmatpush3.bf16.msra.mxu1 %v6094_v3  ;;  %5603 = vmatpush3.bf16.msra.mxu0 %v6094_v3  ;;  %v479_v24 = vrot.slane %v477_v15, 6  ;;  %v482_v25 = vrot.slane %v480_v16, 7  ;;  %v489_v26 = vrot.slane %v487_v17, 6  ;;  %v492_v28 = vrot.slane %v490_v21, 7  ;;  %v256_v34 = vld [vmem:[%s6295_s29 + $0x4c] sm:$0xf] }
  0x16   : > { %6069 = vmatprep.subr.bf16.mxu1 %v6095_v4  ;;  %5604 = vmatprep.subr.bf16.mxu0 %v6095_v4  ;;  %v6309_v27 = vor.u32 %v462_v19, %v459_v18  ;;  %v497_v29 = vshrl.u32 %v254_v13, 16  ;;  %v500_v30 = vshll.u32 %v254_v13, 16  ;;  %v473_v32 = vor.u32 %v472_v23, %v469_v20  ;;  %v237_v51 = vld [vmem:[%s6295_s29] sm:$0xf]  ;;  %v238_v52 = vld [vmem:[%s6295_s29 + $0x4] sm:$0xf] }
  0x17   : > { %v483_v33 = vor.u32 %v482_v25, %v479_v24  ;;  %v507_v35 = vshrl.u32 %v255_v22, 16  ;;  %v493_v38 = vor.u32 %v492_v28, %v489_v26  ;;  %v510_v44 = vshll.u32 %v255_v22, 16  ;;  %v764_v57 = vld [vmem:[#allocation2] sm:$0xf]  ;;  %v6336_v58 = vld [vmem:[#allocation2 + $0x4] sm:$0xf] }
  0x18   : > { %v465_v37 = vrot.slane %v6309_v27, 4  ;;  %v499_v39 = vrot.slane %v497_v29, 6  ;;  %v502_v40 = vrot.slane %v500_v30, 7  ;;  %v475_v41 = vrot.slane %v473_v32, 4  ;;  %v6346_v0 = vld [vmem:[%s6295_s29 + $0x8] sm:$0xf] }
  0x19   : > { %6077 = vmatpush3.bf16.msra.mxu1 %v6095_v4  ;;  %5605 = vmatpush3.bf16.msra.mxu0 %v6095_v4  ;;  %v485_v42 = vrot.slane %v483_v33, 4  ;;  %v509_v43 = vrot.slane %v507_v35, 6  ;;  %v495_v48 = vrot.slane %v493_v38, 4  ;;  %v517_v50 = vshrl.u32 %v256_v34, 16  ;;  %v240_v12 = vld [vmem:[%s6295_s29 + $0xc] sm:$0xf] }
  0x1a   : > { %6070 = vmatprep.subr.bf16.mxu1 %v6096_v9  ;;  %5606 = vmatprep.subr.bf16.mxu0 %v6096_v9  ;;  %v474_v47 = vsel %vm6313_vm3, %v465_v37, %v473_v32  ;;  %v503_v49 = vor.u32 %v502_v40, %v499_v39  ;;  %v484_v53 = vsel %vm6313_vm3, %v475_v41, %v483_v33  ;;  %v512_v55 = vrot.slane %v510_v44, 7  ;;  %v6099_v13 = vld [vmem:[%s8007_s2 + $0x40] sm:$0xff]   ;;  %v6369_v22 = vld [vmem:[%s8007_s2 + $0x38] sm:$0xff]   ;;  %v257_v33 = vld [vmem:[%s6295_s29 + $0x50] sm:$0xf]  ;;  %s4919_s25 = sshll.u32 %s8102_s19, 3 }
  0x1b   : > { %v494_v54 = vsel %vm6313_vm3, %v485_v42, %v493_v38  ;;  %739 = vst [vmem:[#allocation2 + $0x40] sm:$0xf] %v474_v47  ;;  %v520_v56 = vshll.u32 %v256_v34, 16  ;;  %740 = vst [vmem:[#allocation2 + $0x44] sm:$0xf] %v484_v53  ;;  %v519_v62 = vrot.slane %v517_v50, 6  ;;  %v6349_v7 = vcombine.low %v764_v57, %v6336_v58  ;;  %s235_s30 = scalar_lea.vmem %s8010_s5, %s4919_s25 }
  0x1c   : > { %v504_v60 = vsel %vm6313_vm3, %v495_v48, %v503_v49  ;;  %741 = vst [vmem:[#allocation2 + $0x48] sm:$0xf] %v494_v54  ;;  %v505_v61 = vrot.slane %v503_v49, 4  ;;  %v315_v63 = vsel %vm6324_vm5, 0, %v314_v46  ;;  %v513_v1 = vor.u32 %v512_v55, %v509_v43  ;;  %v6380_v29 = vld [vmem:[%s8007_s2 + $0xb8] sm:$0xff]  }
  0x1d   : > { %6078 = vmatpush3.bf16.msra.mxu1 %v6096_v9  ;;  %5607 = vmatpush3.bf16.msra.mxu0 %v6096_v9  ;;  %742 = vst [vmem:[#allocation2 + $0x4c] sm:$0xf] %v504_v60  ;;  %v522_v2 = vrot.slane %v520_v56, 7  ;;  %316 = vst [vmem:[#allocation2 + $0x8] sm:$0x3] %v315_v63  ;;  %v328_v3 = vshrl.u32 %v237_v51, 16 }
  0x1e   : > { %6071 = vmatprep.subr.bf16.mxu1 %v6097_v36  ;;  %5608 = vmatprep.subr.bf16.mxu0 %v6097_v36  ;;  %v331_v4 = vshll.u32 %v237_v51, 16  ;;  %v337_v5 = vshrl.u32 %v238_v52, 16  ;;  %v340_v6 = vshll.u32 %v238_v52, 16  ;;  %v514_v8 = vsel %vm6313_vm3, %v505_v61, %v513_v1  ;;  %v258_v37 = vld [vmem:[%s6295_s29 + $0x54] sm:$0xf] }
  0x1f   : > { %v515_v9 = vrot.slane %v513_v1, 4  ;;  %v6353_v10 = vor.u32 %v522_v2, %v519_v62  ;;  %v330_v11 = vrot.slane %v328_v3, 6  ;;  %743 = vst [vmem:[#allocation2 + $0x50] sm:$0xf] %v514_v8  ;;  %v929_v17 = vshrl.u32 %v6349_v7, 16 }
  0x20   : > { %v333_v14 = vrot.slane %v331_v4, 7  ;;  %v339_v15 = vrot.slane %v337_v5, 6  ;;  %v342_v16 = vrot.slane %v340_v6, 7  ;;  %v931_v19 = vshll.u32 %v6349_v7, 16  ;;  %v260_v5 = vld [vmem:[%s6295_s29 + $0x5c] sm:$0xf] }
  0x21   : > { %6079 = vmatpush3.bf16.msra.mxu1 %v6097_v36  ;;  %5609 = vmatpush3.bf16.msra.mxu0 %v6097_v36  ;;  %v524_v18 = vsel %vm6313_vm3, %v515_v9, %v6353_v10  ;;  %v347_v20 = vshrl.u32 %v6346_v0, 16  ;;  %v350_v21 = vshll.u32 %v6346_v0, 16  ;;  %v357_v26 = vshrl.u32 %v240_v12, 16  ;;  %v259_v0 = vld [vmem:[%s6295_s29 + $0x58] sm:$0xf] }
  0x22   : > { %6072 = vmatprep.subr.bf16.mxu1 %v6098_v59  ;;  %5610 = vmatprep.subr.bf16.mxu0 %v6098_v59  ;;  %744 = vst [vmem:[#allocation2 + $0x54] sm:$0xf] %v524_v18  ;;  %v334_v24 = vor.u32 %v333_v14, %v330_v11  ;;  %v343_v25 = vor.u32 %v342_v16, %v339_v15  ;;  %v360_v28 = vshll.u32 %v240_v12, 16  ;;  %v6100_v30 = vld [vmem:[#allocation2 + $0x40] sm:$0xff]   ;;  %v6382_v32 = vrot.slane %v931_v19, 1  ;;  %v6107_v16 = vld [vmem:[%s8007_s2 + $0x30] sm:$0xff]  }
  0x23   : > { %v992_v38 = vshll.u32 %v6100_v30, 16  ;;  %v996_v39 = vshrl.u32 %v6100_v30, 16  ;;  %v349_v47 = vrot.slane %v347_v20, 6  ;;  %v352_v48 = vrot.slane %v350_v21, 7  ;;  %v241_v30 = vld [vmem:[%s6295_s29 + $0x10] sm:$0xf] }
  0x24   : > { %v6101_v34 = vld [vmem:[#allocation2 + $0x48] sm:$0xff]   ;;  %v335_v35 = vrot.slane %v334_v24, 4  ;;  %v345_v44 = vrot.slane %v343_v25, 4  ;;  %v359_v49 = vrot.slane %v357_v26, 6  ;;  %v362_v51 = vrot.slane %v360_v28, 7 }
  0x25   : > { %6080 = vmatpush3.bf16.msra.mxu1 %v6098_v59  ;;  %5611 = vmatpush3.bf16.msra.mxu0 %v6098_v59  ;;  %v723_v36 = vld [vmem:[#allocation2 + $0x8] sm:$0xe]  ;;  %v1000_v41 = vshll.u32 %v6101_v34, 16  ;;  %v1004_v42 = vshrl.u32 %v6101_v34, 16  ;;  %v6390_v46 = vrot.slane %v992_v38, 1  ;;  %v525_v52 = vrot.slane %v6353_v10, 4 }
  0x26   : > { %6073 = vmatprep.subr.bf16.mxu1 %v6099_v13  ;;  %5612 = vmatprep.subr.bf16.mxu0 %v6099_v13  ;;  %v724_v40 = vsel %vm6373_vm8, %v334_v24, %v723_v36  ;;  %v344_v43 = vsel %vm6313_vm3, %v335_v35, %v343_v25  ;;  %v527_v53 = vshrl.u32 %v257_v33, 16  ;;  %v353_v56 = vor.u32 %v352_v48, %v349_v47  ;;  %v243_v38 = vld [vmem:[%s6295_s29 + $0x18] sm:$0xf] }
  0x27   : > { %725 = vst [vmem:[#allocation2 + $0x8] sm:$0xe] %v724_v40  ;;  %726 = vst [vmem:[#allocation2 + $0xc] sm:$0xf] %v344_v43  ;;  %v1002_v50 = vrot.slane %v1000_v41, 1  ;;  %v998_v54 = vor.u32 %v996_v39, %v6390_v46  ;;  %v530_v57 = vshll.u32 %v257_v33, 16  ;;  %v6396_v61 = vor.u32 %v362_v51, %v359_v49 }
  0x28   : > { %v537_v59 = vshrl.u32 %v258_v37, 16  ;;  %v529_v62 = vrot.slane %v527_v53, 6  ;;  %v540_v63 = vshll.u32 %v258_v37, 16  ;;  %v354_v3 = vsel %vm6313_vm3, %v345_v44, %v353_v56  ;;  %v242_v37 = vld [vmem:[%s6295_s29 + $0x14] sm:$0xf]  ;;  %v6112_v44 = vld [vmem:[%s8007_s2 + $0x28] sm:$0xff]  }
  0x29   : > { %6081 = vmatpush3.bf16.msra.mxu1 %v6099_v13  ;;  %5613 = vmatpush3.bf16.msra.mxu0 %v6099_v13  ;;  %v6102_v55 = vld [vmem:[#allocation2 + $0x50] sm:$0xff]   ;;  %v1006_v60 = vor.u32 %v1004_v42, %v1002_v50  ;;  %v1003_v1 = vsel %vm927_vm7, %v998_v54, %v1002_v50  ;;  %v355_v4 = vrot.slane %v353_v56, 4  ;;  %727 = vst [vmem:[#allocation2 + $0x10] sm:$0xf] %v354_v3  ;;  %v532_v6 = vrot.slane %v530_v57, 7  ;;  %v6117_v56 = vld [vmem:[%s8007_s2 + $0x20] sm:$0xff]  }
  0x2a   : > { %5650 = vmatprep.subr.bf16.mxu1 %v6369_v22  ;;  %5702 = vmatprep.subr.bf16.mxu0 %v6380_v29  ;;  %v1008_v2 = vshll.u32 %v6102_v55, 16  ;;  %v539_v8 = vrot.slane %v537_v59, 6  ;;  %v542_v9 = vrot.slane %v540_v63, 7  ;;  %v1012_v10 = vshrl.u32 %v6102_v55, 16  ;;  %v244_v51 = vld [vmem:[%s6295_s29 + $0x1c] sm:$0xf] }
  0x2b   : > { %5630 = vmatprep.mubr.bf16.mxu1 %v1003_v1  ;;  %v364_v12 = vsel %vm6313_vm3, %v355_v4, %v6396_v61  ;;  %v547_v13 = vshrl.u32 %v259_v0, 16  ;;  %v550_v14 = vshll.u32 %v259_v0, 16  ;;  %v533_v18 = vor.u32 %v532_v6, %v529_v62 }
  0x2c   : > { %v1010_v11 = vrot.slane %v1008_v2, 1  ;;  %728 = vst [vmem:[#allocation2 + $0x14] sm:$0xf] %v364_v12  ;;  %v543_v19 = vor.u32 %v542_v9, %v539_v8  ;;  %v557_v20 = vshrl.u32 %v260_v5, 16  ;;  %v560_v21 = vshll.u32 %v260_v5, 16  ;;  %v6111_v9 = vld [vmem:[%s8007_s2 + $0xb0] sm:$0xff]  }
  0x2d   : > { %v934_v25 = vor.u32 %v6382_v32, %v929_v17  ;;  %v549_v26 = vrot.slane %v547_v13, 6  ;;  %v552_v28 = vrot.slane %v550_v14, 7  ;;  %v534_v34 = vsel %vm6313_vm3, %v525_v52, %v533_v18  ;;  %v261_v8 = vld [vmem:[%s6295_s29 + $0x60] sm:$0xf]  ;;  %v262_v14 = vld [vmem:[%s6295_s29 + $0x64] sm:$0xf] }
  0x2e   : > { %v6406_v15 = vld [vmem:[#allocation2 + $0x8] sm:$0xff]   ;;  %v1011_v24 = vsel %vm927_vm7, %v1006_v60, %v1010_v11  ;;  %v535_v35 = vrot.slane %v533_v18, 4  ;;  %v6419_v36 = vor.u32 %v1012_v10, %v1010_v11  ;;  %745 = vst [vmem:[#allocation2 + $0x58] sm:$0xf] %v534_v34  ;;  %v545_v39 = vrot.slane %v543_v19, 4 }
  0x2f   : > { %5631 = vmatmul.mubr.bf16.vlgmr.msra.gmra.mxu1 %v1011_v24  ;;  %v936_v33 = vshll.u32 %v6406_v15, 16  ;;  %v553_v17 = vor.u32 %v552_v28, %v549_v26  ;;  %v559_v32 = vrot.slane %v557_v20, 6  ;;  %v562_v40 = vrot.slane %v560_v21, 7  ;;  %v263_v21 = vld [vmem:[%s6295_s29 + $0x68] sm:$0xf] }
  0x30   : > { %5651 = vmatpush3.bf16.msra.mxu1 %v6369_v22  ;;  %v940_v42 = vshrl.u32 %v6406_v15, 16  ;;  %v544_v43 = vsel %vm6313_vm3, %v535_v35, %v543_v19  ;;  %v367_v47 = vshrl.u32 %v241_v30, 16  ;;  %v370_v50 = vshll.u32 %v241_v30, 16 }
  0x31   : > { %v938_v41 = vrot.slane %v936_v33, 1  ;;  %5652 = vmatprep.subr.bf16.mxu1 %v6107_v16  ;;  %746 = vst [vmem:[#allocation2 + $0x5c] sm:$0xf] %v544_v43  ;;  %v554_v22 = vsel %vm6313_vm3, %v545_v39, %v553_v17  ;;  %v555_v48 = vrot.slane %v553_v17, 4  ;;  %v6432_v49 = vor.u32 %v562_v40, %v559_v32  ;;  %v6121_v33 = vld [vmem:[%s8007_s2 + $0x18] sm:$0xff]   ;;  %v6115_v40 = vld [vmem:[%s8007_s2 + $0xa8] sm:$0xff]  }
  0x32   : > { %747 = vst [vmem:[#allocation2 + $0x60] sm:$0xf] %v554_v22  ;;  %v365_v53 = vrot.slane %v6396_v61, 4  ;;  %v369_v54 = vrot.slane %v367_v47, 6  ;;  %v377_v55 = vshrl.u32 %v242_v37, 16  ;;  %v372_v60 = vrot.slane %v370_v50, 7 }
  0x33   : > { %v939_v52 = vsel %vm927_vm7, %v934_v25, %v938_v41  ;;  %v6440_v57 = vld [vmem:[#allocation2 + $0x10] sm:$0xff]   ;;  %v564_v59 = vsel %vm6313_vm3, %v555_v48, %v6432_v49  ;;  %v380_v62 = vshll.u32 %v242_v37, 16  ;;  %v387_v63 = vshrl.u32 %v243_v38, 16  ;;  %v264_v48 = vld [vmem:[%s6295_s29 + $0x6c] sm:$0xf] }
  0x34   : > { %5614 = vmatprep.mubr.bf16.mxu0 %v939_v52  ;;  %5653 = vmatpush3.bf16.msra.mxu1 %v6107_v16  ;;  %748 = vst [vmem:[#allocation2 + $0x64] sm:$0xf] %v564_v59  ;;  %v379_v61 = vrot.slane %v377_v55, 6  ;;  %v390_v0 = vshll.u32 %v243_v38, 16  ;;  %v397_v1 = vshrl.u32 %v244_v51, 16  ;;  %v400_v2 = vshll.u32 %v244_v51, 16 }
  0x35   : > { %5654 = vmatprep.subr.bf16.mxu1 %v6112_v44  ;;  %v942_v3 = vor.u32 %v940_v42, %v938_v41  ;;  %v944_v4 = vshll.u32 %v6440_v57, 16  ;;  %v373_v5 = vor.u32 %v372_v60, %v369_v54  ;;  %v382_v6 = vrot.slane %v380_v62, 7 }
  0x36   : > { %v389_v10 = vrot.slane %v387_v63, 6  ;;  %v392_v11 = vrot.slane %v390_v0, 7  ;;  %v399_v12 = vrot.slane %v397_v1, 6  ;;  %v402_v13 = vrot.slane %v400_v2, 7 }
  0x37   : > { %v946_v16 = vrot.slane %v944_v4, 1  ;;  %v374_v18 = vsel %vm6313_vm3, %v365_v53, %v373_v5  ;;  %v375_v19 = vrot.slane %v373_v5, 4  ;;  %v383_v20 = vor.u32 %v382_v6, %v379_v61  ;;  %v6126_v53 = vld [vmem:[%s8007_s2 + $0x10] sm:$0xff]   ;;  %v6119_v6 = vld [vmem:[%s8007_s2 + $0xa0] sm:$0xff]  }
  0x38   : > { %5655 = vmatpush3.bf16.msra.mxu1 %v6112_v44  ;;  %v6454_v24 = vld [vmem:[#allocation2 + $0x58] sm:$0xff]   ;;  %729 = vst [vmem:[#allocation2 + $0x18] sm:$0xf] %v374_v18  ;;  %v948_v25 = vshrl.u32 %v6440_v57, 16  ;;  %v393_v26 = vor.u32 %v392_v11, %v389_v10  ;;  %v6457_v28 = vor.u32 %v402_v13, %v399_v12  ;;  %v567_v30 = vshrl.u32 %v261_v8, 16 }
  0x39   : > { %5656 = vmatprep.subr.bf16.mxu1 %v6117_v56  ;;  %v947_v34 = vsel %vm927_vm7, %v942_v3, %v946_v16  ;;  %v384_v35 = vsel %vm6313_vm3, %v375_v19, %v383_v20  ;;  %v385_v37 = vrot.slane %v383_v20, 4  ;;  %v565_v38 = vrot.slane %v6432_v49, 4  ;;  %v6497_v10 = vld [vmem:[%s6295_s29 + $0x28] sm:$0xf] }
  0x3a   : > { %5615 = vmatmul.mubr.bf16.vlgmr.msra.gmra.mxu0 %v947_v34  ;;  %v1016_v39 = vshll.u32 %v6454_v24, 16  ;;  %v1020_v17 = vshrl.u32 %v6454_v24, 16  ;;  %730 = vst [vmem:[#allocation2 + $0x1c] sm:$0xf] %v384_v35  ;;  %v395_v32 = vrot.slane %v393_v26, 4  ;;  %v569_v41 = vrot.slane %v567_v30, 6 }
  0x3b   : > { %5703 = vmatpush3.bf16.msra.mxu0 %v6380_v29  ;;  %v6472_v42 = vld [vmem:[#allocation2 + $0x60] sm:$0xff]   ;;  %v394_v43 = vsel %vm6313_vm3, %v385_v37, %v393_v26  ;;  %v570_v44 = vshll.u32 %v261_v8, 16  ;;  %v577_v47 = vshrl.u32 %v262_v14, 16  ;;  %v580_v22 = vshll.u32 %v262_v14, 16 }
  0x3c   : > { %5657 = vmatpush3.bf16.msra.mxu1 %v6117_v56  ;;  %v1018_v49 = vrot.slane %v1016_v39, 1  ;;  %5704 = vmatprep.subr.bf16.mxu0 %v6111_v9  ;;  %v404_v50 = vsel %vm6313_vm3, %v395_v32, %v6457_v28  ;;  %731 = vst [vmem:[#allocation2 + $0x20] sm:$0xf] %v394_v43  ;;  %v587_v51 = vshrl.u32 %v263_v21, 16  ;;  %v590_v52 = vshll.u32 %v263_v21, 16  ;;  %v6123_v32 = vld [vmem:[%s8007_s2 + $0x98] sm:$0xff]  }
  0x3d   : > { %v6481_v29 = vld [vmem:[%s6295_s29 + $0x20] sm:$0xf]  ;;  %5658 = vmatprep.subr.bf16.mxu1 %v6121_v33  ;;  %v1024_v54 = vshll.u32 %v6472_v42, 16  ;;  %732 = vst [vmem:[#allocation2 + $0x24] sm:$0xf] %v404_v50  ;;  %v572_v55 = vrot.slane %v570_v44, 7  ;;  %v950_v3 = vor.u32 %v948_v25, %v946_v16 }
  0x3e   : > { %v579_v56 = vrot.slane %v577_v47, 6  ;;  %v582_v59 = vrot.slane %v580_v22, 7  ;;  %v1019_v60 = vsel %vm927_vm7, %v6419_v36, %v1018_v49  ;;  %v1022_v62 = vor.u32 %v1020_v17, %v1018_v49  ;;  %v246_v8 = vld [vmem:[%s6295_s29 + $0x24] sm:$0xf]  ;;  %v6130_v16 = vld [vmem:[%s8007_s2 + $0x8] sm:$0xff]  }
  0x3f   : > { %v589_v63 = vrot.slane %v587_v51, 6  ;;  %5634 = vmatprep.mubr.bf16.mxu1 %v1019_v60  ;;  %v6489_v61 = vrot.slane %v1024_v54, 1  ;;  %5705 = vmatpush3.bf16.msra.mxu0 %v6111_v9  ;;  %v573_v0 = vor.u32 %v572_v55, %v569_v41  ;;  %v592_v2 = vrot.slane %v590_v52, 7  ;;  %v248_v17 = vld [vmem:[%s6295_s29 + $0x2c] sm:$0xf]  ;;  %v6134_v50 = vld [vmem:[%s8007_s2] sm:$0xff]  }
  0x40   : > { %v583_v1 = vor.u32 %v582_v59, %v579_v56  ;;  %5706 = vmatprep.subr.bf16.mxu0 %v6115_v40  ;;  %v597_v4 = vshrl.u32 %v264_v48, 16  ;;  %v600_v5 = vshll.u32 %v264_v48, 16  ;;  %v407_v36 = vshrl.u32 %v6481_v29, 16  ;;  %5659 = vmatpush3.bf16.msra.mxu1 %v6121_v33  ;;  %v265_v54 = vld [vmem:[%s6295_s29 + $0x70] sm:$0xf] }
  0x41   : > { %v1027_v9 = vsel %vm927_vm7, %v1022_v62, %v6489_v61  ;;  %v6501_v11 = vld [vmem:[#allocation2 + $0x18] sm:$0xff]   ;;  %v574_v12 = vsel %vm6313_vm3, %v565_v38, %v573_v0  ;;  %v575_v13 = vrot.slane %v573_v0, 4  ;;  %v1028_v14 = vshrl.u32 %v6472_v42, 16  ;;  %5660 = vmatprep.subr.bf16.mxu1 %v6126_v53  ;;  %v6127_v55 = vld [vmem:[%s8007_s2 + $0x90] sm:$0xff]  }
  0x42   : > { %5635 = vmatmul.mubr.bf16.gmra.mxu1 %v1027_v9  ;;  %749 = vst [vmem:[#allocation2 + $0x68] sm:$0xf] %v574_v12  ;;  %v585_v18 = vrot.slane %v583_v1, 4  ;;  %v593_v19 = vor.u32 %v592_v2, %v589_v63  ;;  %v599_v20 = vrot.slane %v597_v4, 6  ;;  %v602_v21 = vrot.slane %v600_v5, 7  ;;  %v6545_v2 = vld [vmem:[%s8007_s2 + $0xf8] sm:$0xff]  }
  0x43   : > { %v952_v25 = vshll.u32 %v6501_v11, 16  ;;  %v956_v26 = vshrl.u32 %v6501_v11, 16  ;;  %5707 = vmatpush3.bf16.msra.mxu0 %v6115_v40  ;;  %v584_v30 = vsel %vm6313_vm3, %v575_v13, %v583_v1  ;;  %v409_v33 = vrot.slane %v407_v36, 6  ;;  %v266_v60 = vld [vmem:[%s6295_s29 + $0x74] sm:$0xf] }
  0x44   : > { %v6513_v34 = vld [vmem:[#allocation2 + $0x20] sm:$0xff]   ;;  %750 = vst [vmem:[#allocation2 + $0x6c] sm:$0xf] %v584_v30  ;;  %v594_v35 = vsel %vm6313_vm3, %v585_v18, %v593_v19  ;;  %v595_v37 = vrot.slane %v593_v19, 4  ;;  %v6517_v38 = vor.u32 %v602_v21, %v599_v20  ;;  %5708 = vmatprep.subr.bf16.mxu0 %v6119_v6  ;;  %v410_v39 = vshll.u32 %v6481_v29, 16  ;;  %5661 = vmatpush3.bf16.msra.mxu1 %v6126_v53 }
  0x45   : > { %v954_v40 = vrot.slane %v952_v25, 1  ;;  %751 = vst [vmem:[#allocation2 + $0x70] sm:$0xf] %v594_v35  ;;  %v417_v41 = vshrl.u32 %v246_v8, 16  ;;  %v420_v43 = vshll.u32 %v246_v8, 16  ;;  %v427_v44 = vshrl.u32 %v6497_v10, 16  ;;  %5662 = vmatprep.subr.bf16.mxu1 %v6130_v16 }
  0x46   : > { %v960_v47 = vshll.u32 %v6513_v34, 16  ;;  %v604_v22 = vsel %vm6313_vm3, %v595_v37, %v6517_v38  ;;  %v405_v48 = vrot.slane %v6457_v28, 4  ;;  %v412_v49 = vrot.slane %v410_v39, 7  ;;  %v267_v20 = vld [vmem:[%s6295_s29 + $0x78] sm:$0xf] }
  0x47   : > { %v955_v51 = vsel %vm927_vm7, %v950_v3, %v954_v40  ;;  %v958_v52 = vor.u32 %v956_v26, %v954_v40  ;;  %752 = vst [vmem:[#allocation2 + $0x74] sm:$0xf] %v604_v22  ;;  %5709 = vmatpush3.bf16.msra.mxu0 %v6119_v6  ;;  %v419_v29 = vrot.slane %v417_v41, 6  ;;  %v422_v53 = vrot.slane %v420_v43, 7  ;;  %v268_v22 = vld [vmem:[%s6295_s29 + $0x7c] sm:$0xf] }
  0x48   : > { %5618 = vmatprep.mubr.bf16.mxu0 %v955_v51  ;;  %v6538_v28 = vrot.slane %v960_v47, 1  ;;  %v413_v56 = vor.u32 %v412_v49, %v409_v33  ;;  %v430_v59 = vshll.u32 %v6497_v10, 16  ;;  %5710 = vmatprep.subr.bf16.mxu0 %v6123_v32  ;;  %v429_v63 = vrot.slane %v427_v44, 6 }
  0x49   : > { %v423_v62 = vor.u32 %v422_v53, %v419_v29  ;;  %v437_v0 = vshrl.u32 %v248_v17, 16  ;;  %v440_v1 = vshll.u32 %v248_v17, 16  ;;  %5663 = vmatpush3.bf16.msra.mxu1 %v6130_v16  ;;  %v605_v6 = vrot.slane %v6517_v38, 4  ;;  %v6133_v29 = vld [vmem:[%s8007_s2 + $0x80] sm:$0xff]  }
  0x4a   : > { %v963_v3 = vsel %vm927_vm7, %v958_v52, %v6538_v28  ;;  %v414_v4 = vsel %vm6313_vm3, %v405_v48, %v413_v56  ;;  %v415_v5 = vrot.slane %v413_v56, 4  ;;  %5664 = vmatprep.subr.bf16.mxu1 %v6134_v50  ;;  %v1030_v36 = vor.u32 %v1028_v14, %v6489_v61  ;;  %v6129_v61 = vld [vmem:[%s8007_s2 + $0x88] sm:$0xff]   ;;  %v249_v52 = vld [vmem:[%s6295_s29 + $0x30] sm:$0xf] }
  0x4b   : > { %5619 = vmatmul.mubr.bf16.gmra.mxu0 %v963_v3  ;;  %v6552_v8 = vld [vmem:[#allocation2 + $0x68] sm:$0xff]   ;;  %733 = vst [vmem:[#allocation2 + $0x28] sm:$0xf] %v414_v4  ;;  %v425_v10 = vrot.slane %v423_v62, 4  ;;  %v432_v9 = vrot.slane %v430_v59, 7  ;;  %v439_v12 = vrot.slane %v437_v0, 6 }
  0x4c   : > { %v424_v13 = vsel %vm6313_vm3, %v415_v5, %v423_v62  ;;  %v442_v16 = vrot.slane %v440_v1, 7  ;;  %5711 = vmatpush3.bf16.msra.mxu0 %v6123_v32  ;;  %v607_v18 = vshrl.u32 %v265_v54, 16  ;;  %v610_v19 = vshll.u32 %v265_v54, 16  ;;  %v269_v59 = vld [vmem:[%s6295_s29 + $0x80] sm:$0xf]  ;;  %v6589_v1 = vld [vmem:[%s8007_s2 + $0x138] sm:$0xff]  }
  0x4d   : > { %v1032_v21 = vshll.u32 %v6552_v8, 16  ;;  %v1036_v25 = vshrl.u32 %v6552_v8, 16  ;;  %734 = vst [vmem:[#allocation2 + $0x2c] sm:$0xf] %v424_v13  ;;  %v433_v26 = vor.u32 %v432_v9, %v429_v63  ;;  %v617_v30 = vshrl.u32 %v266_v60, 16  ;;  %5712 = vmatprep.subr.bf16.mxu0 %v6127_v55  ;;  %5665 = vmatpush3.bf16.msra.mxu1 %v6134_v50 }
  0x4e   : > { %v6563_v14 = vld [vmem:[#allocation2 + $0x70] sm:$0xff]   ;;  %v6565_v33 = vor.u32 %v442_v16, %v439_v12  ;;  %v609_v35 = vrot.slane %v607_v18, 6  ;;  %v612_v37 = vrot.slane %v610_v19, 7  ;;  %v620_v38 = vshll.u32 %v266_v60, 16  ;;  %5754 = vmatprep.subr.bf16.mxu1 %v6545_v2  ;;  %v270_v16 = vld [vmem:[%s6295_s29 + $0x84] sm:$0xf] }
  0x4f   : > { %v1034_v39 = vrot.slane %v1032_v21, 1  ;;  %v434_v17 = vsel %vm6313_vm3, %v425_v10, %v433_v26  ;;  %v435_v32 = vrot.slane %v433_v26, 4  ;;  %v619_v40 = vrot.slane %v617_v30, 6 }
  0x50   : > { %v1040_v41 = vshll.u32 %v6563_v14, 16  ;;  %v964_v43 = vshrl.u32 %v6513_v34, 16  ;;  %735 = vst [vmem:[#allocation2 + $0x30] sm:$0xf] %v434_v17  ;;  %v613_v44 = vor.u32 %v612_v37, %v609_v35  ;;  %v622_v47 = vrot.slane %v620_v38, 7  ;;  %5713 = vmatpush3.bf16.msra.mxu0 %v6127_v55 }
  0x51   : > { %v1035_v48 = vsel %vm927_vm7, %v1030_v36, %v1034_v39  ;;  %v1038_v49 = vor.u32 %v1036_v25, %v1034_v39  ;;  %v444_v50 = vsel %vm6313_vm3, %v435_v32, %v6565_v33  ;;  %v627_v51 = vshrl.u32 %v267_v20, 16  ;;  %5714 = vmatprep.subr.bf16.mxu0 %v6129_v61  ;;  %v271_v39 = vld [vmem:[%s6295_s29 + $0x88] sm:$0xf] }
  0x52   : > { %5638 = vmatprep.mubr.bf16.mxu1 %v1035_v48  ;;  %v6581_v53 = vrot.slane %v1040_v41, 1  ;;  %736 = vst [vmem:[#allocation2 + $0x34] sm:$0xf] %v444_v50  ;;  %v614_v54 = vsel %vm6313_vm3, %v605_v6, %v613_v44  ;;  %v615_v55 = vrot.slane %v613_v44, 4  ;;  %v623_v56 = vor.u32 %v622_v47, %v619_v40 }
  0x53   : > { %753 = vst [vmem:[#allocation2 + $0x78] sm:$0xf] %v614_v54  ;;  %v629_v60 = vrot.slane %v627_v51, 6  ;;  %v630_v62 = vshll.u32 %v267_v20, 16  ;;  %v637_v63 = vshrl.u32 %v268_v22, 16  ;;  %v640_v0 = vshll.u32 %v268_v22, 16 }
  0x54   : > { %v1043_v3 = vsel %vm927_vm7, %v1038_v49, %v6581_v53  ;;  %v6593_v4 = vld [vmem:[#allocation2 + $0x28] sm:$0xff]   ;;  %v966_v5 = vor.u32 %v964_v43, %v6538_v28  ;;  %v624_v6 = vsel %vm6313_vm3, %v615_v55, %v623_v56  ;;  %v1044_v36 = vshrl.u32 %v6563_v14, 16  ;;  %5715 = vmatpush3.bf16.msra.mxu0 %v6129_v61 }
  0x55   : > { %5639 = vmatmul.mubr.bf16.gmra.mxu1 %v1043_v3  ;;  %754 = vst [vmem:[#allocation2 + $0x7c] sm:$0xf] %v624_v6  ;;  %v625_v10 = vrot.slane %v623_v56, 4  ;;  %v632_v9 = vrot.slane %v630_v62, 7  ;;  %v639_v12 = vrot.slane %v637_v63, 6  ;;  %v642_v13 = vrot.slane %v640_v0, 7  ;;  %5716 = vmatprep.subr.bf16.mxu0 %v6133_v29 }
  0x56   : > { %v968_v18 = vshll.u32 %v6593_v4, 16  ;;  %v972_v19 = vshrl.u32 %v6593_v4, 16  ;;  %v447_v28 = vshrl.u32 %v249_v52, 16  ;;  %v450_v20 = vshll.u32 %v249_v52, 16  ;;  %v1562_v6 = vld [vmem:[#allocation2] sm:$0xe] }
  0x57   : > { %v633_v21 = vor.u32 %v632_v9, %v629_v60  ;;  %v643_v25 = vor.u32 %v642_v13, %v639_v12  ;;  %v647_v26 = vshrl.u32 %v269_v59, 16  ;;  %v650_v30 = vshll.u32 %v269_v59, 16 }
  0x58   : > { %v970_v61 = vrot.slane %v968_v18, 1  ;;  %v445_v35 = vrot.slane %v6565_v33, 4  ;;  %v449_v37 = vrot.slane %v447_v28, 6  ;;  %v452_v38 = vrot.slane %v450_v20, 7  ;;  %5717 = vmatpush3.bf16.msra.mxu0 %v6133_v29 }
  0x59   : > { %v6604_v17 = vld [vmem:[#allocation2 + $0x30] sm:$0xff]   ;;  %v634_v32 = vsel %vm6313_vm3, %v625_v10, %v633_v21  ;;  %v635_v40 = vrot.slane %v633_v21, 4  ;;  %v649_v41 = vrot.slane %v647_v26, 6  ;;  %v657_v43 = vshrl.u32 %v270_v16, 16  ;;  %5806 = vmatprep.subr.bf16.mxu0 %v6589_v1 }
  0x5a   : > { %v971_v44 = vsel %vm927_vm7, %v966_v5, %v970_v61  ;;  %755 = vst [vmem:[#allocation2 + $0x80] sm:$0xf] %v634_v32  ;;  %v453_v47 = vor.u32 %v452_v38, %v449_v37  ;;  %v645_v22 = vrot.slane %v643_v25, 4  ;;  %v652_v33 = vrot.slane %v650_v30, 7 }
  0x5b   : > { %5622 = vmatprep.mubr.bf16.mxu0 %v971_v44  ;;  %v974_v48 = vor.u32 %v972_v19, %v970_v61  ;;  %v976_v49 = vshll.u32 %v6604_v17, 16  ;;  %v644_v50 = vsel %vm6313_vm3, %v635_v40, %v643_v25  ;;  %v660_v55 = vshll.u32 %v270_v16, 16 }
  0x5c   : > { %v6613_v51 = vld [vmem:[#allocation2 + $0x78] sm:$0xff]   ;;  %756 = vst [vmem:[#allocation2 + $0x84] sm:$0xf] %v644_v50  ;;  %v454_v52 = vsel %vm6313_vm3, %v445_v35, %v453_v47  ;;  %v455_v29 = vrot.slane %v453_v47, 4  ;;  %v653_v54 = vor.u32 %v652_v33, %v649_v41  ;;  %v659_v59 = vrot.slane %v657_v43, 6 }
  0x5d   : > { %v978_v56 = vrot.slane %v976_v49, 1  ;;  %737 = vst [vmem:[#allocation2 + $0x38] sm:$0xf] %v454_v52  ;;  %v667_v60 = vshrl.u32 %v271_v39, 16  ;;  %v670_v62 = vshll.u32 %v271_v39, 16  ;;  %v1046_v63 = vor.u32 %v1044_v36, %v6581_v53 }
  0x5e   : > { %v1048_v0 = vshll.u32 %v6613_v51, 16  ;;  %v464_v3 = vsel %vm6313_vm3, %v455_v29, %v6309_v27  ;;  %v654_v5 = vsel %vm6313_vm3, %v645_v22, %v653_v54  ;;  %v655_v9 = vrot.slane %v653_v54, 4 }
  0x5f   : > { %v979_v10 = vsel %vm927_vm7, %v974_v48, %v978_v56  ;;  %738 = vst [vmem:[#allocation2 + $0x3c] sm:$0xf] %v464_v3  ;;  %v662_v12 = vrot.slane %v660_v55, 7  ;;  %757 = vst [vmem:[#allocation2 + $0x88] sm:$0xf] %v654_v5  ;;  %v669_v16 = vrot.slane %v667_v60, 6  ;;  %v4987_v26 = vcombine.low %v1562_v6, %v6336_v58 }
  0x60   : > { %5623 = vmatmul.mubr.bf16.gmra.mxu0 %v979_v10  ;;  %v1050_v13 = vrot.slane %v1048_v0, 1  ;;  %v672_v53 = vrot.slane %v670_v62, 7  ;;  %v1052_v36 = vshrl.u32 %v6613_v51, 16  ;;  %v980_v27 = vshrl.u32 %v6604_v17, 16  ;;  %v6139_v10 = vld [vmem:[%s8007_s2 + $0x130] sm:$0xff]  }
  0x61   : > { %v663_v18 = vor.u32 %v662_v12, %v659_v59  ;;  %v1584_v32 = vrot.slane %v4987_v26, 1  ;;  %v1585_v43 = vrot.slane %v6406_v15, 1  ;;  %v1587_v60 = vrot.slane %v6440_v57, 1 }
  0x62   : > { %v1051_v19 = vsel %vm927_vm7, %v1046_v63, %v1050_v13  ;;  %v6628_v28 = vor.u32 %v672_v53, %v669_v16  ;;  %v1054_v30 = vor.u32 %v1052_v36, %v1050_v13  ;;  %v982_v39 = vor.u32 %v980_v27, %v978_v56  ;;  %v6138_v13 = vld [vmem:[%s8007_s2 + $0xf0] sm:$0xff]   ;;  %v6143_v53 = vld [vmem:[%s8007_s2 + $0x120] sm:$0xff]   ;;  %v6140_v36 = vld [vmem:[%s8007_s2 + $0xe8] sm:$0xff]  }
  0x63   : > { %5642 = vmatprep.mubr.bf16.mxu1 %v1051_v19  ;;  %v6630_v20 = vld [vmem:[#allocation2 + $0x80] sm:$0xff]   ;;  %v664_v21 = vsel %vm6313_vm3, %v655_v9, %v663_v18  ;;  %v665_v25 = vrot.slane %v663_v18, 4  ;;  %v1586_v29 = vsel %vm1583_vm9, %v1584_v32, %v1585_v43  ;;  %v1589_v3 = vrot.slane %v6501_v11, 1  ;;  %v6145_v18 = vld [vmem:[%s8007_s2 + $0x118] sm:$0xff]  }
  0x64   : > { %758 = vst [vmem:[#allocation2 + $0x8c] sm:$0xf] %v664_v21  ;;  %v1056_v61 = vshll.u32 %v6630_v20, 16  ;;  %v1060_v58 = vshrl.u32 %v6630_v20, 16  ;;  %v1591_v9 = vrot.slane %v6513_v34, 1  ;;  %v1593_v12 = vrot.slane %v6593_v4, 1 }
  0x65   : > { %v674_v35 = vsel %vm6313_vm3, %v665_v25, %v6628_v28  ;;  %v1590_v6 = vsel %vm1583_vm9, %v1587_v60, %v1589_v3  ;;  %v6147_v21 = vld [vmem:[%s8007_s2 + $0x110] sm:$0xff]   ;;  %v6144_v25 = vld [vmem:[%s8007_s2 + $0xd8] sm:$0xff]   ;;  %v6151_v32 = vld [vmem:[%s8007_s2 + $0x100] sm:$0xff]   ;;  %vm3656_vm13 = vsmask.f32 5376  ;;  %vm4641_vm14 = vcmask 1040384  }
  0x66   : > { %v6639_v37 = vld [vmem:[#allocation2 + $0x38] sm:$0xff]   ;;  %759 = vst [vmem:[#allocation2 + $0x90] sm:$0xf] %v674_v35  ;;  %v1058_v38 = vrot.slane %v1056_v61, 1  ;;  %v1592_v16 = vsel %vm1583_vm9, %v1589_v3, %v1591_v9  ;;  %v6146_v61 = vld [vmem:[%s8007_s2 + $0xd0] sm:$0xff]   ;;  %v6149_v35 = vld [vmem:[%s8007_s2 + $0x108] sm:$0xff]  }
  0x67   : > { %v984_v40 = vshll.u32 %v6639_v37, 16  ;;  %v988_v41 = vshrl.u32 %v6639_v37, 16 }
  0x68   : > { %v1059_v44 = vsel %vm927_vm7, %v1054_v30, %v1058_v38  ;;  %v1062_v49 = vor.u32 %v1060_v58, %v1058_v38  ;;  %v6227_v30 = vld [vmem:[#allocation2 + $0x48] sm:$0xff]   ;;  %v6150_v58 = vld [vmem:[%s8007_s2 + $0xc0] sm:$0xff]  }
  0x69   : > { %5643 = vmatmul.mubr.bf16.gmra.mxu1 %v1059_v44  ;;  %v986_v47 = vrot.slane %v984_v40, 1  ;;  %v6148_v40 = vld [vmem:[%s8007_s2 + $0xc8] sm:$0xff]  }
  0x6b   : > { %v6646_v22 = vld [vmem:[#allocation2 + $0x88] sm:$0xff]   ;;  %v987_v33 = vsel %vm927_vm7, %v982_v39, %v986_v47  ;;  %v990_v48 = vor.u32 %v988_v41, %v986_v47  ;;  %v6736_v47 = vld [vmem:[%s8007_s2 + $0x178] sm:$0xff]  }
  0x6c   : > { %5626 = vmatprep.mubr.bf16.mxu0 %v987_v33  ;;  %v1064_v50 = vshll.u32 %v6646_v22, 16  ;;  %v1068_v55 = vshrl.u32 %v6646_v22, 16  ;;  %v1607_v33 = vrot.slane %v6472_v42, 1 }
  0x6d   : > { %v6650_v52 = vld [vmem:[#allocation2 + $0x90] ss:$0 sps:$4 sm:$0x11]   ;;  %v995_v54 = vsel %vm927_vm7, %v990_v48, %v6390_v46  ;;  %v1588_v46 = vsel %vm1583_vm9, %v1585_v43, %v1587_v60  ;;  %v6728_v43 = vld [vmem:[%s8007_s2 + $0x1b8] sm:$0xff]   ;;  %v272_v48 = vld [vmem:[%s6295_s29 + $0x8c] sm:$0xf] }
  0x6e   : > { %5627 = vmatmul.mubr.bf16.gmra.mxu0 %v995_v54  ;;  %v1066_v56 = vrot.slane %v1064_v50, 1  ;;  %v1072_v59 = vshll.u32 %v6650_v52, 16  ;;  %v677_v50 = vshrl.u32 %v272_v48, 16  ;;  %v680_v54 = vshll.u32 %v272_v48, 16 }
  0x6f   : > { %5718 = vmatprep.mubr.bf16.mxu0 %v1586_v29  ;;  %v320_v29 = vld [vmem:[#allocation2 + $0x98] sm:$0xe]  ;;  %v1611_v60 = vrot.slane %v6563_v14, 1 }
  0x70   : > { %v1067_v62 = vsel %vm927_vm7, %v1062_v49, %v1066_v56  ;;  %v1070_v63 = vor.u32 %v1068_v55, %v1066_v56  ;;  %v1074_v0 = vrot.slane %v1072_v59, 1  ;;  %v1609_v49 = vrot.slane %v6552_v8, 1 }
  0x71   : > { %5646 = vmatprep.mubr.bf16.mxu1 %v1067_v62  ;;  %v321_v55 = vsel %vm6373_vm8, 0, %v320_v29  ;;  %v675_v56 = vrot.slane %v6628_v28, 4  ;;  %v679_v59 = vrot.slane %v677_v50, 6  ;;  %v6750_v62 = vld [vmem:[#allocation2 + $0x18] sm:$0xff]   ;;  %v1613_v28 = vrot.slane %v6613_v51, 1 }
  0x72   : > { %v1075_v5 = vsel %vm927_vm7, %v1070_v63, %v1074_v0  ;;  %322 = vst [vmem:[#allocation2 + $0x98] sm:$0xe] %v321_v55  ;;  %v682_v63 = vrot.slane %v680_v54, 7  ;;  %v1610_v3 = vsel %vm1583_vm9, %v1607_v33, %v1609_v49  ;;  %v1619_v29 = vrot.slane %v6650_v52, 1 }
  0x73   : > { %5647 = vmatmul.mubr.bf16.gmra.mxu1 %v1075_v5  ;;  %v1901_v5 = vld [vmem:[#allocation2 + $0xc] sm:$0xf] }
  0x74   : > { %5666 = vmatprep.mubr.bf16.mxu1 %v6349_v7  ;;  %v6141_v7 = vld [vmem:[%s8007_s2 + $0x128] sm:$0xff]   ;;  %v683_v23 = vor.u32 %v682_v63, %v679_v59 }
  0x76   : > { %5719 = vmatmul.mubr.bf16.vlgmr.msra.gmra.mxu0 %v1588_v46  ;;  %v2834_v46 = vld [vmem:[#allocation2 + $0x8] sm:$0xc] }
  0x77   : > { %5807 = vmatpush3.bf16.msra.mxu0 %v6589_v1  ;;  %5722 = vmatprep.mubr.bf16.mxu0 %v1590_v6  ;;  %v1594_v1 = vsel %vm1583_vm9, %v1591_v9, %v1593_v12  ;;  %v6755_v6 = vld [vmem:[#allocation2 + $0x20] sm:$0xff]   ;;  %v2859_v9 = vrot.slane %v6750_v62, 2 }
  0x78   : > { %5808 = vmatprep.subr.bf16.mxu0 %v6139_v10 }
  0x7b   : > { %5667 = vmatmul.mubr.bf16.vlgmr.msra.gmra.mxu1 %v6406_v15  ;;  %5809 = vmatpush3.bf16.msra.mxu0 %v6139_v10  ;;  %v1595_v15 = vrot.slane %v6604_v17, 1  ;;  %v5080_v10 = vcombine.low %v2834_v46, %v1901_v5  ;;  %v2050_v46 = vrot.slane %v6750_v62, 1 }
  0x7c   : > { %5755 = vmatpush3.bf16.msra.mxu1 %v6545_v2  ;;  %5670 = vmatprep.mubr.bf16.mxu1 %v6440_v57  ;;  %v6142_v57 = vld [vmem:[%s8007_s2 + $0xe0] sm:$0xff]   ;;  %v1597_v2 = vrot.slane %v6639_v37, 1 }
  0x7d   : > { %5756 = vmatprep.subr.bf16.mxu1 %v6138_v13  ;;  %5810 = vmatprep.subr.bf16.mxu0 %v6141_v7  ;;  %v1596_v19 = vsel %vm1583_vm9, %v1593_v12, %v1595_v15  ;;  %v1900_v12 = vld [vmem:[#allocation2 + $0x8] sm:$0xe] }
  0x7e   : > { %5723 = vmatmul.mubr.bf16.gmra.mxu0 %v1592_v16  ;;  %v1598_v27 = vsel %vm1583_vm9, %v1595_v15, %v1597_v2  ;;  %v685_v16 = vrot.slane %v683_v23, 4  ;;  %v761_v15 = vld [vmem:[#allocation2 + $0x98] sm:$0x3]  ;;  %v6780_v45 = vcombine.low %v1900_v12, %v1901_v5  ;;  %v2412_v5 = vshrl.u32 %v6755_v6, 16 }
  0x7f   : > { %5726 = vmatprep.mubr.bf16.mxu0 %v1594_v1  ;;  %5811 = vmatpush3.bf16.msra.mxu0 %v6141_v7  ;;  %v684_v7 = vsel %vm6313_vm3, %v675_v56, %v683_v23  ;;  %v1615_v1 = vrot.slane %v6630_v20, 1  ;;  %v6814_v56 = vld [vmem:[#allocation2 + $0x48] sm:$0xff]   ;;  %v6820_v23 = vld [vmem:[#allocation2 + $0x50] sm:$0xff]  }
  0x80   : > { %5757 = vmatpush3.bf16.msra.mxu1 %v6138_v13  ;;  %5812 = vmatprep.subr.bf16.mxu0 %v6143_v53  ;;  %v6758_v13 = vld [vmem:[#allocation2 + $0x28] sm:$0xff]   ;;  %760 = vst [vmem:[#allocation2 + $0x94] sm:$0xf] %v684_v7  ;;  %v2047_v63 = vrot.slane %v6780_v45, 1  ;;  %v2871_v52 = vrot.slane %v6814_v56, 2  ;;  %v2873_v12 = vrot.slane %v6820_v23, 2 }
  0x81   : > { %5758 = vmatprep.subr.bf16.mxu1 %v6140_v36  ;;  %v1616_v48 = vsel %vm1583_vm9, %v1613_v28, %v1615_v1 }
  0x83   : > { %5671 = vmatmul.mubr.bf16.gmra.mxu1 %v6501_v11  ;;  %5813 = vmatpush3.bf16.msra.mxu0 %v6143_v53  ;;  %v6226_v11 = vld [vmem:[#allocation2 + $0x40] sm:$0xff]   ;;  %v2856_v53 = vrot.slane %v5080_v10, 2  ;;  %v6826_v10 = vld [vmem:[#allocation2 + $0x58] sm:$0xff]  }
  0x84   : > { %5674 = vmatprep.mubr.bf16.mxu1 %v6513_v34  ;;  %5759 = vmatpush3.bf16.msra.mxu1 %v6140_v36  ;;  %v1599_v26 = vrot.slane %v6226_v11, 1  ;;  %v1601_v34 = vrot.slane %v6227_v30, 1 }
  0x85   : > { %5760 = vmatprep.subr.bf16.mxu1 %v6142_v57  ;;  %5814 = vmatprep.subr.bf16.mxu0 %v6145_v18 }
  0x86   : > { %5727 = vmatmul.mubr.bf16.gmra.mxu0 %v1596_v19  ;;  %v1600_v38 = vsel %vm1583_vm9, %v1597_v2, %v1599_v26  ;;  %v1602_v39 = vsel %vm1583_vm9, %v1599_v26, %v1601_v34  ;;  %v6767_v2 = vld [vmem:[#allocation2 + $0x30] sm:$0xff]   ;;  %v2861_v19 = vrot.slane %v6755_v6, 2  ;;  %v6230_v26 = vld [vmem:[#allocation2 + $0x60] sm:$0xff]  }
  0x87   : > { %5730 = vmatprep.mubr.bf16.mxu0 %v1598_v27  ;;  %5815 = vmatpush3.bf16.msra.mxu0 %v6145_v18  ;;  %v762_v18 = vsel %vm6324_vm5, %v685_v16, %v761_v15  ;;  %v6229_v27 = vld [vmem:[#allocation2 + $0x58] sm:$0xff]   ;;  %v2424_v15 = vshll.u32 %v6758_v13, 16 }
  0x88   : > { %5761 = vmatpush3.bf16.msra.mxu1 %v6142_v57  ;;  %5816 = vmatprep.subr.bf16.mxu0 %v6147_v21  ;;  %v1617_v57 = vrot.slane %v6646_v22, 1  ;;  %763 = vst [vmem:[#allocation2 + $0x98] sm:$0x3] %v762_v18  ;;  %v6837_v18 = vsel %vm2855_vm10, %v2871_v52, %v2873_v12 }
  0x89   : > { %5762 = vmatprep.subr.bf16.mxu1 %v6144_v25 }
  0x8a   : > { %v1618_v50 = vsel %vm1583_vm9, %v1615_v1, %v1617_v57  ;;  %v2414_v1 = vrot.slane %v2412_v5, 1 }
  0x8b   : > { %5675 = vmatmul.mubr.bf16.gmra.mxu1 %v6593_v4  ;;  %5817 = vmatpush3.bf16.msra.mxu0 %v6147_v21  ;;  %v6228_v4 = vld [vmem:[#allocation2 + $0x50] sm:$0xff]   ;;  %v1612_v21 = vsel %vm1583_vm9, %v1609_v49, %v1611_v60 }
  0x8c   : > { %5678 = vmatprep.mubr.bf16.mxu1 %v6604_v17  ;;  %5763 = vmatpush3.bf16.msra.mxu1 %v6144_v25  ;;  %v1603_v41 = vrot.slane %v6228_v4, 1  ;;  %v1605_v17 = vrot.slane %v6454_v24, 1  ;;  %v6776_v25 = vld [vmem:[#allocation2 + $0x38] sm:$0xff]  }
  0x8d   : > { %5764 = vmatprep.subr.bf16.mxu1 %v6146_v61  ;;  %5818 = vmatprep.subr.bf16.mxu0 %v6149_v35 }
  0x8e   : > { %5731 = vmatmul.mubr.bf16.gmra.mxu0 %v1600_v38  ;;  %v1604_v44 = vsel %vm1583_vm9, %v1601_v34, %v1603_v41  ;;  %v1606_v24 = vsel %vm1583_vm9, %v1603_v41, %v1605_v17  ;;  %v1608_v42 = vsel %vm1583_vm9, %v1605_v17, %v1607_v33  ;;  %v2406_v41 = vshll.u32 %v6750_v62, 16 }
  0x8f   : > { %5734 = vmatprep.mubr.bf16.mxu0 %v1602_v39  ;;  %5819 = vmatpush3.bf16.msra.mxu0 %v6149_v35  ;;  %v6786_v35 = vsel %vm2855_vm10, %v2859_v9, %v2861_v19 }
  0x90   : > { %5765 = vmatpush3.bf16.msra.mxu1 %v6146_v61  ;;  %5820 = vmatprep.subr.bf16.mxu0 %v6151_v32  ;;  %v6783_v61 = vld [vmem:[#allocation2 + $0x40] sm:$0xff]  }
  0x91   : > { %5766 = vmatprep.subr.bf16.mxu1 %v6148_v40  ;;  %v2869_v17 = vrot.slane %v6783_v61, 2 }
  0x93   : > { %5679 = vmatmul.mubr.bf16.gmra.mxu1 %v6639_v37  ;;  %5821 = vmatpush3.bf16.msra.mxu0 %v6151_v32  ;;  %v6740_v37 = vld [vmem:[#allocation2 + $0x10] sm:$0xff]   ;;  %v2403_v32 = vshrl.u32 %v6750_v62, 16 }
  0x94   : > { %5682 = vmatprep.mubr.bf16.mxu1 %v6226_v11  ;;  %5767 = vmatpush3.bf16.msra.mxu1 %v6148_v40  ;;  %v2857_v0 = vrot.slane %v6740_v37, 2  ;;  %v2863_v11 = vrot.slane %v6758_v13, 2  ;;  %v2394_v34 = vshrl.u32 %v6740_v37, 16  ;;  %v2397_v39 = vshll.u32 %v6740_v37, 16 }
  0x95   : > { %5768 = vmatprep.subr.bf16.mxu1 %v6150_v58  ;;  %5910 = vmatprep.subr.bf16.mxu0 %v6728_v43  ;;  %v2865_v40 = vrot.slane %v6767_v2, 2  ;;  %v2048_v55 = vrot.slane %v6740_v37, 1  ;;  %v2469_v37 = vshll.u32 %v6820_v23, 16 }
  0x96   : > { %5735 = vmatmul.mubr.bf16.gmra.mxu0 %v1604_v44  ;;  %v6764_v36 = vsel %vm2855_vm10, %v2857_v0, %v2859_v9  ;;  %v6772_v31 = vsel %vm2855_vm10, %v2856_v53, %v2857_v0  ;;  %v6789_v38 = vsel %vm2855_vm10, %v2861_v19, %v2863_v11  ;;  %v2389_v44 = vshll.u32 %v6780_v45, 16  ;;  %v6828_v9 = vld [vmem:[#allocation2 + $0x60] sm:$0xff]  }
  0x97   : > { %5738 = vmatprep.mubr.bf16.mxu0 %v1606_v24  ;;  %v6800_v24 = vsel %vm2855_vm10, %v2863_v11, %v2865_v40  ;;  %v2396_v54 = vrot.slane %v2394_v34, 1  ;;  %v2399_v59 = vrot.slane %v2397_v39, 2  ;;  %v2875_v53 = vrot.slane %v6826_v10, 2 }
  0x98   : > { %5769 = vmatpush3.bf16.msra.mxu1 %v6150_v58  ;;  %v2386_v58 = vshrl.u32 %v6780_v45, 16  ;;  %v2877_v19 = vrot.slane %v6828_v9, 2 }
  0x99   : > { %5858 = vmatprep.subr.bf16.mxu1 %v6736_v47  ;;  %v2400_v16 = vor.u32 %v2399_v59, %v2396_v54  ;;  %v6844_v11 = vsel %vm2855_vm10, %v2873_v12, %v2875_v53  ;;  %v2049_v54 = vsel %vm1583_vm9, %v2047_v63, %v2048_v55  ;;  %v2451_v59 = vshll.u32 %v6783_v61, 16 }
  0x9a   : > { %v2388_v0 = vrot.slane %v2386_v58, 1  ;;  %v6851_v34 = vsel %vm2855_vm10, %v2875_v53, %v2877_v19  ;;  %v6884_v53 = vld [vmem:[#allocation2 + $0x80] sm:$0xff]  }
  0x9b   : > { %5683 = vmatmul.mubr.bf16.gmra.mxu1 %v6227_v30  ;;  %v1614_v30 = vsel %vm1583_vm9, %v1611_v60, %v1613_v28  ;;  %v2408_v60 = vrot.slane %v2406_v41, 2  ;;  %v2421_v28 = vshrl.u32 %v6758_v13, 16  ;;  %v2433_v41 = vshll.u32 %v6767_v2, 16 }
  0x9c   : > { %5686 = vmatprep.mubr.bf16.mxu1 %v6228_v4  ;;  %v2867_v4 = vrot.slane %v6776_v25, 2 }
  0x9d   : > { %v2423_v45 = vrot.slane %v2421_v28, 1 }
  0x9e   : > { %5739 = vmatmul.mubr.bf16.gmra.mxu0 %v1608_v42  ;;  %v6803_v33 = vsel %vm2855_vm10, %v2865_v40, %v2867_v4  ;;  %v6807_v49 = vsel %vm2855_vm10, %v2867_v4, %v2869_v17  ;;  %v2405_v42 = vrot.slane %v2403_v32, 1  ;;  %v2054_v32 = vrot.slane %v6758_v13, 1 }
  0x9f   : > { %5742 = vmatprep.mubr.bf16.mxu0 %v1610_v3  ;;  %v2391_v3 = vrot.slane %v2389_v44, 2  ;;  %v2426_v4 = vrot.slane %v2424_v15, 2  ;;  %v2442_v44 = vshll.u32 %v6776_v25, 16 }
  0xa0   : > { %v2409_v58 = vor.u32 %v2408_v60, %v2405_v42  ;;  %v6160_v42 = vld [vmem:[%s8007_s2 + $0x1b0] sm:$0xff]  }
  0xa1   : > { %v2392_v7 = vor.u32 %v2391_v3, %v2388_v0  ;;  %v6872_v0 = vld [vmem:[#allocation2 + $0x78] sm:$0xff]   ;;  %v2435_v3 = vrot.slane %v2433_v41, 2  ;;  %v2444_v12 = vrot.slane %v2442_v44, 2  ;;  %v2466_v41 = vshrl.u32 %v6820_v23, 16 }
  0xa2   : > { %v2883_v63 = vrot.slane %v6872_v0, 2  ;;  %v8011_v44 = vrot.slane %v6776_v25, 1 }
  0xa3   : > { %5687 = vmatmul.mubr.bf16.gmra.mxu1 %v6229_v27  ;;  %v2052_v27 = vrot.slane %v6755_v6, 1  ;;  %v2401_v39 = vsel %vm2384_vm11, %v2392_v7, %v2400_v16 }
  0xa4   : > { %5690 = vmatprep.mubr.bf16.mxu1 %v6230_v26  ;;  %v1620_v26 = vsel %vm1583_vm9, %v1617_v57, %v1619_v29  ;;  %v6859_v57 = vld [vmem:[#allocation2 + $0x70] sm:$0xff]  }
  0xa5   : > { %v2881_v29 = vrot.slane %v6859_v57, 2 }
  0xa6   : > { %5743 = vmatmul.mubr.bf16.gmra.mxu0 %v1612_v21  ;;  %v6841_v21 = vld [vmem:[#allocation2 + $0x68] sm:$0xff]  }
  0xa7   : > { %5746 = vmatprep.mubr.bf16.mxu0 %v1614_v30  ;;  %v2879_v40 = vrot.slane %v6841_v21, 2  ;;  %v6887_v15 = vsel %vm2855_vm10, %v2881_v29, %v2883_v63 }
  0xa8   : > { %8027 = vst [vmem:[#allocation3_spill] sm:$0xff] %v6887_v15 }
  0xa9   : > { %v6878_v5 = vsel %vm2855_vm10, %v2879_v40, %v2881_v29 }
  0xab   : > { %5691 = vmatmul.mubr.bf16.gmra.mxu1 %v6552_v8  ;;  %v2415_v8 = vshll.u32 %v6755_v6, 16 }
  0xac   : > { %5694 = vmatprep.mubr.bf16.mxu1 %v6563_v14  ;;  %v6831_v14 = vsel %vm2855_vm10, %v2869_v17, %v2871_v52  ;;  %v6862_v17 = vsel %vm2855_vm10, %v2877_v19, %v2879_v40  ;;  %v2410_v52 = vsel %vm2384_vm11, %v2400_v16, %v2409_v58  ;;  %v2457_v19 = vshrl.u32 %v6814_v56, 16 }
  0xad   : > { %v2417_v30 = vrot.slane %v2415_v8, 2  ;;  %v2427_v16 = vor.u32 %v2426_v4, %v2423_v45  ;;  %v2051_v40 = vsel %vm1583_vm9, %v2048_v55, %v2050_v46  ;;  %v2053_v4 = vsel %vm1583_vm9, %v2050_v46, %v2052_v27 }
  0xae   : > { %5747 = vmatmul.mubr.bf16.gmra.mxu0 %v1616_v48  ;;  %v2459_v29 = vrot.slane %v2457_v19, 1 }
  0xaf   : > { %5750 = vmatprep.mubr.bf16.mxu0 %v1618_v50  ;;  %v2418_v48 = vor.u32 %v2417_v30, %v2414_v1  ;;  %v2448_v50 = vshrl.u32 %v6783_v61, 16  ;;  %v2453_v1 = vrot.slane %v2451_v59, 2  ;;  %v2460_v30 = vshll.u32 %v6814_v56, 16 }
  0xb1   : > { %v2419_v28 = vsel %vm2384_vm11, %v2409_v58, %v2418_v48  ;;  %v2450_v7 = vrot.slane %v2448_v50, 1  ;;  %v2428_v62 = vsel %vm2384_vm11, %v2418_v48, %v2427_v16  ;;  %v2055_v48 = vsel %vm1583_vm9, %v2052_v27, %v2054_v32 }
  0xb3   : > { %5695 = vmatmul.mubr.bf16.gmra.mxu1 %v6613_v51  ;;  %v2430_v51 = vshrl.u32 %v6767_v2, 16  ;;  %v6923_v46 = vor.u32 %v2453_v1, %v2450_v7  ;;  %v6952_v7 = vld [vmem:[#allocation2 + $0x98] ss:$0 sps:$4 sm:$0x33]   ;;  %v3173_v1 = vld [vmem:[#allocation2 + $0x14] sm:$0xf] }
  0xb4   : > { %5698 = vmatprep.mubr.bf16.mxu1 %v6630_v20  ;;  %v2439_v20 = vshrl.u32 %v6776_v25, 16 }
  0xb5   : > { %v2432_v60 = vrot.slane %v2430_v51, 1 }
  0xb6   : > { %5751 = vmatmul.mubr.bf16.gmra.mxu0 %v1620_v26  ;;  %v2441_v8 = vrot.slane %v2439_v20, 1  ;;  %v6159_v26 = vld [vmem:[%s8007_s2 + $0x170] sm:$0xff]   ;;  %v2056_v20 = vrot.slane %v6767_v2, 1  ;;  %v2475_v2 = vshrl.u32 %v6826_v10, 16 }
  0xb7   : > { %5822 = vmatprep.mubr.bf16.mxu0 %v2401_v39  ;;  %v2885_v39 = vrot.slane %v6884_v53, 2  ;;  %v2436_v51 = vor.u32 %v2435_v3, %v2432_v60  ;;  %v2478_v60 = vshll.u32 %v6826_v10, 16  ;;  %v6170_v3 = vld [vmem:[%s8007_s2 + $0x1a0] sm:$0xff]  }
  0xb8   : > { %v2445_v58 = vor.u32 %v2444_v12, %v2441_v8  ;;  %v6940_v8 = vld [vmem:[#allocation2 + $0x90] sm:$0xff]   ;;  %v2057_v6 = vsel %vm1583_vm9, %v2054_v32, %v2056_v20  ;;  %v6949_v27 = vsel %vm1583_vm9, %v2056_v20, %v8011_v44 }
  0xb9   : > { %v6915_v55 = vsel %vm2855_vm10, %v2883_v63, %v2885_v39  ;;  %v2437_v59 = vsel %vm2384_vm11, %v2427_v16, %v2436_v51  ;;  %v3172_v63 = vld [vmem:[#allocation2 + $0x10] sm:$0xc]  ;;  %v2889_v32 = vrot.slane %v6940_v8, 2 }
  0xba   : > { %8028 = vst [vmem:[#allocation4_spill] sm:$0xff] %v6915_v55  ;;  %v2455_v19 = vsel %vm2384_vm11, %v2445_v58, %v6923_v46 }
  0xbb   : > { %5699 = vmatmul.mubr.bf16.gmra.mxu1 %v6646_v22  ;;  %v6890_v22 = vld [vmem:[#allocation2 + $0x88] sm:$0xff]  }
  0xbc   : > { %5770 = vmatprep.mubr.bf16.mxu1 %v2049_v54  ;;  %v2887_v45 = vrot.slane %v6890_v22, 2  ;;  %v2462_v54 = vrot.slane %v2460_v30, 2  ;;  %v2477_v30 = vrot.slane %v2475_v2, 1  ;;  %v6980_v2 = vld [vmem:[#allocation2 + $0x20] sm:$0xff]  }
  0xbe   : > { %5823 = vmatmul.mubr.bf16.vlgmr.msra.gmra.mxu0 %v2410_v52  ;;  %v6920_v50 = vsel %vm2855_vm10, %v2885_v39, %v2887_v45  ;;  %v2471_v52 = vrot.slane %v2469_v37, 2  ;;  %v6956_v16 = vor.u32 %v2462_v54, %v2459_v29  ;;  %v2480_v39 = vrot.slane %v2478_v60, 2 }
  0xbf   : > { %5911 = vmatpush3.bf16.msra.mxu0 %v6728_v43  ;;  %5826 = vmatprep.mubr.bf16.mxu0 %v2419_v28  ;;  %v6165_v43 = vld [vmem:[%s8007_s2 + $0x1a8] sm:$0xff]   ;;  %8029 = vst [vmem:[#allocation5_spill] sm:$0xff] %v6920_v50  ;;  %v2446_v28 = vsel %vm2384_vm11, %v2436_v51, %v2445_v58  ;;  %v2891_v51 = vrot.slane %v6952_v7, 2  ;;  %v6972_v58 = vld [vmem:[#allocation2 + $0x18] sm:$0xff]   ;;  %v6975_v20 = vsel %vm2855_vm10, %v2887_v45, %v2889_v32  ;;  %v2487_v29 = vshll.u32 %v6828_v9, 16 }
  0xc0   : > { %5912 = vmatprep.subr.bf16.mxu0 %v6160_v42  ;;  %8030 = vst [vmem:[#allocation6_spill] sm:$0xff] %v6975_v20  ;;  %v2493_v54 = vshrl.u32 %v6841_v21, 16 }
  0xc1   : > { %v6983_v60 = vsel %vm2855_vm10, %v2889_v32, %v2891_v51  ;;  %v3666_v32 = vshrl.u32 %v6972_v58, 16  ;;  %v2489_v50 = vrot.slane %v2487_v29, 2 }
  0xc2   : > { %8031 = vst [vmem:[#allocation7_spill] sm:$0xff] %v6983_v60  ;;  %v3678_v60 = vshll.u32 %v6980_v2, 16 }
  0xc3   : > { %5771 = vmatmul.mubr.bf16.vlgmr.msra.gmra.mxu1 %v2051_v40  ;;  %5913 = vmatpush3.bf16.msra.mxu0 %v6160_v42  ;;  %v2468_v42 = vrot.slane %v2466_v41, 1  ;;  %v2484_v40 = vshrl.u32 %v6828_v9, 16  ;;  %v6167_v41 = vld [vmem:[%s8007_s2 + $0x160] sm:$0xff]   ;;  %v3668_v44 = vrot.slane %v3666_v32, 2 }
  0xc4   : > { %5859 = vmatpush3.bf16.msra.mxu1 %v6736_v47  ;;  %5774 = vmatprep.mubr.bf16.mxu1 %v2053_v4  ;;  %v6163_v47 = vld [vmem:[%s8007_s2 + $0x168] sm:$0xff]   ;;  %v4106_v4 = vld [vmem:[#allocation2 + $0x10] sm:$0x8] }
  0xc5   : > { %5860 = vmatprep.subr.bf16.mxu1 %v6159_v26  ;;  %5914 = vmatprep.subr.bf16.mxu0 %v6165_v43  ;;  %v6965_v37 = vor.u32 %v2471_v52, %v2468_v42  ;;  %v4129_v52 = vrot.slane %v6972_v58, 3  ;;  %v2486_v20 = vrot.slane %v2484_v40, 1 }
  0xc6   : > { %5827 = vmatmul.mubr.bf16.gmra.mxu0 %v2428_v62  ;;  %v5173_v62 = vcombine.low %v4106_v4, %v3173_v1  ;;  %v4131_v4 = vrot.slane %v6980_v2, 3 }
  0xc7   : > { %5830 = vmatprep.mubr.bf16.mxu0 %v2437_v59  ;;  %5915 = vmatpush3.bf16.msra.mxu0 %v6165_v43  ;;  %v6174_v43 = vld [vmem:[%s8007_s2 + $0x198] sm:$0xff]   ;;  %v2496_v59 = vshll.u32 %v6841_v21, 16  ;;  %v2473_v40 = vsel %vm2384_vm11, %v6956_v16, %v6965_v37 }
  0xc8   : > { %5861 = vmatpush3.bf16.msra.mxu1 %v6159_v26  ;;  %5916 = vmatprep.subr.bf16.mxu0 %v6170_v3  ;;  %v6970_v26 = vcombine.low %v3172_v63, %v3173_v1  ;;  %v4128_v42 = vrot.slane %v5173_v62, 3  ;;  %v6178_v1 = vld [vmem:[%s8007_s2 + $0x190] sm:$0xff]   ;;  %v3675_v62 = vshrl.u32 %v6980_v2, 16  ;;  %v7002_v13 = vsel %vm4127_vm12, %v4129_v52, %v4131_v4 }
  0xc9   : > { %5862 = vmatprep.subr.bf16.mxu1 %v6163_v47 }
  0xca   : > { %v3658_v45 = vshrl.u32 %v6970_v26, 16  ;;  %v3661_v63 = vshll.u32 %v6970_v26, 16  ;;  %v3677_v15 = vrot.slane %v3675_v62, 2  ;;  %v2505_v62 = vshll.u32 %v6859_v57, 16 }
  0xcb   : > { %5775 = vmatmul.mubr.bf16.gmra.mxu1 %v2055_v48  ;;  %5917 = vmatpush3.bf16.msra.mxu0 %v6170_v3  ;;  %v3669_v3 = vshll.u32 %v6972_v58, 16  ;;  %v6172_v48 = vld [vmem:[%s8007_s2 + $0x158] sm:$0xff]  }
  0xcc   : > { %5778 = vmatprep.mubr.bf16.mxu1 %v2057_v6  ;;  %5863 = vmatpush3.bf16.msra.mxu1 %v6163_v47  ;;  %v6998_v6 = vsel %vm4127_vm12, %v4128_v42, %v4129_v52  ;;  %v3660_v47 = vrot.slane %v3658_v45, 2  ;;  %v3663_v51 = vrot.slane %v3661_v63, 3  ;;  %v8032_v42 = vrot.slane %v6783_v61, 1 }
  0xcd   : > { %5864 = vmatprep.subr.bf16.mxu1 %v6167_v41  ;;  %5918 = vmatprep.subr.bf16.mxu0 %v6174_v43  ;;  %v3671_v12 = vrot.slane %v3669_v3, 3  ;;  %v8033_v45 = vrot.slane %v6776_v25, 1  ;;  %v3680_v52 = vrot.slane %v3678_v60, 3  ;;  %v6177_v25 = vld [vmem:[%s8007_s2 + $0x150] sm:$0xff]  }
  0xce   : > { %5831 = vmatmul.mubr.bf16.gmra.mxu0 %v2446_v28  ;;  %v3664_v55 = vor.u32 %v3663_v51, %v3660_v47  ;;  %v7025_v60 = vld [vmem:[#allocation2 + $0x30] sm:$0xff]  }
  0xcf   : > { %5834 = vmatprep.mubr.bf16.mxu0 %v2455_v19  ;;  %5919 = vmatpush3.bf16.msra.mxu0 %v6174_v43  ;;  %v2061_v63 = vsel %vm1583_vm9, %v8033_v45, %v8032_v42  ;;  %v3672_v28 = vor.u32 %v3671_v12, %v3668_v44  ;;  %v2464_v19 = vsel %vm2384_vm11, %v6923_v46, %v6956_v16  ;;  %v6182_v44 = vld [vmem:[%s8007_s2 + $0x188] sm:$0xff]   ;;  %v2498_v46 = vrot.slane %v2496_v59, 2 }
  0xd0   : > { %5865 = vmatpush3.bf16.msra.mxu1 %v6167_v41  ;;  %5920 = vmatprep.subr.bf16.mxu0 %v6178_v1  ;;  %v2481_v43 = vor.u32 %v2480_v39, %v2477_v30  ;;  %v7023_v12 = vld [vmem:[#allocation2 + $0x28] sm:$0xff]   ;;  %v2495_v41 = vrot.slane %v2493_v54, 1  ;;  %v3681_v30 = vor.u32 %v3680_v52, %v3677_v15  ;;  %v7031_v39 = vor.u32 %v2489_v50, %v2486_v20  ;;  %v6187_v54 = vld [vmem:[%s8007_s2 + $0x180] sm:$0xff]  }
  0xd1   : > { %5866 = vmatprep.subr.bf16.mxu1 %v6172_v48  ;;  %v7028_v16 = vsel %vm3656_vm13, %v3664_v55, %v3672_v28  ;;  %v4133_v32 = vrot.slane %v7023_v12, 3  ;;  %v3684_v3 = vshrl.u32 %v7023_v12, 16  ;;  %v3687_v47 = vshll.u32 %v7023_v12, 16  ;;  %v6181_v59 = vld [vmem:[%s8007_s2 + $0x148] sm:$0xff]  }
  0xd2   : > { %v7040_v55 = vsel %vm3656_vm13, %v3672_v28, %v3681_v30  ;;  %v4135_v15 = vrot.slane %v7025_v60, 3  ;;  %v3693_v50 = vshrl.u32 %v7025_v60, 16  ;;  %v2502_v20 = vshrl.u32 %v6859_v57, 16 }
  0xd3   : > { %5779 = vmatmul.mubr.bf16.gmra.mxu1 %v6949_v27  ;;  %5921 = vmatpush3.bf16.msra.mxu0 %v6178_v1  ;;  %8034 = vst [vmem:[#allocation8_spill] sm:$0xff] %v7040_v55  ;;  %v3696_v27 = vshll.u32 %v7025_v60, 16  ;;  %v7050_v1 = vsel %vm4127_vm12, %v4131_v4, %v4133_v32  ;;  %v3689_v51 = vrot.slane %v3687_v47, 3  ;;  %v8037_v28 = vrot.slane %v6814_v56, 1  ;;  %v6185_v56 = vld [vmem:[%s8007_s2 + $0x140] sm:$0xff]  }
  0xd4   : > { %5782 = vmatprep.mubr.bf16.mxu1 %v2061_v63  ;;  %5867 = vmatpush3.bf16.msra.mxu1 %v6172_v48  ;;  %8035 = vst [vmem:[#allocation9_spill] sm:$0xff] %v7050_v1  ;;  %v3686_v48 = vrot.slane %v3684_v3, 2  ;;  %v7054_v42 = vsel %vm4127_vm12, %v4133_v32, %v4135_v15  ;;  %v3695_v45 = vrot.slane %v3693_v50, 2  ;;  %v8038_v52 = vrot.slane %v6783_v61, 1 }
  0xd5   : > { %5868 = vmatprep.subr.bf16.mxu1 %v6177_v25  ;;  %5922 = vmatprep.subr.bf16.mxu0 %v6182_v44  ;;  %8036 = vst [vmem:[#allocation10_spill] sm:$0xff] %v7054_v42  ;;  %v3698_v63 = vrot.slane %v3696_v27, 3  ;;  %v2511_v4 = vshrl.u32 %v6872_v0, 16  ;;  %v8040_v47 = vmov %v8037_v28  ;;  %v2066_v50 = vrot.slane %v6826_v10, 1  ;;  %v7078_v10 = vld [vmem:[%s8007_s2 + $0x238] sm:$0xff]  }
  0xd6   : > { %5835 = vmatmul.mubr.bf16.gmra.mxu0 %v2464_v19  ;;  %v2063_v29 = vsel %vm1583_vm9, %v8038_v52, %v8037_v28  ;;  %v3690_v3 = vor.u32 %v3689_v51, %v3686_v48  ;;  %v8039_v19 = vrot.slane %v6820_v23, 1  ;;  %v2514_v27 = vshll.u32 %v6872_v0, 16  ;;  %v7080_v48 = vld [vmem:[#allocation2 + $0x38] sm:$0xff]   ;;  %v7087_v51 = vld [vmem:[#allocation2 + $0x40] sm:$0xff]  }
  0xd7   : > { %5838 = vmatprep.mubr.bf16.mxu0 %v2473_v40  ;;  %5923 = vmatpush3.bf16.msra.mxu0 %v6182_v44  ;;  %v3699_v61 = vor.u32 %v3698_v63, %v3695_v45  ;;  %v2482_v40 = vsel %vm2384_vm11, %v6965_v37, %v2481_v43  ;;  %v2499_v28 = vor.u32 %v2498_v46, %v2495_v41  ;;  %v2504_v41 = vrot.slane %v2502_v20, 1 }
  0xd8   : > { %v2065_v32 = vsel %vm1583_vm9, %v8040_v47, %v8039_v19  ;;  %5869 = vmatpush3.bf16.msra.mxu1 %v6177_v25  ;;  %5924 = vmatprep.subr.bf16.mxu0 %v6187_v54  ;;  %v7083_v25 = vsel %vm3656_vm13, %v3681_v30, %v3690_v3  ;;  %v2491_v37 = vsel %vm2384_vm11, %v2481_v43, %v7031_v39  ;;  %v2507_v46 = vrot.slane %v2505_v62, 2 }
  0xd9   : > { %5870 = vmatprep.subr.bf16.mxu1 %v6181_v59  ;;  %8041 = vst [vmem:[#allocation11_spill] sm:$0xff] %v7083_v25  ;;  %v7090_v45 = vsel %vm3656_vm13, %v3690_v3, %v3699_v61  ;;  %v2513_v63 = vrot.slane %v2511_v4, 1  ;;  %v4137_v52 = vrot.slane %v7080_v48, 3  ;;  %v3702_v19 = vshrl.u32 %v7080_v48, 16 }
  0xda   : > { %8042 = vst [vmem:[#allocation12_spill] sm:$0xff] %v7090_v45  ;;  %v3705_v30 = vshll.u32 %v7080_v48, 16  ;;  %v2516_v47 = vrot.slane %v2514_v27, 2  ;;  %v4139_v43 = vrot.slane %v7087_v51, 3  ;;  %v3711_v20 = vshrl.u32 %v7087_v51, 16 }
  0xdb   : > { %5783 = vmatmul.mubr.bf16.gmra.mxu1 %v2063_v29  ;;  %5925 = vmatpush3.bf16.msra.mxu0 %v6187_v54  ;;  %v3714_v62 = vshll.u32 %v7087_v51, 16  ;;  %v2520_v3 = vshrl.u32 %v6884_v53, 16  ;;  %v7102_v29 = vld [vmem:[%s8007_s2 + $0x1f8] sm:$0xff]   ;;  %v7106_v54 = vsel %vm4127_vm12, %v4135_v15, %v4137_v52  ;;  %v8044_v25 = vrot.slane %v6820_v23, 1 }
  0xdc   : > { %5786 = vmatprep.mubr.bf16.mxu1 %v2065_v32  ;;  %5871 = vmatpush3.bf16.msra.mxu1 %v6181_v59  ;;  %v3704_v59 = vrot.slane %v3702_v19, 2  ;;  %v3707_v4 = vrot.slane %v3705_v30, 3  ;;  %v2523_v32 = vshll.u32 %v6884_v53, 16  ;;  %v7110_v27 = vsel %vm4127_vm12, %v4137_v52, %v4139_v43 }
  0xdd   : > { %5872 = vmatprep.subr.bf16.mxu1 %v6185_v56  ;;  %6014 = vmatprep.subr.bf16.mxu0 %v7078_v10  ;;  %8043 = vst [vmem:[#allocation13_spill] sm:$0xff] %v7110_v27  ;;  %v3713_v44 = vrot.slane %v3711_v20, 2  ;;  %v3716_v45 = vrot.slane %v3714_v62, 3  ;;  %v2067_v55 = vsel %vm1583_vm9, %v8044_v25, %v2066_v50  ;;  %v2070_v1 = vrot.slane %v6841_v21, 1 }
  0xde   : > { %5839 = vmatmul.mubr.bf16.gmra.mxu0 %v2482_v40  ;;  %v3708_v42 = vor.u32 %v3707_v4, %v3704_v59  ;;  %v2508_v15 = vor.u32 %v2507_v46, %v2504_v41  ;;  %v2500_v40 = vsel %vm2384_vm11, %v7031_v39, %v2499_v28  ;;  %v8045_v30 = vrot.slane %v6828_v9, 1 }
  0xdf   : > { %5842 = vmatprep.mubr.bf16.mxu0 %v2491_v37  ;;  %v3717_v19 = vor.u32 %v3716_v45, %v3713_v44  ;;  %v7123_v37 = vld [vmem:[#allocation2 + $0x48] sm:$0xff]   ;;  %v2517_v21 = vor.u32 %v2516_v47, %v2513_v63  ;;  %v2522_v25 = vrot.slane %v2520_v3, 1  ;;  %v7128_v44 = vld [vmem:[#allocation2 + $0x50] sm:$0xff]  }
  0xe0   : > { %5873 = vmatpush3.bf16.msra.mxu1 %v6185_v56  ;;  %v2069_v52 = vsel %vm1583_vm9, %v2066_v50, %v8045_v30  ;;  %v7126_v23 = vsel %vm3656_vm13, %v3699_v61, %v3708_v42  ;;  %v2525_v56 = vrot.slane %v2523_v32, 2  ;;  %v2529_v50 = vshrl.u32 %v6890_v22, 16 }
  0xe1   : > { %5962 = vmatprep.subr.bf16.mxu1 %v7102_v29  ;;  %v7131_v39 = vsel %vm3656_vm13, %v3708_v42, %v3717_v19  ;;  %v4141_v41 = vrot.slane %v7123_v37, 3  ;;  %v3720_v46 = vshrl.u32 %v7123_v37, 16  ;;  %v3723_v45 = vshll.u32 %v7123_v37, 16 }
  0xe2   : > { %8046 = vst [vmem:[#allocation14_spill] sm:$0xff] %v7131_v39  ;;  %v2509_v61 = vsel %vm2384_vm11, %v2499_v28, %v2508_v15  ;;  %v4143_v63 = vrot.slane %v7128_v44, 3  ;;  %v3729_v47 = vshrl.u32 %v7128_v44, 16  ;;  %v3732_v62 = vshll.u32 %v7128_v44, 16 }
  0xe3   : > { %5787 = vmatmul.mubr.bf16.gmra.mxu1 %v2067_v55  ;;  %v2532_v42 = vshll.u32 %v6890_v22, 16  ;;  %v7143_v55 = vsel %vm4127_vm12, %v4139_v43, %v4141_v41  ;;  %v3722_v3 = vrot.slane %v3720_v46, 2  ;;  %v3725_v59 = vrot.slane %v3723_v45, 3 }
  0xe4   : > { %5790 = vmatprep.mubr.bf16.mxu1 %v2069_v52  ;;  %v2526_v4 = vor.u32 %v2525_v56, %v2522_v25  ;;  %v7146_v32 = vsel %vm4127_vm12, %v4141_v41, %v4143_v63  ;;  %v3731_v30 = vrot.slane %v3729_v47, 2  ;;  %v3734_v28 = vrot.slane %v3732_v62, 3  ;;  %v7157_v47 = vld [vmem:[#allocation2 + $0x58] sm:$0xff]   ;;  %v7165_v62 = vld [vmem:[#allocation2 + $0x60] sm:$0xff]  }
  0xe5   : > { %8047 = vst [vmem:[#allocation15_spill] sm:$0xff] %v7146_v32  ;;  %v2538_v52 = vshrl.u32 %v6940_v8, 16  ;;  %v3726_v20 = vor.u32 %v3725_v59, %v3722_v3  ;;  %v8048_v39 = vrot.slane %v6828_v9, 1  ;;  %v2074_v43 = vrot.slane %v6872_v0, 1 }
  0xe6   : > { %5843 = vmatmul.mubr.bf16.gmra.mxu0 %v2500_v40  ;;  %v2541_v46 = vshll.u32 %v6940_v8, 16  ;;  %v3735_v45 = vor.u32 %v3734_v28, %v3731_v30  ;;  %v8049_v40 = vrot.slane %v6859_v57, 1  ;;  %v2531_v56 = vrot.slane %v2529_v50, 1 }
  0xe7   : > { %5846 = vmatprep.mubr.bf16.mxu0 %v2509_v61  ;;  %v2071_v27 = vsel %vm1583_vm9, %v8048_v39, %v2070_v1  ;;  %v2534_v41 = vrot.slane %v2532_v42, 2  ;;  %v7160_v61 = vsel %vm3656_vm13, %v3717_v19, %v3726_v20  ;;  %v2518_v9 = vsel %vm2384_vm11, %v2508_v15, %v2517_v21 }
  0xe8   : > { %v2073_v25 = vsel %vm1583_vm9, %v2070_v1, %v8049_v40  ;;  %8050 = vst [vmem:[#allocation16_spill] sm:$0xff] %v7160_v61  ;;  %v2527_v39 = vsel %vm2384_vm11, %v2517_v21, %v2526_v4  ;;  %v2076_v0 = vrot.slane %v6884_v53, 1  ;;  %v7168_v3 = vsel %vm3656_vm13, %v3726_v20, %v3735_v45 }
  0xe9   : > { %8051 = vst [vmem:[#allocation17_spill] sm:$0xff] %v7168_v3  ;;  %v2540_v1 = vrot.slane %v2538_v52, 1  ;;  %v4145_v50 = vrot.slane %v7157_v47, 3  ;;  %v3738_v42 = vshrl.u32 %v7157_v47, 16  ;;  %v3741_v19 = vshll.u32 %v7157_v47, 16 }
  0xea   : > { %v2543_v59 = vrot.slane %v2541_v46, 2  ;;  %v4147_v15 = vrot.slane %v7165_v62, 3  ;;  %v3747_v21 = vshrl.u32 %v7165_v62, 16  ;;  %v3750_v53 = vshll.u32 %v7165_v62, 16 }
  0xeb   : > { %5791 = vmatmul.mubr.bf16.gmra.mxu1 %v2071_v27  ;;  %v2535_v30 = vor.u32 %v2534_v41, %v2531_v56  ;;  %v7177_v20 = vsel %vm4127_vm12, %v4143_v63, %v4145_v50  ;;  %v3740_v27 = vrot.slane %v3738_v42, 2  ;;  %v3743_v28 = vrot.slane %v3741_v19, 3 }
  0xec   : > { %5794 = vmatprep.mubr.bf16.mxu1 %v2073_v25  ;;  %v2547_v52 = vshrl.u32 %v6952_v7, 16  ;;  %v7181_v40 = vsel %vm4127_vm12, %v4145_v50, %v4147_v15  ;;  %v3749_v25 = vrot.slane %v3747_v21, 2  ;;  %v3752_v46 = vrot.slane %v3750_v53, 3 }
  0xed   : > { %v2550_v3 = vshll.u32 %v6952_v7, 16  ;;  %v3744_v32 = vor.u32 %v3743_v28, %v3740_v27  ;;  %v8052_v61 = vrot.slane %v6859_v57, 1  ;;  %v2544_v63 = vor.u32 %v2543_v59, %v2540_v1  ;;  %v7195_v7 = vld [vmem:[#allocation2 + $0x70] sm:$0xff]  }
  0xee   : > { %5847 = vmatmul.mubr.bf16.gmra.mxu0 %v2518_v9  ;;  %v3753_v41 = vor.u32 %v3752_v46, %v3749_v25  ;;  %v2077_v42 = vsel %vm1583_vm9, %v2074_v43, %v2076_v0  ;;  %v7188_v9 = vld [vmem:[#allocation2 + $0x68] sm:$0xff]   ;;  %v2536_v50 = vsel %vm2384_vm11, %v2526_v4, %v2535_v30  ;;  %v2549_v21 = vrot.slane %v2547_v52, 1  ;;  %8053 = vst [vmem:[#allocation18_spill] sm:$0xff] %v7195_v7 }
  0xef   : > { %5850 = vmatprep.mubr.bf16.mxu0 %v2527_v39  ;;  %v2075_v56 = vsel %vm1583_vm9, %v8052_v61, %v2074_v43  ;;  %v7191_v19 = vsel %vm3656_vm13, %v3735_v45, %v3744_v32  ;;  %v2078_v39 = vrot.slane %v6890_v22, 1  ;;  %v2552_v61 = vrot.slane %v2550_v3, 2 }
  0xf0   : > { %v7198_v57 = vsel %vm3656_vm13, %v3744_v32, %v3753_v41  ;;  %v4149_v1 = vrot.slane %v7188_v9, 3  ;;  %v3756_v43 = vshrl.u32 %v7188_v9, 16  ;;  %v3759_v59 = vshll.u32 %v7188_v9, 16 }
  0xf1   : > { %8054 = vst [vmem:[#allocation19_spill] sm:$0xff] %v7198_v57  ;;  %v2545_v45 = vsel %vm2384_vm11, %v2535_v30, %v2544_v63  ;;  %v8012_v4 = vrot.slane %v7195_v7, 3  ;;  %v3765_v22 = vshrl.u32 %v7195_v7, 16  ;;  %v3768_v53 = vshll.u32 %v7195_v7, 16 }
  0xf2   : > { %v2080_v32 = vrot.slane %v6940_v8, 1  ;;  %v7209_v27 = vsel %vm4127_vm12, %v4147_v15, %v4149_v1  ;;  %v3758_v3 = vrot.slane %v3756_v43, 2  ;;  %v3761_v28 = vrot.slane %v3759_v59, 3  ;;  %v6186_v57 = vld [vmem:[#allocation2 + $0x98] ss:$0 sps:$4 sm:$0x11]   ;;  %v7222_v59 = vpop.f32.mrf.mxu1 }
  0xf3   : > { %5795 = vmatmul.mubr.bf16.gmra.mxu1 %v2075_v56  ;;  %v7214_v52 = vsel %vm4127_vm12, %v4149_v1, %v8012_v4  ;;  %v3767_v30 = vrot.slane %v3765_v22, 2  ;;  %v3770_v25 = vrot.slane %v3768_v53, 3  ;;  %v2553_v46 = vor.u32 %v2552_v61, %v2549_v21 }
  0xf4   : > { %5798 = vmatprep.mubr.bf16.mxu1 %v2077_v42  ;;  %8055 = vst [vmem:[#allocation20_spill] sm:$0xff] %v7214_v52  ;;  %v3762_v56 = vor.u32 %v3761_v28, %v3758_v3  ;;  %v2079_v42 = vsel %vm1583_vm9, %v2076_v0, %v2078_v39  ;;  %v3319_v8 = vrot.slane %v6970_v26, 2  ;;  %v3320_v15 = vrot.slane %v6972_v58, 2  ;;  %v7233_v61 = vpop.f32.mrf.mxu1 }
  0xf5   : > { %v7219_v43 = vor.u32 %v3770_v25, %v3767_v30  ;;  %v2554_v0 = vsel %vm2384_vm11, %v2544_v63, %v2553_v46  ;;  %v2082_v26 = vrot.slane %v6186_v57, 1  ;;  %v3324_v22 = vrot.slane %v7023_v12, 2  ;;  %v6202_v46 = vld [vmem:[%s8007_s2 + $0x228] sm:$0xff]  }
  0xf6   : > { %5851 = vmatmul.mubr.bf16.gmra.mxu0 %v2536_v50  ;;  %v2081_v50 = vsel %vm1583_vm9, %v2078_v39, %v2080_v32  ;;  %v7225_v1 = vsel %vm3656_vm13, %v3753_v41, %v3762_v56  ;;  %v3321_v58 = vsel %vm2855_vm10, %v3319_v8, %v3320_v15  ;;  %v3322_v39 = vrot.slane %v6980_v2, 2  ;;  %v7240_v53 = vpop.f32.mrf.mxu1  ;;  %v6197_v2 = vld [vmem:[%s8007_s2 + $0x230] sm:$0xff]  }
  0xf7   : > { %5854 = vmatprep.mubr.bf16.mxu0 %v2545_v45  ;;  %8056 = vst [vmem:[#allocation21_spill] sm:$0xff] %v7219_v43  ;;  %v7229_v21 = vsel %vm3656_vm13, %v3762_v56, %v7219_v43  ;;  %v2083_v41 = vsel %vm1583_vm9, %v2080_v32, %v2082_v26  ;;  %v3326_v12 = vrot.slane %v7025_v60, 2  ;;  %v3328_v30 = vrot.slane %v7080_v48, 2  ;;  %v6207_v56 = vld [vmem:[%s8007_s2 + $0x220] sm:$0xff]  }
  0xf8   : > { %8057 = vst [vmem:[#allocation22_spill] sm:$0xff] %v7229_v21  ;;  %v3323_v63 = vsel %vm2855_vm10, %v3320_v15, %v3322_v39  ;;  %v3325_v3 = vsel %vm2855_vm10, %v3322_v39, %v3324_v22  ;;  %v7250_v28 = vpop.f32.mrf.mxu1  ;;  %v6221_v43 = vld [vmem:[#allocation2 + $0xa0] ss:$0 sps:$4 sm:$0x33]  }
  0xf9   : > { %v3329_v48 = vsel %vm2855_vm10, %v3326_v12, %v3328_v30 }
  0xfa   : > { %v7236_v45 = vpop.f32.mrf.mxu0 }
  0xfb   : > { %5799 = vmatmul.mubr.bf16.gmra.mxu1 %v2079_v42 }
  0xfc   : > { %5802 = vmatprep.mubr.bf16.mxu1 %v2081_v50  ;;  %v7243_v57 = vpop.f32.mrf.mxu0  ;;  %v6204_v50 = vld [vmem:[%s8007_s2 + $0x1e0] sm:$0xff]  }
  0xfe   : > { %5855 = vmatmul.mubr.bf16.gmra.mxu0 %v2554_v0  ;;  %v7254_v32 = vpop.f32.mrf.mxu0  ;;  %v6211_v0 = vld [vmem:[%s8007_s2 + $0x218] sm:$0xff]  }
  0xff   : > { %5926 = vmatprep.mubr.bf16.mxu0 %v3321_v58  ;;  %v6215_v58 = vld [vmem:[%s8007_s2 + $0x210] sm:$0xff]  }
 0x100   : > { %v7267_v60 = vpop.f32.mrf.mxu0 }
 0x102   : > { %v7260_v25 = vpop.f32.mrf.mxu1 }
 0x103   : > { %5803 = vmatmul.mubr.bf16.gmra.mxu1 %v2083_v41  ;;  %v3334_v41 = vrot.slane %v7128_v44, 2 }
 0x104   : > { %5874 = vmatprep.mubr.bf16.mxu1 %v6772_v31  ;;  %v6196_v31 = vld [vmem:[%s8007_s2 + $0x1f0] sm:$0xff]   ;;  %v7275_v42 = vpop.f32.mrf.mxu1 }
 0x106   : > { %5927 = vmatmul.mubr.bf16.vlgmr.msra.gmra.mxu0 %v3323_v63  ;;  %v7284_v15 = vpop.f32.mrf.mxu1 }
 0x107   : > { %6015 = vmatpush3.bf16.msra.mxu0 %v7078_v10  ;;  %5930 = vmatprep.mubr.bf16.mxu0 %v3325_v3  ;;  %v3327_v10 = vsel %vm2855_vm10, %v3324_v22, %v3326_v12  ;;  %v3336_v22 = vrot.slane %v7157_v47, 2  ;;  %v6214_v3 = vld [vmem:[%s8007_s2 + $0x1d0] sm:$0xff]  }
 0x108   : > { %6016 = vmatprep.subr.bf16.mxu0 %v6197_v2  ;;  %v7301_v39 = vpop.f32.mrf.mxu1 }
 0x109   : > { %v3337_v47 = vsel %vm2855_vm10, %v3334_v41, %v3336_v22 }
 0x10b   : > { %5875 = vmatmul.mubr.bf16.vlgmr.msra.gmra.mxu1 %v6764_v36  ;;  %6017 = vmatpush3.bf16.msra.mxu0 %v6197_v2  ;;  %v6200_v36 = vld [vmem:[%s8007_s2 + $0x1e8] sm:$0xff]   ;;  %v7281_v8 = vpop.f32.mrf.mxu0 }
 0x10c   : > { %5963 = vmatpush3.bf16.msra.mxu1 %v7102_v29  ;;  %5878 = vmatprep.mubr.bf16.mxu1 %v6786_v35  ;;  %v3330_v29 = vrot.slane %v7087_v51, 2  ;;  %v3332_v35 = vrot.slane %v7123_v37, 2  ;;  %v6219_v2 = vld [vmem:[%s8007_s2 + $0x208] sm:$0xff]  }
 0x10d   : > { %5964 = vmatprep.subr.bf16.mxu1 %v6196_v31  ;;  %6018 = vmatprep.subr.bf16.mxu0 %v6202_v46  ;;  %v7294_v26 = vpop.f32.mrf.mxu0 }
 0x10e   : > { %5931 = vmatmul.mubr.bf16.gmra.mxu0 %v3327_v10  ;;  %v3331_v51 = vsel %vm2855_vm10, %v3328_v30, %v3330_v29  ;;  %v3333_v37 = vsel %vm2855_vm10, %v3330_v29, %v3332_v35  ;;  %v3335_v44 = vsel %vm2855_vm10, %v3332_v35, %v3334_v41  ;;  %v6223_v30 = vld [vmem:[%s8007_s2 + $0x200] sm:$0xff]   ;;  %v3340_v10 = vrot.slane %v7188_v9, 2  ;;  %v7347_v9 = vld [vmem:[#allocation2 + $0x78] sm:$0xff]  }
 0x10f   : > { %5934 = vmatprep.mubr.bf16.mxu0 %v3329_v48  ;;  %6019 = vmatpush3.bf16.msra.mxu0 %v6202_v46 }
 0x110   : > { %5965 = vmatpush3.bf16.msra.mxu1 %v6196_v31  ;;  %6020 = vmatprep.subr.bf16.mxu0 %v6207_v56 }
 0x111   : > { %5966 = vmatprep.subr.bf16.mxu1 %v6200_v36 }
 0x113   : > { %5879 = vmatmul.mubr.bf16.gmra.mxu1 %v6789_v38  ;;  %6021 = vmatpush3.bf16.msra.mxu0 %v6207_v56  ;;  %v6209_v38 = vld [vmem:[%s8007_s2 + $0x1d8] sm:$0xff]   ;;  %v6222_v56 = vld [vmem:[%s8007_s2 + $0x1c0] sm:$0xff]  }
 0x114   : > { %5882 = vmatprep.mubr.bf16.mxu1 %v6800_v24  ;;  %5967 = vmatpush3.bf16.msra.mxu1 %v6200_v36  ;;  %v7307_v24 = vpop.f32.mrf.mxu0 }
 0x115   : > { %5968 = vmatprep.subr.bf16.mxu1 %v6204_v50  ;;  %6022 = vmatprep.subr.bf16.mxu0 %v6211_v0  ;;  %v7310_v63 = vpop.f32.mrf.mxu1 }
 0x116   : > { %5935 = vmatmul.mubr.bf16.gmra.mxu0 %v3331_v51  ;;  %v7320_v12 = vpop.f32.mrf.mxu0 }
 0x117   : > { %5938 = vmatprep.mubr.bf16.mxu0 %v3333_v37  ;;  %6023 = vmatpush3.bf16.msra.mxu0 %v6211_v0  ;;  %v7327_v31 = vpop.f32.mrf.mxu1  ;;  %v3342_v0 = vrot.slane %v7195_v7, 2 }
 0x118   : > { %5969 = vmatpush3.bf16.msra.mxu1 %v6204_v50  ;;  %6024 = vmatprep.subr.bf16.mxu0 %v6215_v58 }
 0x119   : > { %5970 = vmatprep.subr.bf16.mxu1 %v6209_v38  ;;  %v7336_v48 = vpop.f32.mrf.mxu1 }
 0x11b   : > { %5883 = vmatmul.mubr.bf16.gmra.mxu1 %v6803_v33  ;;  %6025 = vmatpush3.bf16.msra.mxu0 %v6215_v58  ;;  %v6218_v33 = vld [vmem:[%s8007_s2 + $0x1c8] sm:$0xff]   ;;  %v7349_v35 = vpop.f32.mrf.mxu1  ;;  %v3343_v58 = vsel %vm2855_vm10, %v3340_v10, %v3342_v0 }
 0x11c   : > { %5886 = vmatprep.mubr.bf16.mxu1 %v6807_v49  ;;  %5971 = vmatpush3.bf16.msra.mxu1 %v6209_v38  ;;  %v3338_v49 = vrot.slane %v7165_v62, 2  ;;  %v7363_v38 = vld [vmem:[#allocation2 + $0x80] sm:$0xff]  }
 0x11d   : > { %5972 = vmatprep.subr.bf16.mxu1 %v6214_v3  ;;  %6026 = vmatprep.subr.bf16.mxu0 %v6219_v2 }
 0x11e   : > { %5939 = vmatmul.mubr.bf16.gmra.mxu0 %v3335_v44  ;;  %v3339_v29 = vsel %vm2855_vm10, %v3336_v22, %v3338_v49  ;;  %v3341_v62 = vsel %vm2855_vm10, %v3338_v49, %v3340_v10  ;;  %v7367_v22 = vld [vmem:[#allocation2 + $0x88] sm:$0xff]   ;;  %v7385_v10 = vld [vmem:[#allocation2 + $0x90] sm:$0xff]  }
 0x11f   : > { %5942 = vmatprep.mubr.bf16.mxu0 %v3337_v47  ;;  %6027 = vmatpush3.bf16.msra.mxu0 %v6219_v2  ;;  %8059 = vst [vmem:[#allocation24_spill] sm:$0xff] %v7367_v22  ;;  %8063 = vst [vmem:[#allocation28_spill] sm:$0xff] %v7385_v10 }
 0x120   : > { %v7332_v46 = vpop.f32.mrf.mxu0  ;;  %5973 = vmatpush3.bf16.msra.mxu1 %v6214_v3  ;;  %6028 = vmatprep.subr.bf16.mxu0 %v6223_v30 }
 0x121   : > { %5974 = vmatprep.subr.bf16.mxu1 %v6218_v33 }
 0x122   : > { %v7341_v36 = vpop.f32.mrf.mxu0 }
 0x123   : > { %5887 = vmatmul.mubr.bf16.gmra.mxu1 %v6831_v14  ;;  %6029 = vmatpush3.bf16.msra.mxu0 %v6223_v30  ;;  %v3344_v14 = vrot.slane %v7347_v9, 2  ;;  %v3348_v30 = vrot.slane %v7367_v22, 2 }
 0x124   : > { %5890 = vmatprep.mubr.bf16.mxu1 %v6837_v18  ;;  %5975 = vmatpush3.bf16.msra.mxu1 %v6218_v33  ;;  %v7351_v50 = vpop.f32.mrf.mxu0 }
 0x125   : > { %5976 = vmatprep.subr.bf16.mxu1 %v6222_v56  ;;  %v3345_v41 = vsel %vm2855_vm10, %v3342_v0, %v3344_v14 }
 0x126   : > { %5943 = vmatmul.mubr.bf16.gmra.mxu0 %v3339_v29  ;;  %v7357_v18 = vpop.f32.mrf.mxu0 }
 0x127   : > { %5946 = vmatprep.mubr.bf16.mxu0 %v3341_v62  ;;  %v7391_v62 = vld [vmem:[#allocation2 + $0x98] sm:$0xff]  }
 0x128   : > { %5977 = vmatpush3.bf16.msra.mxu1 %v6222_v56  ;;  %8064 = vst [vmem:[#allocation29_spill] sm:$0xff] %v7391_v62  ;;  %v3352_v4 = vrot.slane %v7391_v62, 2 }
 0x129   : > { %v7355_v51 = vpop.f32.mrf.mxu1 }
 0x12b   : > { %5891 = vmatmul.mubr.bf16.gmra.mxu1 %v6844_v11  ;;  %v7360_v37 = vpop.f32.mrf.mxu1  ;;  %v3346_v11 = vrot.slane %v7363_v38, 2 }
 0x12c   : > { %8058 = vst [vmem:[#allocation23_spill] sm:$0xff] %v7360_v37  ;;  %5894 = vmatprep.mubr.bf16.mxu1 %v6851_v34 }
 0x12d   : > { %v7369_v3 = vpop.f32.mrf.mxu1  ;;  %v3347_v49 = vsel %vm2855_vm10, %v3344_v14, %v3346_v11  ;;  %v3349_v29 = vsel %vm2855_vm10, %v3346_v11, %v3348_v30 }
 0x12e   : > { %8060 = vst [vmem:[#allocation25_spill] sm:$0xff] %v7369_v3  ;;  %v7371_v2 = vpop.f32.mrf.mxu0  ;;  %5947 = vmatmul.mubr.bf16.gmra.mxu0 %v3343_v58  ;;  %v8069_v3 = vld [vmem:[#allocation4_spill] sm:$0xff] }
 0x12f   : > { %v7373_v44 = vpop.f32.mrf.mxu1  ;;  %5950 = vmatprep.mubr.bf16.mxu0 %v3345_v41 }
 0x130   : > { %8061 = vst [vmem:[#allocation26_spill] sm:$0xff] %v7373_v44  ;;  %v7376_v47 = vpop.f32.mrf.mxu0  ;;  %v8068_v44 = vld [vmem:[#allocation3_spill] sm:$0xff] }
 0x132   : > { %v7379_v33 = vpop.f32.mrf.mxu0 }
 0x133   : > { %v7381_v34 = vpop.f32.mrf.mxu1  ;;  %5895 = vmatmul.mubr.bf16.gmra.mxu1 %v6862_v17  ;;  %v3350_v17 = vrot.slane %v7385_v10, 2 }
 0x134   : > { %8062 = vst [vmem:[#allocation27_spill] sm:$0xff] %v7381_v34  ;;  %v7387_v56 = vpop.f32.mrf.mxu0  ;;  %5898 = vmatprep.mubr.bf16.mxu1 %v6878_v5 }
 0x135   : > { %v7393_v0 = vpop.f32.mrf.mxu1  ;;  %v3351_v11 = vsel %vm2855_vm10, %v3348_v30, %v3350_v17 }
 0x136   : > { %8065 = vst [vmem:[#allocation30_spill] sm:$0xff] %v7393_v0  ;;  %v5720_v58 = vpop.f32.mrf.mxu0  ;;  %5951 = vmatmul.mubr.bf16.gmra.mxu0 %v3347_v49 }
 0x137   : > { %v7395_v41 = vpop.f32.mrf.mxu1  ;;  %5954 = vmatprep.mubr.bf16.mxu0 %v3349_v29  ;;  %v3353_v29 = vsel %vm2855_vm10, %v3350_v17, %v3352_v4 }
 0x138   : > { %8066 = vst [vmem:[#allocation31_spill] sm:$0xff] %v7395_v41  ;;  %v1721_v14 = vpop.f32.mrf.mxu0 }
 0x139   : > { %v7399_v34 = vpop.f32.mrf.mxu1 }
 0x13a   : > { %8067 = vst [vmem:[#allocation32_spill] sm:$0xff] %v7399_v34  ;;  %v5721_v21 = vpop.f32.mrf.mxu0 }
 0x13b   : > { %v5668_v5 = vpop.f32.mrf.mxu1  ;;  %5899 = vmatmul.mubr.bf16.gmra.mxu1 %v8068_v44  ;;  %v3354_v44 = vrot.slane %v6221_v43, 2  ;;  %v8071_v43 = vld [vmem:[#allocation6_spill] sm:$0xff] }
 0x13c   : > { %v1428_v0 = vadd.f32 %v5668_v5, %v7236_v45  ;;  %v1724_v49 = vpop.f32.mrf.mxu0  ;;  %5902 = vmatprep.mubr.bf16.mxu1 %v8069_v3 }
 0x13d   : > { %v1419_v41 = vpop.f32.mrf.mxu1 }
 0x13e   : > { %v1420_v10 = vadd.f32 %v1419_v41, %v7243_v57  ;;  %v5724_v62 = vpop.f32.mrf.mxu0  ;;  %5955 = vmatmul.mubr.bf16.gmra.mxu0 %v3351_v11  ;;  %v7407_v34 = vadd.f32 %v5720_v58, %v1428_v0  ;;  %v8070_v57 = vld [vmem:[#allocation5_spill] sm:$0xff]  ;;  %v3355_v0 = vsel %vm2855_vm10, %v3352_v4, %v3354_v44 }
 0x13f   : > { %v5669_v52 = vpop.f32.mrf.mxu1  ;;  %5958 = vmatprep.mubr.bf16.mxu0 %v3353_v29 }
 0x140   : > { %v1431_v30 = vadd.f32 %v5669_v52, %v7254_v32  ;;  %v1737_v37 = vpop.f32.mrf.mxu0  ;;  %v7410_v22 = vadd.f32 %v1721_v14, %v1420_v10 }
 0x141   : > { %v1422_v45 = vpop.f32.mrf.mxu1 }
 0x142   : > { %v1423_v3 = vadd.f32 %v1422_v45, %v7267_v60  ;;  %v5725_v5 = vpop.f32.mrf.mxu0  ;;  %v7413_v17 = vadd.f32 %v5721_v21, %v1431_v30 }
 0x143   : > { %v5672_v7 = vpop.f32.mrf.mxu1  ;;  %5903 = vmatmul.mubr.bf16.gmra.mxu1 %v8070_v57  ;;  %v8073_v57 = vld [vmem:[#allocation9_spill] sm:$0xff] }
 0x144   : > { %v1444_v58 = vadd.f32 %v5672_v7, %v7281_v8  ;;  %v1740_v41 = vpop.f32.mrf.mxu0  ;;  %5906 = vmatprep.mubr.bf16.mxu1 %v8071_v43  ;;  %v7419_v52 = vadd.f32 %v1724_v49, %v1423_v3 }
 0x145   : > { %v1435_v32 = vpop.f32.mrf.mxu1 }
 0x146   : > { %v1436_v10 = vadd.f32 %v1435_v32, %v7294_v26  ;;  %v5728_v14 = vpop.f32.mrf.mxu0  ;;  %5959 = vmatmul.mubr.bf16.gmra.mxu0 %v3355_v0  ;;  %v7422_v60 = vadd.f32 %v5724_v62, %v1444_v58  ;;  %v8072_v26 = vld [vmem:[#allocation7_spill] sm:$0xff] }
 0x147   : > { %v5673_v21 = vpop.f32.mrf.mxu1  ;;  %6030 = vmatprep.mubr.bf16.mxu0 %v6998_v6 }
 0x148   : > { %v1447_v11 = vadd.f32 %v5673_v21, %v7307_v24  ;;  %v1753_v4 = vpop.f32.mrf.mxu0  ;;  %v7426_v29 = vadd.f32 %v1737_v37, %v1436_v10  ;;  %v8074_v10 = vld [vmem:[#allocation8_spill] sm:$0xff]  ;;  %v8075_v21 = vld [vmem:[#allocation11_spill] sm:$0xff] }
 0x149   : > { %v1438_v7 = vpop.f32.mrf.mxu1 }
 0x14a   : > { %v1439_v8 = vadd.f32 %v1438_v7, %v7320_v12  ;;  %v5729_v49 = vpop.f32.mrf.mxu0  ;;  %v7429_v44 = vadd.f32 %v5725_v5, %v1447_v11 }
 0x14b   : > { %v5676_v30 = vpop.f32.mrf.mxu1  ;;  %5907 = vmatmul.mubr.bf16.gmra.mxu1 %v8072_v26 }
 0x14c   : > { %v1460_v62 = vadd.f32 %v5676_v30, %v7332_v46  ;;  %v1756_v45 = vpop.f32.mrf.mxu0  ;;  %5978 = vmatprep.mubr.bf16.mxu1 %v7028_v16  ;;  %v7434_v6 = vadd.f32 %v1740_v41, %v1439_v8  ;;  %v8076_v8 = vld [vmem:[#allocation10_spill] sm:$0xff] }
 0x14d   : > { %v1451_v24 = vpop.f32.mrf.mxu1 }
 0x14e   : > { %v1452_v37 = vadd.f32 %v1451_v24, %v7341_v36  ;;  %v5732_v3 = vpop.f32.mrf.mxu0  ;;  %6031 = vmatmul.mubr.bf16.vlgmr.msra.gmra.mxu0 %v7002_v13  ;;  %v7438_v12 = vadd.f32 %v5728_v14, %v1460_v62 }
 0x14f   : > { %v5677_v5 = vpop.f32.mrf.mxu1  ;;  %6034 = vmatprep.mubr.bf16.mxu0 %v8073_v57 }
 0x150   : > { %v1463_v0 = vadd.f32 %v5677_v5, %v7351_v50  ;;  %v1769_v58 = vpop.f32.mrf.mxu0  ;;  %v7442_v46 = vadd.f32 %v1753_v4, %v1452_v37  ;;  %v8077_v5 = vld [vmem:[#allocation12_spill] sm:$0xff] }
 0x151   : > { %v1454_v43 = vpop.f32.mrf.mxu1 }
 0x152   : > { %v1455_v16 = vadd.f32 %v1454_v43, %v7357_v18  ;;  %v5733_v41 = vpop.f32.mrf.mxu0  ;;  %v7445_v32 = vadd.f32 %v5729_v49, %v1463_v0  ;;  %v8078_v43 = vld [vmem:[#allocation13_spill] sm:$0xff] }
 0x153   : > { %v5680_v36 = vpop.f32.mrf.mxu1  ;;  %5979 = vmatmul.mubr.bf16.vlgmr.msra.gmra.mxu1 %v8074_v10 }
 0x154   : > { %v1476_v13 = vadd.f32 %v5680_v36, %v7371_v2  ;;  %v1772_v14 = vpop.f32.mrf.mxu0  ;;  %5982 = vmatprep.mubr.bf16.mxu1 %v8075_v21  ;;  %v7450_v11 = vadd.f32 %v1756_v45, %v1455_v16  ;;  %v8079_v21 = vld [vmem:[#allocation14_spill] sm:$0xff] }
 0x155   : > { %v1467_v50 = vpop.f32.mrf.mxu1 }
 0x156   : > { %v1468_v4 = vadd.f32 %v1467_v50, %v7376_v47  ;;  %v5736_v7 = vpop.f32.mrf.mxu0  ;;  %6035 = vmatmul.mubr.bf16.gmra.mxu0 %v8076_v8  ;;  %v7454_v18 = vadd.f32 %v5732_v3, %v1476_v13 }
 0x157   : > { %v5681_v49 = vpop.f32.mrf.mxu1  ;;  %6038 = vmatprep.mubr.bf16.mxu0 %v7106_v54 }
 0x158   : > { %v1479_v30 = vadd.f32 %v5681_v49, %v7379_v33  ;;  %v1785_v26 = vpop.f32.mrf.mxu0  ;;  %v7458_v2 = vadd.f32 %v1769_v58, %v1468_v4 }
 0x159   : > { %v1470_v62 = vpop.f32.mrf.mxu1 }
 0x15a   : > { %v1471_v45 = vadd.f32 %v1470_v62, %v7387_v56  ;;  %v5737_v24 = vpop.f32.mrf.mxu0  ;;  %v7461_v37 = vadd.f32 %v5733_v41, %v1479_v30  ;;  %v8081_v30 = vld [vmem:[#allocation15_spill] sm:$0xff] }
 0x15b   : > { %v5684_v47 = vpop.f32.mrf.mxu1  ;;  %5983 = vmatmul.mubr.bf16.gmra.mxu1 %v8077_v5 }
 0x15c   : > { %v1492_v3 = vadd.f32 %v5684_v47, %v7222_v59  ;;  %v1788_v57 = vpop.f32.mrf.mxu0  ;;  %5986 = vmatprep.mubr.bf16.mxu1 %v7126_v23  ;;  %v7466_v54 = vadd.f32 %v1772_v14, %v1471_v45 }
 0x15d   : > { %v1483_v33 = vpop.f32.mrf.mxu1 }
 0x15e   : > { %v1484_v0 = vadd.f32 %v1483_v33, %v7233_v61  ;;  %v5740_v58 = vpop.f32.mrf.mxu0  ;;  %6039 = vmatmul.mubr.bf16.gmra.mxu0 %v8078_v43  ;;  %v7470_v56 = vadd.f32 %v5736_v7, %v1492_v3  ;;  %v8080_v7 = vld [vmem:[#allocation16_spill] sm:$0xff]  ;;  %v3777_v43 = vshll.u32 %v7347_v9, 16 }
 0x15f   : > { %v5685_v16 = vpop.f32.mrf.mxu1  ;;  %6042 = vmatprep.mubr.bf16.mxu0 %v7143_v55 }
 0x160   : > { %v1495_v41 = vadd.f32 %v5685_v16, %v7240_v53  ;;  %v1801_v36 = vpop.f32.mrf.mxu0  ;;  %v7474_v59 = vadd.f32 %v1785_v26, %v1484_v0 }
 0x161   : > { %v1486_v10 = vpop.f32.mrf.mxu1 }
 0x162   : > { %v1487_v23 = vadd.f32 %v1486_v10, %v7250_v28  ;;  %v5741_v13 = vpop.f32.mrf.mxu0  ;;  %v7477_v14 = vadd.f32 %v5737_v24, %v1495_v41  ;;  %v4153_v10 = vrot.slane %v7347_v9, 3 }
 0x163   : > { %v5688_v61 = vpop.f32.mrf.mxu1  ;;  %5987 = vmatmul.mubr.bf16.gmra.mxu1 %v8079_v21  ;;  %v3779_v21 = vrot.slane %v3777_v43, 3 }
 0x164   : > { %v1508_v50 = vadd.f32 %v5688_v61, %v7260_v25  ;;  %v1804_v4 = vpop.f32.mrf.mxu0  ;;  %5990 = vmatprep.mubr.bf16.mxu1 %v8080_v7  ;;  %v7482_v55 = vadd.f32 %v1788_v57, %v1487_v23  ;;  %v8082_v57 = vld [vmem:[#allocation17_spill] sm:$0xff]  ;;  %v8083_v7 = vld [vmem:[#allocation19_spill] sm:$0xff] }
 0x165   : > { %v1499_v53 = vpop.f32.mrf.mxu1 }
 0x166   : > { %v1500_v8 = vadd.f32 %v1499_v53, %v7275_v42  ;;  %v5744_v49 = vpop.f32.mrf.mxu0  ;;  %6043 = vmatmul.mubr.bf16.gmra.mxu0 %v8081_v30  ;;  %v7486_v28 = vadd.f32 %v5740_v58, %v1508_v50  ;;  %v3774_v58 = vshrl.u32 %v7347_v9, 16  ;;  %v8084_v9 = vld [vmem:[#allocation18_spill] sm:$0xff]  ;;  %v3786_v30 = vshll.u32 %v7363_v38, 16 }
 0x167   : > { %v5689_v26 = vpop.f32.mrf.mxu1  ;;  %6046 = vmatprep.mubr.bf16.mxu0 %v7177_v20 }
 0x168   : > { %v1511_v62 = vadd.f32 %v5689_v26, %v7284_v15  ;;  %v1817_v45 = vpop.f32.mrf.mxu0  ;;  %v7490_v25 = vadd.f32 %v1801_v36, %v1500_v8  ;;  %v3776_v61 = vrot.slane %v3774_v58, 2  ;;  %v8085_v8 = vrot.slane %v8084_v9, 3 }
 0x169   : > { %v1502_v24 = vpop.f32.mrf.mxu1 }
 0x16a   : > { %v1503_v47 = vadd.f32 %v1502_v24, %v7301_v39  ;;  %v5745_v5 = vpop.f32.mrf.mxu0  ;;  %v7493_v3 = vadd.f32 %v5741_v13, %v1511_v62  ;;  %v3780_v62 = vor.u32 %v3779_v21, %v3776_v61  ;;  %v8090_v21 = vld [vmem:[#allocation21_spill] sm:$0xff] }
 0x16b   : > { %v5692_v42 = vpop.f32.mrf.mxu1  ;;  %5991 = vmatmul.mubr.bf16.gmra.mxu1 %v8082_v57  ;;  %v8088_v57 = vld [vmem:[#allocation20_spill] sm:$0xff] }
 0x16c   : > { %v1524_v33 = vadd.f32 %v5692_v42, %v7310_v63  ;;  %v1820_v0 = vpop.f32.mrf.mxu0  ;;  %5994 = vmatprep.mubr.bf16.mxu1 %v7191_v19  ;;  %v7498_v20 = vadd.f32 %v1804_v4, %v1503_v47 }
 0x16d   : > { %v1515_v15 = vpop.f32.mrf.mxu1 }
 0x16e   : > { %v1516_v39 = vadd.f32 %v1515_v15, %v7327_v31  ;;  %v5748_v16 = vpop.f32.mrf.mxu0  ;;  %6047 = vmatmul.mubr.bf16.gmra.mxu0 %v7181_v40  ;;  %v7504_v41 = vadd.f32 %v5744_v49, %v1524_v33  ;;  %v4154_v49 = vsel %vm4127_vm12, %v8085_v8, %v4153_v10  ;;  %v4155_v15 = vrot.slane %v7363_v38, 3 }
 0x16f   : > { %v5693_v36 = vpop.f32.mrf.mxu1  ;;  %6050 = vmatprep.mubr.bf16.mxu0 %v7209_v27  ;;  %v3783_v27 = vshrl.u32 %v7363_v38, 16 }
 0x170   : > { %v1527_v63 = vadd.f32 %v5693_v36, %v7336_v48  ;;  %v1833_v19 = vpop.f32.mrf.mxu0  ;;  %v7509_v23 = vadd.f32 %v1817_v45, %v1516_v39  ;;  %v8086_v45 = vld [vmem:[#allocation24_spill] sm:$0xff]  ;;  %v3788_v36 = vrot.slane %v3786_v30, 3 }
 0x171   : > { %v1518_v13 = vpop.f32.mrf.mxu1  ;;  %v3792_v24 = vshrl.u32 %v8086_v45, 16  ;;  %v3795_v47 = vshll.u32 %v8086_v45, 16  ;;  %v3785_v58 = vrot.slane %v3783_v27, 2  ;;  %v8092_v27 = vld [vmem:[#allocation22_spill] sm:$0xff]  ;;  %v8093_v30 = vld [vmem:[#allocation28_spill] sm:$0xff] }
 0x172   : > { %v1519_v31 = vadd.f32 %v1518_v13, %v7349_v35  ;;  %v5749_v50 = vpop.f32.mrf.mxu0  ;;  %v7512_v4 = vadd.f32 %v5745_v5, %v1527_v63  ;;  %v8087_v5 = vld [vmem:[#allocation23_spill] sm:$0xff]  ;;  %v4157_v63 = vrot.slane %v8086_v45, 3 }
 0x173   : > { %v5696_v40 = vpop.f32.mrf.mxu1  ;;  %5995 = vmatmul.mubr.bf16.gmra.mxu1 %v8083_v7  ;;  %v8091_v7 = vld [vmem:[#allocation26_spill] sm:$0xff]  ;;  %v8094_v45 = vld [vmem:[#allocation27_spill] sm:$0xff] }
 0x174   : > { %v1540_v48 = vadd.f32 %v5696_v40, %v7355_v51  ;;  %v1836_v53 = vpop.f32.mrf.mxu0  ;;  %5998 = vmatprep.mubr.bf16.mxu1 %v7225_v1  ;;  %v7522_v35 = vadd.f32 %v1820_v0, %v1519_v31  ;;  %v8089_v0 = vld [vmem:[#allocation25_spill] sm:$0xff]  ;;  %v3781_v31 = vsel %vm3656_vm13, %v8090_v21, %v3780_v62  ;;  %v3794_v40 = vrot.slane %v3792_v24, 2 }
 0x175   : > { %v1531_v26 = vpop.f32.mrf.mxu1  ;;  %v3789_v24 = vor.u32 %v3788_v36, %v3785_v58  ;;  %v4159_v58 = vrot.slane %v8093_v30, 3 }
 0x176   : > { %v1532_v42 = vadd.f32 %v1531_v26, %v8087_v5  ;;  %v5752_v51 = vpop.f32.mrf.mxu0  ;;  %6051 = vmatmul.mubr.bf16.gmra.mxu0 %v8088_v57  ;;  %v7528_v1 = vadd.f32 %v5748_v16, %v1540_v48  ;;  %v3797_v16 = vrot.slane %v3795_v47, 3  ;;  %v3801_v26 = vshrl.u32 %v8093_v30, 16 }
 0x177   : > { %v5697_v33 = vpop.f32.mrf.mxu1  ;;  %6054 = vmatprep.mubr.bf16.mxu0 %v4154_v49  ;;  %v4156_v49 = vsel %vm4127_vm12, %v4153_v10, %v4155_v15  ;;  %v4158_v47 = vsel %vm4127_vm12, %v4155_v15, %v4157_v63  ;;  %v8097_v10 = vld [vmem:[#allocation30_spill] sm:$0xff] }
 0x178   : > { %v1543_v43 = vadd.f32 %v5697_v33, %v8089_v0  ;;  %v1849_v39 = vpop.f32.mrf.mxu0  ;;  %v7533_v13 = vadd.f32 %v1833_v19, %v1532_v42  ;;  %v3804_v19 = vshll.u32 %v8093_v30, 16  ;;  %v3798_v33 = vor.u32 %v3797_v16, %v3794_v40  ;;  %v8096_v0 = vld [vmem:[#allocation29_spill] sm:$0xff] }
 0x179   : > { %v1534_v61 = vpop.f32.mrf.mxu1  ;;  %v3803_v36 = vrot.slane %v3801_v26, 2  ;;  %v3790_v16 = vsel %vm3656_vm13, %v3780_v62, %v3789_v24 }
 0x17a   : > { %v1535_v48 = vadd.f32 %v1534_v61, %v8091_v7  ;;  %v5753_v9 = vpop.f32.mrf.mxu0  ;;  %v7538_v8 = vadd.f32 %v5749_v50, %v1543_v43  ;;  %v3810_v43 = vshrl.u32 %v8096_v0, 16  ;;  %v3813_v61 = vshll.u32 %v8096_v0, 16 }
 0x17b   : > { %v5700_v38 = vpop.f32.mrf.mxu1  ;;  %5999 = vmatmul.mubr.bf16.gmra.mxu1 %v8092_v27  ;;  %v3806_v15 = vrot.slane %v3804_v19, 3 }
 0x17c   : > { %v1556_v5 = vadd.f32 %v5700_v38, %v8094_v45  ;;  %v1852_v42 = vpop.f32.mrf.mxu0  ;;  %6002 = vmatprep.mubr.bf16.mxu1 %v3781_v31  ;;  %v7546_v57 = vadd.f32 %v1836_v53, %v1535_v48  ;;  %v6225_v53 = vld [vmem:[#allocation2 + $0xa0] ss:$0 sps:$4 sm:$0x77]   ;;  %v8098_v31 = vld [vmem:[#allocation31_spill] sm:$0xff]  ;;  %v4161_v45 = vrot.slane %v8096_v0, 3 }
 0x17d   : > { %v1547_v50 = vpop.f32.mrf.mxu1  ;;  %v3819_v62 = vshrl.u32 %v6225_v53, 16 }
 0x17e   : > { %8095 = vst [vmem:[#allocation3_spill] sm:$0xff] %v7546_v57  ;;  %v1548_v21 = vadd.f32 %v1547_v50, %v8097_v10  ;;  %v5824_v7 = vpop.f32.mrf.mxu0  ;;  %6055 = vmatmul.mubr.bf16.gmra.mxu0 %v4156_v49  ;;  %v7551_v27 = vadd.f32 %v5752_v51, %v1556_v5  ;;  %v3799_v51 = vsel %vm3656_vm13, %v3789_v24, %v3798_v33  ;;  %v3812_v49 = vrot.slane %v3810_v43, 2 }
 0x17f   : > { %v5701_v38 = vpop.f32.mrf.mxu1  ;;  %6058 = vmatprep.mubr.bf16.mxu0 %v4158_v47  ;;  %v3815_v5 = vrot.slane %v3813_v61, 3  ;;  %v8099_v47 = vld [vmem:[#allocation32_spill] sm:$0xff]  ;;  %v3822_v24 = vshll.u32 %v6225_v53, 16 }
 0x180   : > { %v1559_v48 = vadd.f32 %v5701_v38, %v8098_v31  ;;  %v2655_v40 = vpop.f32.mrf.mxu0  ;;  %v7557_v57 = vadd.f32 %v1849_v39, %v1548_v21  ;;  %v4160_v38 = vsel %vm4127_vm12, %v4157_v63, %v4159_v58  ;;  %v3807_v31 = vor.u32 %v3806_v15, %v3803_v36 }
 0x181   : > { %v1550_v50 = vpop.f32.mrf.mxu1  ;;  %v4162_v21 = vsel %vm4127_vm12, %v4159_v58, %v4161_v45  ;;  %v3821_v58 = vrot.slane %v3819_v62, 2 }
 0x182   : > { %v1551_v10 = vadd.f32 %v1550_v50, %v8099_v47  ;;  %v5825_v30 = vpop.f32.mrf.mxu0  ;;  %v7561_v26 = vadd.f32 %v5753_v9, %v1559_v48  ;;  %v3816_v50 = vor.u32 %v3815_v5, %v3812_v49  ;;  %v3808_v36 = vsel %vm3656_vm13, %v3798_v33, %v3807_v31 }
 0x183   : > { %v5772_v19 = vpop.f32.mrf.mxu1  ;;  %6003 = vmatmul.mubr.bf16.gmra.mxu1 %v3790_v16  ;;  %v3824_v47 = vrot.slane %v3822_v24, 3 }
 0x184   : > { %v2329_v0 = vadd.f32 %v5772_v19, %v7407_v34  ;;  %v2658_v39 = vpop.f32.mrf.mxu0  ;;  %6006 = vmatprep.mubr.bf16.mxu1 %v3799_v51  ;;  %v7566_v43 = vadd.f32 %v1852_v42, %v1551_v10  ;;  %v4163_v34 = vrot.slane %v6225_v53, 3  ;;  %v3817_v49 = vsel %vm3656_vm13, %v3807_v31, %v3816_v50 }
 0x185   : > { %v2184_v61 = vpop.f32.mrf.mxu1 }
 0x186   : > { %v2327_v9 = vadd.f32 %v2184_v61, %v7410_v22  ;;  %v5828_v48 = vpop.f32.mrf.mxu0  ;;  %6059 = vmatmul.mubr.bf16.gmra.mxu0 %v4160_v38  ;;  %v7569_v16 = vadd.f32 %v5824_v7, %v2329_v0  ;;  %v4164_v33 = vsel %vm4127_vm12, %v4161_v45, %v4163_v34  ;;  %v3825_v38 = vor.u32 %v3824_v47, %v3821_v58 }
 0x187   : > { %v5773_v63 = vpop.f32.mrf.mxu1  ;;  %6062 = vmatprep.mubr.bf16.mxu0 %v4162_v21 }
 0x188   : > { %v2330_v15 = vadd.f32 %v5773_v63, %v7413_v17  ;;  %v2671_v51 = vpop.f32.mrf.mxu0  ;;  %v7573_v42 = vadd.f32 %v2655_v40, %v2327_v9  ;;  %v3826_v45 = vsel %vm3656_vm13, %v3816_v50, %v3825_v38 }
 0x189   : > { %v2187_v10 = vpop.f32.mrf.mxu1 }
 0x18a   : > { %v2328_v22 = vadd.f32 %v2187_v10, %v7419_v52  ;;  %v5829_v5 = vpop.f32.mrf.mxu0  ;;  %v7577_v7 = vadd.f32 %v5825_v30, %v2330_v15 }
 0x18b   : > { %v5776_v19 = vpop.f32.mrf.mxu1  ;;  %6007 = vmatmul.mubr.bf16.gmra.mxu1 %v3808_v36 }
 0x18c   : > { %v2333_v53 = vadd.f32 %v5776_v19, %v7422_v60  ;;  %v2674_v17 = vpop.f32.mrf.mxu0  ;;  %6010 = vmatprep.mubr.bf16.mxu1 %v3817_v49  ;;  %v7581_v62 = vadd.f32 %v2658_v39, %v2328_v22 }
 0x18d   : > { %v2200_v40 = vpop.f32.mrf.mxu1 }
 0x18e   : > { %v2331_v0 = vadd.f32 %v2200_v40, %v7426_v29  ;;  %v5832_v31 = vpop.f32.mrf.mxu0  ;;  %6063 = vmatmul.mubr.bf16.gmra.mxu0 %v4164_v33  ;;  %v7584_v52 = vadd.f32 %v5828_v48, %v2333_v53 }
 0x18f   : > { %v5777_v30 = vpop.f32.mrf.mxu1 }
 0x190   : > { %v2334_v21 = vadd.f32 %v5777_v30, %v7429_v44  ;;  %v2687_v24 = vpop.f32.mrf.mxu0  ;;  %v7588_v61 = vadd.f32 %v2671_v51, %v2331_v0 }
 0x191   : > { %v2203_v60 = vpop.f32.mrf.mxu1 }
 0x192   : > { %v2332_v9 = vadd.f32 %v2203_v60, %v7434_v6  ;;  %v5833_v39 = vpop.f32.mrf.mxu0  ;;  %v7591_v63 = vadd.f32 %v5829_v5, %v2334_v21 }
 0x193   : > { %v5780_v36 = vpop.f32.mrf.mxu1  ;;  %6011 = vmatmul.mubr.bf16.gmra.mxu1 %v3826_v45 }
 0x194   : > { %v2337_v29 = vadd.f32 %v5780_v36, %v7438_v12  ;;  %v2690_v48 = vpop.f32.mrf.mxu0  ;;  %v7594_v34 = vadd.f32 %v2674_v17, %v2332_v9 }
 0x195   : > { %v2216_v15 = vpop.f32.mrf.mxu1 }
 0x196   : > { %v2335_v44 = vadd.f32 %v2216_v15, %v7442_v46  ;;  %v5836_v58 = vpop.f32.mrf.mxu0  ;;  %v7597_v50 = vadd.f32 %v5832_v31, %v2337_v29 }
 0x197   : > { %v5781_v51 = vpop.f32.mrf.mxu1 }
 0x198   : > { %v2338_v47 = vadd.f32 %v5781_v51, %v7445_v32  ;;  %v2703_v6 = vpop.f32.mrf.mxu0  ;;  %v7600_v10 = vadd.f32 %v2687_v24, %v2335_v44 }
 0x199   : > { %v2219_v49 = vpop.f32.mrf.mxu1 }
 0x19a   : > { %v2336_v22 = vadd.f32 %v2219_v49, %v7450_v11  ;;  %v5837_v5 = vpop.f32.mrf.mxu0  ;;  %v7603_v12 = vadd.f32 %v5833_v39, %v2338_v47 }
 0x19b   : > { %v5784_v19 = vpop.f32.mrf.mxu1 }
 0x19c   : > { %v2341_v33 = vadd.f32 %v5784_v19, %v7454_v18  ;;  %v2706_v53 = vpop.f32.mrf.mxu0  ;;  %v7606_v46 = vadd.f32 %v2690_v48, %v2336_v22 }
 0x19d   : > { %v2232_v17 = vpop.f32.mrf.mxu1 }
 0x19e   : > { %v2339_v38 = vadd.f32 %v2232_v17, %v7458_v2  ;;  %v5840_v40 = vpop.f32.mrf.mxu0  ;;  %v7609_v32 = vadd.f32 %v5836_v58, %v2341_v33 }
 0x19f   : > { %v5785_v0 = vpop.f32.mrf.mxu1 }
 0x1a0   : > { %v2342_v31 = vadd.f32 %v5785_v0, %v7461_v37  ;;  %v2719_v30 = vpop.f32.mrf.mxu0  ;;  %v7612_v11 = vadd.f32 %v2703_v6, %v2339_v38 }
 0x1a1   : > { %v2235_v21 = vpop.f32.mrf.mxu1 }
 0x1a2   : > { %v2340_v24 = vadd.f32 %v2235_v21, %v7466_v54  ;;  %v5841_v45 = vpop.f32.mrf.mxu0  ;;  %v7615_v18 = vadd.f32 %v5837_v5, %v2342_v31 }
 0x1a3   : > { %v5788_v60 = vpop.f32.mrf.mxu1 }
 0x1a4   : > { %v2345_v9 = vadd.f32 %v5788_v60, %v7470_v56  ;;  %v2722_v39 = vpop.f32.mrf.mxu0  ;;  %v7618_v2 = vadd.f32 %v2706_v53, %v2340_v24 }
 0x1a5   : > { %v2248_v36 = vpop.f32.mrf.mxu1 }
 0x1a6   : > { %v2343_v29 = vadd.f32 %v2248_v36, %v7474_v59  ;;  %v5844_v48 = vpop.f32.mrf.mxu0  ;;  %v7621_v37 = vadd.f32 %v5840_v40, %v2345_v9 }
 0x1a7   : > { %v5789_v15 = vpop.f32.mrf.mxu1 }
 0x1a8   : > { %v2346_v44 = vadd.f32 %v5789_v15, %v7477_v14  ;;  %v2735_v58 = vpop.f32.mrf.mxu0  ;;  %v7624_v54 = vadd.f32 %v2719_v30, %v2343_v29 }
 0x1a9   : > { %v2251_v51 = vpop.f32.mrf.mxu1 }
 0x1aa   : > { %v2344_v47 = vadd.f32 %v2251_v51, %v7482_v55  ;;  %v5845_v6 = vpop.f32.mrf.mxu0  ;;  %v7627_v56 = vadd.f32 %v5841_v45, %v2346_v44 }
 0x1ab   : > { %v5792_v49 = vpop.f32.mrf.mxu1 }
 0x1ac   : > { %v2349_v22 = vadd.f32 %v5792_v49, %v7486_v28  ;;  %v2738_v5 = vpop.f32.mrf.mxu0  ;;  %v7630_v59 = vadd.f32 %v2722_v39, %v2344_v47 }
 0x1ad   : > { %v2264_v19 = vpop.f32.mrf.mxu1 }
 0x1ae   : > { %v2347_v33 = vadd.f32 %v2264_v19, %v7490_v25  ;;  %v5848_v53 = vpop.f32.mrf.mxu0  ;;  %v7633_v14 = vadd.f32 %v5844_v48, %v2349_v22 }
 0x1af   : > { %v5793_v17 = vpop.f32.mrf.mxu1 }
 0x1b0   : > { %v2350_v38 = vadd.f32 %v5793_v17, %v7493_v3  ;;  %v2751_v40 = vpop.f32.mrf.mxu0  ;;  %v7636_v55 = vadd.f32 %v2735_v58, %v2347_v33 }
 0x1b1   : > { %v2267_v0 = vpop.f32.mrf.mxu1 }
 0x1b2   : > { %v2348_v31 = vadd.f32 %v2267_v0, %v7498_v20  ;;  %v5849_v30 = vpop.f32.mrf.mxu0  ;;  %v7639_v28 = vadd.f32 %v5845_v6, %v2350_v38  ;;  %v8100_v38 = vld [vmem:[#allocation3_spill] sm:$0xff] }
 0x1b3   : > { %v5796_v21 = vpop.f32.mrf.mxu1 }
 0x1b4   : > { %v2353_v24 = vadd.f32 %v5796_v21, %v7504_v41  ;;  %v2754_v45 = vpop.f32.mrf.mxu0  ;;  %v7642_v25 = vadd.f32 %v2738_v5, %v2348_v31 }
 0x1b5   : > { %v2280_v60 = vpop.f32.mrf.mxu1 }
 0x1b6   : > { %v2351_v9 = vadd.f32 %v2280_v60, %v7509_v23  ;;  %v5852_v39 = vpop.f32.mrf.mxu0  ;;  %v7645_v3 = vadd.f32 %v5848_v53, %v2353_v24 }
 0x1b7   : > { %v5797_v36 = vpop.f32.mrf.mxu1 }
 0x1b8   : > { %v2354_v29 = vadd.f32 %v5797_v36, %v7512_v4  ;;  %v2767_v48 = vpop.f32.mrf.mxu0  ;;  %v7648_v20 = vadd.f32 %v2751_v40, %v2351_v9 }
 0x1b9   : > { %v2283_v15 = vpop.f32.mrf.mxu1 }
 0x1ba   : > { %v2352_v44 = vadd.f32 %v2283_v15, %v7522_v35  ;;  %v5853_v58 = vpop.f32.mrf.mxu0  ;;  %v7651_v41 = vadd.f32 %v5849_v30, %v2354_v29 }
 0x1bb   : > { %v5800_v51 = vpop.f32.mrf.mxu1 }
 0x1bc   : > { %v2357_v47 = vadd.f32 %v5800_v51, %v7528_v1  ;;  %v2770_v6 = vpop.f32.mrf.mxu0  ;;  %v7654_v23 = vadd.f32 %v2754_v45, %v2352_v44 }
 0x1bd   : > { %v2296_v49 = vpop.f32.mrf.mxu1 }
 0x1be   : > { %v2355_v22 = vadd.f32 %v2296_v49, %v7533_v13  ;;  %v5856_v5 = vpop.f32.mrf.mxu0  ;;  %v7657_v4 = vadd.f32 %v5852_v39, %v2357_v47 }
 0x1bf   : > { %v5801_v19 = vpop.f32.mrf.mxu1 }
 0x1c0   : > { %v2358_v33 = vadd.f32 %v5801_v19, %v7538_v8  ;;  %v2783_v53 = vpop.f32.mrf.mxu0  ;;  %v7660_v35 = vadd.f32 %v2767_v48, %v2355_v22 }
 0x1c1   : > { %v2299_v17 = vpop.f32.mrf.mxu1 }
 0x1c2   : > { %v2356_v40 = vadd.f32 %v2299_v17, %v8100_v38  ;;  %v5857_v0 = vpop.f32.mrf.mxu0  ;;  %v7663_v1 = vadd.f32 %v5853_v58, %v2358_v33 }
 0x1c3   : > { %v5804_v31 = vpop.f32.mrf.mxu1 }
 0x1c4   : > { %v2361_v30 = vadd.f32 %v5804_v31, %v7551_v27  ;;  %v2786_v21 = vpop.f32.mrf.mxu0  ;;  %v7666_v13 = vadd.f32 %v2770_v6, %v2356_v40 }
 0x1c5   : > { %v2312_v24 = vpop.f32.mrf.mxu1 }
 0x1c6   : > { %v2359_v45 = vadd.f32 %v2312_v24, %v7557_v57  ;;  %v5928_v60 = vpop.f32.mrf.mxu0  ;;  %v7669_v8 = vadd.f32 %v5856_v5, %v2361_v30 }
 0x1c7   : > { %v5805_v9 = vpop.f32.mrf.mxu1 }
 0x1c8   : > { %v2362_v39 = vadd.f32 %v5805_v9, %v7561_v26  ;;  %v3456_v36 = vpop.f32.mrf.mxu0  ;;  %v7672_v29 = vadd.f32 %v2783_v53, %v2359_v45 }
 0x1c9   : > { %v2315_v48 = vpop.f32.mrf.mxu1 }
 0x1ca   : > { %v2360_v15 = vadd.f32 %v2315_v48, %v7566_v43  ;;  %v5929_v44 = vpop.f32.mrf.mxu0  ;;  %v7675_v27 = vadd.f32 %v5857_v0, %v2362_v39 }
 0x1cb   : > { %v5876_v58 = vpop.f32.mrf.mxu1 }
 0x1cc   : > { %v3138_v51 = vadd.f32 %v5876_v58, %v7569_v16  ;;  %v3459_v47 = vpop.f32.mrf.mxu0  ;;  %v7678_v57 = vadd.f32 %v2786_v21, %v2360_v15 }
 0x1cd   : > { %v2993_v6 = vpop.f32.mrf.mxu1 }
 0x1ce   : > { %v3136_v49 = vadd.f32 %v2993_v6, %v7573_v42  ;;  %v5932_v22 = vpop.f32.mrf.mxu0  ;;  %v7681_v26 = vadd.f32 %v5928_v60, %v3138_v51 }
 0x1cf   : > { %v5877_v5 = vpop.f32.mrf.mxu1 }
 0x1d0   : > { %v3139_v19 = vadd.f32 %v5877_v5, %v7577_v7  ;;  %v3472_v33 = vpop.f32.mrf.mxu0  ;;  %v7684_v43 = vadd.f32 %v3456_v36, %v3136_v49 }
 0x1d1   : > { %v2996_v53 = vpop.f32.mrf.mxu1 }
 0x1d2   : > { %v3137_v17 = vadd.f32 %v2996_v53, %v7581_v62  ;;  %v5933_v38 = vpop.f32.mrf.mxu0  ;;  %v7687_v16 = vadd.f32 %v5929_v44, %v3139_v19 }
 0x1d3   : > { %v5880_v40 = vpop.f32.mrf.mxu1 }
 0x1d4   : > { %v3142_v0 = vadd.f32 %v5880_v40, %v7584_v52  ;;  %v3475_v31 = vpop.f32.mrf.mxu0  ;;  %v7690_v42 = vadd.f32 %v3459_v47, %v3137_v17 }
 0x1d5   : > { %v3009_v30 = vpop.f32.mrf.mxu1 }
 0x1d6   : > { %v3140_v21 = vadd.f32 %v3009_v30, %v7588_v61  ;;  %v5936_v24 = vpop.f32.mrf.mxu0  ;;  %v7693_v7 = vadd.f32 %v5932_v22, %v3142_v0 }
 0x1d7   : > { %v5881_v45 = vpop.f32.mrf.mxu1 }
 0x1d8   : > { %v3143_v60 = vadd.f32 %v5881_v45, %v7591_v63  ;;  %v3488_v9 = vpop.f32.mrf.mxu0  ;;  %v7696_v62 = vadd.f32 %v3472_v33, %v3140_v21 }
 0x1d9   : > { %v3012_v39 = vpop.f32.mrf.mxu1 }
 0x1da   : > { %v3141_v36 = vadd.f32 %v3012_v39, %v7594_v34  ;;  %v5937_v48 = vpop.f32.mrf.mxu0  ;;  %v7699_v52 = vadd.f32 %v5933_v38, %v3143_v60 }
 0x1db   : > { %v5884_v15 = vpop.f32.mrf.mxu1 }
 0x1dc   : > { %v3146_v44 = vadd.f32 %v5884_v15, %v7597_v50  ;;  %v3491_v58 = vpop.f32.mrf.mxu0  ;;  %v7702_v61 = vadd.f32 %v3475_v31, %v3141_v36 }
 0x1dd   : > { %v3025_v51 = vpop.f32.mrf.mxu1 }
 0x1de   : > { %v3144_v47 = vadd.f32 %v3025_v51, %v7600_v10  ;;  %v5940_v6 = vpop.f32.mrf.mxu0  ;;  %v7705_v63 = vadd.f32 %v5936_v24, %v3146_v44 }
 0x1df   : > { %v5885_v49 = vpop.f32.mrf.mxu1 }
 0x1e0   : > { %v3147_v22 = vadd.f32 %v5885_v49, %v7603_v12  ;;  %v3504_v5 = vpop.f32.mrf.mxu0  ;;  %v7708_v34 = vadd.f32 %v3488_v9, %v3144_v47 }
 0x1e1   : > { %v3028_v19 = vpop.f32.mrf.mxu1 }
 0x1e2   : > { %v3145_v33 = vadd.f32 %v3028_v19, %v7606_v46  ;;  %v5941_v53 = vpop.f32.mrf.mxu0  ;;  %v7711_v50 = vadd.f32 %v5937_v48, %v3147_v22 }
 0x1e3   : > { %v5888_v17 = vpop.f32.mrf.mxu1 }
 0x1e4   : > { %v3150_v38 = vadd.f32 %v5888_v17, %v7609_v32  ;;  %v3507_v40 = vpop.f32.mrf.mxu0  ;;  %v7714_v10 = vadd.f32 %v3491_v58, %v3145_v33 }
 0x1e5   : > { %v3041_v0 = vpop.f32.mrf.mxu1 }
 0x1e6   : > { %v3148_v31 = vadd.f32 %v3041_v0, %v7612_v11  ;;  %v5944_v30 = vpop.f32.mrf.mxu0  ;;  %v7717_v12 = vadd.f32 %v5940_v6, %v3150_v38 }
 0x1e7   : > { %v5889_v21 = vpop.f32.mrf.mxu1 }
 0x1e8   : > { %v3151_v24 = vadd.f32 %v5889_v21, %v7615_v18  ;;  %v3520_v45 = vpop.f32.mrf.mxu0  ;;  %v7720_v46 = vadd.f32 %v3504_v5, %v3148_v31 }
 0x1e9   : > { %v3044_v60 = vpop.f32.mrf.mxu1 }
 0x1ea   : > { %v3149_v9 = vadd.f32 %v3044_v60, %v7618_v2  ;;  %v5945_v39 = vpop.f32.mrf.mxu0  ;;  %v7723_v32 = vadd.f32 %v5941_v53, %v3151_v24 }
 0x1eb   : > { %v5892_v36 = vpop.f32.mrf.mxu1 }
 0x1ec   : > { %v3154_v48 = vadd.f32 %v5892_v36, %v7621_v37  ;;  %v3523_v15 = vpop.f32.mrf.mxu0  ;;  %v7726_v11 = vadd.f32 %v3507_v40, %v3149_v9 }
 0x1ed   : > { %v3057_v44 = vpop.f32.mrf.mxu1 }
 0x1ee   : > { %v3152_v58 = vadd.f32 %v3057_v44, %v7624_v54  ;;  %v5948_v51 = vpop.f32.mrf.mxu0  ;;  %v7729_v18 = vadd.f32 %v5944_v30, %v3154_v48 }
 0x1ef   : > { %v5893_v47 = vpop.f32.mrf.mxu1 }
 0x1f0   : > { %v3155_v6 = vadd.f32 %v5893_v47, %v7627_v56  ;;  %v3536_v49 = vpop.f32.mrf.mxu0  ;;  %v7732_v2 = vadd.f32 %v3520_v45, %v3152_v58 }
 0x1f1   : > { %v3060_v22 = vpop.f32.mrf.mxu1 }
 0x1f2   : > { %v3153_v5 = vadd.f32 %v3060_v22, %v7630_v59  ;;  %v5949_v19 = vpop.f32.mrf.mxu0  ;;  %v7735_v37 = vadd.f32 %v5945_v39, %v3155_v6 }
 0x1f3   : > { %v5896_v33 = vpop.f32.mrf.mxu1 }
 0x1f4   : > { %v3158_v53 = vadd.f32 %v5896_v33, %v7633_v14  ;;  %v3539_v17 = vpop.f32.mrf.mxu0  ;;  %v7738_v54 = vadd.f32 %v3523_v15, %v3153_v5 }
 0x1f5   : > { %v3073_v38 = vpop.f32.mrf.mxu1 }
 0x1f6   : > { %v3156_v40 = vadd.f32 %v3073_v38, %v7636_v55  ;;  %v5952_v0 = vpop.f32.mrf.mxu0  ;;  %v7741_v56 = vadd.f32 %v5948_v51, %v3158_v53 }
 0x1f7   : > { %v5897_v31 = vpop.f32.mrf.mxu1 }
 0x1f8   : > { %v3159_v30 = vadd.f32 %v5897_v31, %v7639_v28  ;;  %v3552_v21 = vpop.f32.mrf.mxu0  ;;  %v7744_v59 = vadd.f32 %v3536_v49, %v3156_v40 }
 0x1f9   : > { %v3076_v24 = vpop.f32.mrf.mxu1 }
 0x1fa   : > { %v3157_v45 = vadd.f32 %v3076_v24, %v7642_v25  ;;  %v5953_v60 = vpop.f32.mrf.mxu0  ;;  %v7747_v14 = vadd.f32 %v5949_v19, %v3159_v30 }
 0x1fb   : > { %v5900_v9 = vpop.f32.mrf.mxu1 }
 0x1fc   : > { %v3162_v39 = vadd.f32 %v5900_v9, %v7645_v3  ;;  %v3555_v36 = vpop.f32.mrf.mxu0  ;;  %v7750_v55 = vadd.f32 %v3539_v17, %v3157_v45 }
 0x1fd   : > { %v3089_v48 = vpop.f32.mrf.mxu1 }
 0x1fe   : > { %v3160_v15 = vadd.f32 %v3089_v48, %v7648_v20  ;;  %v5956_v44 = vpop.f32.mrf.mxu0  ;;  %v7753_v28 = vadd.f32 %v5952_v0, %v3162_v39 }
 0x1ff   : > { %v5901_v58 = vpop.f32.mrf.mxu1 }
 0x200   : > { %v3163_v51 = vadd.f32 %v5901_v58, %v7651_v41  ;;  %v3568_v47 = vpop.f32.mrf.mxu0  ;;  %v7756_v25 = vadd.f32 %v3552_v21, %v3160_v15 }
 0x201   : > { %v3092_v6 = vpop.f32.mrf.mxu1 }
 0x202   : > { %v3161_v49 = vadd.f32 %v3092_v6, %v7654_v23  ;;  %v5957_v22 = vpop.f32.mrf.mxu0  ;;  %v7759_v3 = vadd.f32 %v5953_v60, %v3163_v51 }
 0x203   : > { %v5904_v5 = vpop.f32.mrf.mxu1 }
 0x204   : > { %v3166_v19 = vadd.f32 %v5904_v5, %v7657_v4  ;;  %v3571_v33 = vpop.f32.mrf.mxu0  ;;  %v7762_v20 = vadd.f32 %v3555_v36, %v3161_v49 }
 0x205   : > { %v3105_v53 = vpop.f32.mrf.mxu1 }
 0x206   : > { %v3164_v17 = vadd.f32 %v3105_v53, %v7660_v35  ;;  %v5960_v38 = vpop.f32.mrf.mxu0  ;;  %v7765_v41 = vadd.f32 %v5956_v44, %v3166_v19 }
 0x207   : > { %v5905_v40 = vpop.f32.mrf.mxu1 }
 0x208   : > { %v3167_v0 = vadd.f32 %v5905_v40, %v7663_v1  ;;  %v3584_v31 = vpop.f32.mrf.mxu0  ;;  %v7768_v23 = vadd.f32 %v3568_v47, %v3164_v17  ;;  %v7792_v17 = vld [vmem:[%s8008_s3] ss:$0 sm:$0xff] }
 0x209   : > { %v3108_v30 = vpop.f32.mrf.mxu1 }
 0x20a   : > { %v3165_v21 = vadd.f32 %v3108_v30, %v7666_v13  ;;  %v5961_v24 = vpop.f32.mrf.mxu0  ;;  %v7771_v4 = vadd.f32 %v5957_v22, %v3167_v0  ;;  %v273_v30 = vld [vmem:[%s8006_s1] sm:$0xff] }
 0x20b   : > { %v5908_v45 = vpop.f32.mrf.mxu1 }
 0x20c   : > { %v3170_v60 = vadd.f32 %v5908_v45, %v7669_v8  ;;  %v3587_v9 = vpop.f32.mrf.mxu0  ;;  %v7774_v35 = vadd.f32 %v3571_v33, %v3165_v21 }
 0x20d   : > { %v3121_v39 = vpop.f32.mrf.mxu1 }
 0x20e   : > { %v3168_v36 = vadd.f32 %v3121_v39, %v7672_v29  ;;  %v6032_v48 = vpop.f32.mrf.mxu0  ;;  %v7777_v1 = vadd.f32 %v5960_v38, %v3170_v60  ;;  %v275_v60 = vld [vmem:[%s8006_s1 + $0x10] sm:$0xff] }
 0x20f   : > { %v5909_v15 = vpop.f32.mrf.mxu1 }
 0x210   : > { %v3171_v44 = vadd.f32 %v5909_v15, %v7675_v27  ;;  %v4265_v58 = vpop.f32.mrf.mxu0  ;;  %v7780_v13 = vadd.f32 %v3584_v31, %v3168_v36 }
 0x211   : > { %v3124_v51 = vpop.f32.mrf.mxu1 }
 0x212   : > { %v3169_v47 = vadd.f32 %v3124_v51, %v7678_v57  ;;  %v6033_v6 = vpop.f32.mrf.mxu0  ;;  %v7783_v8 = vadd.f32 %v5961_v24, %v3171_v44 }
 0x213   : > { %v5980_v49 = vpop.f32.mrf.mxu1 }
 0x214   : > { %v4072_v22 = vadd.f32 %v5980_v49, %v7681_v26  ;;  %v4268_v5 = vpop.f32.mrf.mxu0  ;;  %v7786_v29 = vadd.f32 %v3587_v9, %v3169_v47 }
 0x215   : > { %v3927_v19 = vpop.f32.mrf.mxu1 }
 0x216   : > { %v4410_v33 = vadd.f32 %v6032_v48, %v4072_v22  ;;  %v4070_v53 = vadd.f32 %v3927_v19, %v7684_v43  ;;  %v6036_v27 = vpop.f32.mrf.mxu0 }
 0x217   : > { %v5981_v57 = vpop.f32.mrf.mxu1 }
 0x218   : > { %v4408_v38 = vadd.f32 %v4265_v58, %v4070_v53  ;;  %v4073_v40 = vadd.f32 %v5981_v57, %v7687_v16  ;;  %v4281_v0 = vpop.f32.mrf.mxu0  ;;  %v4453_v26 = vadd.f32 %v7792_v17, %v4410_v33  ;;  %v276_v16 = vld [vmem:[%s8006_s1 + $0x18] sm:$0xff] }
 0x219   : > { %v3930_v31 = vpop.f32.mrf.mxu1 }
 0x21a   : > { %v4451_v43 = vadd.f32 %v7792_v17, %v4408_v38  ;;  %v4411_v21 = vadd.f32 %v6033_v6, %v4073_v40  ;;  %v4071_v24 = vadd.f32 %v3930_v31, %v7690_v42  ;;  %v6037_v45 = vpop.f32.mrf.mxu0  ;;  %v274_v42 = vld [vmem:[%s8006_s1 + $0x8] sm:$0xff]  ;;  %v4489_v51 = vmul.f32 %v4453_v26, %v275_v60  ;;  %v277_v40 = vld [vmem:[%s8006_s1 + $0x20] sm:$0xff] }
 0x21b   : > { %v5984_v9 = vpop.f32.mrf.mxu1 }
 0x21c   : > { %v4454_v39 = vadd.f32 %v7792_v17, %v4411_v21  ;;  %v4409_v36 = vadd.f32 %v4268_v5, %v4071_v24  ;;  %v4284_v48 = vpop.f32.mrf.mxu0  ;;  %v4487_v15 = vmul.f32 %v4451_v43, %v273_v30  ;;  %v4076_v44 = vadd.f32 %v5984_v9, %v7693_v7 }
 0x21d   : > { %v3943_v58 = vpop.f32.mrf.mxu1  ;;  %v4566_v24 = vmul.f32 %v4489_v51, %v4489_v51 }
 0x21e   : > { %v4490_v47 = vmul.f32 %v4454_v39, %v276_v16  ;;  %v4452_v6 = vadd.f32 %v7792_v17, %v4409_v36  ;;  %v4074_v49 = vadd.f32 %v3943_v58, %v7696_v62  ;;  %v6040_v22 = vpop.f32.mrf.mxu0  ;;  %v4414_v5 = vadd.f32 %v6036_v27, %v4076_v44 }
 0x21f   : > { %v5985_v19 = vpop.f32.mrf.mxu1  ;;  %v4564_v38 = vmul.f32 %v4487_v15, %v4487_v15 }
 0x220   : > { %v5265_v33 = vpack.c.bf16 %v4490_v47, %v4489_v51  ;;  %v4488_v53 = vmul.f32 %v4452_v6, %v274_v42  ;;  %v4412_v7 = vadd.f32 %v4281_v0, %v4074_v49  ;;  %v4297_v57 = vpop.f32.mrf.mxu0  ;;  %v4077_v62 = vadd.f32 %v5985_v19, %v7699_v52  ;;  %v279_v52 = vld [vmem:[%s8006_s1 + $0x30] sm:$0xff]  ;;  %v278_v19 = vld [vmem:[%s8006_s1 + $0x28] sm:$0xff] }
 0x221   : > { %v3946_v31 = vpop.f32.mrf.mxu1  ;;  %v4457_v0 = vadd.f32 %v7792_v17, %v4414_v5  ;;  %v4567_v49 = vmul.f32 %v4490_v47, %v4490_v47 }
 0x222   : > { %5347 = vst [vmem:[%s7819_s28 + $0x8] sm:$0xff] %v5265_v33   ;;  %v4523_v26 = vadd.f32 %v4488_v53, %v4487_v15  ;;  %v4565_v30 = vmul.f32 %v4488_v53, %v4488_v53  ;;  %v5260_v43 = vpack.c.bf16 %v4488_v53, %v4487_v15  ;;  %v4455_v27 = vadd.f32 %v7792_v17, %v4412_v7  ;;  %v6041_v21 = vpop.f32.mrf.mxu0  ;;  %v280_v15 = vld [vmem:[%s8006_s1 + $0x38] sm:$0xff] }
 0x223   : > { %v4415_v60 = vadd.f32 %v6037_v45, %v4077_v62  ;;  %v4075_v16 = vadd.f32 %v3946_v31, %v7702_v61  ;;  %v5988_v9 = vpop.f32.mrf.mxu1  ;;  %v4493_v7 = vmul.f32 %v4457_v0, %v279_v52 }
 0x224   : > { %v4524_v39 = vadd.f32 %v4523_v26, %v4489_v51  ;;  %v4600_v36 = vadd.f32 %v4565_v30, %v4564_v38  ;;  %5261 = vst [vmem:[%s7819_s28] sm:$0xff] %v5260_v43   ;;  %v4491_v42 = vmul.f32 %v4455_v27, %v277_v40  ;;  %v4080_v44 = vadd.f32 %v5988_v9, %v7705_v63  ;;  %v4300_v58 = vpop.f32.mrf.mxu0 }
 0x225   : > { %v4458_v45 = vadd.f32 %v7792_v17, %v4415_v60  ;;  %v4413_v6 = vadd.f32 %v4284_v48, %v4075_v16  ;;  %v3959_v61 = vpop.f32.mrf.mxu1  ;;  %v283_v16 = vld [vmem:[%s8006_s1 + $0x50] sm:$0xff] }
 0x226   : > { %v4601_v51 = vadd.f32 %v4600_v36, %v4566_v24  ;;  %v4525_v5 = vadd.f32 %v4524_v39, %v4490_v47  ;;  %v4418_v33 = vadd.f32 %v6040_v22, %v4080_v44  ;;  %v6044_v53 = vpop.f32.mrf.mxu0  ;;  %v4078_v63 = vadd.f32 %v3959_v61, %v7708_v34  ;;  %v281_v34 = vld [vmem:[%s8006_s1 + $0x40] sm:$0xff]  ;;  %v284_v44 = vld [vmem:[%s8006_s1 + $0x58] sm:$0xff] }
 0x227   : > { %v4494_v38 = vmul.f32 %v4458_v45, %v280_v15  ;;  %v4456_v40 = vadd.f32 %v7792_v17, %v4413_v6  ;;  %v5989_v62 = vpop.f32.mrf.mxu1  ;;  %v4568_v48 = vmul.f32 %v4491_v42, %v4491_v42  ;;  %v4570_v6 = vmul.f32 %v4493_v7, %v4493_v7 }
 0x228   : > { %v4526_v31 = vadd.f32 %v4525_v5, %v4491_v42  ;;  %v4602_v26 = vadd.f32 %v4601_v51, %v4567_v49  ;;  %v4081_v30 = vadd.f32 %v5989_v62, %v7711_v50  ;;  %v4313_v47 = vpop.f32.mrf.mxu0  ;;  %v4461_v24 = vadd.f32 %v7792_v17, %v4418_v33 }
 0x229   : > { %v5275_v43 = vpack.c.bf16 %v4494_v38, %v4493_v7  ;;  %v4492_v27 = vmul.f32 %v4456_v40, %v278_v19  ;;  %v4416_v22 = vadd.f32 %v4297_v57, %v4078_v63  ;;  %v3962_v60 = vpop.f32.mrf.mxu1 }
 0x22a   : > { %v4603_v0 = vadd.f32 %v4602_v26, %v4568_v48  ;;  %v4419_v9 = vadd.f32 %v6041_v21, %v4081_v30  ;;  %v4079_v39 = vadd.f32 %v3962_v60, %v7714_v10  ;;  %v6045_v50 = vpop.f32.mrf.mxu0  ;;  %v4497_v19 = vmul.f32 %v4461_v24, %v283_v16 }
 0x22b   : > { %5349 = vst [vmem:[%s7819_s28 + $0x18] sm:$0xff] %v5275_v43   ;;  %v4527_v36 = vadd.f32 %v4526_v31, %v4492_v27  ;;  %v4569_v52 = vmul.f32 %v4492_v27, %v4492_v27  ;;  %v5270_v15 = vpack.c.bf16 %v4492_v27, %v4491_v42  ;;  %v4459_v57 = vadd.f32 %v7792_v17, %v4416_v22  ;;  %v5992_v45 = vpop.f32.mrf.mxu1  ;;  %v282_v42 = vld [vmem:[%s8006_s1 + $0x48] sm:$0xff] }
 0x22c   : > { %v4462_v61 = vadd.f32 %v7792_v17, %v4419_v9  ;;  %v4417_v49 = vadd.f32 %v4300_v58, %v4079_v39  ;;  %v4084_v21 = vadd.f32 %v5992_v45, %v7717_v12  ;;  %v4316_v10 = vpop.f32.mrf.mxu0  ;;  %v4571_v12 = vmul.f32 %v4494_v38, %v4494_v38 }
 0x22d   : > { %v4528_v51 = vadd.f32 %v4527_v36, %v4493_v7  ;;  %v4604_v5 = vadd.f32 %v4603_v0, %v4569_v52  ;;  %5348 = vst [vmem:[%s7819_s28 + $0x10] sm:$0xff] %v5270_v15   ;;  %v4495_v33 = vmul.f32 %v4459_v57, %v281_v34  ;;  %v3975_v40 = vpop.f32.mrf.mxu1 }
 0x22e   : > { %v4498_v63 = vmul.f32 %v4462_v61, %v284_v44  ;;  %v4460_v62 = vadd.f32 %v7792_v17, %v4417_v49  ;;  %v4422_v31 = vadd.f32 %v6044_v53, %v4084_v21  ;;  %v4082_v58 = vadd.f32 %v3975_v40, %v7720_v46  ;;  %v6048_v48 = vpop.f32.mrf.mxu0  ;;  %v288_v61 = vld [vmem:[%s8006_s1 + $0x78] sm:$0xff] }
 0x22f   : > { %v4605_v26 = vadd.f32 %v4604_v5, %v4570_v6  ;;  %v4529_v7 = vadd.f32 %v4528_v51, %v4494_v38  ;;  %v5993_v30 = vpop.f32.mrf.mxu1  ;;  %v4572_v43 = vmul.f32 %v4495_v33, %v4495_v33  ;;  %v285_v38 = vld [vmem:[%s8006_s1 + $0x60] sm:$0xff]  ;;  %v287_v6 = vld [vmem:[%s8006_s1 + $0x70] sm:$0xff] }
 0x230   : > { %v5285_v27 = vpack.c.bf16 %v4498_v63, %v4497_v19  ;;  %v4496_v24 = vmul.f32 %v4460_v62, %v282_v42  ;;  %v4329_v22 = vpop.f32.mrf.mxu0  ;;  %v4420_v16 = vadd.f32 %v4313_v47, %v4082_v58  ;;  %v4085_v34 = vadd.f32 %v5993_v30, %v7723_v32  ;;  %v286_v42 = vld [vmem:[%s8006_s1 + $0x68] sm:$0xff] }
 0x231   : > { %v4530_v60 = vadd.f32 %v4529_v7, %v4495_v33  ;;  %v4606_v0 = vadd.f32 %v4605_v26, %v4571_v12  ;;  %v3978_v9 = vpop.f32.mrf.mxu1  ;;  %v4465_v46 = vadd.f32 %v7792_v17, %v4422_v31  ;;  %v4574_v32 = vmul.f32 %v4497_v19, %v4497_v19 }
 0x232   : > { %5351 = vst [vmem:[%s7819_s28 + $0x28] sm:$0xff] %v5285_v27   ;;  %v4573_v53 = vmul.f32 %v4496_v24, %v4496_v24  ;;  %v5280_v39 = vpack.c.bf16 %v4496_v24, %v4495_v33  ;;  %v4083_v36 = vadd.f32 %v3978_v9, %v7726_v11  ;;  %v6049_v52 = vpop.f32.mrf.mxu0  ;;  %v4463_v47 = vadd.f32 %v7792_v17, %v4420_v16 }
 0x233   : > { %v4607_v15 = vadd.f32 %v4606_v0, %v4572_v43  ;;  %v4531_v57 = vadd.f32 %v4530_v60, %v4496_v24  ;;  %v4423_v44 = vadd.f32 %v6045_v50, %v4085_v34  ;;  %v5996_v45 = vpop.f32.mrf.mxu1  ;;  %v4575_v62 = vmul.f32 %v4498_v63, %v4498_v63 }
 0x234   : > { %5350 = vst [vmem:[%s7819_s28 + $0x20] sm:$0xff] %v5280_v39   ;;  %v4421_v49 = vadd.f32 %v4316_v10, %v4083_v36  ;;  %v4088_v11 = vadd.f32 %v5996_v45, %v7729_v18  ;;  %v4332_v21 = vpop.f32.mrf.mxu0  ;;  %v4499_v33 = vmul.f32 %v4463_v47, %v285_v38  ;;  %v4501_v18 = vmul.f32 %v4465_v46, %v287_v6  ;;  %v291_v36 = vld [vmem:[%s8006_s1 + $0x90] sm:$0xff] }
 0x235   : > { %v4532_v51 = vadd.f32 %v4531_v57, %v4497_v19  ;;  %v4608_v5 = vadd.f32 %v4607_v15, %v4573_v53  ;;  %v4466_v50 = vadd.f32 %v7792_v17, %v4423_v44  ;;  %v3991_v40 = vpop.f32.mrf.mxu1 }
 0x236   : > { %v4464_v31 = vadd.f32 %v7792_v17, %v4421_v49  ;;  %v4426_v58 = vadd.f32 %v6048_v48, %v4088_v11  ;;  %v4086_v12 = vadd.f32 %v3991_v40, %v7732_v2  ;;  %v6052_v10 = vpop.f32.mrf.mxu0  ;;  %v4576_v16 = vmul.f32 %v4499_v33, %v4499_v33  ;;  %v289_v2 = vld [vmem:[%s8006_s1 + $0x80] sm:$0xff] }
 0x237   : > { %v4609_v26 = vadd.f32 %v4608_v5, %v4574_v32  ;;  %v4533_v7 = vadd.f32 %v4532_v51, %v4498_v63  ;;  %v4502_v19 = vmul.f32 %v4466_v50, %v288_v61  ;;  %v5997_v30 = vpop.f32.mrf.mxu1  ;;  %v4578_v44 = vmul.f32 %v4501_v18, %v4501_v18  ;;  %v292_v32 = vld [vmem:[%s8006_s1 + $0x98] sm:$0xff] }
 0x238   : > { %v4500_v43 = vmul.f32 %v4464_v31, %v286_v42  ;;  %v4424_v27 = vadd.f32 %v4329_v22, %v4086_v12  ;;  %v4089_v24 = vadd.f32 %v5997_v30, %v7735_v37  ;;  %v4345_v60 = vpop.f32.mrf.mxu0  ;;  %v4469_v39 = vadd.f32 %v7792_v17, %v4426_v58 }
 0x239   : > { %v4534_v0 = vadd.f32 %v4533_v7, %v4499_v33  ;;  %v4610_v34 = vadd.f32 %v4609_v26, %v4575_v62  ;;  %v5295_v9 = vpack.c.bf16 %v4502_v19, %v4501_v18  ;;  %v3994_v48 = vpop.f32.mrf.mxu1 }
 0x23a   : > { %v4577_v53 = vmul.f32 %v4500_v43, %v4500_v43  ;;  %v5290_v63 = vpack.c.bf16 %v4500_v43, %v4499_v33  ;;  %v4467_v46 = vadd.f32 %v7792_v17, %v4424_v27  ;;  %v6053_v22 = vpop.f32.mrf.mxu0  ;;  %v4427_v15 = vadd.f32 %v6049_v52, %v4089_v24 }
 0x23b   : > { %v4611_v38 = vadd.f32 %v4610_v34, %v4576_v16  ;;  %5353 = vst [vmem:[%s7819_s28 + $0x38] sm:$0xff] %v5295_v9   ;;  %v4535_v37 = vadd.f32 %v4534_v0, %v4500_v43  ;;  %v4087_v57 = vadd.f32 %v3994_v48, %v7738_v54  ;;  %v6000_v47 = vpop.f32.mrf.mxu1  ;;  %v4579_v52 = vmul.f32 %v4502_v19, %v4502_v19 }
 0x23c   : > { %5352 = vst [vmem:[%s7819_s28 + $0x30] sm:$0xff] %v5290_v63   ;;  %v4503_v45 = vmul.f32 %v4467_v46, %v289_v2  ;;  %v4092_v6 = vadd.f32 %v6000_v47, %v7741_v56  ;;  %v4348_v61 = vpop.f32.mrf.mxu0  ;;  %v4470_v51 = vadd.f32 %v7792_v17, %v4427_v15  ;;  %v4505_v50 = vmul.f32 %v4469_v39, %v291_v36  ;;  %v290_v56 = vld [vmem:[%s8006_s1 + $0x88] sm:$0xff]  ;;  %v295_v46 = vld [vmem:[%s8006_s1 + $0xb0] sm:$0xff] }
 0x23d   : > { %v4536_v49 = vadd.f32 %v4535_v37, %v4501_v18  ;;  %v4612_v11 = vadd.f32 %v4611_v38, %v4577_v53  ;;  %v4425_v5 = vadd.f32 %v4332_v21, %v4087_v57  ;;  %v4007_v33 = vpop.f32.mrf.mxu1 }
 0x23e   : > { %v4430_v54 = vadd.f32 %v6052_v10, %v4092_v6  ;;  %v4090_v42 = vadd.f32 %v4007_v33, %v7744_v59  ;;  %v6056_v40 = vpop.f32.mrf.mxu0  ;;  %v4506_v58 = vmul.f32 %v4470_v51, %v292_v32  ;;  %v4580_v10 = vmul.f32 %v4503_v45, %v4503_v45 }
 0x23f   : > { %v4613_v62 = vadd.f32 %v4612_v11, %v4578_v44  ;;  %v4537_v31 = vadd.f32 %v4536_v49, %v4502_v19  ;;  %v4468_v12 = vadd.f32 %v7792_v17, %v4425_v5  ;;  %v6001_v26 = vpop.f32.mrf.mxu1  ;;  %v293_v19 = vld [vmem:[%s8006_s1 + $0xa0] sm:$0xff]  ;;  %v4582_v48 = vmul.f32 %v4505_v50, %v4505_v50 }
 0x240   : > { %v4428_v18 = vadd.f32 %v4345_v60, %v4090_v42  ;;  %v4093_v21 = vadd.f32 %v6001_v26, %v7747_v14  ;;  %v4361_v7 = vpop.f32.mrf.mxu0  ;;  %v5305_v59 = vpack.c.bf16 %v4506_v58, %v4505_v50  ;;  %v4473_v60 = vadd.f32 %v7792_v17, %v4430_v54 }
 0x241   : > { %v4538_v30 = vadd.f32 %v4537_v31, %v4503_v45  ;;  %v4614_v43 = vadd.f32 %v4613_v62, %v4579_v52  ;;  %v4010_v27 = vpop.f32.mrf.mxu1  ;;  %v4504_v24 = vmul.f32 %v4468_v12, %v290_v56  ;;  %v4583_v47 = vmul.f32 %v4506_v58, %v4506_v58 }
 0x242   : > { %v4471_v0 = vadd.f32 %v7792_v17, %v4428_v18  ;;  %v4431_v16 = vadd.f32 %v6053_v22, %v4093_v21  ;;  %v6057_v34 = vpop.f32.mrf.mxu0  ;;  %5355 = vst [vmem:[%s7819_s28 + $0x48] sm:$0xff] %v5305_v59   ;;  %v4091_v14 = vadd.f32 %v4010_v27, %v7750_v55  ;;  %v296_v22 = vld [vmem:[%s8006_s1 + $0xb8] sm:$0xff]  ;;  %v4509_v11 = vmul.f32 %v4473_v60, %v295_v46 }
 0x243   : > { %v4615_v9 = vadd.f32 %v4614_v43, %v4580_v10  ;;  %v6004_v2 = vpop.f32.mrf.mxu1  ;;  %v4539_v53 = vadd.f32 %v4538_v30, %v4504_v24  ;;  %v4581_v63 = vmul.f32 %v4504_v24, %v4504_v24  ;;  %v5300_v39 = vpack.c.bf16 %v4504_v24, %v4503_v45  ;;  %v294_v45 = vld [vmem:[%s8006_s1 + $0xa8] sm:$0xff]  ;;  %v297_v10 = vld [vmem:[%s8006_s1 + $0xc0] sm:$0xff]  ;;  %v300_v43 = vld [vmem:[%s8006_s1 + $0xd8] sm:$0xff] }
 0x244   : > { %v4364_v38 = vpop.f32.mrf.mxu0  ;;  %v4507_v37 = vmul.f32 %v4471_v0, %v293_v19  ;;  %v4474_v36 = vadd.f32 %v7792_v17, %v4431_v16  ;;  %v4429_v15 = vadd.f32 %v4348_v61, %v4091_v14  ;;  %v4096_v55 = vadd.f32 %v6004_v2, %v7753_v28 }
 0x245   : > { %v4023_v57 = vpop.f32.mrf.mxu1  ;;  %v4540_v44 = vadd.f32 %v4539_v53, %v4505_v50  ;;  %v4616_v32 = vadd.f32 %v4615_v9, %v4581_v63  ;;  %5354 = vst [vmem:[%s7819_s28 + $0x40] sm:$0xff] %v5300_v39   ;;  %v4586_v16 = vmul.f32 %v4509_v11, %v4509_v11 }
 0x246   : > { %v4094_v6 = vadd.f32 %v4023_v57, %v7756_v25  ;;  %v6060_v49 = vpop.f32.mrf.mxu0  ;;  %v4510_v51 = vmul.f32 %v4474_v36, %v296_v22  ;;  %v4472_v5 = vadd.f32 %v7792_v17, %v4429_v15  ;;  %v4434_v33 = vadd.f32 %v6056_v40, %v4096_v55  ;;  %v299_v40 = vld [vmem:[%s8006_s1 + $0xd0] sm:$0xff] }
 0x247   : > { %v6005_v61 = vpop.f32.mrf.mxu1  ;;  %v4617_v52 = vadd.f32 %v4616_v32, %v4582_v48  ;;  %v4541_v28 = vadd.f32 %v4540_v44, %v4506_v58  ;;  %v4584_v62 = vmul.f32 %v4507_v37, %v4507_v37 }
 0x248   : > { %v4432_v54 = vadd.f32 %v4361_v7, %v4094_v6  ;;  %v4097_v50 = vadd.f32 %v6005_v61, %v7759_v3  ;;  %v4377_v42 = vpop.f32.mrf.mxu0  ;;  %v5315_v31 = vpack.c.bf16 %v4510_v51, %v4509_v11  ;;  %v4508_v56 = vmul.f32 %v4472_v5, %v294_v45 }
 0x249   : > { %v4477_v12 = vadd.f32 %v7792_v17, %v4434_v33  ;;  %v4026_v25 = vpop.f32.mrf.mxu1  ;;  %v4542_v26 = vadd.f32 %v4541_v28, %v4507_v37  ;;  %v4618_v18 = vadd.f32 %v4617_v52, %v4583_v47 }
 0x24a   : > { %v4475_v21 = vadd.f32 %v7792_v17, %v4432_v54  ;;  %v4435_v58 = vadd.f32 %v6057_v34, %v4097_v50  ;;  %v6061_v7 = vpop.f32.mrf.mxu0  ;;  %5357 = vst [vmem:[%s7819_s28 + $0x58] sm:$0xff] %v5315_v31   ;;  %v4585_v3 = vmul.f32 %v4508_v56, %v4508_v56  ;;  %v5310_v30 = vpack.c.bf16 %v4508_v56, %v4507_v37  ;;  %v303_v50 = vld [vmem:[%s8006_s1 + $0xf0] sm:$0xff] }
 0x24b   : > { %v4095_v59 = vadd.f32 %v4026_v25, %v7762_v20  ;;  %v6008_v27 = vpop.f32.mrf.mxu1  ;;  %v4619_v24 = vadd.f32 %v4618_v18, %v4584_v62  ;;  %v4543_v19 = vadd.f32 %v4542_v26, %v4508_v56  ;;  %v4513_v34 = vmul.f32 %v4477_v12, %v299_v40  ;;  %v298_v20 = vld [vmem:[%s8006_s1 + $0xc8] sm:$0xff] }
 0x24c   : > { %v4478_v0 = vadd.f32 %v7792_v17, %v4435_v58  ;;  %5356 = vst [vmem:[%s7819_s28 + $0x50] sm:$0xff] %v5310_v30   ;;  %v4100_v60 = vadd.f32 %v6008_v27, %v7765_v41  ;;  %v4380_v2 = vpop.f32.mrf.mxu0  ;;  %v4511_v63 = vmul.f32 %v4475_v21, %v297_v10  ;;  %v302_v12 = vld [vmem:[%s8006_s1 + $0xe8] sm:$0xff] }
 0x24d   : > { %v4433_v9 = vadd.f32 %v4364_v38, %v4095_v59  ;;  %v4039_v14 = vpop.f32.mrf.mxu1  ;;  %v4544_v48 = vadd.f32 %v4543_v19, %v4509_v11  ;;  %v4620_v53 = vadd.f32 %v4619_v24, %v4585_v3  ;;  %v4587_v38 = vmul.f32 %v4510_v51, %v4510_v51 }
 0x24e   : > { %v4514_v39 = vmul.f32 %v4478_v0, %v300_v43  ;;  %v4438_v22 = vadd.f32 %v6060_v49, %v4100_v60  ;;  %v4098_v37 = vadd.f32 %v4039_v14, %v7768_v23  ;;  %v6064_v32 = vpop.f32.mrf.mxu0  ;;  %v4588_v11 = vmul.f32 %v4511_v63, %v4511_v63  ;;  %v301_v23 = vld [vmem:[%s8006_s1 + $0xe0] sm:$0xff] }
 0x24f   : > { %v4476_v46 = vadd.f32 %v7792_v17, %v4433_v9  ;;  %v6009_v36 = vpop.f32.mrf.mxu1  ;;  %v4621_v15 = vadd.f32 %v4620_v53, %v4586_v16  ;;  %v4545_v41 = vadd.f32 %v4544_v48, %v4510_v51  ;;  %v4590_v31 = vmul.f32 %v4513_v34, %v4513_v34 }
 0x250   : > { %v5325_v55 = vpack.c.bf16 %v4514_v39, %v4513_v34  ;;  %v4436_v47 = vadd.f32 %v4377_v42, %v4098_v37  ;;  %v4101_v44 = vadd.f32 %v6009_v36, %v7771_v4  ;;  %v4481_v61 = vadd.f32 %v7792_v17, %v4438_v22  ;;  %v4393_v25 = vpop.f32.mrf.mxu0 }
 0x251   : > { %v4512_v57 = vmul.f32 %v4476_v46, %v298_v20  ;;  %v4042_v45 = vpop.f32.mrf.mxu1  ;;  %v4546_v6 = vadd.f32 %v4545_v41, %v4511_v63  ;;  %v4622_v5 = vadd.f32 %v4621_v15, %v4587_v38  ;;  %v4591_v3 = vmul.f32 %v4514_v39, %v4514_v39 }
 0x252   : > { %5359 = vst [vmem:[%s7819_s28 + $0x68] sm:$0xff] %v5325_v55   ;;  %v4099_v49 = vadd.f32 %v4042_v45, %v7774_v35  ;;  %v4479_v52 = vadd.f32 %v7792_v17, %v4436_v47  ;;  %v4439_v42 = vadd.f32 %v6061_v7, %v4101_v44  ;;  %v304_v35 = vld [vmem:[%s8006_s1 + $0xf8] sm:$0xff]  ;;  %v4517_v30 = vmul.f32 %v4481_v61, %v303_v50  ;;  %v6065_v16 = vpop.f32.mrf.mxu0 }
 0x253   : > { %v4589_v33 = vmul.f32 %v4512_v57, %v4512_v57  ;;  %v5320_v51 = vpack.c.bf16 %v4512_v57, %v4511_v63  ;;  %v6012_v4 = vpop.f32.mrf.mxu1  ;;  %v4623_v28 = vadd.f32 %v4622_v5, %v4588_v11  ;;  %v4547_v54 = vadd.f32 %v4546_v6, %v4512_v57  ;;  %v308_v55 = vld [vmem:[%s8006_s1 + $0x118] sm:$0xff] }
 0x254   : > { %v4437_v62 = vadd.f32 %v4380_v2, %v4099_v49  ;;  %v4515_v56 = vmul.f32 %v4479_v52, %v301_v23  ;;  %v4104_v26 = vadd.f32 %v6012_v4, %v7777_v1  ;;  %v4482_v58 = vadd.f32 %v7792_v17, %v4439_v42  ;;  %v4396_v41 = vpop.f32.mrf.mxu0 }
 0x255   : > { %5358 = vst [vmem:[%s7819_s28 + $0x60] sm:$0xff] %v5320_v51   ;;  %v4055_v18 = vpop.f32.mrf.mxu1  ;;  %v4548_v40 = vadd.f32 %v4547_v54, %v4513_v34  ;;  %v4624_v21 = vadd.f32 %v4623_v28, %v4589_v33  ;;  %v4594_v38 = vmul.f32 %v4517_v30, %v4517_v30 }
 0x256   : > { %v4480_v7 = vadd.f32 %v7792_v17, %v4437_v62  ;;  %v4442_v10 = vadd.f32 %v6064_v32, %v4104_v26  ;;  %v4102_v43 = vadd.f32 %v4055_v18, %v7780_v13  ;;  %v4518_v19 = vmul.f32 %v4482_v58, %v304_v35  ;;  %v305_v13 = vld [vmem:[%s8006_s1 + $0x100] sm:$0xff] }
 0x257   : > { %v6013_v59 = vpop.f32.mrf.mxu1  ;;  %v4625_v27 = vadd.f32 %v4624_v21, %v4590_v31  ;;  %v4549_v24 = vadd.f32 %v4548_v40, %v4514_v39  ;;  %v4592_v14 = vmul.f32 %v4515_v56, %v4515_v56 }
 0x258   : > { %v4516_v0 = vmul.f32 %v4480_v7, %v302_v12  ;;  %v4440_v1 = vadd.f32 %v4393_v25, %v4102_v43  ;;  %v4105_v34 = vadd.f32 %v6013_v59, %v7783_v8  ;;  %v5335_v48 = vpack.c.bf16 %v4518_v19, %v4517_v30  ;;  %v307_v8 = vld [vmem:[%s8006_s1 + $0x110] sm:$0xff] }
 0x259   : > { %v4058_v9 = vpop.f32.mrf.mxu1  ;;  %v4550_v60 = vadd.f32 %v4549_v24, %v4515_v56  ;;  %v4626_v2 = vadd.f32 %v4625_v27, %v4591_v3  ;;  %v4485_v39 = vadd.f32 %v7792_v17, %v4442_v10  ;;  %v4595_v45 = vmul.f32 %v4518_v19, %v4518_v19 }
 0x25a   : > { %v4593_v53 = vmul.f32 %v4516_v0, %v4516_v0  ;;  %v5330_v63 = vpack.c.bf16 %v4516_v0, %v4515_v56  ;;  %v4483_v20 = vadd.f32 %v7792_v17, %v4440_v1  ;;  %5361 = vst [vmem:[%s7819_s28 + $0x78] sm:$0xff] %v5335_v48   ;;  %v4443_v37 = vadd.f32 %v6065_v16, %v4105_v34 }
 0x25b   : > { %v4627_v46 = vadd.f32 %v4626_v2, %v4592_v14  ;;  %v4551_v22 = vadd.f32 %v4550_v60, %v4516_v0  ;;  %v4103_v36 = vadd.f32 %v4058_v9, %v7786_v29  ;;  %v4521_v6 = vmul.f32 %v4485_v39, %v307_v8  ;;  %v306_v29 = vld [vmem:[%s8006_s1 + $0x108] sm:$0xff] }
 0x25c   : > { %5360 = vst [vmem:[%s7819_s28 + $0x70] sm:$0xff] %v5330_v63   ;;  %v4519_v15 = vmul.f32 %v4483_v20, %v305_v13  ;;  %v4486_v44 = vadd.f32 %v7792_v17, %v4443_v37 }
 0x25d   : > { %v4552_v57 = vadd.f32 %v4551_v22, %v4517_v30  ;;  %v4628_v47 = vadd.f32 %v4627_v46, %v4593_v53  ;;  %v4441_v32 = vadd.f32 %v4396_v41, %v4103_v36  ;;  %v4598_v62 = vmul.f32 %v4521_v6, %v4521_v6 }
 0x25e   : > { %v4522_v23 = vmul.f32 %v4486_v44, %v308_v55  ;;  %v4596_v51 = vmul.f32 %v4519_v15, %v4519_v15 }
 0x25f   : > { %v4629_v11 = vadd.f32 %v4628_v47, %v4594_v38  ;;  %v4553_v5 = vadd.f32 %v4552_v57, %v4518_v19  ;;  %v4484_v49 = vadd.f32 %v7792_v17, %v4441_v32 }
 0x260   : > { %v5345_v52 = vpack.c.bf16 %v4522_v23, %v4521_v6  ;;  %v4599_v35 = vmul.f32 %v4522_v23, %v4522_v23 }
 0x261   : > { %v4554_v33 = vadd.f32 %v4553_v5, %v4519_v15  ;;  %v4630_v61 = vadd.f32 %v4629_v11, %v4595_v45  ;;  %v4520_v4 = vmul.f32 %v4484_v49, %v306_v29 }
 0x262   : > { %5363 = vst [vmem:[%s7819_s28 + $0x88] sm:$0xff] %v5345_v52  }
 0x263   : > { %v4631_v28 = vadd.f32 %v4630_v61, %v4596_v51  ;;  %v4555_v54 = vadd.f32 %v4554_v33, %v4520_v4  ;;  %v4597_v50 = vmul.f32 %v4520_v4, %v4520_v4  ;;  %v5340_v42 = vpack.c.bf16 %v4520_v4, %v4519_v15 }
 0x265   : > { %v4556_v31 = vadd.f32 %v4555_v54, %v4521_v6  ;;  %v4632_v56 = vadd.f32 %v4631_v28, %v4597_v50  ;;  %5362 = vst [vmem:[%s7819_s28 + $0x80] sm:$0xff] %v5340_v42  }
 0x267   : > { %v4557_v12 = vadd.f32 %v4556_v31, %v4522_v23  ;;  %v4633_v25 = vadd.f32 %v4632_v56, %v4598_v62 }
 0x269   : > { %v4558_v26 = vrot.slane %v4557_v12, 4  ;;  %v4634_v17 = vadd.f32 %v4633_v25, %v4599_v35 }
 0x26b   : > { %v4559_v18 = vadd.f32 %v4558_v26, %v4557_v12  ;;  %v4635_v40 = vrot.slane %v4634_v17, 4 }
 0x26d   : > { %v4560_v21 = vrot.slane %v4559_v18, 2  ;;  %v4636_v58 = vadd.f32 %v4635_v40, %v4634_v17 }
 0x26f   : > { %v4561_v7 = vadd.f32 %v4560_v21, %v4559_v18  ;;  %v4637_v3 = vrot.slane %v4636_v58, 2 }
 0x271   : > { %v4562_v30 = vrot.slane %v4561_v7, 1  ;;  %v4638_v10 = vadd.f32 %v4637_v3, %v4636_v58 }
 0x273   : > { %v4639_v43 = vrot.slane %v4638_v10, 1  ;;  %v4563_v59 = vadd.f32 %v4562_v30, %v4561_v7 }
 0x275   : > { %v4640_v27 = vadd.f32 %v4639_v43, %v4638_v10 }
 0x277   : > { %v4642_v24 = vsel %vm4641_vm14, %v4563_v59, %v4640_v27 }
 0x278   : > { %v4644_v19 = vsel %vm311_vm1, %v4642_v24, 0.0 }
 0x279   : > { %4645 = vst [vmem:[%s235_s30] sm:$0xff] %v4644_v19 }
 0x27a PF: > { %s16_s18 = sadd.s32 1, %s6237_s18  }
 0x27b   : > { %p13_p4 = scmp.ge.s32.totalorder %s16_s18, 4  }
 0x27d   :  { %15 = sbr.rel (!%p13_p4) target bundleno = 1 (0x1), region = 86 }

// kernel: utnet_conv_forward.4
= control target key start
LH: loop header
LB: loop body
LE: loop exit
PB: predicated region body
PF: predicated region fallthrough
CT: control target
= control target key end

     0   :  { %s6843_s24 = smov 0   ;;  %s8871_s0 = inlined_call_operand.vmem [shape: bf16[2,288,128], index: 0, kind: input, shape index: {}]   ;;  %s8872_s1 = inlined_call_operand.vmem [shape: f32[1,128], index: 1, kind: input, shape index: {}]   ;;  %s8873_s2 = inlined_call_operand.vmem [shape: f32[1,128], index: 2, kind: input, shape index: {}]   ;;  %s8874_s3 = inlined_call_operand.vmem [shape: f32[288,128], index: 3, kind: input, shape index: {}]   ;;  %s8875_s4 = inlined_call_operand.vmem [shape: bf16[9,128,128], index: 4, kind: input, shape index: {}]   ;;  %s8876_s5 = inlined_call_operand.vmem [shape: f32[1,128], index: 5, kind: input, shape index: {}]   ;;  %s8877_s6 = inlined_call_operand.vmem [shape: bf16[2,288,128], index: 6, kind: output, shape index: {0}]   ;;  %s8878_s7 = inlined_call_operand.vmem [shape: f32[2,8,128], index: 7, kind: output, shape index: {1}]  }
   0x1 LB: > { %s5268_s25 = sadd.s32 4294967295, %s6800_s24   ;;  %p5272_p0 = scmp.ge.s32.totalorder %s6800_s24, 1  ;;  %s6800_s24 = sphi %s6843_s24, %s18_s24  }
   0x2   : > { %p240_p1 = scmp.lt.s32.totalorder %s6800_s24, 3 }
   0x4   : > { %p241_p2 = pnand %p5272_p0, %p240_p1 }
   0x6   : > { %244 = sbr.rel (%p241_p2) target bundleno = 690 (0x2b2), region = 44 }
   0xb   : > { %v6611_v0 = vld [vmem:[%s8875_s4 + $0x78] sm:$0xff]   ;;  %p276_p3 = scmp.lt.s32.totalorder %s5268_s25, 1  ;;  %v6612_v1 = vld [vmem:[%s8875_s4 + $0x70] sm:$0xff]   ;;  %v6802_v2 = vmov 0   ;;  %v6613_v3 = vld [vmem:[%s8875_s4 + $0x68] sm:$0xff]   ;;  %vm577_vm1 = vcmask 1041408  }
   0xc   : > { %6585 = vmatprep.subr.bf16.mxu1 %v6611_v0  ;;  %6117 = vmatprep.subr.bf16.mxu0 %v6611_v0  ;;  %575 = vst [vmem:[#allocation2] sm:$0xf] %v6802_v2  ;;  %576 = vst [vmem:[#allocation2 + $0x4] sm:$0xf] %v6802_v2  ;;  %v6614_v4 = vld [vmem:[%s8875_s4 + $0x60] sm:$0xff]   ;;  %v6615_v16 = vld [vmem:[%s8875_s4 + $0x58] sm:$0xff]  }
   0xd   : > { %s8944_s25 = smov (!%p276_p3, %s5268_s25), 1  ;;  %589 = vst [vmem:[#allocation2 + $0x9c] sm:$0xf] %v6802_v2  ;;  %590 = vst [vmem:[#allocation2 + $0xa0] sm:$0xf] %v6802_v2  ;;  %6593 = vmatpush3.bf16.msra.mxu1 %v6611_v0  ;;  %6118 = vmatpush3.bf16.msra.mxu0 %v6611_v0  ;;  %v6616_v23 = vld [vmem:[%s8875_s4 + $0x50] sm:$0xff]  }
   0xe   : > { %6586 = vmatprep.subr.bf16.mxu1 %v6612_v1  ;;  %6119 = vmatprep.subr.bf16.mxu0 %v6612_v1  ;;  %s6601_s9 = smul.u32 144, %s8944_s25  ;;  %v6879_v9 = vld [vmem:[%s8872_s1] ss:$0 sm:$0xff]  ;;  %vm578_vm0 = vsmask.f32 1280  ;;  %v304_v29 = vld [vmem:[%s8874_s3 + $0x68] sm:$0xff] }
   0xf   : > { %v6884_v15 = vld [vmem:[%s8873_s2] ss:$0 sm:$0xff]  ;;  %v305_v30 = vld [vmem:[%s8874_s3 + $0x70] sm:$0xff]  ;;  %v306_v31 = vld [vmem:[%s8874_s3 + $0x78] sm:$0xff]  ;;  %vm681_vm2 = vsmask.f32 5392 }
  0x10   : > { %s6868_s12 = scalar_lea.vmem %s8871_s0, %s6601_s9  ;;  %v307_v36 = vld [vmem:[%s8874_s3 + $0x80] sm:$0xff]  ;;  %vm6926_vm3 = vmand %vm577_vm1, %vm578_vm0  ;;  %v580_v42 = vld [vmem:[#allocation2 + $0x8] sm:$0x3]  ;;  %vm583_vm5 = vcmask 1043457   ;;  %vm584_vm6 = vsmask.f32 7942  ;;  %s8628_s10 = scalar_lea.vmem %s8877_s6, %s6601_s9 }
  0x11   : > { %6594 = vmatpush3.bf16.msra.mxu1 %v6612_v1  ;;  %6120 = vmatpush3.bf16.msra.mxu0 %v6612_v1  ;;  %v5854_v5 = vld [vmem:[%s6868_s12 + $0x30] sm:$0xff]   ;;  %v5855_v7 = vld [vmem:[%s6868_s12 + $0x38] sm:$0xff]   ;;  %v5856_v8 = vld [vmem:[%s6868_s12 + $0x40] sm:$0xff]   ;;  %v581_v56 = vsel %vm6926_vm3, 0, %v580_v42  ;;  %vm1283_vm7 = vsmask.f32 7424 }
  0x12   : > { %6587 = vmatprep.subr.bf16.mxu1 %v6613_v3  ;;  %6121 = vmatprep.subr.bf16.mxu0 %v6613_v3  ;;  %v5714_v6 = vunpack.c.h.bf16 %v5854_v5  ;;  %v5713_v10 = vunpack.c.l.bf16 %v5854_v5  ;;  %v5717_v11 = vunpack.c.l.bf16 %v5855_v7  ;;  %v5718_v12 = vunpack.c.h.bf16 %v5855_v7  ;;  %v5857_v22 = vld [vmem:[%s6868_s12 + $0x48] sm:$0xff]   ;;  %v6900_v27 = vld [vmem:[%s6868_s12] sm:$0xff]   ;;  %v309_v55 = vld [vmem:[%s8874_s3 + $0x90] sm:$0xff]  ;;  %582 = vst [vmem:[#allocation2 + $0x8] sm:$0x3] %v581_v56 }
  0x13   : > { %v5721_v13 = vunpack.c.l.bf16 %v5856_v8  ;;  %v5722_v14 = vunpack.c.h.bf16 %v5856_v8  ;;  %v5725_v25 = vunpack.c.l.bf16 %v5857_v22  ;;  %v5726_v26 = vunpack.c.h.bf16 %v5857_v22  ;;  %v308_v43 = vld [vmem:[%s8874_s3 + $0x88] sm:$0xff]  ;;  %v6618_v2 = vld [vmem:[%s8875_s4 + $0x40] sm:$0xff]   ;;  %vm6957_vm4 = vmor %vm578_vm0, %vm681_vm2 }
  0x14   : > { %v419_v17 = vmul.f32 %v5714_v6, %v6879_v9  ;;  %v420_v18 = vmul.f32 %v5717_v11, %v6879_v9  ;;  %v421_v19 = vmul.f32 %v5718_v12, %v6879_v9  ;;  %v6903_v28 = vmul.f32 %v5713_v10, %v6879_v9  ;;  %v6617_v57 = vld [vmem:[%s8875_s4 + $0x48] sm:$0xff]   ;;  %v310_v6 = vld [vmem:[%s8874_s3 + $0x98] sm:$0xff]  ;;  %vm7027_vm8 = vmand %vm583_vm5, %vm584_vm6 }
  0x15   : > { %6595 = vmatpush3.bf16.msra.mxu1 %v6613_v3  ;;  %6122 = vmatpush3.bf16.msra.mxu0 %v6613_v3  ;;  %v422_v20 = vmul.f32 %v5721_v13, %v6879_v9  ;;  %v423_v21 = vmul.f32 %v5722_v14, %v6879_v9  ;;  %v5689_v35 = vunpack.c.l.bf16 %v6900_v27  ;;  %v424_v39 = vmul.f32 %v5725_v25, %v6879_v9 }
  0x16   : > { %6588 = vmatprep.subr.bf16.mxu1 %v6614_v4  ;;  %6123 = vmatprep.subr.bf16.mxu0 %v6614_v4  ;;  %v462_v24 = vadd.f32 %v6884_v15, %v419_v17  ;;  %v463_v32 = vadd.f32 %v6884_v15, %v420_v18  ;;  %v464_v33 = vadd.f32 %v6884_v15, %v421_v19  ;;  %v5690_v47 = vunpack.c.h.bf16 %v6900_v27 }
  0x17   : > { %v465_v34 = vadd.f32 %v6884_v15, %v422_v20  ;;  %v466_v37 = vadd.f32 %v6884_v15, %v423_v21  ;;  %v425_v40 = vmul.f32 %v5726_v26, %v6879_v9  ;;  %v467_v50 = vadd.f32 %v6884_v15, %v424_v39 }
  0x18   : > { %v498_v38 = vmax.f32 %v462_v24, 0.0  ;;  %v499_v44 = vmax.f32 %v463_v32, 0.0  ;;  %v500_v45 = vmax.f32 %v464_v33, 0.0  ;;  %v6945_v1 = vmul.f32 %v5689_v35, %v6879_v9 }
  0x19   : > { %6596 = vmatpush3.bf16.msra.mxu1 %v6614_v4  ;;  %6124 = vmatpush3.bf16.msra.mxu0 %v6614_v4  ;;  %v501_v46 = vmax.f32 %v465_v34, 0.0  ;;  %v502_v48 = vmax.f32 %v466_v37, 0.0  ;;  %v468_v51 = vadd.f32 %v6884_v15, %v425_v40  ;;  %v503_v60 = vmax.f32 %v467_v50, 0.0 }
  0x1a   : > { %6589 = vmatprep.subr.bf16.mxu1 %v6615_v16  ;;  %6125 = vmatprep.subr.bf16.mxu0 %v6615_v16  ;;  %v534_v49 = vmul.f32 %v498_v38, %v304_v29  ;;  %v535_v52 = vmul.f32 %v499_v44, %v305_v30  ;;  %v536_v53 = vmul.f32 %v500_v45, %v306_v31  ;;  %v6970_v38 = vld [vmem:[%s8875_s4 + $0xb8] sm:$0xff]   ;;  %vm1939_vm9 = vcmask 1046528  }
  0x1b   : > { %v537_v54 = vmul.f32 %v501_v46, %v307_v36  ;;  %v538_v58 = vmul.f32 %v502_v48, %v308_v43  ;;  %v504_v61 = vmax.f32 %v468_v51, 0.0  ;;  %v539_v7 = vmul.f32 %v503_v60, %v309_v55  ;;  %v6965_v36 = vld [vmem:[%s8875_s4 + $0x38] sm:$0xff]   ;;  %v5849_v55 = vld [vmem:[%s6868_s12 + $0x8] sm:$0xff]   ;;  %v5858_v60 = vld [vmem:[%s6868_s12 + $0x50] sm:$0xff]  }
  0x1c   : > { %v5628_v59 = vpack.c.bf16 %v534_v49, %v534_v49  ;;  %v5629_v62 = vpack.c.bf16 %v535_v52, %v535_v52  ;;  %v5630_v63 = vpack.c.bf16 %v536_v53, %v536_v53  ;;  %v1120_v53 = vld [vmem:[#allocation2] sm:$0xf]  ;;  %vm3211_vm10 = vcmask 1045504  }
  0x1d   : > { %6597 = vmatpush3.bf16.msra.mxu1 %v6615_v16  ;;  %6126 = vmatpush3.bf16.msra.mxu0 %v6615_v16  ;;  %v5631_v0 = vpack.c.bf16 %v537_v54, %v537_v54  ;;  %v5632_v3 = vpack.c.bf16 %v538_v58, %v538_v58  ;;  %v540_v32 = vmul.f32 %v504_v61, %v310_v6  ;;  %v1121_v54 = vld [vmem:[#allocation2 + $0x4] sm:$0xf]  ;;  %vm2740_vm11 = vsmask.f32 6400 }
  0x1e   : > { %6590 = vmatprep.subr.bf16.mxu1 %v6616_v23  ;;  %6127 = vmatprep.subr.bf16.mxu0 %v6616_v23  ;;  %v813_v4 = vshrl.u32 %v5628_v59, 16  ;;  %v816_v5 = vshll.u32 %v5628_v59, 16  ;;  %v823_v8 = vshrl.u32 %v5629_v62, 16  ;;  %v826_v10 = vshll.u32 %v5629_v62, 16 }
  0x1f   : > { %v833_v11 = vshrl.u32 %v5630_v63, 16  ;;  %v836_v12 = vshll.u32 %v5630_v63, 16  ;;  %v843_v16 = vshrl.u32 %v5631_v0, 16  ;;  %v846_v17 = vshll.u32 %v5631_v0, 16 }
  0x20   : > { %v815_v13 = vrot.slane %v813_v4, 6  ;;  %v818_v14 = vrot.slane %v816_v5, 7  ;;  %v825_v18 = vrot.slane %v823_v8, 6  ;;  %v828_v19 = vrot.slane %v826_v10, 7  ;;  %v291_v4 = vld [vmem:[%s8874_s3] sm:$0xff]  ;;  %v292_v5 = vld [vmem:[%s8874_s3 + $0x8] sm:$0xff] }
  0x21   : > { %6598 = vmatpush3.bf16.msra.mxu1 %v6616_v23  ;;  %6128 = vmatpush3.bf16.msra.mxu0 %v6616_v23  ;;  %v835_v20 = vrot.slane %v833_v11, 6  ;;  %v838_v21 = vrot.slane %v836_v12, 7  ;;  %v845_v24 = vrot.slane %v843_v16, 6  ;;  %v848_v25 = vrot.slane %v846_v17, 7 }
  0x22   : > { %6591 = vmatprep.subr.bf16.mxu1 %v6617_v57  ;;  %6129 = vmatprep.subr.bf16.mxu0 %v6617_v57  ;;  %v6953_v22 = vor.u32 %v818_v14, %v815_v13  ;;  %v853_v26 = vshrl.u32 %v5632_v3, 16  ;;  %v829_v29 = vor.u32 %v828_v19, %v825_v18  ;;  %v856_v31 = vshll.u32 %v5632_v3, 16 }
  0x23   : > { %v839_v30 = vor.u32 %v838_v21, %v835_v20  ;;  %v849_v34 = vor.u32 %v848_v25, %v845_v24  ;;  %v5633_v37 = vpack.c.bf16 %v539_v7, %v539_v7  ;;  %v5634_v43 = vpack.c.bf16 %v540_v32, %v540_v32 }
  0x24   : > { %v821_v33 = vrot.slane %v6953_v22, 4  ;;  %v855_v35 = vrot.slane %v853_v26, 6  ;;  %v831_v39 = vrot.slane %v829_v29, 4  ;;  %v858_v42 = vrot.slane %v856_v31, 7 }
  0x25   : > { %6599 = vmatpush3.bf16.msra.mxu1 %v6617_v57  ;;  %6130 = vmatpush3.bf16.msra.mxu0 %v6617_v57  ;;  %v841_v40 = vrot.slane %v839_v30, 4  ;;  %v851_v45 = vrot.slane %v849_v34, 4  ;;  %v863_v46 = vshrl.u32 %v5633_v37, 16  ;;  %v866_v48 = vshll.u32 %v5633_v37, 16 }
  0x26   : > { %6592 = vmatprep.subr.bf16.mxu1 %v6618_v2  ;;  %6131 = vmatprep.subr.bf16.mxu0 %v6618_v2  ;;  %v830_v44 = vsel %vm6957_vm4, %v821_v33, %v829_v29  ;;  %v840_v49 = vsel %vm6957_vm4, %v831_v39, %v839_v30  ;;  %v859_v51 = vor.u32 %v858_v42, %v855_v35  ;;  %v873_v52 = vshrl.u32 %v5634_v43, 16  ;;  %v293_v33 = vld [vmem:[%s8874_s3 + $0x10] sm:$0xff] }
  0x27   : > { %v850_v50 = vsel %vm6957_vm4, %v841_v40, %v849_v34  ;;  %1095 = vst [vmem:[#allocation2 + $0x40] sm:$0xf] %v830_v44  ;;  %1096 = vst [vmem:[#allocation2 + $0x44] sm:$0xf] %v840_v49  ;;  %v865_v56 = vrot.slane %v863_v46, 6  ;;  %v868_v57 = vrot.slane %v866_v48, 7  ;;  %v407_v59 = vmul.f32 %v5690_v47, %v6879_v9 }
  0x28   : > { %1097 = vst [vmem:[#allocation2 + $0x48] sm:$0xf] %v850_v50  ;;  %v876_v58 = vshll.u32 %v5634_v43, 16  ;;  %v860_v61 = vsel %vm6957_vm4, %v851_v45, %v859_v51  ;;  %v861_v62 = vrot.slane %v859_v51, 4  ;;  %v875_v63 = vrot.slane %v873_v52, 6  ;;  %v294_v45 = vld [vmem:[%s8874_s3 + $0x18] sm:$0xff] }
  0x29   : > { %6600 = vmatpush3.bf16.msra.mxu1 %v6618_v2  ;;  %6132 = vmatpush3.bf16.msra.mxu0 %v6618_v2  ;;  %v449_v0 = vadd.f32 %v6884_v15, %v6945_v1  ;;  %1098 = vst [vmem:[#allocation2 + $0x4c] sm:$0xf] %v860_v61  ;;  %v869_v2 = vor.u32 %v868_v57, %v865_v56  ;;  %v5693_v7 = vunpack.c.l.bf16 %v5849_v55  ;;  %v5694_v1 = vunpack.c.h.bf16 %v5849_v55  ;;  %v1079_v55 = vld [vmem:[#allocation2 + $0x8] sm:$0xe] }
  0x2a   : > { %6169 = vmatprep.subr.bf16.mxu1 %v6965_v36  ;;  %6221 = vmatprep.subr.bf16.mxu0 %v6970_v38  ;;  %v878_v3 = vrot.slane %v876_v58, 7  ;;  %v450_v27 = vadd.f32 %v6884_v15, %v407_v59  ;;  %v6993_v47 = vcombine.low %v1120_v53, %v1121_v54  ;;  %v5729_v8 = vunpack.c.l.bf16 %v5858_v60 }
  0x2b   : > { %v485_v6 = vmax.f32 %v449_v0, 0.0  ;;  %v870_v10 = vsel %vm6957_vm4, %v861_v62, %v869_v2  ;;  %v871_v11 = vrot.slane %v869_v2, 4  ;;  %v408_v18 = vmul.f32 %v5693_v7, %v6879_v9 }
  0x2c   : > { %v7000_v12 = vor.u32 %v878_v3, %v875_v63  ;;  %v486_v13 = vmax.f32 %v450_v27, 0.0  ;;  %1099 = vst [vmem:[#allocation2 + $0x50] sm:$0xf] %v870_v10  ;;  %v1285_v16 = vshrl.u32 %v6993_v47, 16  ;;  %v1287_v17 = vshll.u32 %v6993_v47, 16 }
  0x2d   : > { %v521_v14 = vmul.f32 %v485_v6, %v291_v4  ;;  %v409_v21 = vmul.f32 %v5694_v1, %v6879_v9  ;;  %v5730_v24 = vunpack.c.h.bf16 %v5858_v60  ;;  %v451_v30 = vadd.f32 %v6884_v15, %v408_v18 }
  0x2e   : > { %v880_v19 = vsel %vm6957_vm4, %v871_v11, %v7000_v12  ;;  %v522_v20 = vmul.f32 %v486_v13, %v292_v5  ;;  %v6619_v25 = vld [vmem:[#allocation2 + $0x40] sm:$0xff]   ;;  %v1289_v29 = vrot.slane %v1287_v17, 1  ;;  %v426_v31 = vmul.f32 %v5729_v8, %v6879_v9  ;;  %v312_v17 = vld [vmem:[%s8874_s3 + $0xa8] sm:$0xff] }
  0x2f   : > { %1100 = vst [vmem:[#allocation2 + $0x54] sm:$0xf] %v880_v19  ;;  %v5615_v26 = vpack.c.bf16 %v521_v14, %v521_v14  ;;  %v452_v34 = vadd.f32 %v6884_v15, %v409_v21  ;;  %v427_v35 = vmul.f32 %v5730_v24, %v6879_v9  ;;  %v881_v37 = vrot.slane %v7000_v12, 4  ;;  %v7098_v12 = vld [vmem:[%s6868_s12 + $0x60] sm:$0xff]  }
  0x30   : > { %v5616_v32 = vpack.c.bf16 %v522_v20, %v522_v20  ;;  %v6620_v39 = vld [vmem:[#allocation2 + $0x48] sm:$0xff]   ;;  %v1348_v40 = vshll.u32 %v6619_v25, 16  ;;  %v1352_v42 = vshrl.u32 %v6619_v25, 16  ;;  %v7017_v44 = vor.u32 %v1289_v29, %v1285_v16  ;;  %v311_v16 = vld [vmem:[%s8874_s3 + $0xa0] sm:$0xff] }
  0x31   : > { %v684_v43 = vshrl.u32 %v5615_v26, 16  ;;  %v687_v46 = vshll.u32 %v5615_v26, 16  ;;  %v487_v50 = vmax.f32 %v451_v30, 0.0  ;;  %v1356_v52 = vshll.u32 %v6620_v39, 16  ;;  %v5859_v30 = vld [vmem:[%s6868_s12 + $0x58] sm:$0xff]  }
  0x32   : > { %v693_v48 = vshrl.u32 %v5616_v32, 16  ;;  %v696_v49 = vshll.u32 %v5616_v32, 16  ;;  %v7022_v51 = vrot.slane %v1348_v40, 1  ;;  %v1360_v53 = vshrl.u32 %v6620_v39, 16  ;;  %v5850_v39 = vld [vmem:[%s6868_s12 + $0x10] sm:$0xff]  }
  0x33   : > { %v686_v54 = vrot.slane %v684_v43, 6  ;;  %v689_v56 = vrot.slane %v687_v46, 7  ;;  %v488_v59 = vmax.f32 %v452_v34, 0.0  ;;  %v1358_v61 = vrot.slane %v1356_v52, 1 }
  0x34   : > { %v695_v57 = vrot.slane %v693_v48, 6  ;;  %v698_v58 = vrot.slane %v696_v49, 7  ;;  %v1354_v60 = vor.u32 %v1352_v42, %v7022_v51  ;;  %v523_v63 = vmul.f32 %v487_v50, %v293_v33  ;;  %v6626_v33 = vld [vmem:[%s8875_s4 + $0x30] sm:$0xff]  }
  0x35   : > { %v469_v0 = vadd.f32 %v6884_v15, %v426_v31  ;;  %v690_v3 = vor.u32 %v689_v56, %v686_v54  ;;  %v524_v27 = vmul.f32 %v488_v59, %v294_v45  ;;  %v470_v5 = vadd.f32 %v6884_v15, %v427_v35 }
  0x36   : > { %v6622_v2 = vld [vmem:[#allocation2 + $0x50] sm:$0xff]   ;;  %v699_v4 = vor.u32 %v698_v58, %v695_v57  ;;  %v1359_v6 = vsel %vm1283_vm7, %v1354_v60, %v1358_v61  ;;  %v1362_v7 = vor.u32 %v1360_v53, %v1358_v61  ;;  %v5617_v1 = vpack.c.bf16 %v523_v63, %v523_v63  ;;  %v6631_v60 = vld [vmem:[%s8875_s4 + $0x28] sm:$0xff]  }
  0x37   : > { %v505_v8 = vmax.f32 %v469_v0, 0.0  ;;  %6149 = vmatprep.mubr.bf16.mxu1 %v1359_v6  ;;  %v1364_v10 = vshll.u32 %v6622_v2, 16  ;;  %v691_v11 = vrot.slane %v690_v3, 4  ;;  %v1080_v13 = vsel %vm7027_vm8, %v690_v3, %v1079_v55 }
  0x38   : > { %v5618_v14 = vpack.c.bf16 %v524_v27, %v524_v27  ;;  %1081 = vst [vmem:[#allocation2 + $0x8] sm:$0xe] %v1080_v13  ;;  %v701_v18 = vrot.slane %v699_v4, 4  ;;  %v703_v19 = vshrl.u32 %v5617_v1, 16  ;;  %v706_v20 = vshll.u32 %v5617_v1, 16  ;;  %v313_v27 = vld [vmem:[%s8874_s3 + $0xb0] sm:$0xff] }
  0x39   : > { %v506_v21 = vmax.f32 %v470_v5, 0.0  ;;  %v1366_v24 = vrot.slane %v1364_v10, 1  ;;  %v700_v25 = vsel %vm6957_vm4, %v691_v11, %v699_v4  ;;  %v541_v34 = vmul.f32 %v505_v8, %v311_v16  ;;  %v314_v8 = vld [vmem:[%s8874_s3 + $0xb8] sm:$0xff] }
  0x3a   : > { %v713_v26 = vshrl.u32 %v5618_v14, 16  ;;  %v716_v29 = vshll.u32 %v5618_v14, 16  ;;  %1082 = vst [vmem:[#allocation2 + $0xc] sm:$0xf] %v700_v25  ;;  %v705_v31 = vrot.slane %v703_v19, 6  ;;  %v708_v32 = vrot.slane %v706_v20, 7 }
  0x3b   : > { %v542_v35 = vmul.f32 %v506_v21, %v312_v17  ;;  %v1367_v40 = vsel %vm1283_vm7, %v1362_v7, %v1366_v24  ;;  %v1368_v45 = vshrl.u32 %v6622_v2, 16  ;;  %v5635_v48 = vpack.c.bf16 %v541_v34, %v541_v34  ;;  %v295_v25 = vld [vmem:[%s8874_s3 + $0x20] sm:$0xff] }
  0x3c   : > { %v715_v42 = vrot.slane %v713_v26, 6  ;;  %v718_v43 = vrot.slane %v716_v29, 7  ;;  %6150 = vmatmul.mubr.bf16.vlgmr.msra.gmra.mxu1 %v1367_v40  ;;  %v709_v46 = vor.u32 %v708_v32, %v705_v31  ;;  %v5733_v50 = vunpack.c.l.bf16 %v5859_v30  ;;  %v7085_v26 = vld [vmem:[%s6868_s12 + $0x18] sm:$0xff]  }
  0x3d   : > { %v5636_v49 = vpack.c.bf16 %v542_v35, %v542_v35  ;;  %6170 = vmatpush3.bf16.msra.mxu1 %v6965_v36  ;;  %v7053_v53 = vor.u32 %v1368_v45, %v1366_v24  ;;  %v5734_v54 = vunpack.c.h.bf16 %v5859_v30  ;;  %v5697_v55 = vunpack.c.l.bf16 %v5850_v39 }
  0x3e   : > { %v7051_v52 = vor.u32 %v718_v43, %v715_v42  ;;  %v710_v56 = vsel %vm6957_vm4, %v701_v18, %v709_v46  ;;  %v711_v57 = vrot.slane %v709_v46, 4  ;;  %6171 = vmatprep.subr.bf16.mxu1 %v6626_v33  ;;  %v883_v58 = vshrl.u32 %v5635_v48, 16  ;;  %v6635_v18 = vld [vmem:[%s8875_s4 + $0x20] sm:$0xff]   ;;  %v6640_v46 = vld [vmem:[%s8875_s4 + $0x18] sm:$0xff]  }
  0x3f   : > { %v886_v59 = vshll.u32 %v5635_v48, 16  ;;  %1083 = vst [vmem:[#allocation2 + $0x10] sm:$0xf] %v710_v56  ;;  %v893_v61 = vshrl.u32 %v5636_v49, 16  ;;  %v896_v36 = vshll.u32 %v5636_v49, 16  ;;  %v428_v63 = vmul.f32 %v5733_v50, %v6879_v9 }
  0x40   : > { %v429_v0 = vmul.f32 %v5734_v54, %v6879_v9  ;;  %v720_v2 = vsel %vm6957_vm4, %v711_v57, %v7051_v52  ;;  %v885_v3 = vrot.slane %v883_v58, 6  ;;  %v5698_v5 = vunpack.c.h.bf16 %v5850_v39  ;;  %v296_v39 = vld [vmem:[%s8874_s3 + $0x28] sm:$0xff] }
  0x41   : > { %v888_v4 = vrot.slane %v886_v59, 7  ;;  %v6624_v6 = vld [vmem:[#allocation2 + $0x8] sm:$0xff]   ;;  %1084 = vst [vmem:[#allocation2 + $0x14] sm:$0xf] %v720_v2  ;;  %6172 = vmatpush3.bf16.msra.mxu1 %v6626_v33  ;;  %v895_v7 = vrot.slane %v893_v61, 6  ;;  %v898_v1 = vrot.slane %v896_v36, 7  ;;  %v471_v10 = vadd.f32 %v6884_v15, %v428_v63 }
  0x42   : > { %v472_v11 = vadd.f32 %v6884_v15, %v429_v0  ;;  %6173 = vmatprep.subr.bf16.mxu1 %v6631_v60  ;;  %v410_v14 = vmul.f32 %v5697_v55, %v6879_v9  ;;  %v411_v16 = vmul.f32 %v5698_v5, %v6879_v9  ;;  %v721_v17 = vrot.slane %v7051_v52, 4  ;;  %v315_v52 = vld [vmem:[%s8874_s3 + $0xc0] sm:$0xff] }
  0x43   : > { %v889_v13 = vor.u32 %v888_v4, %v885_v3  ;;  %v1292_v19 = vshll.u32 %v6624_v6, 16  ;;  %v1296_v20 = vshrl.u32 %v6624_v6, 16  ;;  %v7079_v21 = vor.u32 %v898_v1, %v895_v7  ;;  %v6645_v4 = vld [vmem:[%s8875_s4 + $0x10] sm:$0xff]  }
  0x44   : > { %v507_v24 = vmax.f32 %v471_v10, 0.0  ;;  %v508_v31 = vmax.f32 %v472_v11, 0.0  ;;  %v453_v32 = vadd.f32 %v6884_v15, %v410_v14  ;;  %v454_v40 = vadd.f32 %v6884_v15, %v411_v16  ;;  %v6630_v14 = vld [vmem:[%s8875_s4 + $0xb0] sm:$0xff]  }
  0x45   : > { %v890_v29 = vsel %vm6957_vm4, %v881_v37, %v889_v13  ;;  %v891_v30 = vrot.slane %v889_v13, 4  ;;  %v1294_v33 = vrot.slane %v1292_v19, 1  ;;  %v901_v35 = vrot.slane %v7079_v21, 4  ;;  %6174 = vmatpush3.bf16.msra.mxu1 %v6631_v60 }
  0x46   : > { %1101 = vst [vmem:[#allocation2 + $0x58] sm:$0xf] %v890_v29  ;;  %v543_v34 = vmul.f32 %v507_v24, %v313_v27  ;;  %v544_v42 = vmul.f32 %v508_v31, %v314_v8  ;;  %v489_v43 = vmax.f32 %v453_v32, 0.0  ;;  %v5701_v45 = vunpack.c.l.bf16 %v7085_v26  ;;  %6175 = vmatprep.subr.bf16.mxu1 %v6635_v18 }
  0x47   : > { %v900_v37 = vsel %vm6957_vm4, %v891_v30, %v7079_v21  ;;  %v1295_v48 = vsel %vm1283_vm7, %v7017_v44, %v1294_v33  ;;  %v1298_v49 = vor.u32 %v1296_v20, %v1294_v33  ;;  %v490_v54 = vmax.f32 %v454_v40, 0.0  ;;  %v6649_v20 = vld [vmem:[%s8875_s4 + $0x8] sm:$0xff]  }
  0x48   : > { %1102 = vst [vmem:[#allocation2 + $0x5c] sm:$0xf] %v900_v37  ;;  %v5637_v50 = vpack.c.bf16 %v543_v34, %v543_v34  ;;  %6133 = vmatprep.mubr.bf16.mxu0 %v1295_v48  ;;  %v6625_v55 = vld [vmem:[#allocation2 + $0x10] sm:$0xff]   ;;  %v5638_v56 = vpack.c.bf16 %v544_v42, %v544_v42  ;;  %v525_v57 = vmul.f32 %v489_v43, %v295_v25  ;;  %v5702_v58 = vunpack.c.h.bf16 %v7085_v26 }
  0x49   : > { %v412_v59 = vmul.f32 %v5701_v45, %v6879_v9  ;;  %v526_v36 = vmul.f32 %v490_v54, %v296_v39  ;;  %v5737_v63 = vunpack.c.l.bf16 %v7098_v12  ;;  %6176 = vmatpush3.bf16.msra.mxu1 %v6635_v18  ;;  %v1300_v0 = vshll.u32 %v6625_v55, 16  ;;  %v297_v37 = vld [vmem:[%s8874_s3 + $0x30] sm:$0xff]  ;;  %v298_v45 = vld [vmem:[%s8874_s3 + $0x38] sm:$0xff] }
  0x4a   : > { %v903_v60 = vshrl.u32 %v5637_v50, 16  ;;  %v906_v61 = vshll.u32 %v5637_v50, 16  ;;  %v913_v44 = vshrl.u32 %v5638_v56, 16  ;;  %v916_v2 = vshll.u32 %v5638_v56, 16  ;;  %6177 = vmatprep.subr.bf16.mxu1 %v6640_v46 }
  0x4b   : > { %v5619_v3 = vpack.c.bf16 %v525_v57, %v525_v57  ;;  %v5620_v6 = vpack.c.bf16 %v526_v36, %v526_v36  ;;  %v1304_v7 = vshrl.u32 %v6625_v55, 16  ;;  %v1302_v1 = vrot.slane %v1300_v0, 1  ;;  %v7150_v57 = vld [vmem:[%s6868_s12 + $0x20] sm:$0xff]  }
  0x4c   : > { %v905_v27 = vrot.slane %v903_v60, 6  ;;  %v908_v5 = vrot.slane %v906_v61, 7  ;;  %v915_v8 = vrot.slane %v913_v44, 6  ;;  %v918_v10 = vrot.slane %v916_v2, 7 }
  0x4d   : > { %v723_v11 = vshrl.u32 %v5619_v3, 16  ;;  %v726_v16 = vshll.u32 %v5619_v3, 16  ;;  %v733_v18 = vshrl.u32 %v5620_v6, 16  ;;  %v736_v19 = vshll.u32 %v5620_v6, 16  ;;  %6178 = vmatpush3.bf16.msra.mxu1 %v6640_v46 }
  0x4e   : > { %v909_v13 = vor.u32 %v908_v5, %v905_v27  ;;  %v1303_v21 = vsel %vm1283_vm7, %v1298_v49, %v1302_v1  ;;  %v7122_v25 = vor.u32 %v918_v10, %v915_v8  ;;  %v7124_v29 = vor.u32 %v1304_v7, %v1302_v1  ;;  %6179 = vmatprep.subr.bf16.mxu1 %v6645_v4  ;;  %v5861_v49 = vld [vmem:[%s6868_s12 + $0x68] sm:$0xff]   ;;  %v6638_v27 = vld [vmem:[%s8875_s4 + $0xa0] sm:$0xff]  }
  0x4f   : > { %v6628_v24 = vld [vmem:[#allocation2 + $0x58] sm:$0xff]   ;;  %v725_v26 = vrot.slane %v723_v11, 6  ;;  %6134 = vmatmul.mubr.bf16.vlgmr.msra.gmra.mxu0 %v1303_v21  ;;  %v728_v32 = vrot.slane %v726_v16, 7  ;;  %v735_v33 = vrot.slane %v733_v18, 6  ;;  %v738_v40 = vrot.slane %v736_v19, 7 }
  0x50   : > { %v910_v30 = vsel %vm6957_vm4, %v901_v35, %v909_v13  ;;  %v911_v31 = vrot.slane %v909_v13, 4  ;;  %6222 = vmatpush3.bf16.msra.mxu0 %v6970_v38  ;;  %v1372_v34 = vshll.u32 %v6628_v24, 16  ;;  %v1376_v39 = vshrl.u32 %v6628_v24, 16  ;;  %v6634_v35 = vld [vmem:[%s8875_s4 + $0xa8] sm:$0xff]  }
  0x51   : > { %1103 = vst [vmem:[#allocation2 + $0x60] sm:$0xf] %v910_v30  ;;  %v413_v42 = vmul.f32 %v5702_v58, %v6879_v9  ;;  %6223 = vmatprep.subr.bf16.mxu0 %v6630_v14  ;;  %v729_v38 = vor.u32 %v728_v32, %v725_v26  ;;  %v455_v46 = vadd.f32 %v6884_v15, %v412_v59  ;;  %v5738_v48 = vunpack.c.h.bf16 %v7098_v12  ;;  %v6653_v58 = vld [vmem:[%s8875_s4] sm:$0xff]   ;;  %v6642_v32 = vld [vmem:[%s8875_s4 + $0x98] sm:$0xff]  }
  0x52   : > { %v920_v43 = vsel %vm6957_vm4, %v911_v31, %v7122_v25  ;;  %6180 = vmatpush3.bf16.msra.mxu1 %v6645_v4  ;;  %v1374_v50 = vrot.slane %v1372_v34, 1  ;;  %v7145_v54 = vor.u32 %v738_v40, %v735_v33  ;;  %v430_v56 = vmul.f32 %v5737_v63, %v6879_v9 }
  0x53   : > { %1104 = vst [vmem:[#allocation2 + $0x64] sm:$0xf] %v920_v43  ;;  %v456_v55 = vadd.f32 %v6884_v15, %v413_v42  ;;  %6181 = vmatprep.subr.bf16.mxu1 %v6649_v20  ;;  %v730_v12 = vsel %vm6957_vm4, %v721_v17, %v729_v38  ;;  %v731_v59 = vrot.slane %v729_v38, 4  ;;  %v491_v60 = vmax.f32 %v455_v46, 0.0 }
  0x54   : > { %v431_v61 = vmul.f32 %v5738_v48, %v6879_v9  ;;  %v1375_v36 = vsel %vm1283_vm7, %v7053_v53, %v1374_v50  ;;  %v7162_v63 = vor.u32 %v1376_v39, %v1374_v50  ;;  %6224 = vmatpush3.bf16.msra.mxu0 %v6630_v14  ;;  %1085 = vst [vmem:[#allocation2 + $0x18] sm:$0xf] %v730_v12  ;;  %v741_v44 = vrot.slane %v7145_v54, 4  ;;  %v316_v53 = vld [vmem:[%s8874_s3 + $0xc8] sm:$0xff]  ;;  %v6655_v14 = vld [vmem:[%s8875_s4 + $0xf8] sm:$0xff]   ;;  %v6646_v48 = vld [vmem:[%s8875_s4 + $0x90] sm:$0xff]  }
  0x55   : > { %v492_v0 = vmax.f32 %v456_v55, 0.0  ;;  %6153 = vmatprep.mubr.bf16.mxu1 %v1375_v36  ;;  %v740_v17 = vsel %vm6957_vm4, %v731_v59, %v7145_v54  ;;  %v527_v2 = vmul.f32 %v491_v60, %v297_v37  ;;  %6225 = vmatprep.subr.bf16.mxu0 %v6634_v35  ;;  %v473_v3 = vadd.f32 %v6884_v15, %v430_v56  ;;  %v7208_v60 = vld [vmem:[%s8873_s2] ss:$0 sm:$0xff] }
  0x56   : > { %v921_v4 = vrot.slane %v7122_v25, 4  ;;  %1086 = vst [vmem:[#allocation2 + $0x1c] sm:$0xf] %v740_v17  ;;  %v474_v6 = vadd.f32 %v6884_v15, %v431_v61  ;;  %v5741_v7 = vunpack.c.l.bf16 %v5861_v49  ;;  %v5742_v1 = vunpack.c.h.bf16 %v5861_v49  ;;  %6182 = vmatpush3.bf16.msra.mxu1 %v6649_v20  ;;  %v6652_v25 = vld [vmem:[%s8875_s4 + $0x80] sm:$0xff]  }
  0x57   : > { %v528_v5 = vmul.f32 %v492_v0, %v298_v45  ;;  %v5621_v8 = vpack.c.bf16 %v527_v2, %v527_v2  ;;  %v509_v10 = vmax.f32 %v473_v3, 0.0  ;;  %v5705_v11 = vunpack.c.l.bf16 %v7150_v57  ;;  %6183 = vmatprep.subr.bf16.mxu1 %v6653_v58  ;;  %v317_v2 = vld [vmem:[%s8874_s3 + $0xd0] sm:$0xff] }
  0x58   : > { %v5706_v13 = vunpack.c.h.bf16 %v7150_v57  ;;  %6226 = vmatpush3.bf16.msra.mxu0 %v6634_v35  ;;  %v510_v18 = vmax.f32 %v474_v6, 0.0  ;;  %v432_v19 = vmul.f32 %v5741_v7, %v6879_v9  ;;  %v433_v21 = vmul.f32 %v5742_v1, %v6879_v9  ;;  %v5853_v1 = vld [vmem:[%s6868_s12 + $0x28] sm:$0xff]  }
  0x59   : > { %v5622_v16 = vpack.c.bf16 %v528_v5, %v528_v5  ;;  %v743_v20 = vshrl.u32 %v5621_v8, 16  ;;  %v746_v26 = vshll.u32 %v5621_v8, 16  ;;  %v545_v30 = vmul.f32 %v509_v10, %v315_v52  ;;  %6227 = vmatprep.subr.bf16.mxu0 %v6638_v27 }
  0x5a   : > { %v7187_v24 = vld [vmem:[#allocation2 + $0x60] sm:$0xff]   ;;  %v414_v31 = vmul.f32 %v5705_v11, %v6879_v9  ;;  %v546_v39 = vmul.f32 %v510_v18, %v316_v53  ;;  %v475_v40 = vadd.f32 %v6884_v15, %v432_v19  ;;  %6184 = vmatpush3.bf16.msra.mxu1 %v6653_v58  ;;  %v476_v61 = vadd.f32 %v7208_v60, %v433_v21  ;;  %v318_v53 = vld [vmem:[%s8874_s3 + $0xd8] sm:$0xff] }
  0x5b   : > { %v753_v33 = vshrl.u32 %v5622_v16, 16  ;;  %v756_v34 = vshll.u32 %v5622_v16, 16  ;;  %v1380_v37 = vshll.u32 %v7187_v24, 16  ;;  %v745_v42 = vrot.slane %v743_v20, 6  ;;  %6273 = vmatprep.subr.bf16.mxu1 %v6655_v14  ;;  %v7236_v14 = vld [vmem:[%s8872_s1] ss:$0 sm:$0xff] }
  0x5c   : > { %v748_v35 = vrot.slane %v746_v26, 7  ;;  %v5639_v43 = vpack.c.bf16 %v545_v30, %v545_v30  ;;  %v5640_v46 = vpack.c.bf16 %v546_v39, %v546_v39  ;;  %v1384_v9 = vshrl.u32 %v7187_v24, 16  ;;  %6228 = vmatpush3.bf16.msra.mxu0 %v6638_v27 }
  0x5d   : > { %v755_v38 = vrot.slane %v753_v33, 6  ;;  %v758_v45 = vrot.slane %v756_v34, 7  ;;  %v7199_v49 = vrot.slane %v1380_v37, 1  ;;  %v7201_v15 = vld [vmem:[#allocation2 + $0x18] sm:$0xff]   ;;  %6229 = vmatprep.subr.bf16.mxu0 %v6642_v32  ;;  %v511_v10 = vmax.f32 %v475_v40, 0.0  ;;  %v300_v40 = vld [vmem:[%s8874_s3 + $0x48] sm:$0xff] }
  0x5e   : > { %v749_v50 = vor.u32 %v748_v35, %v745_v42  ;;  %v923_v55 = vshrl.u32 %v5639_v43, 16  ;;  %v926_v56 = vshll.u32 %v5639_v43, 16  ;;  %v933_v12 = vshrl.u32 %v5640_v46, 16 }
  0x5f   : > { %v7203_v58 = vor.u32 %v758_v45, %v755_v38  ;;  %v936_v59 = vshll.u32 %v5640_v46, 16  ;;  %v1383_v36 = vsel %vm1283_vm7, %v7162_v63, %v7199_v49  ;;  %v1308_v0 = vshll.u32 %v7201_v15, 16  ;;  %v6648_v63 = vld [vmem:[%s8875_s4 + $0x88] sm:$0xff]   ;;  %v7266_v45 = vld [vmem:[%s6868_s12 + $0x70] sm:$0xff]   ;;  %v7271_v46 = vld [vmem:[%s8875_s4 + $0x138] sm:$0xff]  }
  0x60   : > { %v750_v52 = vsel %vm6957_vm4, %v741_v44, %v749_v50  ;;  %v751_v17 = vrot.slane %v749_v50, 4  ;;  %6154 = vmatmul.mubr.bf16.gmra.mxu1 %v1383_v36  ;;  %v1312_v54 = vshrl.u32 %v7201_v15, 16  ;;  %v925_v3 = vrot.slane %v923_v55, 6  ;;  %6230 = vmatpush3.bf16.msra.mxu0 %v6642_v32 }
  0x61   : > { %1087 = vst [vmem:[#allocation2 + $0x20] sm:$0xf] %v750_v52  ;;  %v928_v27 = vrot.slane %v926_v56, 7  ;;  %v935_v44 = vrot.slane %v933_v12, 6  ;;  %v1310_v5 = vrot.slane %v1308_v0, 1  ;;  %v938_v7 = vrot.slane %v936_v59, 7  ;;  %6231 = vmatprep.subr.bf16.mxu0 %v6646_v48 }
  0x62   : > { %v760_v6 = vsel %vm6957_vm4, %v751_v17, %v7203_v58  ;;  %v512_v11 = vmax.f32 %v476_v61, 0.0  ;;  %v415_v16 = vmul.f32 %v7236_v14, %v5706_v13  ;;  %v457_v21 = vadd.f32 %v7208_v60, %v414_v31 }
  0x63   : > { %1088 = vst [vmem:[#allocation2 + $0x24] sm:$0xf] %v760_v6  ;;  %v929_v8 = vor.u32 %v928_v27, %v925_v3  ;;  %v1311_v18 = vsel %vm1283_vm7, %v7124_v29, %v1310_v5  ;;  %v939_v19 = vor.u32 %v938_v7, %v935_v44  ;;  %v7246_v20 = vadd.f32 %v7208_v60, %v6903_v28  ;;  %v299_v29 = vld [vmem:[%s8874_s3 + $0x40] sm:$0xff] }
  0x64   : > { %6137 = vmatprep.mubr.bf16.mxu0 %v1311_v18  ;;  %v547_v57 = vmul.f32 %v511_v10, %v317_v2  ;;  %v548_v32 = vmul.f32 %v512_v11, %v318_v53  ;;  %6232 = vmatpush3.bf16.msra.mxu0 %v6646_v48  ;;  %v1314_v13 = vor.u32 %v1312_v54, %v1310_v5  ;;  %v493_v33 = vmax.f32 %v457_v21, 0.0 }
  0x65   : > { %v930_v26 = vsel %vm6957_vm4, %v921_v4, %v929_v8  ;;  %v931_v30 = vrot.slane %v929_v8, 4  ;;  %v941_v31 = vrot.slane %v939_v19, 4  ;;  %v458_v28 = vadd.f32 %v7208_v60, %v415_v16  ;;  %6233 = vmatprep.subr.bf16.mxu0 %v6648_v63 }
  0x66   : > { %1105 = vst [vmem:[#allocation2 + $0x68] sm:$0xf] %v930_v26  ;;  %v5641_v34 = vpack.c.bf16 %v547_v57, %v547_v57  ;;  %v5642_v39 = vpack.c.bf16 %v548_v32, %v548_v32  ;;  %v5709_v37 = vunpack.c.l.bf16 %v5853_v1  ;;  %v529_v35 = vmul.f32 %v493_v33, %v299_v29  ;;  %v301_v29 = vld [vmem:[%s8874_s3 + $0x50] sm:$0xff] }
  0x67   : > { %v940_v4 = vsel %vm6957_vm4, %v931_v30, %v939_v19  ;;  %v494_v42 = vmax.f32 %v458_v28, 0.0  ;;  %v761_v43 = vrot.slane %v7203_v58, 4  ;;  %v5710_v38 = vunpack.c.h.bf16 %v5853_v1 }
  0x68   : > { %1106 = vst [vmem:[#allocation2 + $0x6c] sm:$0xf] %v940_v4  ;;  %v943_v48 = vshrl.u32 %v5641_v34, 16  ;;  %v946_v50 = vshll.u32 %v5641_v34, 16  ;;  %v953_v55 = vshrl.u32 %v5642_v39, 16  ;;  %v956_v56 = vshll.u32 %v5642_v39, 16  ;;  %6234 = vmatpush3.bf16.msra.mxu0 %v6648_v63 }
  0x69   : > { %v530_v59 = vmul.f32 %v494_v42, %v300_v40  ;;  %v5623_v61 = vpack.c.bf16 %v529_v35, %v529_v35  ;;  %v416_v36 = vmul.f32 %v7236_v14, %v5709_v37  ;;  %v417_v58 = vmul.f32 %v7236_v14, %v5710_v38  ;;  %6235 = vmatprep.subr.bf16.mxu0 %v6652_v25  ;;  %v5863_v4 = vld [vmem:[%s6868_s12 + $0x78] sm:$0xff]  }
  0x6a   : > { %v7273_v12 = vld [vmem:[#allocation2 + $0x20] sm:$0xff]   ;;  %v945_v0 = vrot.slane %v943_v48, 6  ;;  %v948_v52 = vrot.slane %v946_v50, 7  ;;  %v955_v17 = vrot.slane %v953_v55, 6  ;;  %v958_v2 = vrot.slane %v956_v56, 7 }
  0x6b   : > { %v1316_v53 = vshll.u32 %v7273_v12, 16  ;;  %v5624_v54 = vpack.c.bf16 %v530_v59, %v530_v59  ;;  %v763_v3 = vshrl.u32 %v5623_v61, 16  ;;  %v766_v27 = vshll.u32 %v5623_v61, 16 }
  0x6c   : > { %v949_v44 = vor.u32 %v948_v52, %v945_v0  ;;  %v7278_v63 = vor.u32 %v958_v2, %v955_v17  ;;  %v459_v5 = vadd.f32 %v7208_v60, %v416_v36  ;;  %v5745_v6 = vunpack.c.l.bf16 %v7266_v45  ;;  %6236 = vmatpush3.bf16.msra.mxu0 %v6652_v25  ;;  %v302_v25 = vld [vmem:[%s8874_s3 + $0x58] sm:$0xff]  ;;  %v319_v36 = vld [vmem:[%s8874_s3 + $0xe0] sm:$0xff] }
  0x6d   : > { %v1318_v7 = vrot.slane %v1316_v53, 1  ;;  %v765_v1 = vrot.slane %v763_v3, 6  ;;  %v768_v8 = vrot.slane %v766_v27, 7  ;;  %v773_v10 = vshrl.u32 %v5624_v54, 16  ;;  %6325 = vmatprep.subr.bf16.mxu0 %v7271_v46 }
  0x6e   : > { %v950_v16 = vsel %vm6957_vm4, %v941_v31, %v949_v44  ;;  %v951_v18 = vrot.slane %v949_v44, 4  ;;  %v776_v19 = vshll.u32 %v5624_v54, 16  ;;  %v460_v21 = vadd.f32 %v7208_v60, %v417_v58 }
  0x6f   : > { %v7283_v11 = vld [vmem:[#allocation2 + $0x68] sm:$0xff]   ;;  %v1319_v26 = vsel %vm1283_vm7, %v1314_v13, %v1318_v7  ;;  %1107 = vst [vmem:[#allocation2 + $0x70] sm:$0xf] %v950_v16  ;;  %v769_v30 = vor.u32 %v768_v8, %v765_v1  ;;  %v775_v57 = vrot.slane %v773_v10, 6  ;;  %v1320_v32 = vshrl.u32 %v7273_v12, 16 }
  0x70   : > { %6138 = vmatmul.mubr.bf16.gmra.mxu0 %v1319_v26  ;;  %v1386_v31 = vor.u32 %v1384_v9, %v7199_v49  ;;  %v1388_v28 = vshll.u32 %v7283_v11, 16  ;;  %v960_v13 = vsel %vm6957_vm4, %v951_v18, %v7278_v63  ;;  %v778_v33 = vrot.slane %v776_v19, 7 }
  0x71   : > { %1108 = vst [vmem:[#allocation2 + $0x74] sm:$0xf] %v960_v13  ;;  %v770_v34 = vsel %vm6957_vm4, %v761_v43, %v769_v30  ;;  %v771_v39 = vrot.slane %v769_v30, 4  ;;  %v495_v40 = vmax.f32 %v459_v5, 0.0  ;;  %v496_v24 = vmax.f32 %v460_v21, 0.0  ;;  %v320_v5 = vld [vmem:[%s8874_s3 + $0xe8] sm:$0xff] }
  0x72   : > { %v1390_v9 = vrot.slane %v1388_v28, 1  ;;  %v779_v49 = vor.u32 %v778_v33, %v775_v57  ;;  %1089 = vst [vmem:[#allocation2 + $0x28] sm:$0xf] %v770_v34  ;;  %v5746_v37 = vunpack.c.h.bf16 %v7266_v45  ;;  %v434_v42 = vmul.f32 %v7236_v14, %v5745_v6  ;;  %v303_v6 = vld [vmem:[%s8874_s3 + $0x60] sm:$0xff] }
  0x73   : > { %v7308_v35 = vor.u32 %v1320_v32, %v1318_v7  ;;  %v531_v38 = vmul.f32 %v495_v40, %v301_v29  ;;  %v532_v48 = vmul.f32 %v496_v24, %v302_v25  ;;  %v5749_v50 = vunpack.c.l.bf16 %v5863_v4  ;;  %v321_v29 = vld [vmem:[%s8874_s3 + $0xf0] sm:$0xff]  ;;  %v7341_v25 = vld [vmem:[%s6868_s12 + $0x80] sm:$0xff]  }
  0x74   : > { %v1391_v55 = vsel %vm1283_vm7, %v1386_v31, %v1390_v9  ;;  %v1392_v56 = vshrl.u32 %v7283_v11, 16  ;;  %v780_v43 = vsel %vm6957_vm4, %v771_v39, %v779_v49  ;;  %v961_v59 = vrot.slane %v7278_v63, 4 }
  0x75   : > { %6157 = vmatprep.mubr.bf16.mxu1 %v1391_v55  ;;  %1090 = vst [vmem:[#allocation2 + $0x2c] sm:$0xf] %v780_v43  ;;  %v5625_v61 = vpack.c.bf16 %v531_v38, %v531_v38  ;;  %v5626_v45 = vpack.c.bf16 %v532_v48, %v532_v48  ;;  %v435_v58 = vmul.f32 %v7236_v14, %v5746_v37  ;;  %v781_v52 = vrot.slane %v779_v49, 4  ;;  %v322_v37 = vld [vmem:[%s8874_s3 + $0xf8] sm:$0xff] }
  0x76   : > { %v477_v0 = vadd.f32 %v7208_v60, %v434_v42  ;;  %v5750_v17 = vunpack.c.h.bf16 %v5863_v4  ;;  %v436_v2 = vmul.f32 %v7236_v14, %v5749_v50  ;;  %v497_v53 = vmax.f32 %v7246_v20, 0.0 }
  0x77   : > { %v783_v54 = vshrl.u32 %v5625_v61, 16  ;;  %v786_v3 = vshll.u32 %v5625_v61, 16  ;;  %v793_v27 = vshrl.u32 %v5626_v45, 16  ;;  %v796_v44 = vshll.u32 %v5626_v45, 16 }
  0x78   : > { %v7328_v7 = vld [vmem:[#allocation2 + $0x70] sm:$0xff]   ;;  %v478_v1 = vadd.f32 %v7208_v60, %v435_v58  ;;  %v513_v8 = vmax.f32 %v477_v0, 0.0  ;;  %v437_v20 = vmul.f32 %v7236_v14, %v5750_v17  ;;  %v479_v10 = vadd.f32 %v7208_v60, %v436_v2 }
  0x79   : > { %v785_v16 = vrot.slane %v783_v54, 6  ;;  %v788_v18 = vrot.slane %v786_v3, 7  ;;  %v795_v19 = vrot.slane %v793_v27, 6  ;;  %v798_v21 = vrot.slane %v796_v44, 7 }
  0x7a   : > { %v1394_v26 = vor.u32 %v1392_v56, %v1390_v9  ;;  %v1396_v30 = vshll.u32 %v7328_v7, 16  ;;  %v514_v57 = vmax.f32 %v478_v1, 0.0  ;;  %v549_v32 = vmul.f32 %v513_v8, %v319_v36 }
  0x7b   : > { %v789_v31 = vor.u32 %v788_v18, %v785_v16  ;;  %v7337_v28 = vor.u32 %v798_v21, %v795_v19  ;;  %v480_v13 = vadd.f32 %v7208_v60, %v437_v20  ;;  %v515_v33 = vmax.f32 %v479_v10, 0.0 }
  0x7c   : > { %v7343_v4 = vrot.slane %v1396_v30, 1  ;;  %v7345_v34 = vld [vmem:[#allocation2 + $0x28] sm:$0xff]   ;;  %v550_v39 = vmul.f32 %v514_v57, %v320_v5  ;;  %v5643_v40 = vpack.c.bf16 %v549_v32, %v549_v32  ;;  %v533_v24 = vmul.f32 %v497_v53, %v303_v6 }
  0x7d   : > { %v790_v9 = vsel %vm6957_vm4, %v781_v52, %v789_v31  ;;  %v791_v49 = vrot.slane %v789_v31, 4  ;;  %v516_v42 = vmax.f32 %v480_v13, 0.0  ;;  %v551_v38 = vmul.f32 %v515_v33, %v321_v29  ;;  %v7368_v32 = vld [vmem:[%s6868_s12 + $0x88] sm:$0xff]   ;;  %s5275_s12 = sshll.u32 %s8944_s25, 3 }
  0x7e   : > { %v1399_v48 = vsel %vm1283_vm7, %v1394_v26, %v7343_v4  ;;  %v1324_v50 = vshll.u32 %v7345_v34, 16  ;;  %1091 = vst [vmem:[#allocation2 + $0x30] sm:$0xf] %v790_v9  ;;  %v1328_v55 = vshrl.u32 %v7345_v34, 16  ;;  %v5644_v56 = vpack.c.bf16 %v550_v39, %v550_v39  ;;  %s289_s18 = scalar_lea.vmem %s8878_s7, %s5275_s12 }
  0x7f   : > { %6158 = vmatmul.mubr.bf16.gmra.mxu1 %v1399_v48  ;;  %v800_v43 = vsel %vm6957_vm4, %v791_v49, %v7337_v28  ;;  %v963_v61 = vshrl.u32 %v5643_v40, 16  ;;  %v966_v45 = vshll.u32 %v5643_v40, 16  ;;  %v5753_v36 = vunpack.c.l.bf16 %v7341_v25 }
  0x80   : > { %v1326_v58 = vrot.slane %v1324_v50, 1  ;;  %1092 = vst [vmem:[#allocation2 + $0x34] sm:$0xf] %v800_v43  ;;  %v973_v0 = vshrl.u32 %v5644_v56, 16  ;;  %v976_v52 = vshll.u32 %v5644_v56, 16  ;;  %v552_v17 = vmul.f32 %v516_v42, %v322_v37 }
  0x81   : > { %v965_v2 = vrot.slane %v963_v61, 6  ;;  %v968_v53 = vrot.slane %v966_v45, 7  ;;  %v5645_v54 = vpack.c.bf16 %v551_v38, %v551_v38  ;;  %v5627_v3 = vpack.c.bf16 %v533_v24, %v533_v24  ;;  %v1918_v45 = vld [vmem:[#allocation2] sm:$0xe] }
  0x82   : > { %v1327_v27 = vsel %vm1283_vm7, %v7308_v35, %v1326_v58  ;;  %v1330_v44 = vor.u32 %v1328_v55, %v1326_v58  ;;  %v975_v5 = vrot.slane %v973_v0, 6  ;;  %v978_v6 = vrot.slane %v976_v52, 7 }
  0x83   : > { %6141 = vmatprep.mubr.bf16.mxu0 %v1327_v27  ;;  %v969_v1 = vor.u32 %v968_v53, %v965_v2  ;;  %v5646_v8 = vpack.c.bf16 %v552_v17, %v552_v17  ;;  %v983_v20 = vshrl.u32 %v5645_v54, 16  ;;  %v986_v10 = vshll.u32 %v5645_v54, 16 }
  0x84   : > { %v979_v16 = vor.u32 %v978_v6, %v975_v5  ;;  %v801_v18 = vrot.slane %v7337_v28, 4  ;;  %v803_v19 = vshrl.u32 %v5627_v3, 16  ;;  %v806_v21 = vshll.u32 %v5627_v3, 16  ;;  %v324_v3 = vld [vmem:[%s8874_s3 + $0x108] sm:$0xff] }
  0x85   : > { %v970_v26 = vsel %vm6957_vm4, %v961_v59, %v969_v1  ;;  %v971_v35 = vrot.slane %v969_v1, 4  ;;  %v985_v30 = vrot.slane %v983_v20, 6  ;;  %v988_v57 = vrot.slane %v986_v10, 7  ;;  %v6747_v20 = vld [vmem:[#allocation2 + $0x4] sm:$0xf] }
  0x86   : > { %1109 = vst [vmem:[#allocation2 + $0x78] sm:$0xf] %v970_v26  ;;  %v981_v29 = vrot.slane %v979_v16, 4  ;;  %v993_v31 = vshrl.u32 %v5646_v8, 16  ;;  %v996_v13 = vshll.u32 %v5646_v8, 16  ;;  %v805_v33 = vrot.slane %v803_v19, 6 }
  0x87   : > { %v7370_v39 = vld [vmem:[#allocation2 + $0x30] sm:$0xff]   ;;  %v980_v28 = vsel %vm6957_vm4, %v971_v35, %v979_v16  ;;  %v989_v40 = vor.u32 %v988_v57, %v985_v30  ;;  %v808_v63 = vrot.slane %v806_v21, 7  ;;  %v5754_v24 = vunpack.c.h.bf16 %v7341_v25  ;;  %v323_v25 = vld [vmem:[%s8874_s3 + $0x100] sm:$0xff] }
  0x88   : > { %1110 = vst [vmem:[#allocation2 + $0x7c] sm:$0xf] %v980_v28  ;;  %v995_v59 = vrot.slane %v993_v31, 6  ;;  %v998_v9 = vrot.slane %v996_v13, 7  ;;  %v438_v49 = vmul.f32 %v7236_v14, %v5753_v36  ;;  %v5757_v37 = vunpack.c.l.bf16 %v7368_v32  ;;  %v325_v21 = vld [vmem:[%s8874_s3 + $0x110] sm:$0xff] }
  0x89   : > { %v1332_v42 = vshll.u32 %v7370_v39, 16  ;;  %v990_v38 = vsel %vm6957_vm4, %v981_v29, %v989_v40  ;;  %v991_v48 = vrot.slane %v989_v40, 4  ;;  %v809_v50 = vor.u32 %v808_v63, %v805_v33 }
  0x8a   : > { %v1400_v55 = vshrl.u32 %v7328_v7, 16  ;;  %v7381_v56 = vor.u32 %v998_v9, %v995_v59  ;;  %1111 = vst [vmem:[#allocation2 + $0x80] sm:$0xf] %v990_v38  ;;  %v439_v43 = vmul.f32 %v7236_v14, %v5754_v24  ;;  %v481_v61 = vadd.f32 %v7208_v60, %v438_v49 }
  0x8b   : > { %v1334_v36 = vrot.slane %v1332_v42, 1  ;;  %v810_v58 = vsel %vm6957_vm4, %v801_v18, %v809_v50  ;;  %v811_v0 = vrot.slane %v809_v50, 4  ;;  %v440_v27 = vmul.f32 %v7236_v14, %v5757_v37 }
  0x8c   : > { %v1000_v52 = vsel %vm6957_vm4, %v991_v48, %v7381_v56  ;;  %1093 = vst [vmem:[#allocation2 + $0x38] sm:$0xf] %v810_v58  ;;  %v482_v17 = vadd.f32 %v7208_v60, %v439_v43  ;;  %v517_v2 = vmax.f32 %v481_v61, 0.0  ;;  %v1402_v8 = vor.u32 %v1400_v55, %v7343_v4  ;;  %v7413_v4 = vld [vmem:[#allocation2 + $0x8] sm:$0xff]  }
  0x8d   : > { %v1335_v53 = vsel %vm1283_vm7, %v1330_v44, %v1334_v36  ;;  %1112 = vst [vmem:[#allocation2 + $0x84] sm:$0xf] %v1000_v52  ;;  %v820_v54 = vsel %vm6957_vm4, %v811_v0, %v6953_v22  ;;  %v483_v44 = vadd.f32 %v7208_v60, %v440_v27  ;;  %v5381_v10 = vcombine.low %v1918_v45, %v6747_v20 }
  0x8e   : > { %6142 = vmatmul.mubr.bf16.gmra.mxu0 %v1335_v53  ;;  %1094 = vst [vmem:[#allocation2 + $0x3c] sm:$0xf] %v820_v54  ;;  %v518_v5 = vmax.f32 %v482_v17, 0.0  ;;  %v553_v6 = vmul.f32 %v517_v2, %v323_v25  ;;  %v1336_v22 = vshrl.u32 %v7370_v39, 16  ;;  %v1001_v19 = vrot.slane %v7381_v56, 4 }
  0x8f   : > { %v7402_v1 = vld [vmem:[#allocation2 + $0x78] sm:$0xff]   ;;  %v519_v30 = vmax.f32 %v483_v44, 0.0  ;;  %v1941_v60 = vrot.slane %v7413_v4, 1  ;;  %v1940_v28 = vrot.slane %v5381_v10, 1  ;;  %vm4483_vm12 = vcmask 1044480  }
  0x90   : > { %v554_v16 = vmul.f32 %v518_v5, %v324_v3  ;;  %v5647_v18 = vpack.c.bf16 %v553_v6, %v553_v6  ;;  %v1404_v26 = vshll.u32 %v7402_v1, 16  ;;  %v1408_v35 = vshrl.u32 %v7402_v1, 16 }
  0x91   : > { %v555_v33 = vmul.f32 %v519_v30, %v325_v21  ;;  %v1338_v37 = vor.u32 %v1336_v22, %v1334_v36  ;;  %v1942_v20 = vsel %vm1939_vm9, %v1940_v28, %v1941_v60  ;;  %vm4012_vm13 = vsmask.f32 5376 }
  0x92   : > { %v5648_v57 = vpack.c.bf16 %v554_v16, %v554_v16  ;;  %v1003_v29 = vshrl.u32 %v5647_v18, 16  ;;  %v1006_v31 = vshll.u32 %v5647_v18, 16  ;;  %v1406_v13 = vrot.slane %v1404_v26, 1  ;;  %v6749_v16 = vld [vmem:[#allocation2 + $0x10] sm:$0xff]  }
  0x93   : > { %v5649_v38 = vpack.c.bf16 %v555_v33, %v555_v33  ;;  %v1943_v18 = vrot.slane %v6749_v16, 1  ;;  %vm4997_vm14 = vcmask 1040384  }
  0x94   : > { %v7416_v40 = vld [vmem:[#allocation2 + $0x80] sm:$0xff]   ;;  %v1005_v63 = vrot.slane %v1003_v29, 6  ;;  %v1008_v24 = vrot.slane %v1006_v31, 7  ;;  %v1013_v59 = vshrl.u32 %v5648_v57, 16  ;;  %v1407_v9 = vsel %vm1283_vm7, %v1402_v8, %v1406_v13 }
  0x95   : > { %v7419_v49 = vld [vmem:[#allocation2 + $0x38] sm:$0xff]   ;;  %v1016_v42 = vshll.u32 %v5648_v57, 16  ;;  %6161 = vmatprep.mubr.bf16.mxu1 %v1407_v9  ;;  %v1410_v48 = vor.u32 %v1408_v35, %v1406_v13  ;;  %v1412_v50 = vshll.u32 %v7416_v40, 16  ;;  %v1023_v45 = vshrl.u32 %v5649_v38, 16 }
  0x96   : > { %v1009_v55 = vor.u32 %v1008_v24, %v1005_v63  ;;  %v1015_v56 = vrot.slane %v1013_v59, 6  ;;  %v1340_v25 = vshll.u32 %v7419_v49, 16  ;;  %v1344_v43 = vshrl.u32 %v7419_v49, 16  ;;  %v6660_v24 = vld [vmem:[%s8875_s4 + $0x128] sm:$0xff]  }
  0x97   : > { %v1018_v61 = vrot.slane %v1016_v42, 7  ;;  %v1414_v58 = vrot.slane %v1412_v50, 1  ;;  %v1026_v36 = vshll.u32 %v5649_v38, 16  ;;  %v1025_v53 = vrot.slane %v1023_v45, 6  ;;  %v6750_v45 = vld [vmem:[%s8875_s4 + $0xf8] sm:$0xff]  }
  0x98   : > { %v1010_v0 = vsel %vm6957_vm4, %v1001_v19, %v1009_v55  ;;  %v1011_v52 = vrot.slane %v1009_v55, 4  ;;  %v1342_v17 = vrot.slane %v1340_v25, 1  ;;  %v1945_v19 = vrot.slane %v7201_v15, 1  ;;  %v6664_v55 = vld [vmem:[%s8875_s4 + $0x118] sm:$0xff]   ;;  %v6657_v25 = vld [vmem:[%s8875_s4 + $0xf0] sm:$0xff]  }
  0x99   : > { %v1019_v2 = vor.u32 %v1018_v61, %v1015_v56  ;;  %1113 = vst [vmem:[#allocation2 + $0x88] sm:$0xf] %v1010_v0  ;;  %v1415_v54 = vsel %vm1283_vm7, %v1410_v48, %v1414_v58  ;;  %v1028_v3 = vrot.slane %v1026_v36, 7  ;;  %v1416_v21 = vshrl.u32 %v7416_v40, 16  ;;  %v6662_v48 = vld [vmem:[%s8875_s4 + $0x120] sm:$0xff]   ;;  %v6666_v61 = vld [vmem:[%s8875_s4 + $0x110] sm:$0xff]  }
  0x9a   : > { %6162 = vmatmul.mubr.bf16.gmra.mxu1 %v1415_v54  ;;  %v1343_v27 = vsel %vm1283_vm7, %v1338_v37, %v1342_v17  ;;  %v1346_v5 = vor.u32 %v1344_v43, %v1342_v17  ;;  %v1944_v35 = vsel %vm1939_vm9, %v1941_v60, %v1943_v18  ;;  %v1946_v30 = vsel %vm1939_vm9, %v1943_v18, %v1945_v19  ;;  %v6668_v17 = vld [vmem:[%s8875_s4 + $0x108] sm:$0xff]  }
  0x9b   : > { %v1020_v6 = vsel %vm6957_vm4, %v1011_v52, %v1019_v2  ;;  %v1021_v8 = vrot.slane %v1019_v2, 4  ;;  %6145 = vmatprep.mubr.bf16.mxu0 %v1343_v27  ;;  %v7430_v44 = vor.u32 %v1028_v3, %v1025_v53  ;;  %v1418_v57 = vor.u32 %v1416_v21, %v1414_v58  ;;  %v6659_v58 = vld [vmem:[%s8875_s4 + $0xe8] sm:$0xff]   ;;  %v6661_v53 = vld [vmem:[%s8875_s4 + $0xe0] sm:$0xff]   ;;  %v326_v21 = vld [vmem:[%s8874_s3 + $0x118] sm:$0xff] }
  0x9c   : > { %1114 = vst [vmem:[#allocation2 + $0x8c] sm:$0xf] %v1020_v6  ;;  %v1351_v10 = vsel %vm1283_vm7, %v1346_v5, %v7022_v51  ;;  %v6658_v51 = vld [vmem:[%s8875_s4 + $0x130] sm:$0xff]   ;;  %v1947_v60 = vrot.slane %v7273_v12, 1  ;;  %v1949_v63 = vrot.slane %v7345_v34, 1  ;;  %v1951_v50 = vrot.slane %v7370_v39, 1 }
  0x9d   : > { %6146 = vmatmul.mubr.bf16.gmra.mxu0 %v1351_v10  ;;  %v1030_v22 = vsel %vm6957_vm4, %v1021_v8, %v7430_v44  ;;  %v1953_v56 = vrot.slane %v7419_v49, 1  ;;  %v7489_v52 = vld [vmem:[#allocation2 + $0x48] sm:$0xff]   ;;  %v5758_v2 = vunpack.c.h.bf16 %v7368_v32  ;;  %v6670_v27 = vld [vmem:[%s8875_s4 + $0x100] sm:$0xff]   ;;  %v6663_v5 = vld [vmem:[%s8875_s4 + $0xd8] sm:$0xff]  }
  0x9e   : > { %1115 = vst [vmem:[#allocation2 + $0x90] sm:$0xf] %v1030_v22  ;;  %6237 = vmatprep.mubr.bf16.mxu0 %v1942_v20  ;;  %v1948_v42 = vsel %vm1939_vm9, %v1945_v19, %v1947_v60  ;;  %v1950_v38 = vsel %vm1939_vm9, %v1947_v60, %v1949_v63  ;;  %v1952_v43 = vsel %vm1939_vm9, %v1949_v63, %v1951_v50  ;;  %v1957_v36 = vrot.slane %v7489_v52, 1  ;;  %v7513_v8 = vld [vmem:[#allocation2 + $0x58] sm:$0xff]   ;;  %v6665_v22 = vld [vmem:[%s8875_s4 + $0xd0] sm:$0xff]  }
  0x9f   : > { %v441_v32 = vmul.f32 %v7236_v14, %v5758_v2  ;;  %v1961_v20 = vrot.slane %v7513_v8, 1  ;;  %v7519_v14 = vld [vmem:[%s8875_s4 + $0x1b8] sm:$0xff]   ;;  %v1965_v60 = vrot.slane %v7283_v11, 1 }
  0xa3   : > { %v7440_v26 = vld [vmem:[#allocation2 + $0x88] sm:$0xff]  }
  0xa4   : > { %v1420_v29 = vshll.u32 %v7440_v26, 16  ;;  %v1424_v31 = vshrl.u32 %v7440_v26, 16 }
  0xa5   : > { %v7449_v13 = vld [vmem:[#allocation2 + $0x90] ss:$0 sps:$4 sm:$0x11]   ;;  %6238 = vmatmul.mubr.bf16.vlgmr.msra.gmra.mxu0 %v1944_v35 }
  0xa6   : > { %v1422_v33 = vrot.slane %v1420_v29, 1  ;;  %6326 = vmatpush3.bf16.msra.mxu0 %v7271_v46  ;;  %6241 = vmatprep.mubr.bf16.mxu0 %v1946_v30  ;;  %v1428_v28 = vshll.u32 %v7449_v13, 16 }
  0xa7   : > { %6327 = vmatprep.subr.bf16.mxu0 %v6658_v51 }
  0xa8   : > { %v1423_v59 = vsel %vm1283_vm7, %v1418_v57, %v1422_v33  ;;  %v1426_v9 = vor.u32 %v1424_v31, %v1422_v33  ;;  %v1430_v37 = vrot.slane %v1428_v28, 1  ;;  %v7540_v57 = vld [vmem:[#allocation2 + $0x60] sm:$0xff]   ;;  %v2257_v31 = vld [vmem:[#allocation2 + $0xc] sm:$0xf]  ;;  %v7545_v33 = vld [vmem:[#allocation2 + $0x18] sm:$0xff]  }
  0xa9   : > { %6165 = vmatprep.mubr.bf16.mxu1 %v1423_v59  ;;  %v1963_v29 = vrot.slane %v7540_v57, 1  ;;  %v3215_v59 = vrot.slane %v7545_v33, 2 }
  0xaa   : > { %6328 = vmatpush3.bf16.msra.mxu0 %v6658_v51  ;;  %v1431_v46 = vsel %vm1283_vm7, %v1426_v9, %v1430_v37  ;;  %v3190_v51 = vld [vmem:[#allocation2 + $0x8] sm:$0xc]  ;;  %v6669_v9 = vld [vmem:[%s8875_s4 + $0xc0] sm:$0xff]  }
  0xab   : > { %6329 = vmatprep.subr.bf16.mxu0 %v6660_v24  ;;  %6166 = vmatmul.mubr.bf16.gmra.mxu1 %v1431_v46  ;;  %v5474_v28 = vcombine.low %v3190_v51, %v2257_v31  ;;  %v7553_v37 = vld [vmem:[#allocation2 + $0x20] sm:$0xff]   ;;  %v1964_v46 = vsel %vm1939_vm9, %v1961_v20, %v1963_v29 }
  0xac   : > { %6185 = vmatprep.mubr.bf16.mxu1 %v6993_v47  ;;  %v1954_v47 = vsel %vm1939_vm9, %v1951_v50, %v1953_v56 }
  0xad   : > { %6242 = vmatmul.mubr.bf16.gmra.mxu0 %v1948_v42  ;;  %v3212_v42 = vrot.slane %v5474_v28, 2 }
  0xae   : > { %6245 = vmatprep.mubr.bf16.mxu0 %v1950_v38  ;;  %6330 = vmatpush3.bf16.msra.mxu0 %v6660_v24  ;;  %v7556_v38 = vld [vmem:[#allocation2 + $0x28] sm:$0xff]  }
  0xaf   : > { %6331 = vmatprep.subr.bf16.mxu0 %v6662_v48 }
  0xb2   : > { %6332 = vmatpush3.bf16.msra.mxu0 %v6662_v48 }
  0xb3   : > { %6333 = vmatprep.subr.bf16.mxu0 %v6664_v55  ;;  %6186 = vmatmul.mubr.bf16.vlgmr.msra.gmra.mxu1 %v7413_v4  ;;  %v7486_v4 = vld [vmem:[#allocation2 + $0x40] sm:$0xff]  }
  0xb4   : > { %6274 = vmatpush3.bf16.msra.mxu1 %v6750_v45  ;;  %6189 = vmatprep.mubr.bf16.mxu1 %v6749_v16  ;;  %v1955_v0 = vrot.slane %v7486_v4, 1  ;;  %v586_v16 = vld [vmem:[#allocation2 + $0x98] sm:$0xe] }
  0xb5   : > { %6275 = vmatprep.subr.bf16.mxu1 %v6657_v25  ;;  %6246 = vmatmul.mubr.bf16.gmra.mxu0 %v1952_v43  ;;  %v587_v30 = vsel %vm7027_vm8, 0, %v586_v16  ;;  %v3217_v43 = vrot.slane %v7553_v37, 2  ;;  %v7603_v16 = vld [vmem:[#allocation2 + $0x48] sm:$0xff]  }
  0xb6   : > { %6249 = vmatprep.mubr.bf16.mxu0 %v1954_v47  ;;  %6334 = vmatpush3.bf16.msra.mxu0 %v6664_v55  ;;  %v1956_v54 = vsel %vm1939_vm9, %v1953_v56, %v1955_v0  ;;  %v1958_v3 = vsel %vm1939_vm9, %v1955_v0, %v1957_v36  ;;  %588 = vst [vmem:[#allocation2 + $0x98] sm:$0xe] %v587_v30  ;;  %v7563_v56 = vld [vmem:[#allocation2 + $0x30] sm:$0xff]   ;;  %v1031_v47 = vrot.slane %v7430_v44, 4  ;;  %v7577_v0 = vld [vmem:[%s8875_s4 + $0x178] sm:$0xff]   ;;  %v1971_v30 = vrot.slane %v7416_v40, 1 }
  0xb7   : > { %6335 = vmatprep.subr.bf16.mxu0 %v6666_v61  ;;  %v1966_v55 = vsel %vm1939_vm9, %v1963_v29, %v1965_v60  ;;  %v3221_v44 = vrot.slane %v7563_v56, 2 }
  0xb8   : > { %6276 = vmatpush3.bf16.msra.mxu1 %v6657_v25 }
  0xb9   : > { %6277 = vmatprep.subr.bf16.mxu1 %v6659_v58 }
  0xba   : > { %6336 = vmatpush3.bf16.msra.mxu0 %v6666_v61  ;;  %v7571_v61 = vld [vmem:[#allocation2 + $0x38] sm:$0xff]  }
  0xbb   : > { %6190 = vmatmul.mubr.bf16.gmra.mxu1 %v7201_v15  ;;  %6337 = vmatprep.subr.bf16.mxu0 %v6668_v17  ;;  %v7510_v15 = vld [vmem:[#allocation2 + $0x50] sm:$0xff]  }
  0xbc   : > { %6193 = vmatprep.mubr.bf16.mxu1 %v7273_v12  ;;  %6278 = vmatpush3.bf16.msra.mxu1 %v6659_v58  ;;  %v1959_v6 = vrot.slane %v7510_v15, 1  ;;  %v6755_v12 = vld [vmem:[%s8873_s2] ss:$0 sm:$0xff] }
  0xbd   : > { %6250 = vmatmul.mubr.bf16.gmra.mxu0 %v1956_v54  ;;  %6279 = vmatprep.subr.bf16.mxu1 %v6661_v53  ;;  %v484_v10 = vadd.f32 %v6755_v12, %v441_v32  ;;  %v1969_v54 = vrot.slane %v7402_v1, 1  ;;  %v7598_v12 = vld [vmem:[#allocation2 + $0x40] sm:$0xff]  }
  0xbe   : > { %6253 = vmatprep.mubr.bf16.mxu0 %v1958_v3  ;;  %6338 = vmatpush3.bf16.msra.mxu0 %v6668_v17  ;;  %v1960_v18 = vsel %vm1939_vm9, %v1957_v36, %v1959_v6  ;;  %v1962_v19 = vsel %vm1939_vm9, %v1959_v6, %v1961_v20  ;;  %v7580_v36 = vsel %vm3211_vm10, %v3215_v59, %v3217_v43  ;;  %v2256_v3 = vld [vmem:[#allocation2 + $0x8] sm:$0xe] }
  0xbf   : > { %6339 = vmatprep.subr.bf16.mxu0 %v6670_v27  ;;  %v520_v35 = vmax.f32 %v484_v10, 0.0 }
  0xc0   : > { %6280 = vmatpush3.bf16.msra.mxu1 %v6661_v53  ;;  %v3223_v53 = vrot.slane %v7571_v61, 2 }
  0xc1   : > { %6281 = vmatprep.subr.bf16.mxu1 %v6663_v5  ;;  %v556_v62 = vmul.f32 %v520_v35, %v326_v21  ;;  %v3227_v21 = vrot.slane %v7603_v16, 2 }
  0xc2   : > { %6340 = vmatpush3.bf16.msra.mxu0 %v6670_v27  ;;  %v1117_v27 = vld [vmem:[#allocation2 + $0x98] sm:$0x3]  ;;  %v7595_v20 = vsel %vm3211_vm10, %v3221_v44, %v3223_v53 }
  0xc3   : > { %6194 = vmatmul.mubr.bf16.gmra.mxu1 %v7345_v34  ;;  %6429 = vmatprep.subr.bf16.mxu0 %v7519_v14  ;;  %v6667_v34 = vld [vmem:[%s8875_s4 + $0xc8] sm:$0xff]   ;;  %v5650_v63 = vpack.c.bf16 %v556_v62, %v556_v62 }
  0xc4   : > { %6197 = vmatprep.mubr.bf16.mxu1 %v7370_v39  ;;  %6282 = vmatpush3.bf16.msra.mxu1 %v6663_v5  ;;  %v7543_v39 = vld [vmem:[#allocation2 + $0x10] sm:$0xff]  }
  0xc5   : > { %6254 = vmatmul.mubr.bf16.gmra.mxu0 %v1960_v18  ;;  %6283 = vmatprep.subr.bf16.mxu1 %v6665_v22  ;;  %v3213_v24 = vrot.slane %v7543_v39, 2  ;;  %v1033_v11 = vshrl.u32 %v5650_v63, 16  ;;  %v1036_v48 = vshll.u32 %v5650_v63, 16  ;;  %v2753_v29 = vshll.u32 %v7543_v39, 16 }
  0xc6   : > { %6257 = vmatprep.mubr.bf16.mxu0 %v1962_v19  ;;  %v3225_v19 = vrot.slane %v7598_v12, 2 }
  0xc7   : > { %v7559_v50 = vsel %vm3211_vm10, %v3213_v24, %v3215_v59  ;;  %v7566_v25 = vsel %vm3211_vm10, %v3212_v42, %v3213_v24  ;;  %v1035_v45 = vrot.slane %v1033_v11, 6  ;;  %v1038_v58 = vrot.slane %v1036_v48, 7  ;;  %v7627_v59 = vld [vmem:[#allocation2 + $0x50] sm:$0xff]  }
  0xc8   : > { %6284 = vmatpush3.bf16.msra.mxu1 %v6665_v22  ;;  %v7601_v22 = vcombine.low %v2256_v3, %v2257_v31  ;;  %v7613_v35 = vsel %vm3211_vm10, %v3223_v53, %v3225_v19  ;;  %v7619_v51 = vsel %vm3211_vm10, %v3225_v19, %v3227_v21  ;;  %v1972_v31 = vsel %vm1939_vm9, %v1969_v54, %v1971_v30 }
  0xc9   : > { %6285 = vmatprep.subr.bf16.mxu1 %v6667_v34  ;;  %v1039_v17 = vor.u32 %v1038_v58, %v1035_v45  ;;  %v2755_v24 = vrot.slane %v2753_v29, 2  ;;  %v2759_v42 = vshrl.u32 %v7545_v33, 16  ;;  %v1975_v11 = vrot.slane %v7449_v13, 1 }
  0xca   : > { %v2742_v41 = vshrl.u32 %v7601_v22, 16 }
  0xcb   : > { %6198 = vmatmul.mubr.bf16.gmra.mxu1 %v7419_v49  ;;  %v3219_v49 = vrot.slane %v7556_v38, 2  ;;  %v1040_v5 = vsel %vm6957_vm4, %v1031_v47, %v1039_v17  ;;  %v1041_v6 = vrot.slane %v1039_v17, 4  ;;  %v2768_v47 = vshrl.u32 %v7553_v37, 16  ;;  %v6757_v17 = vld [vmem:[#allocation2 + $0x68] sm:$0xff]  }
  0xcc   : > { %6201 = vmatprep.mubr.bf16.mxu1 %v7486_v4  ;;  %6286 = vmatpush3.bf16.msra.mxu1 %v6667_v34  ;;  %v1967_v4 = vrot.slane %v7328_v7, 1  ;;  %1116 = vst [vmem:[#allocation2 + $0x94] sm:$0xf] %v1040_v5  ;;  %v1973_v34 = vrot.slane %v7440_v26, 1  ;;  %v2744_v62 = vrot.slane %v2742_v41, 1 }
  0xcd   : > { %6258 = vmatmul.mubr.bf16.gmra.mxu0 %v1964_v46  ;;  %6287 = vmatprep.subr.bf16.mxu1 %v6669_v9  ;;  %v7585_v2 = vsel %vm3211_vm10, %v3217_v43, %v3219_v49  ;;  %v7590_v32 = vsel %vm3211_vm10, %v3219_v49, %v3221_v44  ;;  %v1118_v18 = vsel %vm6926_vm3, %v1041_v6, %v1117_v27  ;;  %v3229_v46 = vrot.slane %v7627_v59, 2  ;;  %v7645_v49 = vld [vmem:[#allocation2 + $0x60] sm:$0xff]  }
  0xce   : > { %6261 = vmatprep.mubr.bf16.mxu0 %v1966_v55  ;;  %v1968_v10 = vsel %vm1939_vm9, %v1965_v60, %v1967_v4  ;;  %v1970_v23 = vsel %vm1939_vm9, %v1967_v4, %v1969_v54  ;;  %1119 = vst [vmem:[#allocation2 + $0x98] sm:$0x3] %v1118_v18  ;;  %v1974_v28 = vsel %vm1939_vm9, %v1971_v30, %v1973_v34  ;;  %v2761_v44 = vrot.slane %v2759_v42, 1  ;;  %v7674_v42 = vld [vmem:[#allocation2 + $0x70] sm:$0xff]  }
  0xcf   : > { %v7640_v45 = vsel %vm3211_vm10, %v3227_v21, %v3229_v46  ;;  %v1976_v13 = vsel %vm1939_vm9, %v1973_v34, %v1975_v11  ;;  %v2770_v54 = vrot.slane %v2768_v47, 1  ;;  %v3233_v27 = vrot.slane %v7645_v49, 2  ;;  %v7678_v11 = vld [vmem:[#allocation2 + $0x78] sm:$0xff]  }
  0xd0   : > { %6288 = vmatpush3.bf16.msra.mxu1 %v6669_v9  ;;  %v7630_v9 = vld [vmem:[#allocation2 + $0x58] sm:$0xff]   ;;  %v2780_v18 = vshll.u32 %v7556_v38, 16  ;;  %v2786_v21 = vshrl.u32 %v7563_v56, 16  ;;  %v2789_v30 = vshll.u32 %v7563_v56, 16 }
  0xd1   : > { %6377 = vmatprep.subr.bf16.mxu1 %v7577_v0  ;;  %v3231_v55 = vrot.slane %v7630_v9, 2 }
  0xd2   : > { %v2782_v34 = vrot.slane %v2780_v18, 2  ;;  %v2408_v18 = vrot.slane %v7553_v37, 1 }
  0xd3   : > { %6202 = vmatmul.mubr.bf16.gmra.mxu1 %v7489_v52  ;;  %v2745_v52 = vshll.u32 %v7601_v22, 16  ;;  %v7643_v58 = vsel %vm3211_vm10, %v3229_v46, %v3231_v55  ;;  %v7652_v5 = vsel %vm3211_vm10, %v3231_v55, %v3233_v27  ;;  %v2798_v46 = vshll.u32 %v7571_v61, 16 }
  0xd4   : > { %6205 = vmatprep.mubr.bf16.mxu1 %v7510_v15  ;;  %v2750_v15 = vshrl.u32 %v7543_v39, 16 }
  0xd5   : > { %6262 = vmatmul.mubr.bf16.gmra.mxu0 %v1968_v10  ;;  %v2747_v60 = vrot.slane %v2745_v52, 2  ;;  %v2777_v10 = vshrl.u32 %v7556_v38, 16 }
  0xd6   : > { %6265 = vmatprep.mubr.bf16.mxu0 %v1970_v23  ;;  %v2752_v63 = vrot.slane %v2750_v15, 1  ;;  %v7656_v23 = vld [vmem:[#allocation2 + $0x68] sm:$0xff]  }
  0xd7   : > { %v2748_v48 = vor.u32 %v2747_v60, %v2744_v62  ;;  %v3235_v41 = vrot.slane %v7656_v23, 2  ;;  %v2779_v52 = vrot.slane %v2777_v10, 1  ;;  %v2788_v62 = vrot.slane %v2786_v21, 1 }
  0xd8   : > { %v2756_v43 = vor.u32 %v2755_v24, %v2752_v63  ;;  %v2791_v60 = vrot.slane %v2789_v30, 2  ;;  %v2404_v63 = vrot.slane %v7543_v39, 1  ;;  %v2795_v24 = vshrl.u32 %v7571_v61, 16  ;;  %v6684_v39 = vld [vmem:[%s8875_s4 + $0x1a8] sm:$0xff]  }
  0xd9   : > { %v7663_v15 = vsel %vm3211_vm10, %v3233_v27, %v3235_v41  ;;  %v6689_v27 = vld [vmem:[%s8875_s4 + $0x1a0] sm:$0xff]   ;;  %v2825_v10 = vshll.u32 %v7627_v59, 16 }
  0xda   : > { %v2757_v53 = vsel %vm2740_vm11, %v2748_v48, %v2756_v43  ;;  %v2792_v48 = vor.u32 %v2791_v60, %v2788_v62  ;;  %v2797_v47 = vrot.slane %v2795_v24, 1  ;;  %v2834_v60 = vshll.u32 %v7630_v9, 16  ;;  %v6678_v24 = vld [vmem:[%s8875_s4 + $0x170] sm:$0xff]  }
  0xdb   : > { %6206 = vmatmul.mubr.bf16.gmra.mxu1 %v7513_v8  ;;  %v2762_v8 = vshll.u32 %v7545_v33, 16  ;;  %v2827_v62 = vrot.slane %v2825_v10, 2 }
  0xdc   : > { %6209 = vmatprep.mubr.bf16.mxu1 %v7540_v57  ;;  %v2771_v57 = vshll.u32 %v7553_v37, 16 }
  0xdd   : > { %6266 = vmatmul.mubr.bf16.gmra.mxu0 %v1972_v31  ;;  %v2764_v4 = vrot.slane %v2762_v8, 2  ;;  %v6679_v31 = vld [vmem:[%s8875_s4 + $0x1b0] sm:$0xff]   ;;  %v3237_v8 = vrot.slane %v7674_v42, 2 }
  0xde   : > { %6269 = vmatprep.mubr.bf16.mxu0 %v1974_v28  ;;  %v2773_v3 = vrot.slane %v2771_v57, 2  ;;  %v2403_v28 = vrot.slane %v7601_v22, 1  ;;  %v2807_v22 = vshll.u32 %v7598_v12, 16 }
  0xdf   : > { %v2765_v6 = vor.u32 %v2764_v4, %v2761_v44  ;;  %v7690_v57 = vsel %vm3211_vm10, %v3235_v41, %v3237_v8  ;;  %v2800_v44 = vrot.slane %v2798_v46, 2  ;;  %v2813_v4 = vshrl.u32 %v7603_v16, 16  ;;  %v7709_v41 = vld [vmem:[#allocation2 + $0x88] sm:$0xff]  }
  0xe0   : > { %v2774_v19 = vor.u32 %v2773_v3, %v2770_v54  ;;  %v2405_v55 = vsel %vm1939_vm9, %v2403_v28, %v2404_v63  ;;  %v2809_v3 = vrot.slane %v2807_v22, 2  ;;  %v3243_v28 = vrot.slane %v7709_v41, 2 }
  0xe1   : > { %v2801_v21 = vor.u32 %v2800_v44, %v2797_v47  ;;  %v2815_v30 = vrot.slane %v2813_v4, 1  ;;  %v2410_v46 = vrot.slane %v7556_v38, 1  ;;  %v2840_v44 = vshrl.u32 %v7645_v49, 16  ;;  %v7743_v4 = vld [vmem:[#allocation2 + $0x90] sm:$0xff]  }
  0xe2   : > { %v2775_v29 = vsel %vm2740_vm11, %v2765_v6, %v2774_v19  ;;  %v2861_v47 = vshll.u32 %v7674_v42, 16 }
  0xe3   : > { %6210 = vmatmul.mubr.bf16.gmra.mxu1 %v6757_v17 }
  0xe4   : > { %6213 = vmatprep.mubr.bf16.mxu1 %v7328_v7  ;;  %v2766_v7 = vsel %vm2740_vm11, %v2756_v43, %v2765_v6  ;;  %v2406_v43 = vrot.slane %v7545_v33, 1  ;;  %v2816_v33 = vshll.u32 %v7603_v16, 16  ;;  %v2822_v6 = vshrl.u32 %v7627_v59, 16 }
  0xe5   : > { %6270 = vmatmul.mubr.bf16.gmra.mxu0 %v1976_v13 }
  0xe6   : > { %6341 = vmatprep.mubr.bf16.mxu0 %v2757_v53 }
  0xeb   : > { %6214 = vmatmul.mubr.bf16.gmra.mxu1 %v7402_v1  ;;  %v2783_v1 = vor.u32 %v2782_v34, %v2779_v52  ;;  %v2818_v52 = vrot.slane %v2816_v33, 2  ;;  %v2831_v34 = vshrl.u32 %v7630_v9, 16  ;;  %v3529_v33 = vld [vmem:[#allocation2 + $0x14] sm:$0xf] }
  0xec   : > { %6217 = vmatprep.mubr.bf16.mxu1 %v7416_v40  ;;  %v2804_v40 = vshrl.u32 %v7598_v12, 16 }
  0xed   : > { %6342 = vmatmul.mubr.bf16.vlgmr.msra.gmra.mxu0 %v2766_v7  ;;  %v2784_v13 = vsel %vm2740_vm11, %v2774_v19, %v2783_v1  ;;  %v2793_v53 = vsel %vm2740_vm11, %v2783_v1, %v2792_v48  ;;  %v2407_v19 = vsel %vm1939_vm9, %v2404_v63, %v2406_v43  ;;  %v2409_v63 = vsel %vm1939_vm9, %v2406_v43, %v2408_v18 }
  0xee   : > { %6430 = vmatpush3.bf16.msra.mxu0 %v7519_v14  ;;  %6345 = vmatprep.mubr.bf16.mxu0 %v2775_v29  ;;  %v3239_v14 = vrot.slane %v7678_v11, 2  ;;  %v2806_v54 = vrot.slane %v2804_v40, 1  ;;  %v6693_v29 = vld [vmem:[%s8875_s4 + $0x198] sm:$0xff]   ;;  %v2802_v40 = vsel %vm2740_vm11, %v2792_v48, %v2801_v21  ;;  %v2833_v48 = vrot.slane %v2831_v34, 1 }
  0xef   : > { %6431 = vmatprep.subr.bf16.mxu0 %v6679_v31  ;;  %v2836_v43 = vrot.slane %v2834_v60, 2 }
  0xf0   : > { %v7695_v17 = vsel %vm3211_vm10, %v3237_v8, %v3239_v14  ;;  %v2810_v7 = vor.u32 %v2809_v3, %v2806_v54  ;;  %v2843_v54 = vshll.u32 %v7645_v49, 16  ;;  %v7747_v3 = vld [vmem:[#allocation2 + $0x98] ss:$0 sps:$4 sm:$0x33]  }
  0xf1   : > { %v3247_v34 = vrot.slane %v7747_v3, 2 }
  0xf2   : > { %6432 = vmatpush3.bf16.msra.mxu0 %v6679_v31  ;;  %v2824_v31 = vrot.slane %v2822_v6, 1  ;;  %v2811_v8 = vsel %vm2740_vm11, %v2801_v21, %v2810_v7 }
  0xf3   : > { %6218 = vmatmul.mubr.bf16.gmra.mxu1 %v7440_v26  ;;  %6433 = vmatprep.subr.bf16.mxu0 %v6684_v39  ;;  %v7706_v26 = vld [vmem:[#allocation2 + $0x80] sm:$0xff]  }
  0xf4   : > { %6289 = vmatprep.mubr.bf16.mxu1 %v2405_v55  ;;  %v3241_v37 = vrot.slane %v7706_v26, 2  ;;  %v2819_v55 = vor.u32 %v2818_v52, %v2815_v30  ;;  %v7736_v38 = vor.u32 %v2827_v62, %v2824_v31  ;;  %v7760_v30 = vor.u32 %v2836_v43, %v2833_v48  ;;  %v7769_v62 = vld [vmem:[#allocation2 + $0x18] sm:$0xff]   ;;  %v6706_v48 = vld [vmem:[%s8875_s4 + $0x180] sm:$0xff]  }
  0xf5   : > { %6346 = vmatmul.mubr.bf16.gmra.mxu0 %v2784_v13  ;;  %v6682_v13 = vld [vmem:[%s8875_s4 + $0x168] sm:$0xff]   ;;  %v2849_v52 = vshrl.u32 %v7656_v23, 16  ;;  %v4485_v43 = vrot.slane %v7769_v62, 3 }
  0xf6   : > { %6349 = vmatprep.mubr.bf16.mxu0 %v2793_v53  ;;  %6434 = vmatpush3.bf16.msra.mxu0 %v6684_v39  ;;  %v7723_v1 = vsel %vm3211_vm10, %v3239_v14, %v3241_v37  ;;  %v7728_v22 = vsel %vm3211_vm10, %v3241_v37, %v3243_v28  ;;  %v8879_v39 = vrot.slane %v7563_v56, 1  ;;  %v6697_v14 = vld [vmem:[%s8875_s4 + $0x190] sm:$0xff]   ;;  %v2820_v6 = vsel %vm2740_vm11, %v2810_v7, %v2819_v55 }
  0xf7   : > { %6435 = vmatprep.subr.bf16.mxu0 %v6689_v27  ;;  %v3528_v53 = vld [vmem:[#allocation2 + $0x10] sm:$0xc]  ;;  %v2829_v21 = vsel %vm2740_vm11, %v2819_v55, %v7736_v38  ;;  %v2842_v37 = vrot.slane %v2840_v44, 1 }
  0xf8   : > { %v4462_v7 = vld [vmem:[#allocation2 + $0x10] sm:$0x8]  ;;  %v7767_v31 = vcombine.low %v3528_v53, %v3529_v33 }
  0xfa   : > { %6436 = vmatpush3.bf16.msra.mxu0 %v6689_v27  ;;  %v2413_v27 = vsel %vm1939_vm9, %v2410_v46, %v8879_v39  ;;  %v4014_v44 = vshrl.u32 %v7767_v31, 16  ;;  %v4017_v53 = vshll.u32 %v7767_v31, 16 }
  0xfb   : > { %6290 = vmatmul.mubr.bf16.vlgmr.msra.gmra.mxu1 %v2407_v19  ;;  %6437 = vmatprep.subr.bf16.mxu0 %v6693_v29  ;;  %v3245_v19 = vrot.slane %v7743_v4, 2 }
  0xfc   : > { %6378 = vmatpush3.bf16.msra.mxu1 %v7577_v0  ;;  %6293 = vmatprep.mubr.bf16.mxu1 %v2409_v63  ;;  %v2411_v0 = vsel %vm1939_vm9, %v2408_v18, %v2410_v46  ;;  %v6701_v18 = vld [vmem:[%s8875_s4 + $0x188] sm:$0xff]   ;;  %v5567_v63 = vcombine.low %v4462_v7, %v3529_v33  ;;  %v2852_v46 = vshll.u32 %v7656_v23, 16  ;;  %v6691_v33 = vld [vmem:[%s8875_s4 + $0x158] sm:$0xff]   ;;  %v4019_v7 = vrot.slane %v4017_v53, 3 }
  0xfd   : > { %6379 = vmatprep.subr.bf16.mxu1 %v6678_v24  ;;  %6350 = vmatmul.mubr.bf16.gmra.mxu0 %v2802_v40  ;;  %v7772_v60 = vsel %vm3211_vm10, %v3243_v28, %v3245_v19  ;;  %v2858_v40 = vshrl.u32 %v7674_v42, 16  ;;  %v7779_v55 = vsel %vm3211_vm10, %v3245_v19, %v3247_v34  ;;  %v4016_v34 = vrot.slane %v4014_v44, 2 }
  0xfe   : > { %6353 = vmatprep.mubr.bf16.mxu0 %v2811_v8  ;;  %6438 = vmatpush3.bf16.msra.mxu0 %v6693_v29  ;;  %v6686_v29 = vld [vmem:[%s8875_s4 + $0x160] sm:$0xff]   ;;  %8895 = vst [vmem:[#allocation3_spill] sm:$0xff] %v7779_v55  ;;  %v4484_v28 = vrot.slane %v5567_v63, 3  ;;  %v8896_v44 = vrot.slane %v7571_v61, 1  ;;  %v2851_v55 = vrot.slane %v2849_v52, 1 }
  0xff   : > { %6439 = vmatprep.subr.bf16.mxu0 %v6697_v14  ;;  %v7776_v8 = vld [vmem:[#allocation2 + $0x20] sm:$0xff]   ;;  %v2860_v52 = vrot.slane %v2858_v40, 1  ;;  %v2867_v40 = vshrl.u32 %v7678_v11, 16 }
 0x100   : > { %6380 = vmatpush3.bf16.msra.mxu1 %v6678_v24  ;;  %v2845_v24 = vrot.slane %v2843_v54, 2  ;;  %v4022_v54 = vshrl.u32 %v7769_v62, 16  ;;  %v7794_v19 = vsel %vm4483_vm12, %v4484_v28, %v4485_v43  ;;  %v4034_v10 = vshll.u32 %v7776_v8, 16  ;;  %v7807_v28 = vld [vmem:[%s8875_s4 + $0x238] sm:$0xff]  }
 0x101   : > { %6381 = vmatprep.subr.bf16.mxu1 %v6682_v13 }
 0x102   : > { %6440 = vmatpush3.bf16.msra.mxu0 %v6697_v14  ;;  %v8880_v14 = vrot.slane %v7776_v8, 3  ;;  %v2846_v39 = vor.u32 %v2845_v24, %v2842_v37  ;;  %v4036_v37 = vrot.slane %v4034_v10, 3  ;;  %v8898_v24 = vrot.slane %v7598_v12, 1 }
 0x103   : > { %6294 = vmatmul.mubr.bf16.gmra.mxu1 %v2411_v0  ;;  %6441 = vmatprep.subr.bf16.mxu0 %v6701_v18  ;;  %v4025_v0 = vshll.u32 %v7769_v62, 16  ;;  %v2422_v12 = vrot.slane %v7630_v9, 1  ;;  %v2897_v9 = vshll.u32 %v7743_v4, 16 }
 0x104   : > { %6297 = vmatprep.mubr.bf16.mxu1 %v2413_v27  ;;  %6382 = vmatpush3.bf16.msra.mxu1 %v6682_v13  ;;  %v4031_v13 = vshrl.u32 %v7776_v8, 16  ;;  %v7800_v27 = vsel %vm4483_vm12, %v4485_v43, %v8880_v14  ;;  %v8897_v43 = vrot.slane %v7563_v56, 1  ;;  %v2838_v56 = vsel %vm2740_vm11, %v7736_v38, %v7760_v30 }
 0x105   : > { %6354 = vmatmul.mubr.bf16.gmra.mxu0 %v2820_v6  ;;  %6383 = vmatprep.subr.bf16.mxu1 %v6686_v29  ;;  %v4024_v6 = vrot.slane %v4022_v54, 2  ;;  %v4027_v63 = vrot.slane %v4025_v0, 3  ;;  %v8899_v0 = vmov %v8896_v44  ;;  %v2847_v61 = vsel %vm2740_vm11, %v7760_v30, %v2846_v39  ;;  %v6700_v30 = vld [vmem:[%s8875_s4 + $0x148] sm:$0xff]  }
 0x106   : > { %6357 = vmatprep.mubr.bf16.mxu0 %v2829_v21  ;;  %6442 = vmatpush3.bf16.msra.mxu0 %v6701_v18  ;;  %v4020_v21 = vor.u32 %v4019_v7, %v4016_v34  ;;  %v4033_v18 = vrot.slane %v4031_v13, 2  ;;  %v2415_v53 = vsel %vm1939_vm9, %v8897_v43, %v8896_v44  ;;  %v2417_v14 = vsel %vm1939_vm9, %v8899_v0, %v8898_v24  ;;  %v6696_v34 = vld [vmem:[%s8875_s4 + $0x150] sm:$0xff]   ;;  %v7860_v0 = vld [vmem:[%s8875_s4 + $0x1f8] sm:$0xff]  }
 0x107   : > { %6443 = vmatprep.subr.bf16.mxu0 %v6706_v48  ;;  %v4028_v54 = vor.u32 %v4027_v63, %v4024_v6  ;;  %v2863_v13 = vrot.slane %v2861_v47, 2  ;;  %v2418_v6 = vrot.slane %v7603_v16, 1  ;;  %v8900_v63 = vmov %v8898_v24 }
 0x108   : > { %6384 = vmatpush3.bf16.msra.mxu1 %v6686_v29  ;;  %v2854_v29 = vrot.slane %v2852_v46, 2  ;;  %v7828_v7 = vor.u32 %v4036_v37, %v4033_v18  ;;  %v2420_v46 = vrot.slane %v7627_v59, 1  ;;  %v2869_v44 = vrot.slane %v2867_v40, 1 }
 0x109   : > { %6385 = vmatprep.subr.bf16.mxu1 %v6691_v33  ;;  %v7826_v10 = vsel %vm4012_vm13, %v4020_v21, %v4028_v54  ;;  %v2864_v16 = vor.u32 %v2863_v13, %v2860_v52  ;;  %v2419_v59 = vsel %vm1939_vm9, %v8900_v63, %v2418_v6  ;;  %v2424_v24 = vrot.slane %v7645_v49, 1 }
 0x10a   : > { %6444 = vmatpush3.bf16.msra.mxu0 %v6706_v48  ;;  %v7836_v38 = vsel %vm4012_vm13, %v4028_v54, %v7828_v7  ;;  %v2855_v47 = vor.u32 %v2854_v29, %v2851_v55  ;;  %v2870_v48 = vshll.u32 %v7678_v11, 16  ;;  %v2421_v21 = vsel %vm1939_vm9, %v2418_v6, %v2420_v46  ;;  %v6704_v55 = vld [vmem:[%s8875_s4 + $0x140] sm:$0xff]  }
 0x10b   : > { %6298 = vmatmul.mubr.bf16.gmra.mxu1 %v2415_v53  ;;  %6533 = vmatprep.subr.bf16.mxu0 %v7807_v28  ;;  %v2423_v52 = vsel %vm1939_vm9, %v2420_v46, %v2422_v12  ;;  %v2425_v49 = vsel %vm1939_vm9, %v2422_v12, %v2424_v24  ;;  %v2428_v46 = vrot.slane %v7674_v42, 1  ;;  %v2903_v63 = vshrl.u32 %v7747_v3, 16 }
 0x10c   : > { %6301 = vmatprep.mubr.bf16.mxu1 %v2417_v14  ;;  %6386 = vmatpush3.bf16.msra.mxu1 %v6691_v33  ;;  %v2876_v14 = vshrl.u32 %v7706_v26, 16  ;;  %v2879_v33 = vshll.u32 %v7706_v26, 16  ;;  %v2856_v18 = vsel %vm2740_vm11, %v2846_v39, %v2855_v47  ;;  %v2872_v43 = vrot.slane %v2870_v48, 2 }
 0x10d   : > { %6358 = vmatmul.mubr.bf16.gmra.mxu0 %v2838_v56  ;;  %6387 = vmatprep.subr.bf16.mxu1 %v6696_v34  ;;  %v2865_v53 = vsel %vm2740_vm11, %v2855_v47, %v2864_v16  ;;  %v2888_v56 = vshll.u32 %v7709_v41, 16  ;;  %v2899_v48 = vrot.slane %v2897_v9, 2  ;;  %v2430_v42 = vrot.slane %v7678_v11, 1  ;;  %v7889_v11 = vpop.f32.mrf.mxu1 }
 0x10e   : > { %6361 = vmatprep.mubr.bf16.mxu0 %v2847_v61  ;;  %v2878_v54 = vrot.slane %v2876_v14, 1  ;;  %v2881_v37 = vrot.slane %v2879_v33, 2  ;;  %v2873_v39 = vor.u32 %v2872_v43, %v2869_v44  ;;  %v2894_v61 = vshrl.u32 %v7743_v4, 16 }
 0x10f   : > { %v2426_v14 = vrot.slane %v7656_v23, 1  ;;  %v2905_v44 = vrot.slane %v2903_v63, 1  ;;  %v2431_v12 = vsel %vm1939_vm9, %v2428_v46, %v2430_v42  ;;  %v7897_v9 = vpop.f32.mrf.mxu1 }
 0x110   : > { %6388 = vmatpush3.bf16.msra.mxu1 %v6696_v34  ;;  %v2885_v34 = vshrl.u32 %v7709_v41, 16  ;;  %v2882_v29 = vor.u32 %v2881_v37, %v2878_v54  ;;  %v2874_v13 = vsel %vm2740_vm11, %v2864_v16, %v2873_v39  ;;  %v2896_v40 = vrot.slane %v2894_v61, 1 }
 0x111   : > { %6389 = vmatprep.subr.bf16.mxu1 %v6700_v30  ;;  %v3675_v54 = vrot.slane %v7767_v31, 2  ;;  %v3676_v37 = vrot.slane %v7769_v62, 2  ;;  %v2436_v31 = vrot.slane %v7743_v4, 1  ;;  %v3678_v62 = vrot.slane %v7776_v8, 2 }
 0x112   : > { %v2887_v6 = vrot.slane %v2885_v34, 1  ;;  %v2883_v47 = vsel %vm2740_vm11, %v2873_v39, %v2882_v29  ;;  %v2900_v16 = vor.u32 %v2899_v48, %v2896_v40  ;;  %v7910_v40 = vld [vmem:[#allocation2 + $0x38] sm:$0xff]   ;;  %v7912_v48 = vpop.f32.mrf.mxu1 }
 0x113   : > { %6302 = vmatmul.mubr.bf16.gmra.mxu1 %v2419_v59  ;;  %v2906_v59 = vshll.u32 %v7747_v3, 16  ;;  %v3677_v34 = vsel %vm3211_vm10, %v3675_v54, %v3676_v37  ;;  %v3684_v63 = vrot.slane %v7910_v40, 2 }
 0x114   : > { %6305 = vmatprep.mubr.bf16.mxu1 %v2421_v21  ;;  %6390 = vmatpush3.bf16.msra.mxu1 %v6700_v30  ;;  %v2890_v30 = vrot.slane %v2888_v56, 2  ;;  %v2427_v21 = vsel %vm1939_vm9, %v2424_v24, %v2426_v14  ;;  %v7887_v56 = vld [vmem:[#allocation2 + $0x28] sm:$0xff]  }
 0x115   : > { %6362 = vmatmul.mubr.bf16.gmra.mxu0 %v2856_v18  ;;  %6391 = vmatprep.subr.bf16.mxu1 %v6704_v55  ;;  %v2908_v43 = vrot.slane %v2906_v59, 2  ;;  %v3680_v61 = vrot.slane %v7887_v56, 2  ;;  %v7919_v59 = vpop.f32.mrf.mxu1 }
 0x116   : > { %6365 = vmatprep.mubr.bf16.mxu0 %v2865_v53  ;;  %v2891_v33 = vor.u32 %v2890_v30, %v2887_v6  ;;  %v2432_v53 = vrot.slane %v7706_v26, 1  ;;  %v2434_v26 = vrot.slane %v7709_v41, 1  ;;  %v3679_v41 = vsel %vm3211_vm10, %v3676_v37, %v3678_v62  ;;  %v7904_v30 = vld [vmem:[#allocation2 + $0x30] sm:$0xff]  }
 0x117   : > { %v2909_v3 = vor.u32 %v2908_v43, %v2905_v44  ;;  %v3681_v4 = vsel %vm3211_vm10, %v3678_v62, %v3680_v61  ;;  %v7960_v62 = vld [vmem:[#allocation2 + $0x58] sm:$0xff]  }
 0x118   : > { %6392 = vmatpush3.bf16.msra.mxu1 %v6704_v55  ;;  %v2429_v55 = vsel %vm1939_vm9, %v2426_v14, %v2428_v46  ;;  %v2892_v18 = vsel %vm2740_vm11, %v2882_v29, %v2891_v33  ;;  %v2901_v23 = vsel %vm2740_vm11, %v2891_v33, %v2900_v16  ;;  %v2433_v24 = vsel %vm1939_vm9, %v2430_v42, %v2432_v53  ;;  %v7892_v29 = vpop.f32.mrf.mxu0  ;;  %v6726_v42 = vld [vmem:[%s8875_s4 + $0x220] sm:$0xff]  }
 0x119   : > { %6481 = vmatprep.subr.bf16.mxu1 %v7860_v0  ;;  %v2910_v39 = vsel %vm2740_vm11, %v2900_v16, %v2909_v3  ;;  %v2437_v6 = vsel %vm1939_vm9, %v2434_v26, %v2436_v31  ;;  %v3682_v33 = vrot.slane %v7904_v30, 2  ;;  %v6721_v16 = vld [vmem:[%s8875_s4 + $0x228] sm:$0xff]  }
 0x11b   : > { %6306 = vmatmul.mubr.bf16.gmra.mxu1 %v2423_v52  ;;  %v2435_v52 = vsel %vm1939_vm9, %v2432_v53, %v2434_v26  ;;  %v3685_v44 = vsel %vm3211_vm10, %v3682_v33, %v3684_v63 }
 0x11c   : > { %6309 = vmatprep.mubr.bf16.mxu1 %v2425_v49  ;;  %v6705_v49 = vld [vmem:[#allocation2 + $0x98] ss:$0 sps:$4 sm:$0x11]  }
 0x11d   : > { %6366 = vmatmul.mubr.bf16.gmra.mxu0 %v2874_v13  ;;  %v7900_v13 = vpop.f32.mrf.mxu0  ;;  %v2438_v14 = vrot.slane %v6705_v49, 1 }
 0x11e   : > { %6369 = vmatprep.mubr.bf16.mxu0 %v2883_v47  ;;  %v6716_v47 = vld [vmem:[%s8875_s4 + $0x230] sm:$0xff]  }
 0x11f   : > { %v7914_v46 = vpop.f32.mrf.mxu0 }
 0x120   : > { %v7931_v43 = vpop.f32.mrf.mxu1 }
 0x122   : > { %v7942_v54 = vpop.f32.mrf.mxu1 }
 0x123   : > { %6310 = vmatmul.mubr.bf16.gmra.mxu1 %v2427_v21  ;;  %v2439_v21 = vsel %vm1939_vm9, %v2436_v31, %v2438_v14  ;;  %v7985_v14 = vld [vmem:[#allocation2 + $0x60] sm:$0xff]  }
 0x124   : > { %6313 = vmatprep.mubr.bf16.mxu1 %v2429_v55  ;;  %v7925_v55 = vpop.f32.mrf.mxu0  ;;  %v7958_v31 = vpop.f32.mrf.mxu1 }
 0x125   : > { %6370 = vmatmul.mubr.bf16.gmra.mxu0 %v2892_v18  ;;  %v3683_v18 = vsel %vm3211_vm10, %v3680_v61, %v3682_v33  ;;  %v6734_v61 = vld [vmem:[%s8875_s4 + $0x210] sm:$0xff]  }
 0x126   : > { %6373 = vmatprep.mubr.bf16.mxu0 %v2901_v23  ;;  %v7933_v23 = vld [vmem:[#allocation2 + $0x48] sm:$0xff]  }
 0x127   : > { %v3688_v37 = vrot.slane %v7933_v23, 2 }
 0x12b   : > { %6314 = vmatmul.mubr.bf16.gmra.mxu1 %v2431_v12  ;;  %v6730_v12 = vld [vmem:[%s8875_s4 + $0x218] sm:$0xff]  }
 0x12c   : > { %6317 = vmatprep.mubr.bf16.mxu1 %v2433_v24 }
 0x12d   : > { %6374 = vmatmul.mubr.bf16.gmra.mxu0 %v2910_v39 }
 0x12e   : > { %6445 = vmatprep.mubr.bf16.mxu0 %v3677_v34  ;;  %v7954_v34 = vld [vmem:[#allocation2 + $0x50] sm:$0xff]  }
 0x12f   : > { %v3690_v49 = vrot.slane %v7954_v34, 2 }
 0x130   : > { %v7939_v53 = vpop.f32.mrf.mxu0 }
 0x132   : > { %v7948_v24 = vpop.f32.mrf.mxu0 }
 0x133   : > { %6318 = vmatmul.mubr.bf16.gmra.mxu1 %v2435_v52 }
 0x134   : > { %6321 = vmatprep.mubr.bf16.mxu1 %v2437_v6  ;;  %v7967_v52 = vpop.f32.mrf.mxu0  ;;  %v7973_v6 = vpop.f32.mrf.mxu1 }
 0x135   : > { %6446 = vmatmul.mubr.bf16.vlgmr.msra.gmra.mxu0 %v3679_v41  ;;  %8901 = vst [vmem:[#allocation4_spill] sm:$0xff] %v7973_v6  ;;  %v3692_v41 = vrot.slane %v7960_v62, 2 }
 0x136   : > { %6534 = vmatpush3.bf16.msra.mxu0 %v7807_v28  ;;  %6449 = vmatprep.mubr.bf16.mxu0 %v3681_v4  ;;  %v7928_v28 = vld [vmem:[#allocation2 + $0x40] sm:$0xff]  }
 0x137   : > { %6535 = vmatprep.subr.bf16.mxu0 %v6716_v47  ;;  %v3686_v3 = vrot.slane %v7928_v28, 2  ;;  %v6723_v4 = vld [vmem:[%s8875_s4 + $0x1e0] sm:$0xff]  }
 0x139   : > { %v3687_v39 = vsel %vm3211_vm10, %v3684_v63, %v3686_v3  ;;  %v3689_v26 = vsel %vm3211_vm10, %v3686_v3, %v3688_v37  ;;  %v3693_v63 = vsel %vm3211_vm10, %v3690_v49, %v3692_v41 }
 0x13a   : > { %6536 = vmatpush3.bf16.msra.mxu0 %v6716_v47  ;;  %v3691_v47 = vsel %vm3211_vm10, %v3688_v37, %v3690_v49  ;;  %v6733_v37 = vld [vmem:[%s8875_s4 + $0x1d0] sm:$0xff]   ;;  %v6737_v49 = vld [vmem:[%s8875_s4 + $0x1c8] sm:$0xff]  }
 0x13b   : > { %6322 = vmatmul.mubr.bf16.gmra.mxu1 %v2439_v21  ;;  %6537 = vmatprep.subr.bf16.mxu0 %v6721_v16  ;;  %v6742_v21 = vld [vmem:[%s8875_s4 + $0x200] sm:$0xff]  }
 0x13c   : > { %6393 = vmatprep.mubr.bf16.mxu1 %v7566_v25  ;;  %v6715_v25 = vld [vmem:[%s8875_s4 + $0x1f0] sm:$0xff]  }
 0x13d   : > { %6450 = vmatmul.mubr.bf16.gmra.mxu0 %v3683_v18 }
 0x13e   : > { %6453 = vmatprep.mubr.bf16.mxu0 %v3685_v44  ;;  %6538 = vmatpush3.bf16.msra.mxu0 %v6721_v16  ;;  %v7991_v16 = vld [vmem:[#allocation2 + $0x68] sm:$0xff]   ;;  %v3694_v44 = vrot.slane %v7985_v14, 2 }
 0x13f   : > { %6539 = vmatprep.subr.bf16.mxu0 %v6726_v42  ;;  %v7988_v33 = vpop.f32.mrf.mxu1  ;;  %v3696_v3 = vrot.slane %v7991_v16, 2 }
 0x140   : > { %8902 = vst [vmem:[#allocation5_spill] sm:$0xff] %v7988_v33 }
 0x142   : > { %6540 = vmatpush3.bf16.msra.mxu0 %v6726_v42  ;;  %v8003_v42 = vpop.f32.mrf.mxu1 }
 0x143   : > { %6394 = vmatmul.mubr.bf16.vlgmr.msra.gmra.mxu1 %v7559_v50  ;;  %6541 = vmatprep.subr.bf16.mxu0 %v6730_v12  ;;  %v6719_v50 = vld [vmem:[%s8875_s4 + $0x1e8] sm:$0xff]   ;;  %8903 = vst [vmem:[#allocation6_spill] sm:$0xff] %v8003_v42  ;;  %v6740_v42 = vld [vmem:[#allocation2 + $0xa0] ss:$0 sps:$4 sm:$0x33]  }
 0x144   : > { %6482 = vmatpush3.bf16.msra.mxu1 %v7860_v0  ;;  %6397 = vmatprep.mubr.bf16.mxu1 %v7580_v36  ;;  %v6738_v36 = vld [vmem:[%s8875_s4 + $0x208] sm:$0xff]   ;;  %v7979_v0 = vpop.f32.mrf.mxu0 }
 0x145   : > { %6483 = vmatprep.subr.bf16.mxu1 %v6715_v25  ;;  %6454 = vmatmul.mubr.bf16.gmra.mxu0 %v3687_v39  ;;  %v8015_v39 = vpop.f32.mrf.mxu1 }
 0x146   : > { %6457 = vmatprep.mubr.bf16.mxu0 %v3689_v26  ;;  %6542 = vmatpush3.bf16.msra.mxu0 %v6730_v12  ;;  %v3695_v12 = vsel %vm3211_vm10, %v3692_v41, %v3694_v44  ;;  %8904 = vst [vmem:[#allocation7_spill] sm:$0xff] %v8015_v39  ;;  %v3697_v26 = vsel %vm3211_vm10, %v3694_v44, %v3696_v3  ;;  %v8042_v44 = vld [vmem:[#allocation2 + $0x88] sm:$0xff]  }
 0x147   : > { %6543 = vmatprep.subr.bf16.mxu0 %v6734_v61  ;;  %v8027_v41 = vpop.f32.mrf.mxu1  ;;  %8908 = vst [vmem:[#allocation11_spill] sm:$0xff] %v8042_v44 }
 0x148   : > { %6484 = vmatpush3.bf16.msra.mxu1 %v6715_v25  ;;  %v8012_v25 = vld [vmem:[#allocation2 + $0x70] sm:$0xff]   ;;  %8905 = vst [vmem:[#allocation8_spill] sm:$0xff] %v8027_v41 }
 0x149   : > { %6485 = vmatprep.subr.bf16.mxu1 %v6719_v50  ;;  %v8058_v41 = vld [vmem:[#allocation2 + $0x90] sm:$0xff]  }
 0x14a   : > { %6544 = vmatpush3.bf16.msra.mxu0 %v6734_v61  ;;  %v8018_v61 = vld [vmem:[#allocation2 + $0x78] sm:$0xff]   ;;  %8910 = vst [vmem:[#allocation13_spill] sm:$0xff] %v8058_v41 }
 0x14b   : > { %6398 = vmatmul.mubr.bf16.gmra.mxu1 %v7585_v2  ;;  %6545 = vmatprep.subr.bf16.mxu0 %v6738_v36  ;;  %v6728_v2 = vld [vmem:[%s8875_s4 + $0x1d8] sm:$0xff]  }
 0x14c   : > { %6401 = vmatprep.mubr.bf16.mxu1 %v7590_v32  ;;  %6486 = vmatpush3.bf16.msra.mxu1 %v6719_v50 }
 0x14d   : > { %6458 = vmatmul.mubr.bf16.gmra.mxu0 %v3691_v47  ;;  %6487 = vmatprep.subr.bf16.mxu1 %v6723_v4 }
 0x14e   : > { %v7997_v18 = vpop.f32.mrf.mxu0  ;;  %6461 = vmatprep.mubr.bf16.mxu0 %v3693_v63  ;;  %6546 = vmatpush3.bf16.msra.mxu0 %v6738_v36  ;;  %v3700_v36 = vrot.slane %v8018_v61, 2  ;;  %v8036_v63 = vld [vmem:[#allocation2 + $0x80] sm:$0xff]  }
 0x14f   : > { %6547 = vmatprep.subr.bf16.mxu0 %v6742_v21  ;;  %8906 = vst [vmem:[#allocation9_spill] sm:$0xff] %v8036_v63 }
 0x150   : > { %6488 = vmatpush3.bf16.msra.mxu1 %v6723_v4  ;;  %v8006_v32 = vpop.f32.mrf.mxu0 }
 0x151   : > { %6489 = vmatprep.subr.bf16.mxu1 %v6728_v2 }
 0x152   : > { %6548 = vmatpush3.bf16.msra.mxu0 %v6742_v21  ;;  %v8021_v50 = vpop.f32.mrf.mxu0 }
 0x153   : > { %6402 = vmatmul.mubr.bf16.gmra.mxu1 %v7595_v20  ;;  %v3698_v20 = vrot.slane %v8012_v25, 2 }
 0x154   : > { %6405 = vmatprep.mubr.bf16.mxu1 %v7613_v35  ;;  %6490 = vmatpush3.bf16.msra.mxu1 %v6728_v2  ;;  %v8030_v4 = vpop.f32.mrf.mxu0  ;;  %v6741_v35 = vld [vmem:[%s8875_s4 + $0x1c0] sm:$0xff]  }
 0x155   : > { %6462 = vmatmul.mubr.bf16.gmra.mxu0 %v3695_v12  ;;  %6491 = vmatprep.subr.bf16.mxu1 %v6733_v37  ;;  %v3699_v47 = vsel %vm3211_vm10, %v3696_v3, %v3698_v20  ;;  %v3701_v2 = vsel %vm3211_vm10, %v3698_v20, %v3700_v36  ;;  %v3702_v3 = vrot.slane %v8036_v63, 2 }
 0x156   : > { %6465 = vmatprep.mubr.bf16.mxu0 %v3697_v26 }
 0x158   : > { %6492 = vmatpush3.bf16.msra.mxu1 %v6733_v37 }
 0x159   : > { %6493 = vmatprep.subr.bf16.mxu1 %v6737_v49 }
 0x15a   : > { %v8039_v21 = vpop.f32.mrf.mxu1 }
 0x15b   : > { %6406 = vmatmul.mubr.bf16.gmra.mxu1 %v7619_v51  ;;  %8907 = vst [vmem:[#allocation10_spill] sm:$0xff] %v8039_v21  ;;  %v3704_v51 = vrot.slane %v8042_v44, 2 }
 0x15c   : > { %6409 = vmatprep.mubr.bf16.mxu1 %v7640_v45  ;;  %6494 = vmatpush3.bf16.msra.mxu1 %v6737_v49  ;;  %v8050_v26 = vpop.f32.mrf.mxu1  ;;  %v3703_v45 = vsel %vm3211_vm10, %v3700_v36, %v3702_v3 }
 0x15d   : > { %v8045_v37 = vpop.f32.mrf.mxu0  ;;  %6466 = vmatmul.mubr.bf16.gmra.mxu0 %v3699_v47  ;;  %6495 = vmatprep.subr.bf16.mxu1 %v6741_v35  ;;  %8909 = vst [vmem:[#allocation12_spill] sm:$0xff] %v8050_v26  ;;  %v3705_v47 = vsel %vm3211_vm10, %v3702_v3, %v3704_v51 }
 0x15e   : > { %6469 = vmatprep.mubr.bf16.mxu0 %v3701_v2  ;;  %v8061_v49 = vpop.f32.mrf.mxu1  ;;  %v8064_v2 = vld [vmem:[#allocation2 + $0x98] sm:$0xff]  }
 0x15f   : > { %v8047_v12 = vpop.f32.mrf.mxu0  ;;  %8911 = vst [vmem:[#allocation14_spill] sm:$0xff] %v8061_v49  ;;  %8912 = vst [vmem:[#allocation15_spill] sm:$0xff] %v8064_v2  ;;  %v3708_v36 = vrot.slane %v8064_v2, 2  ;;  %v3710_v2 = vrot.slane %v6740_v42, 2 }
 0x160   : > { %6496 = vmatpush3.bf16.msra.mxu1 %v6741_v35  ;;  %v3706_v35 = vrot.slane %v8058_v41, 2  ;;  %v8068_v44 = vpop.f32.mrf.mxu1 }
 0x161   : > { %v8053_v21 = vpop.f32.mrf.mxu0  ;;  %8913 = vst [vmem:[#allocation16_spill] sm:$0xff] %v8068_v44 }
 0x162   : > { %v3707_v49 = vsel %vm3211_vm10, %v3704_v51, %v3706_v35 }
 0x163   : > { %v8055_v20 = vpop.f32.mrf.mxu0  ;;  %6410 = vmatmul.mubr.bf16.gmra.mxu1 %v7643_v58 }
 0x164   : > { %6413 = vmatprep.mubr.bf16.mxu1 %v7652_v5  ;;  %v3709_v5 = vsel %vm3211_vm10, %v3706_v35, %v3708_v36 }
 0x165   : > { %v6239_v26 = vpop.f32.mrf.mxu0  ;;  %6470 = vmatmul.mubr.bf16.gmra.mxu0 %v3703_v45 }
 0x166   : > { %6473 = vmatprep.mubr.bf16.mxu0 %v3705_v47 }
 0x167   : > { %v2077_v39 = vpop.f32.mrf.mxu0 }
 0x169   : > { %v6240_v63 = vpop.f32.mrf.mxu0 }
 0x16b   : > { %v2080_v58 = vpop.f32.mrf.mxu0  ;;  %v8072_v3 = vpop.f32.mrf.mxu1  ;;  %6414 = vmatmul.mubr.bf16.gmra.mxu1 %v7663_v15 }
 0x16c   : > { %8914 = vst [vmem:[#allocation17_spill] sm:$0xff] %v8072_v3  ;;  %6417 = vmatprep.mubr.bf16.mxu1 %v7690_v57  ;;  %v3711_v3 = vsel %vm3211_vm10, %v3708_v36, %v3710_v2  ;;  %v4489_v2 = vrot.slane %v7887_v56, 3 }
 0x16d   : > { %v6243_v45 = vpop.f32.mrf.mxu0  ;;  %v8077_v47 = vpop.f32.mrf.mxu1  ;;  %6474 = vmatmul.mubr.bf16.gmra.mxu0 %v3707_v49 }
 0x16e   : > { %6477 = vmatprep.mubr.bf16.mxu0 %v3709_v5 }
 0x16f   : > { %v2093_v44 = vpop.f32.mrf.mxu0  ;;  %v8079_v41 = vpop.f32.mrf.mxu1 }
 0x170   : > { %8915 = vst [vmem:[#allocation18_spill] sm:$0xff] %v8079_v41 }
 0x171   : > { %v6244_v33 = vpop.f32.mrf.mxu0  ;;  %v8081_v51 = vpop.f32.mrf.mxu1 }
 0x172   : > { %8916 = vst [vmem:[#allocation19_spill] sm:$0xff] %v8081_v51 }
 0x173   : > { %v2096_v6 = vpop.f32.mrf.mxu0  ;;  %v6187_v15 = vpop.f32.mrf.mxu1  ;;  %6418 = vmatmul.mubr.bf16.gmra.mxu1 %v7695_v17 }
 0x174   : > { %v1784_v57 = vadd.f32 %v6187_v15, %v7892_v29  ;;  %6421 = vmatprep.mubr.bf16.mxu1 %v7723_v1 }
 0x175   : > { %v1775_v35 = vpop.f32.mrf.mxu1  ;;  %v6247_v49 = vpop.f32.mrf.mxu0  ;;  %6478 = vmatmul.mubr.bf16.gmra.mxu0 %v3711_v3 }
 0x176   : > { %v1776_v42 = vadd.f32 %v1775_v35, %v7900_v13  ;;  %6549 = vmatprep.mubr.bf16.mxu0 %v7794_v19  ;;  %v8089_v5 = vadd.f32 %v6239_v26, %v1784_v57  ;;  %v8917_v26 = vrot.slane %v7776_v8, 3  ;;  %v4491_v8 = vrot.slane %v7904_v30, 3 }
 0x177   : > { %v6188_v51 = vpop.f32.mrf.mxu1  ;;  %v2109_v41 = vpop.f32.mrf.mxu0 }
 0x178   : > { %v1787_v36 = vadd.f32 %v6188_v51, %v7914_v46  ;;  %v8093_v17 = vadd.f32 %v2077_v39, %v1776_v42  ;;  %v4490_v57 = vsel %vm4483_vm12, %v8917_v26, %v4489_v2  ;;  %v4492_v26 = vsel %vm4483_vm12, %v4489_v2, %v4491_v8 }
 0x179   : > { %v1778_v29 = vpop.f32.mrf.mxu1  ;;  %v8095_v15 = vpop.f32.mrf.mxu0 }
 0x17a   : > { %v1779_v1 = vadd.f32 %v1778_v29, %v7925_v55  ;;  %v8098_v3 = vadd.f32 %v6240_v63, %v1787_v36  ;;  %v4040_v55 = vshrl.u32 %v7887_v56, 16 }
 0x17b   : > { %v6191_v13 = vpop.f32.mrf.mxu1  ;;  %6422 = vmatmul.mubr.bf16.gmra.mxu1 %v7728_v22  ;;  %v8101_v19 = vpop.f32.mrf.mxu0  ;;  %v4043_v22 = vshll.u32 %v7887_v56, 16 }
 0x17c   : > { %v1800_v46 = vadd.f32 %v6191_v13, %v7939_v53  ;;  %6425 = vmatprep.mubr.bf16.mxu1 %v7772_v60  ;;  %v8108_v39 = vadd.f32 %v2080_v58, %v1779_v1  ;;  %v4493_v58 = vrot.slane %v7910_v40, 3  ;;  %v4042_v56 = vrot.slane %v4040_v55, 2 }
 0x17d   : > { %v1791_v51 = vpop.f32.mrf.mxu1  ;;  %v8110_v35 = vpop.f32.mrf.mxu0  ;;  %6550 = vmatmul.mubr.bf16.vlgmr.msra.gmra.mxu0 %v7800_v27  ;;  %v4045_v13 = vrot.slane %v4043_v22, 3 }
 0x17e   : > { %v1792_v63 = vadd.f32 %v1791_v51, %v7948_v24  ;;  %6553 = vmatprep.mubr.bf16.mxu0 %v4490_v57  ;;  %v8117_v42 = vadd.f32 %v6243_v45, %v1800_v46  ;;  %v8918_v46 = vld [vmem:[#allocation3_spill] sm:$0xff] }
 0x17f   : > { %v6192_v53 = vpop.f32.mrf.mxu1  ;;  %v8119_v60 = vpop.f32.mrf.mxu0  ;;  %v4046_v22 = vor.u32 %v4045_v13, %v4042_v56 }
 0x180   : > { %v1803_v36 = vadd.f32 %v6192_v53, %v7967_v52  ;;  %v8123_v29 = vadd.f32 %v2093_v44, %v1792_v63  ;;  %v4049_v52 = vshrl.u32 %v7904_v30, 16  ;;  %v4052_v44 = vshll.u32 %v7904_v30, 16 }
 0x181   : > { %v1794_v27 = vpop.f32.mrf.mxu1  ;;  %v8125_v1 = vpop.f32.mrf.mxu0  ;;  %v4494_v63 = vsel %vm4483_vm12, %v4491_v8, %v4493_v58  ;;  %v4058_v53 = vshrl.u32 %v7910_v40, 16  ;;  %v4495_v30 = vrot.slane %v7928_v28, 3 }
 0x182   : > { %v1795_v24 = vadd.f32 %v1794_v27, %v7979_v0  ;;  %v8129_v45 = vadd.f32 %v6244_v33, %v1803_v36  ;;  %v4061_v36 = vshll.u32 %v7910_v40, 16  ;;  %v4047_v40 = vsel %vm4012_vm13, %v7828_v7, %v4046_v22 }
 0x183   : > { %v6195_v57 = vpop.f32.mrf.mxu1  ;;  %6426 = vmatmul.mubr.bf16.gmra.mxu1 %v8918_v46  ;;  %v8132_v51 = vpop.f32.mrf.mxu0  ;;  %v4060_v46 = vrot.slane %v4058_v53, 2  ;;  %v4067_v53 = vshrl.u32 %v7928_v28, 16 }
 0x184   : > { %v1816_v55 = vadd.f32 %v6195_v57, %v7997_v18  ;;  %6497 = vmatprep.mubr.bf16.mxu1 %v7826_v10  ;;  %v8139_v0 = vadd.f32 %v2096_v6, %v1795_v24  ;;  %v4051_v6 = vrot.slane %v4049_v52, 2  ;;  %v4054_v24 = vrot.slane %v4052_v44, 3 }
 0x185   : > { %v1807_v2 = vpop.f32.mrf.mxu1  ;;  %v8141_v33 = vpop.f32.mrf.mxu0  ;;  %6554 = vmatmul.mubr.bf16.gmra.mxu0 %v4492_v26  ;;  %v4497_v57 = vrot.slane %v7933_v23, 3 }
 0x186   : > { %v1808_v27 = vadd.f32 %v1807_v2, %v8006_v32  ;;  %6557 = vmatprep.mubr.bf16.mxu0 %v4494_v63  ;;  %v8147_v8 = vadd.f32 %v6247_v49, %v1816_v55  ;;  %v4063_v49 = vrot.slane %v4061_v36, 3  ;;  %v4496_v55 = vsel %vm4483_vm12, %v4493_v58, %v4495_v30 }
 0x187   : > { %v6196_v18 = vpop.f32.mrf.mxu1  ;;  %v8149_v10 = vpop.f32.mrf.mxu0  ;;  %v4498_v2 = vsel %vm4483_vm12, %v4495_v30, %v4497_v57 }
 0x188   : > { %v1819_v56 = vadd.f32 %v6196_v18, %v8021_v50  ;;  %v8153_v13 = vadd.f32 %v2109_v41, %v1808_v27  ;;  %v4055_v50 = vor.u32 %v4054_v24, %v4051_v6  ;;  %v4076_v27 = vshrl.u32 %v7933_v23, 16 }
 0x189   : > { %v1810_v26 = vpop.f32.mrf.mxu1  ;;  %v8157_v32 = vpop.f32.mrf.mxu0  ;;  %v4079_v18 = vshll.u32 %v7933_v23, 16 }
 0x18a   : > { %v1811_v63 = vadd.f32 %v1810_v26, %v8030_v4  ;;  %v8162_v52 = vadd.f32 %v8095_v15, %v1819_v56  ;;  %v4070_v4 = vshll.u32 %v7928_v28, 16  ;;  %v4501_v56 = vrot.slane %v7960_v62, 3 }
 0x18b   : > { %v6199_v44 = vpop.f32.mrf.mxu1  ;;  %6498 = vmatmul.mubr.bf16.vlgmr.msra.gmra.mxu1 %v7836_v38  ;;  %v8165_v41 = vpop.f32.mrf.mxu0  ;;  %v4064_v38 = vor.u32 %v4063_v49, %v4060_v46 }
 0x18c   : > { %v1832_v7 = vadd.f32 %v6199_v44, %v8045_v37  ;;  %6501 = vmatprep.mubr.bf16.mxu1 %v4047_v40  ;;  %v8172_v58 = vadd.f32 %v8101_v19, %v1811_v63  ;;  %v4499_v37 = vrot.slane %v7954_v34, 3  ;;  %v4056_v19 = vsel %vm4012_vm13, %v4046_v22, %v4055_v50 }
 0x18d   : > { %v1823_v15 = vpop.f32.mrf.mxu1  ;;  %v8174_v36 = vpop.f32.mrf.mxu0  ;;  %6558 = vmatmul.mubr.bf16.gmra.mxu0 %v4496_v55  ;;  %v4069_v40 = vrot.slane %v4067_v53, 2  ;;  %v4072_v46 = vrot.slane %v4070_v4, 3  ;;  %v4065_v49 = vsel %vm4012_vm13, %v4055_v50, %v4064_v38  ;;  %v4081_v55 = vrot.slane %v4079_v18, 3 }
 0x18e   : > { %v1824_v30 = vadd.f32 %v1823_v15, %v8047_v12  ;;  %6561 = vmatprep.mubr.bf16.mxu0 %v4498_v2  ;;  %v8181_v6 = vadd.f32 %v8110_v35, %v1832_v7  ;;  %v4078_v35 = vrot.slane %v4076_v27, 2  ;;  %v4500_v44 = vsel %vm4483_vm12, %v4497_v57, %v4499_v37 }
 0x18f   : > { %v6200_v28 = vpop.f32.mrf.mxu1  ;;  %v8184_v24 = vpop.f32.mrf.mxu0  ;;  %v4088_v53 = vshll.u32 %v7954_v34, 16  ;;  %v4502_v50 = vsel %vm4483_vm12, %v4499_v37, %v4501_v56  ;;  %v4073_v15 = vor.u32 %v4072_v46, %v4069_v40  ;;  %v4094_v18 = vshrl.u32 %v7960_v62, 16 }
 0x190   : > { %v1835_v26 = vadd.f32 %v6200_v28, %v8053_v21  ;;  %v8189_v23 = vadd.f32 %v8119_v60, %v1824_v30  ;;  %v4085_v60 = vshrl.u32 %v7954_v34, 16  ;;  %v4082_v27 = vor.u32 %v4081_v55, %v4078_v35 }
 0x191   : > { %v1826_v12 = vpop.f32.mrf.mxu1  ;;  %v8192_v63 = vpop.f32.mrf.mxu0  ;;  %v4097_v30 = vshll.u32 %v7960_v62, 16  ;;  %v4503_v37 = vrot.slane %v7985_v14, 3  ;;  %v4505_v40 = vrot.slane %v7991_v16, 3 }
 0x192   : > { %v1827_v22 = vadd.f32 %v1826_v12, %v8055_v20  ;;  %v8197_v2 = vadd.f32 %v8125_v1, %v1835_v26  ;;  %v4090_v26 = vrot.slane %v4088_v53, 3  ;;  %v4074_v12 = vsel %vm4012_vm13, %v4064_v38, %v4073_v15 }
 0x193   : > { %v6203_v21 = vpop.f32.mrf.mxu1  ;;  %6502 = vmatmul.mubr.bf16.gmra.mxu1 %v4056_v19  ;;  %v8199_v7 = vpop.f32.mrf.mxu0  ;;  %v4087_v19 = vrot.slane %v4085_v60, 2  ;;  %v4099_v55 = vrot.slane %v4097_v30, 3 }
 0x194   : > { %v1848_v4 = vadd.f32 %v6203_v21, %v7889_v11  ;;  %6505 = vmatprep.mubr.bf16.mxu1 %v4065_v49  ;;  %v8206_v20 = vadd.f32 %v8132_v51, %v1827_v22  ;;  %v4083_v49 = vsel %vm4012_vm13, %v4073_v15, %v4082_v27 }
 0x195   : > { %v1839_v57 = vpop.f32.mrf.mxu1  ;;  %v8208_v1 = vpop.f32.mrf.mxu0  ;;  %6562 = vmatmul.mubr.bf16.gmra.mxu0 %v4500_v44  ;;  %v4504_v44 = vsel %vm4483_vm12, %v4501_v56, %v4503_v37  ;;  %v4091_v38 = vor.u32 %v4090_v26, %v4087_v19 }
 0x196   : > { %v1840_v34 = vadd.f32 %v1839_v57, %v7897_v9  ;;  %6565 = vmatprep.mubr.bf16.mxu0 %v4502_v50  ;;  %v8215_v11 = vadd.f32 %v8141_v33, %v1848_v4  ;;  %v4096_v33 = vrot.slane %v4094_v18, 2  ;;  %v4103_v50 = vshrl.u32 %v7985_v14, 16 }
 0x197   : > { %v6204_v28 = vpop.f32.mrf.mxu1  ;;  %v8217_v51 = vpop.f32.mrf.mxu0  ;;  %v4106_v4 = vshll.u32 %v7985_v14, 16  ;;  %v4112_v57 = vshrl.u32 %v7991_v16, 16  ;;  %v4115_v18 = vshll.u32 %v7991_v16, 16 }
 0x198   : > { %v1851_v46 = vadd.f32 %v6204_v28, %v7912_v48  ;;  %v8223_v62 = vadd.f32 %v8149_v10, %v1840_v34  ;;  %v4506_v10 = vsel %vm4483_vm12, %v4503_v37, %v4505_v40  ;;  %v4100_v15 = vor.u32 %v4099_v55, %v4096_v33  ;;  %v8919_v33 = vld [vmem:[#allocation4_spill] sm:$0xff] }
 0x199   : > { %v1842_v9 = vpop.f32.mrf.mxu1  ;;  %v8226_v35 = vpop.f32.mrf.mxu0  ;;  %v4509_v28 = vrot.slane %v8018_v61, 3  ;;  %v4105_v26 = vrot.slane %v4103_v50, 2 }
 0x19a   : > { %v1843_v22 = vadd.f32 %v1842_v9, %v7919_v59  ;;  %v8231_v21 = vadd.f32 %v8157_v32, %v1851_v46  ;;  %v4108_v46 = vrot.slane %v4106_v4, 3 }
 0x19b   : > { %v6207_v48 = vpop.f32.mrf.mxu1  ;;  %6506 = vmatmul.mubr.bf16.gmra.mxu1 %v4074_v12  ;;  %v8233_v60 = vpop.f32.mrf.mxu0  ;;  %v4101_v12 = vsel %vm4012_vm13, %v4091_v38, %v4100_v15 }
 0x19c   : > { %v1864_v53 = vadd.f32 %v6207_v48, %v7931_v43  ;;  %6509 = vmatprep.mubr.bf16.mxu1 %v4083_v49  ;;  %v8240_v59 = vadd.f32 %v8165_v41, %v1843_v22  ;;  %v4507_v43 = vrot.slane %v8012_v25, 3  ;;  %v4092_v41 = vsel %vm4012_vm13, %v4082_v27, %v4091_v38 }
 0x19d   : > { %v1855_v56 = vpop.f32.mrf.mxu1  ;;  %v8242_v32 = vpop.f32.mrf.mxu0  ;;  %6566 = vmatmul.mubr.bf16.gmra.mxu0 %v4504_v44  ;;  %v4117_v49 = vrot.slane %v4115_v18, 3  ;;  %v4124_v48 = vshll.u32 %v8012_v25, 16  ;;  %v4109_v50 = vor.u32 %v4108_v46, %v4105_v26  ;;  %v4133_v18 = vshll.u32 %v8018_v61, 16 }
 0x19e   : > { %v1856_v30 = vadd.f32 %v1855_v56, %v7942_v54  ;;  %6569 = vmatprep.mubr.bf16.mxu0 %v4506_v10  ;;  %v8249_v34 = vadd.f32 %v8174_v36, %v1864_v53  ;;  %v4114_v36 = vrot.slane %v4112_v57, 2  ;;  %v4508_v55 = vsel %vm4483_vm12, %v4505_v40, %v4507_v43  ;;  %v8920_v10 = vld [vmem:[#allocation5_spill] sm:$0xff] }
 0x19f   : > { %v6208_v14 = vpop.f32.mrf.mxu1  ;;  %v8252_v37 = vpop.f32.mrf.mxu0  ;;  %v4510_v38 = vsel %vm4483_vm12, %v4507_v43, %v4509_v28  ;;  %v4130_v57 = vshrl.u32 %v8018_v61, 16  ;;  %v8922_v43 = vld [vmem:[#allocation9_spill] sm:$0xff]  ;;  %v4126_v46 = vrot.slane %v4124_v48, 3 }
 0x1a0   : > { %v1867_v19 = vadd.f32 %v6208_v14, %v7958_v31  ;;  %v8257_v16 = vadd.f32 %v8184_v24, %v1856_v30  ;;  %v4121_v24 = vshrl.u32 %v8012_v25, 16  ;;  %v4118_v56 = vor.u32 %v4117_v49, %v4114_v36  ;;  %v8921_v30 = vld [vmem:[#allocation6_spill] sm:$0xff]  ;;  %v8924_v36 = vld [vmem:[#allocation7_spill] sm:$0xff] }
 0x1a1   : > { %v1858_v54 = vpop.f32.mrf.mxu1  ;;  %v8260_v9 = vpop.f32.mrf.mxu0  ;;  %v4511_v14 = vrot.slane %v8922_v43, 3 }
 0x1a2   : > { %v1859_v27 = vadd.f32 %v1858_v54, %v8919_v33  ;;  %v8265_v22 = vadd.f32 %v8192_v63, %v1867_v19  ;;  %v4123_v26 = vrot.slane %v4121_v24, 2  ;;  %v8923_v54 = vld [vmem:[#allocation11_spill] sm:$0xff]  ;;  %v4110_v33 = vsel %vm4012_vm13, %v4100_v15, %v4109_v50 }
 0x1a3   : > { %v6211_v31 = vpop.f32.mrf.mxu1  ;;  %6510 = vmatmul.mubr.bf16.gmra.mxu1 %v4092_v41  ;;  %v8267_v44 = vpop.f32.mrf.mxu0  ;;  %v4512_v24 = vsel %vm4483_vm12, %v4509_v28, %v4511_v14 }
 0x1a4   : > { %v1880_v53 = vadd.f32 %v6211_v31, %v8920_v10  ;;  %6513 = vmatprep.mubr.bf16.mxu1 %v4101_v12  ;;  %v8274_v4 = vadd.f32 %v8199_v7, %v1859_v27  ;;  %v4513_v12 = vrot.slane %v8923_v54, 3  ;;  %v8926_v10 = vld [vmem:[#allocation8_spill] sm:$0xff]  ;;  %v4127_v15 = vor.u32 %v4126_v46, %v4123_v26 }
 0x1a5   : > { %v1871_v40 = vpop.f32.mrf.mxu1  ;;  %v8276_v63 = vpop.f32.mrf.mxu0  ;;  %6570 = vmatmul.mubr.bf16.gmra.mxu0 %v4508_v55  ;;  %v4119_v55 = vsel %vm4012_vm13, %v4109_v50, %v4118_v56  ;;  %v4148_v26 = vshrl.u32 %v8923_v54, 16  ;;  %v4151_v46 = vshll.u32 %v8923_v54, 16 }
 0x1a6   : > { %v1872_v25 = vadd.f32 %v1871_v40, %v8921_v30  ;;  %6573 = vmatprep.mubr.bf16.mxu0 %v4510_v38  ;;  %v8283_v41 = vadd.f32 %v8208_v1, %v1880_v53  ;;  %v4132_v1 = vrot.slane %v4130_v57, 2  ;;  %v4135_v38 = vrot.slane %v4133_v18, 3 }
 0x1a7   : > { %v6212_v19 = vpop.f32.mrf.mxu1  ;;  %v8285_v7 = vpop.f32.mrf.mxu0  ;;  %v4139_v57 = vshrl.u32 %v8922_v43, 16  ;;  %v4142_v18 = vshll.u32 %v8922_v43, 16 }
 0x1a8   : > { %v1883_v49 = vadd.f32 %v6212_v19, %v8924_v36  ;;  %v8291_v61 = vadd.f32 %v8217_v51, %v1872_v25  ;;  %v4514_v51 = vsel %vm4483_vm12, %v4511_v14, %v4513_v12  ;;  %v8928_v25 = vld [vmem:[#allocation10_spill] sm:$0xff]  ;;  %v4136_v36 = vor.u32 %v4135_v38, %v4132_v1  ;;  %v8930_v14 = vld [vmem:[#allocation12_spill] sm:$0xff] }
 0x1a9   : > { %v1874_v27 = vpop.f32.mrf.mxu1  ;;  %v8294_v31 = vpop.f32.mrf.mxu0  ;;  %v8934_v1 = vld [vmem:[#allocation14_spill] sm:$0xff] }
 0x1aa   : > { %8925 = vst [vmem:[#allocation3_spill] sm:$0xff] %v8291_v61  ;;  %v1875_v53 = vadd.f32 %v1874_v27, %v8926_v10  ;;  %v8299_v48 = vadd.f32 %v8226_v35, %v1883_v49 }
 0x1ab   : > { %v6215_v40 = vpop.f32.mrf.mxu1  ;;  %6514 = vmatmul.mubr.bf16.gmra.mxu1 %v4110_v33  ;;  %v8301_v30 = vpop.f32.mrf.mxu0  ;;  %v8931_v33 = vld [vmem:[#allocation13_spill] sm:$0xff] }
 0x1ac   : > { %8927 = vst [vmem:[#allocation4_spill] sm:$0xff] %v8299_v48  ;;  %v1896_v50 = vadd.f32 %v6215_v40, %v8928_v25  ;;  %6517 = vmatprep.mubr.bf16.mxu1 %v4119_v55  ;;  %v8308_v19 = vadd.f32 %v8233_v60, %v1875_v53  ;;  %v4515_v27 = vrot.slane %v8931_v33, 3  ;;  %v4128_v60 = vsel %vm4012_vm13, %v4118_v56, %v4127_v15  ;;  %v8933_v53 = vld [vmem:[#allocation15_spill] sm:$0xff]  ;;  %v6744_v48 = vld [vmem:[#allocation2 + $0xa0] ss:$0 sps:$4 sm:$0x77]  }
 0x1ad   : > { %v1887_v28 = vpop.f32.mrf.mxu1  ;;  %v8310_v35 = vpop.f32.mrf.mxu0  ;;  %6574 = vmatmul.mubr.bf16.gmra.mxu0 %v4512_v24  ;;  %v4517_v24 = vrot.slane %v8933_v53, 3  ;;  %v4141_v40 = vrot.slane %v4139_v57, 2  ;;  %v4144_v25 = vrot.slane %v4142_v18, 3 }
 0x1ae   : > { %8929 = vst [vmem:[#allocation5_spill] sm:$0xff] %v8308_v19  ;;  %v1888_v49 = vadd.f32 %v1887_v28, %v8930_v14  ;;  %6577 = vmatprep.mubr.bf16.mxu0 %v4514_v51  ;;  %v8317_v55 = vadd.f32 %v8242_v32, %v1896_v50  ;;  %v4137_v28 = vsel %vm4012_vm13, %v4127_v15, %v4136_v36  ;;  %v4150_v32 = vrot.slane %v4148_v26, 2  ;;  %v8936_v26 = vld [vmem:[#allocation17_spill] sm:$0xff] }
 0x1af   : > { %v6216_v43 = vpop.f32.mrf.mxu1  ;;  %v8320_v10 = vpop.f32.mrf.mxu0  ;;  %v4153_v50 = vrot.slane %v4151_v46, 3  ;;  %v4516_v19 = vsel %vm4483_vm12, %v4513_v12, %v4515_v27  ;;  %v4160_v15 = vshll.u32 %v8931_v33, 16 }
 0x1b0   : > { %8932 = vst [vmem:[#allocation6_spill] sm:$0xff] %v8317_v55  ;;  %v1899_v38 = vadd.f32 %v6216_v43, %v8934_v1  ;;  %v8325_v54 = vadd.f32 %v8252_v37, %v1888_v49  ;;  %v8935_v55 = vld [vmem:[#allocation16_spill] sm:$0xff]  ;;  %v4157_v37 = vshrl.u32 %v8931_v33, 16  ;;  %v4518_v49 = vsel %vm4483_vm12, %v4515_v27, %v4517_v24 }
 0x1b1   : > { %v1890_v51 = vpop.f32.mrf.mxu1  ;;  %v8328_v14 = vpop.f32.mrf.mxu0  ;;  %v4154_v1 = vor.u32 %v4153_v50, %v4150_v32  ;;  %v4519_v33 = vrot.slane %v6744_v48, 3 }
 0x1b2   : > { %v1891_v56 = vadd.f32 %v1890_v51, %v8935_v55  ;;  %v8333_v61 = vadd.f32 %v8260_v9, %v1899_v38  ;;  %v4145_v55 = vor.u32 %v4144_v25, %v4141_v40  ;;  %v4169_v38 = vshll.u32 %v8933_v53, 16 }
 0x1b3   : > { %v6219_v57 = vpop.f32.mrf.mxu1  ;;  %6518 = vmatmul.mubr.bf16.gmra.mxu1 %v4128_v60  ;;  %v8335_v18 = vpop.f32.mrf.mxu0  ;;  %v4166_v60 = vshrl.u32 %v8933_v53, 16  ;;  %v4159_v25 = vrot.slane %v4157_v37, 2 }
 0x1b4   : > { %v1912_v46 = vadd.f32 %v6219_v57, %v8936_v26  ;;  %6521 = vmatprep.mubr.bf16.mxu1 %v4137_v28  ;;  %v8342_v12 = vadd.f32 %v8267_v44, %v1891_v56  ;;  %v4162_v44 = vrot.slane %v4160_v15, 3  ;;  %v8937_v56 = vld [vmem:[#allocation18_spill] sm:$0xff]  ;;  %v4155_v53 = vsel %vm4012_vm13, %v4145_v55, %v4154_v1 }
 0x1b5   : > { %v1903_v43 = vpop.f32.mrf.mxu1  ;;  %v6347_v9 = vpop.f32.mrf.mxu0  ;;  %6578 = vmatmul.mubr.bf16.gmra.mxu0 %v4516_v19  ;;  %v4146_v19 = vsel %vm4012_vm13, %v4136_v36, %v4145_v55  ;;  %v4171_v26 = vrot.slane %v4169_v38, 3 }
 0x1b6   : > { %v1904_v51 = vadd.f32 %v1903_v43, %v8077_v47  ;;  %6581 = vmatprep.mubr.bf16.mxu0 %v4518_v49  ;;  %v8348_v27 = vadd.f32 %v8276_v63, %v1912_v46  ;;  %v4168_v49 = vrot.slane %v4166_v60, 2  ;;  %v8938_v43 = vld [vmem:[#allocation19_spill] sm:$0xff]  ;;  %v4520_v46 = vsel %vm4483_vm12, %v4517_v24, %v4519_v33 }
 0x1b7   : > { %v6220_v28 = vpop.f32.mrf.mxu1  ;;  %v3027_v40 = vpop.f32.mrf.mxu0 }
 0x1b8   : > { %v1915_v57 = vadd.f32 %v6220_v28, %v8937_v56  ;;  %v8353_v32 = vadd.f32 %v8285_v7, %v1904_v51  ;;  %v4163_v28 = vor.u32 %v4162_v44, %v4159_v25  ;;  %v4175_v51 = vshrl.u32 %v6744_v48, 16 }
 0x1b9   : > { %v1906_v50 = vpop.f32.mrf.mxu1  ;;  %v6348_v47 = vpop.f32.mrf.mxu0  ;;  %v4178_v56 = vshll.u32 %v6744_v48, 16 }
 0x1ba   : > { %v1907_v63 = vadd.f32 %v1906_v50, %v8938_v43  ;;  %v8359_v37 = vadd.f32 %v8294_v31, %v1915_v57  ;;  %v4172_v50 = vor.u32 %v4171_v26, %v4168_v49  ;;  %v4164_v25 = vsel %vm4012_vm13, %v4154_v1, %v4163_v28 }
 0x1bb   : > { %v6291_v15 = vpop.f32.mrf.mxu1  ;;  %6522 = vmatmul.mubr.bf16.gmra.mxu1 %v4146_v19  ;;  %v3030_v36 = vpop.f32.mrf.mxu0  ;;  %v4177_v57 = vrot.slane %v4175_v51, 2  ;;  %v4180_v48 = vrot.slane %v4178_v56, 3 }
 0x1bc   : > { %v2685_v7 = vadd.f32 %v6291_v15, %v8089_v5  ;;  %6525 = vmatprep.mubr.bf16.mxu1 %v4155_v53  ;;  %v8363_v55 = vadd.f32 %v8301_v30, %v1907_v63  ;;  %v4173_v53 = vsel %vm4012_vm13, %v4163_v28, %v4172_v50 }
 0x1bd   : > { %v2540_v60 = vpop.f32.mrf.mxu1  ;;  %v6351_v38 = vpop.f32.mrf.mxu0  ;;  %6582 = vmatmul.mubr.bf16.gmra.mxu0 %v4520_v46 }
 0x1be   : > { %v2683_v24 = vadd.f32 %v2540_v60, %v8093_v17  ;;  %v8367_v31 = vadd.f32 %v8310_v35, %v2685_v7 }
 0x1bf   : > { %v6292_v33 = vpop.f32.mrf.mxu1  ;;  %v3043_v44 = vpop.f32.mrf.mxu0 }
 0x1c0   : > { %v2686_v5 = vadd.f32 %v6292_v33, %v8098_v3  ;;  %v8372_v30 = vadd.f32 %v8320_v10, %v2683_v24  ;;  %v4181_v3 = vor.u32 %v4180_v48, %v4177_v57 }
 0x1c1   : > { %v2543_v19 = vpop.f32.mrf.mxu1  ;;  %v6352_v49 = vpop.f32.mrf.mxu0 }
 0x1c2   : > { %v2684_v17 = vadd.f32 %v2543_v19, %v8108_v39  ;;  %v8377_v35 = vadd.f32 %v8328_v14, %v2686_v5  ;;  %v4182_v51 = vsel %vm4012_vm13, %v4172_v50, %v4181_v3 }
 0x1c3   : > { %v6295_v26 = vpop.f32.mrf.mxu1  ;;  %6526 = vmatmul.mubr.bf16.gmra.mxu1 %v4164_v25  ;;  %v3046_v1 = vpop.f32.mrf.mxu0 }
 0x1c4   : > { %v2689_v43 = vadd.f32 %v6295_v26, %v8117_v42  ;;  %6529 = vmatprep.mubr.bf16.mxu1 %v4173_v53  ;;  %v8381_v63 = vadd.f32 %v8335_v18, %v2684_v17 }
 0x1c5   : > { %v2556_v10 = vpop.f32.mrf.mxu1  ;;  %v6355_v46 = vpop.f32.mrf.mxu0 }
 0x1c6   : > { %v2687_v15 = vadd.f32 %v2556_v10, %v8123_v29  ;;  %v8384_v28 = vadd.f32 %v6347_v9, %v2689_v43 }
 0x1c7   : > { %v6296_v39 = vpop.f32.mrf.mxu1  ;;  %v3059_v7 = vpop.f32.mrf.mxu0 }
 0x1c8   : > { %v2690_v14 = vadd.f32 %v6296_v39, %v8129_v45  ;;  %v8388_v56 = vadd.f32 %v3027_v40, %v2687_v15 }
 0x1c9   : > { %v2559_v42 = vpop.f32.mrf.mxu1  ;;  %v6356_v60 = vpop.f32.mrf.mxu0 }
 0x1ca   : > { %v2688_v24 = vadd.f32 %v2559_v42, %v8139_v0  ;;  %v8391_v18 = vadd.f32 %v6348_v47, %v2690_v14 }
 0x1cb   : > { %v6299_v33 = vpop.f32.mrf.mxu1  ;;  %6530 = vmatmul.mubr.bf16.gmra.mxu1 %v4182_v51  ;;  %v3062_v25 = vpop.f32.mrf.mxu0 }
 0x1cc   : > { %v2693_v29 = vadd.f32 %v6299_v33, %v8147_v8  ;;  %v8394_v9 = vadd.f32 %v3030_v36, %v2688_v24 }
 0x1cd   : > { %v2572_v5 = vpop.f32.mrf.mxu1  ;;  %v6359_v57 = vpop.f32.mrf.mxu0 }
 0x1ce   : > { %v2691_v45 = vadd.f32 %v2572_v5, %v8153_v13  ;;  %v8397_v50 = vadd.f32 %v6351_v38, %v2693_v29 }
 0x1cf   : > { %v6300_v40 = vpop.f32.mrf.mxu1  ;;  %v3075_v48 = vpop.f32.mrf.mxu0 }
 0x1d0   : > { %v2694_v19 = vadd.f32 %v6300_v40, %v8162_v52  ;;  %v8400_v0 = vadd.f32 %v3043_v44, %v2691_v45 }
 0x1d1   : > { %v2575_v47 = vpop.f32.mrf.mxu1  ;;  %v6360_v53 = vpop.f32.mrf.mxu0 }
 0x1d2   : > { %v2692_v17 = vadd.f32 %v2575_v47, %v8172_v58  ;;  %v8403_v26 = vadd.f32 %v6352_v49, %v2694_v19 }
 0x1d3   : > { %v6303_v8 = vpop.f32.mrf.mxu1  ;;  %v3078_v36 = vpop.f32.mrf.mxu0 }
 0x1d4   : > { %v2697_v43 = vadd.f32 %v6303_v8, %v8181_v6  ;;  %v8406_v3 = vadd.f32 %v3046_v1, %v2692_v17 }
 0x1d5   : > { %v2588_v13 = vpop.f32.mrf.mxu1  ;;  %v6363_v38 = vpop.f32.mrf.mxu0 }
 0x1d6   : > { %v2695_v10 = vadd.f32 %v2588_v13, %v8189_v23  ;;  %v8409_v15 = vadd.f32 %v6355_v46, %v2697_v43 }
 0x1d7   : > { %v6304_v52 = vpop.f32.mrf.mxu1  ;;  %v3091_v44 = vpop.f32.mrf.mxu0 }
 0x1d8   : > { %v2698_v39 = vadd.f32 %v6304_v52, %v8197_v2  ;;  %v8412_v14 = vadd.f32 %v3059_v7, %v2695_v10 }
 0x1d9   : > { %v2591_v58 = vpop.f32.mrf.mxu1  ;;  %v6364_v49 = vpop.f32.mrf.mxu0 }
 0x1da   : > { %v2696_v51 = vadd.f32 %v2591_v58, %v8206_v20  ;;  %v8415_v42 = vadd.f32 %v6356_v60, %v2698_v39 }
 0x1db   : > { %v6307_v6 = vpop.f32.mrf.mxu1  ;;  %v3094_v1 = vpop.f32.mrf.mxu0 }
 0x1dc   : > { %v2701_v24 = vadd.f32 %v6307_v6, %v8215_v11  ;;  %v8418_v33 = vadd.f32 %v3062_v25, %v2696_v51 }
 0x1dd   : > { %v2604_v23 = vpop.f32.mrf.mxu1  ;;  %v6367_v46 = vpop.f32.mrf.mxu0 }
 0x1de   : > { %v2699_v29 = vadd.f32 %v2604_v23, %v8223_v62  ;;  %v8421_v5 = vadd.f32 %v6359_v57, %v2701_v24  ;;  %v8939_v24 = vld [vmem:[#allocation3_spill] sm:$0xff] }
 0x1df   : > { %v6308_v2 = vpop.f32.mrf.mxu1  ;;  %v3107_v7 = vpop.f32.mrf.mxu0 }
 0x1e0   : > { %v2702_v45 = vadd.f32 %v6308_v2, %v8231_v21  ;;  %v8424_v40 = vadd.f32 %v3075_v48, %v2699_v29  ;;  %v8940_v2 = vld [vmem:[#allocation4_spill] sm:$0xff] }
 0x1e1   : > { %v2607_v20 = vpop.f32.mrf.mxu1  ;;  %v6368_v60 = vpop.f32.mrf.mxu0 }
 0x1e2   : > { %v2700_v19 = vadd.f32 %v2607_v20, %v8240_v59  ;;  %v8427_v47 = vadd.f32 %v6360_v53, %v2702_v45 }
 0x1e3   : > { %v6311_v11 = vpop.f32.mrf.mxu1  ;;  %v3110_v25 = vpop.f32.mrf.mxu0 }
 0x1e4   : > { %v2705_v17 = vadd.f32 %v6311_v11, %v8249_v34  ;;  %v8430_v8 = vadd.f32 %v3078_v36, %v2700_v19  ;;  %v8941_v19 = vld [vmem:[#allocation5_spill] sm:$0xff] }
 0x1e5   : > { %v2620_v62 = vpop.f32.mrf.mxu1  ;;  %v6371_v57 = vpop.f32.mrf.mxu0 }
 0x1e6   : > { %v2703_v43 = vadd.f32 %v2620_v62, %v8257_v16  ;;  %v8433_v13 = vadd.f32 %v6363_v38, %v2705_v17  ;;  %v8942_v62 = vld [vmem:[#allocation6_spill] sm:$0xff] }
 0x1e7   : > { %v6312_v21 = vpop.f32.mrf.mxu1  ;;  %v3123_v48 = vpop.f32.mrf.mxu0 }
 0x1e8   : > { %v2706_v10 = vadd.f32 %v6312_v21, %v8265_v22  ;;  %v8436_v52 = vadd.f32 %v3091_v44, %v2703_v43 }
 0x1e9   : > { %v2623_v59 = vpop.f32.mrf.mxu1  ;;  %v6372_v53 = vpop.f32.mrf.mxu0 }
 0x1ea   : > { %v2704_v39 = vadd.f32 %v2623_v59, %v8274_v4  ;;  %v8439_v58 = vadd.f32 %v6364_v49, %v2706_v10 }
 0x1eb   : > { %v6315_v34 = vpop.f32.mrf.mxu1  ;;  %v3126_v36 = vpop.f32.mrf.mxu0 }
 0x1ec   : > { %v2709_v51 = vadd.f32 %v6315_v34, %v8283_v41  ;;  %v8442_v6 = vadd.f32 %v3094_v1, %v2704_v39 }
 0x1ed   : > { %v2636_v16 = vpop.f32.mrf.mxu1  ;;  %v6375_v38 = vpop.f32.mrf.mxu0 }
 0x1ee   : > { %v2707_v23 = vadd.f32 %v2636_v16, %v8939_v24  ;;  %v8445_v29 = vadd.f32 %v6367_v46, %v2709_v51 }
 0x1ef   : > { %v6316_v22 = vpop.f32.mrf.mxu1  ;;  %v3139_v44 = vpop.f32.mrf.mxu0 }
 0x1f0   : > { %v2710_v45 = vadd.f32 %v6316_v22, %v8940_v2  ;;  %v8448_v20 = vadd.f32 %v3107_v7, %v2707_v23 }
 0x1f1   : > { %v2639_v4 = vpop.f32.mrf.mxu1  ;;  %v6376_v49 = vpop.f32.mrf.mxu0 }
 0x1f2   : > { %v2708_v11 = vadd.f32 %v2639_v4, %v8941_v19  ;;  %v8451_v17 = vadd.f32 %v6368_v60, %v2710_v45 }
 0x1f3   : > { %v6319_v41 = vpop.f32.mrf.mxu1  ;;  %v3142_v1 = vpop.f32.mrf.mxu0 }
 0x1f4   : > { %v2713_v43 = vadd.f32 %v6319_v41, %v8942_v62  ;;  %v8454_v21 = vadd.f32 %v3110_v25, %v2708_v11 }
 0x1f5   : > { %v2652_v46 = vpop.f32.mrf.mxu1  ;;  %v6447_v10 = vpop.f32.mrf.mxu0 }
 0x1f6   : > { %v2711_v59 = vadd.f32 %v2652_v46, %v8325_v54  ;;  %v8457_v39 = vadd.f32 %v6371_v57, %v2713_v43 }
 0x1f7   : > { %v6320_v7 = vpop.f32.mrf.mxu1  ;;  %v3812_v34 = vpop.f32.mrf.mxu0 }
 0x1f8   : > { %v2714_v51 = vadd.f32 %v6320_v7, %v8333_v61  ;;  %v8460_v16 = vadd.f32 %v3123_v48, %v2711_v59 }
 0x1f9   : > { %v2655_v60 = vpop.f32.mrf.mxu1  ;;  %v6448_v24 = vpop.f32.mrf.mxu0 }
 0x1fa   : > { %v2712_v23 = vadd.f32 %v2655_v60, %v8342_v12  ;;  %v8463_v22 = vadd.f32 %v6372_v53, %v2714_v51 }
 0x1fb   : > { %v6323_v25 = vpop.f32.mrf.mxu1  ;;  %v3815_v2 = vpop.f32.mrf.mxu0 }
 0x1fc   : > { %v2717_v45 = vadd.f32 %v6323_v25, %v8348_v27  ;;  %v8466_v4 = vadd.f32 %v3126_v36, %v2712_v23 }
 0x1fd   : > { %v2668_v54 = vpop.f32.mrf.mxu1  ;;  %v6451_v57 = vpop.f32.mrf.mxu0 }
 0x1fe   : > { %v2715_v19 = vadd.f32 %v2668_v54, %v8353_v32  ;;  %v8469_v11 = vadd.f32 %v6375_v38, %v2717_v45 }
 0x1ff   : > { %v6324_v61 = vpop.f32.mrf.mxu1  ;;  %v3828_v48 = vpop.f32.mrf.mxu0 }
 0x200   : > { %v2718_v41 = vadd.f32 %v6324_v61, %v8359_v37  ;;  %v8472_v62 = vadd.f32 %v3139_v44, %v2715_v19 }
 0x201   : > { %v2671_v12 = vpop.f32.mrf.mxu1  ;;  %v6452_v53 = vpop.f32.mrf.mxu0 }
 0x202   : > { %v2716_v43 = vadd.f32 %v2671_v12, %v8363_v55  ;;  %v8475_v46 = vadd.f32 %v6376_v49, %v2718_v41 }
 0x203   : > { %v6395_v27 = vpop.f32.mrf.mxu1  ;;  %v3831_v36 = vpop.f32.mrf.mxu0 }
 0x204   : > { %v3494_v59 = vadd.f32 %v6395_v27, %v8367_v31  ;;  %v8478_v7 = vadd.f32 %v3142_v1, %v2716_v43 }
 0x205   : > { %v3349_v32 = vpop.f32.mrf.mxu1  ;;  %v6455_v38 = vpop.f32.mrf.mxu0 }
 0x206   : > { %v3492_v51 = vadd.f32 %v3349_v32, %v8372_v30  ;;  %v8481_v60 = vadd.f32 %v6447_v10, %v3494_v59 }
 0x207   : > { %v6396_v37 = vpop.f32.mrf.mxu1  ;;  %v3844_v44 = vpop.f32.mrf.mxu0 }
 0x208   : > { %v3495_v23 = vadd.f32 %v6396_v37, %v8377_v35  ;;  %v8484_v25 = vadd.f32 %v3812_v34, %v3492_v51 }
 0x209   : > { %v3352_v55 = vpop.f32.mrf.mxu1  ;;  %v6456_v49 = vpop.f32.mrf.mxu0 }
 0x20a   : > { %v3493_v45 = vadd.f32 %v3352_v55, %v8381_v63  ;;  %v8487_v54 = vadd.f32 %v6448_v24, %v3495_v23 }
 0x20b   : > { %v6399_v31 = vpop.f32.mrf.mxu1  ;;  %v3847_v1 = vpop.f32.mrf.mxu0 }
 0x20c   : > { %v3498_v19 = vadd.f32 %v6399_v31, %v8384_v28  ;;  %v8490_v61 = vadd.f32 %v3815_v2, %v3493_v45 }
 0x20d   : > { %v3365_v30 = vpop.f32.mrf.mxu1  ;;  %v6459_v10 = vpop.f32.mrf.mxu0 }
 0x20e   : > { %v3496_v41 = vadd.f32 %v3365_v30, %v8388_v56  ;;  %v8493_v12 = vadd.f32 %v6451_v57, %v3498_v19 }
 0x20f   : > { %v6400_v35 = vpop.f32.mrf.mxu1  ;;  %v3860_v34 = vpop.f32.mrf.mxu0 }
 0x210   : > { %v3499_v43 = vadd.f32 %v6400_v35, %v8391_v18  ;;  %v8496_v27 = vadd.f32 %v3828_v48, %v3496_v41 }
 0x211   : > { %v3368_v63 = vpop.f32.mrf.mxu1  ;;  %v6460_v24 = vpop.f32.mrf.mxu0 }
 0x212   : > { %v3497_v59 = vadd.f32 %v3368_v63, %v8394_v9  ;;  %v8499_v32 = vadd.f32 %v6452_v53, %v3499_v43 }
 0x213   : > { %v6403_v28 = vpop.f32.mrf.mxu1  ;;  %v3863_v2 = vpop.f32.mrf.mxu0 }
 0x214   : > { %v3502_v51 = vadd.f32 %v6403_v28, %v8397_v50  ;;  %v8502_v37 = vadd.f32 %v3831_v36, %v3497_v59 }
 0x215   : > { %v3381_v56 = vpop.f32.mrf.mxu1  ;;  %v6463_v57 = vpop.f32.mrf.mxu0 }
 0x216   : > { %v3500_v23 = vadd.f32 %v3381_v56, %v8400_v0  ;;  %v8505_v55 = vadd.f32 %v6455_v38, %v3502_v51 }
 0x217   : > { %v6404_v18 = vpop.f32.mrf.mxu1  ;;  %v3876_v48 = vpop.f32.mrf.mxu0 }
 0x218   : > { %v3503_v45 = vadd.f32 %v6404_v18, %v8403_v26  ;;  %v8508_v31 = vadd.f32 %v3844_v44, %v3500_v23 }
 0x219   : > { %v3384_v9 = vpop.f32.mrf.mxu1  ;;  %v6464_v53 = vpop.f32.mrf.mxu0 }
 0x21a   : > { %v3501_v19 = vadd.f32 %v3384_v9, %v8406_v3  ;;  %v8511_v30 = vadd.f32 %v6456_v49, %v3503_v45 }
 0x21b   : > { %v6407_v50 = vpop.f32.mrf.mxu1  ;;  %v3879_v36 = vpop.f32.mrf.mxu0 }
 0x21c   : > { %v3506_v41 = vadd.f32 %v6407_v50, %v8409_v15  ;;  %v8514_v35 = vadd.f32 %v3847_v1, %v3501_v19 }
 0x21d   : > { %v3397_v0 = vpop.f32.mrf.mxu1  ;;  %v6467_v38 = vpop.f32.mrf.mxu0 }
 0x21e   : > { %v3504_v43 = vadd.f32 %v3397_v0, %v8412_v14  ;;  %v8517_v63 = vadd.f32 %v6459_v10, %v3506_v41 }
 0x21f   : > { %v6408_v26 = vpop.f32.mrf.mxu1  ;;  %v3892_v44 = vpop.f32.mrf.mxu0 }
 0x220   : > { %v3507_v59 = vadd.f32 %v6408_v26, %v8415_v42  ;;  %v8520_v28 = vadd.f32 %v3860_v34, %v3504_v43 }
 0x221   : > { %v3400_v3 = vpop.f32.mrf.mxu1  ;;  %v6468_v49 = vpop.f32.mrf.mxu0 }
 0x222   : > { %v3505_v51 = vadd.f32 %v3400_v3, %v8418_v33  ;;  %v8523_v56 = vadd.f32 %v6460_v24, %v3507_v59 }
 0x223   : > { %v6411_v15 = vpop.f32.mrf.mxu1  ;;  %v3895_v1 = vpop.f32.mrf.mxu0 }
 0x224   : > { %v3510_v23 = vadd.f32 %v6411_v15, %v8421_v5  ;;  %v8526_v18 = vadd.f32 %v3863_v2, %v3505_v51 }
 0x225   : > { %v3413_v14 = vpop.f32.mrf.mxu1  ;;  %v6471_v10 = vpop.f32.mrf.mxu0 }
 0x226   : > { %v3508_v45 = vadd.f32 %v3413_v14, %v8424_v40  ;;  %v8529_v9 = vadd.f32 %v6463_v57, %v3510_v23 }
 0x227   : > { %v6412_v42 = vpop.f32.mrf.mxu1  ;;  %v3908_v34 = vpop.f32.mrf.mxu0 }
 0x228   : > { %v3511_v19 = vadd.f32 %v6412_v42, %v8427_v47  ;;  %v8532_v50 = vadd.f32 %v3876_v48, %v3508_v45 }
 0x229   : > { %v3416_v33 = vpop.f32.mrf.mxu1  ;;  %v6472_v24 = vpop.f32.mrf.mxu0 }
 0x22a   : > { %v3509_v41 = vadd.f32 %v3416_v33, %v8430_v8  ;;  %v8535_v0 = vadd.f32 %v6464_v53, %v3511_v19 }
 0x22b   : > { %v6415_v5 = vpop.f32.mrf.mxu1  ;;  %v3911_v2 = vpop.f32.mrf.mxu0 }
 0x22c   : > { %v3514_v43 = vadd.f32 %v6415_v5, %v8433_v13  ;;  %v8538_v26 = vadd.f32 %v3879_v36, %v3509_v41 }
 0x22d   : > { %v3429_v40 = vpop.f32.mrf.mxu1  ;;  %v6475_v57 = vpop.f32.mrf.mxu0 }
 0x22e   : > { %v3512_v59 = vadd.f32 %v3429_v40, %v8436_v52  ;;  %v8541_v3 = vadd.f32 %v6467_v38, %v3514_v43 }
 0x22f   : > { %v6416_v47 = vpop.f32.mrf.mxu1  ;;  %v3924_v48 = vpop.f32.mrf.mxu0 }
 0x230   : > { %v3515_v51 = vadd.f32 %v6416_v47, %v8439_v58  ;;  %v8544_v15 = vadd.f32 %v3892_v44, %v3512_v59 }
 0x231   : > { %v3432_v8 = vpop.f32.mrf.mxu1  ;;  %v6476_v53 = vpop.f32.mrf.mxu0 }
 0x232   : > { %v3513_v23 = vadd.f32 %v3432_v8, %v8442_v6  ;;  %v8547_v14 = vadd.f32 %v6468_v49, %v3515_v51 }
 0x233   : > { %v6419_v13 = vpop.f32.mrf.mxu1  ;;  %v3927_v36 = vpop.f32.mrf.mxu0 }
 0x234   : > { %v3518_v45 = vadd.f32 %v6419_v13, %v8445_v29  ;;  %v8550_v42 = vadd.f32 %v3895_v1, %v3513_v23 }
 0x235   : > { %v3445_v52 = vpop.f32.mrf.mxu1  ;;  %v6479_v38 = vpop.f32.mrf.mxu0 }
 0x236   : > { %v3516_v19 = vadd.f32 %v3445_v52, %v8448_v20  ;;  %v8553_v33 = vadd.f32 %v6471_v10, %v3518_v45 }
 0x237   : > { %v6420_v58 = vpop.f32.mrf.mxu1  ;;  %v3940_v44 = vpop.f32.mrf.mxu0 }
 0x238   : > { %v3519_v41 = vadd.f32 %v6420_v58, %v8451_v17  ;;  %v8556_v5 = vadd.f32 %v3908_v34, %v3516_v19 }
 0x239   : > { %v3448_v6 = vpop.f32.mrf.mxu1  ;;  %v6480_v49 = vpop.f32.mrf.mxu0 }
 0x23a   : > { %v3517_v43 = vadd.f32 %v3448_v6, %v8454_v21  ;;  %v8559_v40 = vadd.f32 %v6472_v24, %v3519_v41 }
 0x23b   : > { %v6423_v29 = vpop.f32.mrf.mxu1  ;;  %v3943_v1 = vpop.f32.mrf.mxu0 }
 0x23c   : > { %v3522_v59 = vadd.f32 %v6423_v29, %v8457_v39  ;;  %v8562_v47 = vadd.f32 %v3911_v2, %v3517_v43 }
 0x23d   : > { %v3461_v20 = vpop.f32.mrf.mxu1  ;;  %v6551_v10 = vpop.f32.mrf.mxu0 }
 0x23e   : > { %v3520_v51 = vadd.f32 %v3461_v20, %v8460_v16  ;;  %v8565_v8 = vadd.f32 %v6475_v57, %v3522_v59 }
 0x23f   : > { %v6424_v17 = vpop.f32.mrf.mxu1  ;;  %v4621_v34 = vpop.f32.mrf.mxu0 }
 0x240   : > { %v3523_v23 = vadd.f32 %v6424_v17, %v8463_v22  ;;  %v8568_v13 = vadd.f32 %v3924_v48, %v3520_v51 }
 0x241   : > { %v3464_v21 = vpop.f32.mrf.mxu1  ;;  %v6552_v24 = vpop.f32.mrf.mxu0 }
 0x242   : > { %v3521_v45 = vadd.f32 %v3464_v21, %v8466_v4  ;;  %v8571_v52 = vadd.f32 %v6476_v53, %v3523_v23 }
 0x243   : > { %v6427_v39 = vpop.f32.mrf.mxu1  ;;  %v4624_v2 = vpop.f32.mrf.mxu0 }
 0x244   : > { %v3526_v19 = vadd.f32 %v6427_v39, %v8469_v11  ;;  %v8574_v58 = vadd.f32 %v3927_v36, %v3521_v45 }
 0x245   : > { %v3477_v16 = vpop.f32.mrf.mxu1  ;;  %v6555_v57 = vpop.f32.mrf.mxu0 }
 0x246   : > { %v3524_v41 = vadd.f32 %v3477_v16, %v8472_v62  ;;  %v8577_v6 = vadd.f32 %v6479_v38, %v3526_v19 }
 0x247   : > { %v6428_v22 = vpop.f32.mrf.mxu1  ;;  %v4637_v48 = vpop.f32.mrf.mxu0 }
 0x248   : > { %v3527_v43 = vadd.f32 %v6428_v22, %v8475_v46  ;;  %v8580_v29 = vadd.f32 %v3940_v44, %v3524_v41  ;;  %v8596_v44 = vld [vmem:[%s8876_s5] ss:$0 sm:$0xff] }
 0x249   : > { %v3480_v4 = vpop.f32.mrf.mxu1  ;;  %v6556_v53 = vpop.f32.mrf.mxu0 }
 0x24a   : > { %v3525_v59 = vadd.f32 %v3480_v4, %v8478_v7  ;;  %v8583_v20 = vadd.f32 %v6480_v49, %v3527_v43 }
 0x24b   : > { %v6499_v11 = vpop.f32.mrf.mxu1  ;;  %v8585_v36 = vpop.f32.mrf.mxu0 }
 0x24c   : > { %v4428_v51 = vadd.f32 %v6499_v11, %v8481_v60  ;;  %v8588_v62 = vadd.f32 %v3943_v1, %v3525_v59 }
 0x24d   : > { %v4283_v38 = vpop.f32.mrf.mxu1  ;;  %v8590_v17 = vpop.f32.mrf.mxu0 }
 0x24e   : > { %v4766_v23 = vadd.f32 %v6551_v10, %v4428_v51  ;;  %v4426_v46 = vadd.f32 %v4283_v38, %v8484_v25  ;;  %v6760_v51 = vld [vmem:[%s8874_s3 + $0x18] sm:$0xff] }
 0x24f   : > { %v6500_v7 = vpop.f32.mrf.mxu1  ;;  %v8598_v49 = vpop.f32.mrf.mxu0 }
 0x250   : > { %v4764_v21 = vadd.f32 %v4621_v34, %v4426_v46  ;;  %v4429_v45 = vadd.f32 %v6500_v7, %v8487_v54  ;;  %v4809_v39 = vadd.f32 %v8596_v44, %v4766_v23  ;;  %v6758_v54 = vld [vmem:[%s8874_s3] sm:$0xff] }
 0x251   : > { %v4286_v60 = vpop.f32.mrf.mxu1  ;;  %v8601_v1 = vpop.f32.mrf.mxu0 }
 0x252   : > { %v4807_v10 = vadd.f32 %v8596_v44, %v4764_v21  ;;  %v4767_v19 = vadd.f32 %v6552_v24, %v4429_v45  ;;  %v4427_v25 = vadd.f32 %v4286_v60, %v8490_v61  ;;  %v6759_v61 = vld [vmem:[%s8874_s3 + $0x10] sm:$0xff]  ;;  %v6761_v45 = vld [vmem:[%s8874_s3 + $0x8] sm:$0xff] }
 0x253   : > { %v6503_v16 = vpop.f32.mrf.mxu1  ;;  %v8606_v41 = vpop.f32.mrf.mxu0  ;;  %v4845_v24 = vmul.f32 %v6759_v61, %v4809_v39 }
 0x254   : > { %v4810_v22 = vadd.f32 %v8596_v44, %v4767_v19  ;;  %v4765_v43 = vadd.f32 %v4624_v2, %v4427_v25  ;;  %v4843_v34 = vmul.f32 %v6758_v54, %v4807_v10  ;;  %v4432_v4 = vadd.f32 %v6503_v16, %v8493_v12 }
 0x255   : > { %v4299_v59 = vpop.f32.mrf.mxu1  ;;  %v8613_v11 = vpop.f32.mrf.mxu0  ;;  %v4922_v54 = vmul.f32 %v4845_v24, %v4845_v24 }
 0x256   : > { %v4846_v2 = vmul.f32 %v6760_v51, %v4810_v22  ;;  %v4808_v38 = vadd.f32 %v8596_v44, %v4765_v43  ;;  %v4430_v23 = vadd.f32 %v4299_v59, %v8496_v27  ;;  %v4770_v12 = vadd.f32 %v6555_v57, %v4432_v4 }
 0x257   : > { %v6504_v46 = vpop.f32.mrf.mxu1  ;;  %v8630_v7 = vpop.f32.mrf.mxu0  ;;  %v4920_v10 = vmul.f32 %v4843_v34, %v4843_v34 }
 0x258   : > { %v5767_v21 = vpack.c.bf16 %v4846_v2, %v4845_v24  ;;  %v4844_v60 = vmul.f32 %v6761_v45, %v4808_v38  ;;  %v4768_v39 = vadd.f32 %v4637_v48, %v4430_v23  ;;  %v4433_v27 = vadd.f32 %v6504_v46, %v8499_v32  ;;  %v6762_v23 = vld [vmem:[%s8874_s3 + $0x20] sm:$0xff] }
 0x259   : > { %v4302_v19 = vpop.f32.mrf.mxu1  ;;  %v8636_v25 = vpop.f32.mrf.mxu0  ;;  %v4813_v4 = vadd.f32 %v8596_v44, %v4770_v12 }
 0x25a   : > { %5866 = vst [vmem:[%s8628_s10 + $0x8] sm:$0xff] %v5767_v21   ;;  %v4879_v16 = vadd.f32 %v4844_v60, %v4843_v34  ;;  %v4921_v57 = vmul.f32 %v4844_v60, %v4844_v60  ;;  %v5762_v22 = vpack.c.bf16 %v4844_v60, %v4843_v34  ;;  %v4811_v43 = vadd.f32 %v8596_v44, %v4768_v39 }
 0x25b   : > { %v4771_v59 = vadd.f32 %v6556_v53, %v4433_v27  ;;  %v4431_v61 = vadd.f32 %v4302_v19, %v8502_v37  ;;  %v6507_v48 = vpop.f32.mrf.mxu1  ;;  %v8642_v51 = vpop.f32.mrf.mxu0  ;;  %v4923_v37 = vmul.f32 %v4846_v2, %v4846_v2 }
 0x25c   : > { %v4880_v32 = vadd.f32 %v4879_v16, %v4845_v24  ;;  %v4956_v38 = vadd.f32 %v4921_v57, %v4920_v10  ;;  %5763 = vst [vmem:[%s8628_s10] sm:$0xff] %v5762_v22   ;;  %v4847_v46 = vmul.f32 %v6762_v23, %v4811_v43  ;;  %v4436_v34 = vadd.f32 %v6507_v48, %v8505_v55  ;;  %v6763_v10 = vld [vmem:[%s8874_s3 + $0x30] sm:$0xff]  ;;  %v6764_v55 = vld [vmem:[%s8874_s3 + $0x38] sm:$0xff] }
 0x25d   : > { %v4814_v21 = vadd.f32 %v8596_v44, %v4771_v59  ;;  %v4769_v12 = vadd.f32 %v8585_v36, %v4431_v61  ;;  %v4315_v53 = vpop.f32.mrf.mxu1  ;;  %v8651_v45 = vpop.f32.mrf.mxu0  ;;  %v4849_v27 = vmul.f32 %v6763_v10, %v4813_v4  ;;  %v6765_v4 = vld [vmem:[%s8874_s3 + $0x28] sm:$0xff] }
 0x25e   : > { %v4957_v60 = vadd.f32 %v4956_v38, %v4922_v54  ;;  %v4881_v39 = vadd.f32 %v4880_v32, %v4846_v2  ;;  %v4774_v24 = vadd.f32 %v8590_v17, %v4436_v34  ;;  %v4434_v16 = vadd.f32 %v4315_v53, %v8508_v31 }
 0x25f   : > { %v4850_v19 = vmul.f32 %v6764_v55, %v4814_v21  ;;  %v4812_v36 = vadd.f32 %v8596_v44, %v4769_v12  ;;  %v6508_v57 = vpop.f32.mrf.mxu1  ;;  %v8662_v22 = vpop.f32.mrf.mxu0  ;;  %v4924_v17 = vmul.f32 %v4847_v46, %v4847_v46 }
 0x260   : > { %v4882_v2 = vadd.f32 %v4881_v39, %v4847_v46  ;;  %v4958_v43 = vadd.f32 %v4957_v60, %v4923_v37  ;;  %v4437_v54 = vadd.f32 %v6508_v57, %v8511_v30  ;;  %v4817_v48 = vadd.f32 %v8596_v44, %v4774_v24 }
 0x261   : > { %v5777_v59 = vpack.c.bf16 %v4850_v19, %v4849_v27  ;;  %v4848_v61 = vmul.f32 %v6765_v4, %v4812_v36  ;;  %v4772_v32 = vadd.f32 %v8598_v49, %v4434_v16  ;;  %v4318_v31 = vpop.f32.mrf.mxu1  ;;  %v8670_v38 = vpop.f32.mrf.mxu0  ;;  %v4926_v24 = vmul.f32 %v4849_v27, %v4849_v27  ;;  %v6767_v16 = vld [vmem:[%s8874_s3 + $0x40] sm:$0xff] }
 0x262   : > { %v4959_v23 = vadd.f32 %v4958_v43, %v4924_v17  ;;  %v4775_v34 = vadd.f32 %v8601_v1, %v4437_v54  ;;  %v4435_v21 = vadd.f32 %v4318_v31, %v8514_v35  ;;  %v6766_v35 = vld [vmem:[%s8874_s3 + $0x50] sm:$0xff] }
 0x263   : > { %5868 = vst [vmem:[%s8628_s10 + $0x18] sm:$0xff] %v5777_v59   ;;  %v4883_v30 = vadd.f32 %v4882_v2, %v4848_v61  ;;  %v4925_v12 = vmul.f32 %v4848_v61, %v4848_v61  ;;  %v5772_v53 = vpack.c.bf16 %v4848_v61, %v4847_v46  ;;  %v4815_v37 = vadd.f32 %v8596_v44, %v4772_v32  ;;  %v6511_v60 = vpop.f32.mrf.mxu1  ;;  %v8676_v39 = vpop.f32.mrf.mxu0 }
 0x264   : > { %v4818_v49 = vadd.f32 %v8596_v44, %v4775_v34  ;;  %v4773_v10 = vadd.f32 %v8606_v41, %v4435_v21  ;;  %v4440_v55 = vadd.f32 %v6511_v60, %v8517_v63  ;;  %v4853_v46 = vmul.f32 %v6766_v35, %v4817_v48  ;;  %v6768_v63 = vld [vmem:[%s8874_s3 + $0x58] sm:$0xff]  ;;  %v6769_v34 = vld [vmem:[%s8874_s3 + $0x48] sm:$0xff] }
 0x265   : > { %v4884_v36 = vadd.f32 %v4883_v30, %v4849_v27  ;;  %v4960_v1 = vadd.f32 %v4959_v23, %v4925_v12  ;;  %5867 = vst [vmem:[%s8628_s10 + $0x10] sm:$0xff] %v5772_v53   ;;  %v4851_v57 = vmul.f32 %v6767_v16, %v4815_v37  ;;  %v4331_v2 = vpop.f32.mrf.mxu1  ;;  %v8688_v17 = vpop.f32.mrf.mxu0  ;;  %v4927_v59 = vmul.f32 %v4850_v19, %v4850_v19 }
 0x266   : > { %v4854_v41 = vmul.f32 %v6768_v63, %v4818_v49  ;;  %v4816_v27 = vadd.f32 %v8596_v44, %v4773_v10  ;;  %v4778_v43 = vadd.f32 %v8613_v11, %v4440_v55  ;;  %v4438_v54 = vadd.f32 %v4331_v2, %v8520_v28 }
 0x267   : > { %v4961_v4 = vadd.f32 %v4960_v1, %v4926_v24  ;;  %v4885_v61 = vadd.f32 %v4884_v36, %v4850_v19  ;;  %v6512_v48 = vpop.f32.mrf.mxu1  ;;  %v8696_v32 = vpop.f32.mrf.mxu0  ;;  %v4928_v31 = vmul.f32 %v4851_v57, %v4851_v57 }
 0x268   : > { %v5787_v23 = vpack.c.bf16 %v4854_v41, %v4853_v46  ;;  %v4852_v21 = vmul.f32 %v6769_v34, %v4816_v27  ;;  %v4776_v11 = vadd.f32 %v8630_v7, %v4438_v54  ;;  %v4441_v28 = vadd.f32 %v6512_v48, %v8523_v56 }
 0x269   : > { %v4886_v30 = vadd.f32 %v4885_v61, %v4851_v57  ;;  %v4962_v12 = vadd.f32 %v4961_v4, %v4927_v59  ;;  %v4334_v53 = vpop.f32.mrf.mxu1  ;;  %v8703_v37 = vpop.f32.mrf.mxu0  ;;  %v4821_v24 = vadd.f32 %v8596_v44, %v4778_v43  ;;  %v4930_v56 = vmul.f32 %v4853_v46, %v4853_v46 }
 0x26a   : > { %5870 = vst [vmem:[%s8628_s10 + $0x28] sm:$0xff] %v5787_v23   ;;  %v4929_v19 = vmul.f32 %v4852_v21, %v4852_v21  ;;  %v5782_v60 = vpack.c.bf16 %v4852_v21, %v4851_v57  ;;  %v4439_v49 = vadd.f32 %v4334_v53, %v8526_v18  ;;  %v4819_v36 = vadd.f32 %v8596_v44, %v4776_v11  ;;  %v6770_v18 = vld [vmem:[%s8874_s3 + $0x60] sm:$0xff]  ;;  %v6772_v23 = vld [vmem:[%s8874_s3 + $0x78] sm:$0xff] }
 0x26b   : > { %v4963_v10 = vadd.f32 %v4962_v12, %v4928_v31  ;;  %v4887_v55 = vadd.f32 %v4886_v30, %v4852_v21  ;;  %v4779_v1 = vadd.f32 %v8636_v25, %v4441_v28  ;;  %v6515_v7 = vpop.f32.mrf.mxu1  ;;  %v8710_v35 = vpop.f32.mrf.mxu0  ;;  %v4931_v59 = vmul.f32 %v4854_v41, %v4854_v41 }
 0x26c   : > { %5869 = vst [vmem:[%s8628_s10 + $0x20] sm:$0xff] %v5782_v60   ;;  %v4777_v16 = vadd.f32 %v8642_v51, %v4439_v49  ;;  %v4444_v2 = vadd.f32 %v6515_v7, %v8529_v9  ;;  %v4855_v27 = vmul.f32 %v6770_v18, %v4819_v36 }
 0x26d   : > { %v4888_v57 = vadd.f32 %v4887_v55, %v4853_v46  ;;  %v4964_v63 = vadd.f32 %v4963_v10, %v4929_v19  ;;  %v4822_v43 = vadd.f32 %v8596_v44, %v4779_v1  ;;  %v4347_v54 = vpop.f32.mrf.mxu1  ;;  %v8719_v25 = vpop.f32.mrf.mxu0  ;;  %v6771_v46 = vld [vmem:[%s8874_s3 + $0x70] sm:$0xff] }
 0x26e   : > { %v4820_v4 = vadd.f32 %v8596_v44, %v4777_v16  ;;  %v4782_v61 = vadd.f32 %v8651_v45, %v4444_v2  ;;  %v4442_v51 = vadd.f32 %v4347_v54, %v8532_v50  ;;  %v4857_v48 = vmul.f32 %v6771_v46, %v4821_v24  ;;  %v6773_v50 = vld [vmem:[%s8874_s3 + $0x68] sm:$0xff]  ;;  %v6774_v2 = vld [vmem:[%s8874_s3 + $0x80] sm:$0xff] }
 0x26f   : > { %v4965_v9 = vadd.f32 %v4964_v63, %v4930_v56  ;;  %v4889_v31 = vadd.f32 %v4888_v57, %v4854_v41  ;;  %v4858_v34 = vmul.f32 %v6772_v23, %v4822_v43  ;;  %v6516_v21 = vpop.f32.mrf.mxu1  ;;  %v8730_v30 = vpop.f32.mrf.mxu0  ;;  %v4932_v41 = vmul.f32 %v4855_v27, %v4855_v27 }
 0x270   : > { %v4856_v45 = vmul.f32 %v6773_v50, %v4820_v4  ;;  %v4780_v12 = vadd.f32 %v8662_v22, %v4442_v51  ;;  %v4445_v11 = vadd.f32 %v6516_v21, %v8535_v0  ;;  %v4825_v55 = vadd.f32 %v8596_v44, %v4782_v61  ;;  %v6775_v4 = vld [vmem:[%s8874_s3 + $0x90] sm:$0xff] }
 0x271   : > { %v4890_v28 = vadd.f32 %v4889_v31, %v4855_v27  ;;  %v4966_v53 = vadd.f32 %v4965_v9, %v4931_v59  ;;  %v5797_v19 = vpack.c.bf16 %v4858_v34, %v4857_v48  ;;  %v4350_v60 = vpop.f32.mrf.mxu1  ;;  %v8737_v24 = vpop.f32.mrf.mxu0  ;;  %v4934_v16 = vmul.f32 %v4857_v48, %v4857_v48 }
 0x272   : > { %v4933_v49 = vmul.f32 %v4856_v45, %v4856_v45  ;;  %v5792_v10 = vpack.c.bf16 %v4856_v45, %v4855_v27  ;;  %v4823_v36 = vadd.f32 %v8596_v44, %v4780_v12  ;;  %v4783_v22 = vadd.f32 %v8670_v38, %v4445_v11 }
 0x273   : > { %v4967_v1 = vadd.f32 %v4966_v53, %v4932_v41  ;;  %5872 = vst [vmem:[%s8628_s10 + $0x38] sm:$0xff] %v5797_v19   ;;  %v4891_v7 = vadd.f32 %v4890_v28, %v4856_v45  ;;  %v4443_v0 = vadd.f32 %v4350_v60, %v8538_v26  ;;  %v6519_v56 = vpop.f32.mrf.mxu1  ;;  %v8751_v38 = vpop.f32.mrf.mxu0  ;;  %v4935_v26 = vmul.f32 %v4858_v34, %v4858_v34 }
 0x274   : > { %5871 = vst [vmem:[%s8628_s10 + $0x30] sm:$0xff] %v5792_v10   ;;  %v4859_v57 = vmul.f32 %v6774_v2, %v4823_v36  ;;  %v4448_v63 = vadd.f32 %v6519_v56, %v8541_v3  ;;  %v4826_v43 = vadd.f32 %v8596_v44, %v4783_v22  ;;  %v4861_v61 = vmul.f32 %v6775_v4, %v4825_v55 }
 0x275   : > { %v4892_v18 = vadd.f32 %v4891_v7, %v4857_v48  ;;  %v4968_v27 = vadd.f32 %v4967_v1, %v4933_v49  ;;  %v4781_v54 = vadd.f32 %v8676_v39, %v4443_v0  ;;  %v4363_v59 = vpop.f32.mrf.mxu1  ;;  %v6776_v48 = vld [vmem:[%s8874_s3 + $0x98] sm:$0xff]  ;;  %v8764_v28 = vpop.f32.mrf.mxu0  ;;  %v6778_v7 = vld [vmem:[%s8874_s3 + $0xa0] sm:$0xff] }
 0x276   : > { %v4786_v51 = vadd.f32 %v8688_v17, %v4448_v63  ;;  %v4446_v9 = vadd.f32 %v4363_v59, %v8544_v15  ;;  %v4862_v39 = vmul.f32 %v6776_v48, %v4826_v43  ;;  %v4936_v12 = vmul.f32 %v4859_v57, %v4859_v57 }
 0x277   : > { %v4969_v3 = vadd.f32 %v4968_v27, %v4934_v16  ;;  %v4893_v46 = vadd.f32 %v4892_v18, %v4858_v34  ;;  %v4824_v31 = vadd.f32 %v8596_v44, %v4781_v54  ;;  %v6520_v23 = vpop.f32.mrf.mxu1  ;;  %v6777_v34 = vld [vmem:[%s8874_s3 + $0x88] sm:$0xff]  ;;  %v4938_v10 = vmul.f32 %v4861_v61, %v4861_v61  ;;  %v4733_v2 = vpop.f32.mrf.mxu0  ;;  %v6780_v54 = vld [vmem:[%s8874_s3 + $0xb8] sm:$0xff] }
 0x278   : > { %v4784_v21 = vadd.f32 %v8696_v32, %v4446_v9  ;;  %v4449_v50 = vadd.f32 %v6520_v23, %v8547_v14  ;;  %v5807_v11 = vpack.c.bf16 %v4862_v39, %v4861_v61  ;;  %v4829_v14 = vadd.f32 %v8596_v44, %v4786_v51 }
 0x279   : > { %v4894_v45 = vadd.f32 %v4893_v46, %v4859_v57  ;;  %v4970_v17 = vadd.f32 %v4969_v3, %v4935_v26  ;;  %v4366_v15 = vpop.f32.mrf.mxu1  ;;  %v4860_v41 = vmul.f32 %v6777_v34, %v4824_v31  ;;  %v6781_v46 = vld [vmem:[%s8874_s3 + $0xa8] sm:$0xff] }
 0x27a   : > { %v4827_v53 = vadd.f32 %v8596_v44, %v4784_v21  ;;  %v4787_v19 = vadd.f32 %v8703_v37, %v4449_v50  ;;  %5874 = vst [vmem:[%s8628_s10 + $0x48] sm:$0xff] %v5807_v11   ;;  %v4447_v32 = vadd.f32 %v4366_v15, %v8550_v42  ;;  %v4939_v42 = vmul.f32 %v4862_v39, %v4862_v39 }
 0x27b   : > { %v4971_v60 = vadd.f32 %v4970_v17, %v4936_v12  ;;  %v6523_v49 = vpop.f32.mrf.mxu1  ;;  %v4895_v55 = vadd.f32 %v4894_v45, %v4860_v41  ;;  %v4937_v36 = vmul.f32 %v4860_v41, %v4860_v41  ;;  %v5802_v1 = vpack.c.bf16 %v4860_v41, %v4859_v57  ;;  %v6779_v57 = vld [vmem:[%s8874_s3 + $0xb0] sm:$0xff] }
 0x27c   : > { %v4863_v22 = vmul.f32 %v6778_v7, %v4827_v53  ;;  %v4830_v0 = vadd.f32 %v8596_v44, %v4787_v19  ;;  %v4785_v37 = vadd.f32 %v8710_v35, %v4447_v32  ;;  %v4452_v56 = vadd.f32 %v6523_v49, %v8553_v33  ;;  %v6782_v53 = vld [vmem:[%s8874_s3 + $0xd0] sm:$0xff] }
 0x27d   : > { %v4379_v16 = vpop.f32.mrf.mxu1  ;;  %v4896_v63 = vadd.f32 %v4895_v55, %v4861_v61  ;;  %v4972_v18 = vadd.f32 %v4971_v60, %v4937_v36  ;;  %5873 = vst [vmem:[%s8628_s10 + $0x40] sm:$0xff] %v5802_v1   ;;  %v4865_v43 = vmul.f32 %v6779_v57, %v4829_v14  ;;  %v6784_v36 = vld [vmem:[%s8874_s3 + $0xd8] sm:$0xff] }
 0x27e   : > { %v4450_v27 = vadd.f32 %v4379_v16, %v8556_v5  ;;  %v4866_v35 = vmul.f32 %v6780_v54, %v4830_v0  ;;  %v4828_v33 = vadd.f32 %v8596_v44, %v4785_v37  ;;  %v4790_v59 = vadd.f32 %v8719_v25, %v4452_v56  ;;  %v6580_v25 = vpop.f32.mrf.mxu0 }
 0x27f   : > { %v6524_v26 = vpop.f32.mrf.mxu1  ;;  %v4973_v4 = vadd.f32 %v4972_v18, %v4938_v10  ;;  %v4897_v61 = vadd.f32 %v4896_v63, %v4862_v39  ;;  %v4940_v9 = vmul.f32 %v4863_v22, %v4863_v22  ;;  %v4942_v41 = vmul.f32 %v4865_v43, %v4865_v43  ;;  %v6783_v10 = vld [vmem:[%s8874_s3 + $0xc0] sm:$0xff] }
 0x280   : > { %v4788_v5 = vadd.f32 %v8730_v30, %v4450_v27  ;;  %v4453_v51 = vadd.f32 %v6524_v26, %v8559_v40  ;;  %v5817_v3 = vpack.c.bf16 %v4866_v35, %v4865_v43  ;;  %v4864_v48 = vmul.f32 %v6781_v46, %v4828_v33  ;;  %v4736_v32 = vpop.f32.mrf.mxu0 }
 0x281   : > { %v4833_v31 = vadd.f32 %v8596_v44, %v4790_v59  ;;  %v4382_v23 = vpop.f32.mrf.mxu1  ;;  %v4898_v21 = vadd.f32 %v4897_v61, %v4863_v22  ;;  %v4974_v50 = vadd.f32 %v4973_v4, %v4939_v42  ;;  %v4943_v0 = vmul.f32 %v4866_v35, %v4866_v35  ;;  %v6785_v42 = vld [vmem:[%s8874_s3 + $0xc8] sm:$0xff] }
 0x282   : > { %v4831_v39 = vadd.f32 %v8596_v44, %v4788_v5  ;;  %v4791_v30 = vadd.f32 %v8737_v24, %v4453_v51  ;;  %5876 = vst [vmem:[%s8628_s10 + $0x58] sm:$0xff] %v5817_v3   ;;  %v4941_v40 = vmul.f32 %v4864_v48, %v4864_v48  ;;  %v5812_v45 = vpack.c.bf16 %v4864_v48, %v4863_v22  ;;  %v6583_v57 = vpop.f32.mrf.mxu0  ;;  %v6786_v3 = vld [vmem:[%s8874_s3 + $0xe0] sm:$0xff] }
 0x283   : > { %v4451_v12 = vadd.f32 %v4382_v23, %v8562_v47  ;;  %v6527_v17 = vpop.f32.mrf.mxu1  ;;  %v4975_v11 = vadd.f32 %v4974_v50, %v4940_v9  ;;  %v4899_v15 = vadd.f32 %v4898_v21, %v4864_v48  ;;  %v4869_v19 = vmul.f32 %v6782_v53, %v4833_v31 }
 0x284   : > { %v4834_v34 = vadd.f32 %v8596_v44, %v4791_v30  ;;  %5875 = vst [vmem:[%s8628_s10 + $0x50] sm:$0xff] %v5812_v45   ;;  %v4456_v24 = vadd.f32 %v6527_v17, %v8565_v8  ;;  %v4867_v55 = vmul.f32 %v6783_v10, %v4831_v39  ;;  %v4749_v48 = vpop.f32.mrf.mxu0 }
 0x285   : > { %v4789_v60 = vadd.f32 %v8751_v38, %v4451_v12  ;;  %v4395_v14 = vpop.f32.mrf.mxu1  ;;  %v4900_v49 = vadd.f32 %v4899_v15, %v4865_v43  ;;  %v4976_v47 = vadd.f32 %v4975_v11, %v4941_v40  ;;  %v4946_v9 = vmul.f32 %v4869_v19, %v4869_v19 }
 0x286   : > { %v4870_v1 = vmul.f32 %v6784_v36, %v4834_v34  ;;  %v4794_v38 = vadd.f32 %v8764_v28, %v4456_v24  ;;  %v4454_v8 = vadd.f32 %v4395_v14, %v8568_v13  ;;  %v4944_v54 = vmul.f32 %v4867_v55, %v4867_v55 }
 0x287   : > { %v4832_v7 = vadd.f32 %v8596_v44, %v4789_v60  ;;  %v6528_v22 = vpop.f32.mrf.mxu1  ;;  %v4977_v37 = vadd.f32 %v4976_v47, %v4942_v41  ;;  %v4901_v56 = vadd.f32 %v4900_v49, %v4866_v35  ;;  %v6789_v41 = vld [vmem:[%s8874_s3 + $0xe8] sm:$0xff] }
 0x288   : > { %v5827_v16 = vpack.c.bf16 %v4870_v1, %v4869_v19  ;;  %v4792_v18 = vadd.f32 %v4733_v2, %v4454_v8  ;;  %v4457_v27 = vadd.f32 %v6528_v22, %v8571_v52  ;;  %v4837_v26 = vadd.f32 %v8596_v44, %v4794_v38 }
 0x289   : > { %v4868_v63 = vmul.f32 %v6785_v42, %v4832_v7  ;;  %v4398_v43 = vpop.f32.mrf.mxu1  ;;  %v4902_v28 = vadd.f32 %v4901_v56, %v4867_v55  ;;  %v4978_v33 = vadd.f32 %v4977_v37, %v4943_v0  ;;  %v4947_v30 = vmul.f32 %v4870_v1, %v4870_v1 }
 0x28a   : > { %5878 = vst [vmem:[%s8628_s10 + $0x68] sm:$0xff] %v5827_v16   ;;  %v4455_v13 = vadd.f32 %v4398_v43, %v8574_v58  ;;  %v4835_v4 = vadd.f32 %v8596_v44, %v4792_v18  ;;  %v4795_v51 = vadd.f32 %v6580_v25, %v4457_v27  ;;  %v6787_v25 = vld [vmem:[%s8874_s3 + $0xf0] sm:$0xff] }
 0x28b   : > { %v4945_v59 = vmul.f32 %v4868_v63, %v4868_v63  ;;  %v5822_v35 = vpack.c.bf16 %v4868_v63, %v4867_v55  ;;  %v6531_v61 = vpop.f32.mrf.mxu1  ;;  %v4979_v5 = vadd.f32 %v4978_v33, %v4944_v54  ;;  %v4903_v2 = vadd.f32 %v4902_v28, %v4868_v63  ;;  %v6792_v54 = vld [vmem:[%s8874_s3 + $0x118] sm:$0xff] }
 0x28c   : > { %v4793_v52 = vadd.f32 %v4736_v32, %v4455_v13  ;;  %v4871_v46 = vmul.f32 %v6786_v3, %v4835_v4  ;;  %v4460_v58 = vadd.f32 %v6531_v61, %v8577_v6  ;;  %v4838_v50 = vadd.f32 %v8596_v44, %v4795_v51  ;;  %v6788_v6 = vld [vmem:[%s8874_s3 + $0xf8] sm:$0xff]  ;;  %v6793_v61 = vld [vmem:[%s8874_s3 + $0x108] sm:$0xff] }
 0x28d   : > { %5877 = vst [vmem:[%s8628_s10 + $0x60] sm:$0xff] %v5822_v35   ;;  %v4411_v31 = vpop.f32.mrf.mxu1  ;;  %v4904_v23 = vadd.f32 %v4903_v2, %v4869_v19  ;;  %v4980_v21 = vadd.f32 %v4979_v5, %v4945_v59  ;;  %v4873_v40 = vmul.f32 %v6787_v25, %v4837_v26  ;;  %v6584_v19 = vpop.f32.mrf.mxu0 }
 0x28e   : > { %v4836_v39 = vadd.f32 %v8596_v44, %v4793_v52  ;;  %v4798_v45 = vadd.f32 %v6583_v57, %v4460_v58  ;;  %v4458_v12 = vadd.f32 %v4411_v31, %v8580_v29  ;;  %v4874_v34 = vmul.f32 %v6788_v6, %v4838_v50  ;;  %v6791_v57 = vld [vmem:[%s8874_s3 + $0x110] sm:$0xff] }
 0x28f   : > { %v6532_v17 = vpop.f32.mrf.mxu1  ;;  %v4981_v11 = vadd.f32 %v4980_v21, %v4946_v9  ;;  %v4905_v15 = vadd.f32 %v4904_v23, %v4870_v1  ;;  %v4948_v32 = vmul.f32 %v4871_v46, %v4871_v46  ;;  %v4950_v0 = vmul.f32 %v4873_v40, %v4873_v40  ;;  %v4752_v56 = vpop.f32.mrf.mxu0 }
 0x290   : > { %v4872_v53 = vmul.f32 %v6789_v41, %v4836_v39  ;;  %v4796_v60 = vadd.f32 %v4749_v48, %v4458_v12  ;;  %v4461_v24 = vadd.f32 %v6532_v17, %v8583_v20  ;;  %v5837_v47 = vpack.c.bf16 %v4874_v34, %v4873_v40  ;;  %v6790_v20 = vld [vmem:[%s8874_s3 + $0x100] sm:$0xff] }
 0x291   : > { %v4414_v29 = vpop.f32.mrf.mxu1  ;;  %v4906_v14 = vadd.f32 %v4905_v15, %v4871_v46  ;;  %v4982_v49 = vadd.f32 %v4981_v11, %v4947_v30  ;;  %v4841_v36 = vadd.f32 %v8596_v44, %v4798_v45  ;;  %v4951_v27 = vmul.f32 %v4874_v34, %v4874_v34 }
 0x292   : > { %v4949_v10 = vmul.f32 %v4872_v53, %v4872_v53  ;;  %v5832_v55 = vpack.c.bf16 %v4872_v53, %v4871_v46  ;;  %v4839_v1 = vadd.f32 %v8596_v44, %v4796_v60  ;;  %5880 = vst [vmem:[%s8628_s10 + $0x78] sm:$0xff] %v5837_v47   ;;  %v4799_v8 = vadd.f32 %v6584_v19, %v4461_v24 }
 0x293   : > { %v4983_v7 = vadd.f32 %v4982_v49, %v4948_v32  ;;  %v4907_v38 = vadd.f32 %v4906_v14, %v4872_v53  ;;  %v4459_v22 = vadd.f32 %v4414_v29, %v8588_v62  ;;  %v4877_v62 = vmul.f32 %v6791_v57, %v4841_v36 }
 0x294   : > { %5879 = vst [vmem:[%s8628_s10 + $0x70] sm:$0xff] %v5832_v55   ;;  %v4875_v37 = vmul.f32 %v6790_v20, %v4839_v1  ;;  %v4842_v63 = vadd.f32 %v8596_v44, %v4799_v8 }
 0x295   : > { %v4908_v16 = vadd.f32 %v4907_v38, %v4873_v40  ;;  %v4984_v42 = vadd.f32 %v4983_v7, %v4949_v10  ;;  %v4797_v18 = vadd.f32 %v4752_v56, %v4459_v22  ;;  %v4954_v3 = vmul.f32 %v4877_v62, %v4877_v62 }
 0x296   : > { %v4878_v33 = vmul.f32 %v6792_v54, %v4842_v63  ;;  %v4952_v35 = vmul.f32 %v4875_v37, %v4875_v37 }
 0x297   : > { %v4985_v43 = vadd.f32 %v4984_v42, %v4950_v0  ;;  %v4909_v28 = vadd.f32 %v4908_v16, %v4874_v34  ;;  %v4840_v13 = vadd.f32 %v8596_v44, %v4797_v18 }
 0x298   : > { %v5847_v4 = vpack.c.bf16 %v4878_v33, %v4877_v62  ;;  %v4955_v44 = vmul.f32 %v4878_v33, %v4878_v33 }
 0x299   : > { %v4910_v59 = vadd.f32 %v4909_v28, %v4875_v37  ;;  %v4986_v26 = vadd.f32 %v4985_v43, %v4951_v27  ;;  %v4876_v5 = vmul.f32 %v6793_v61, %v4840_v13 }
 0x29a   : > { %5882 = vst [vmem:[%s8628_s10 + $0x88] sm:$0xff] %v5847_v4  }
 0x29b   : > { %v4987_v2 = vadd.f32 %v4986_v26, %v4952_v35  ;;  %v4911_v51 = vadd.f32 %v4910_v59, %v4876_v5  ;;  %v4953_v52 = vmul.f32 %v4876_v5, %v4876_v5  ;;  %v5842_v9 = vpack.c.bf16 %v4876_v5, %v4875_v37 }
 0x29d   : > { %v4912_v46 = vadd.f32 %v4911_v51, %v4877_v62  ;;  %v4988_v48 = vadd.f32 %v4987_v2, %v4953_v52  ;;  %5881 = vst [vmem:[%s8628_s10 + $0x80] sm:$0xff] %v5842_v9  }
 0x29f   : > { %v4913_v58 = vadd.f32 %v4912_v46, %v4878_v33  ;;  %v4989_v31 = vadd.f32 %v4988_v48, %v4954_v3 }
 0x2a1   : > { %v4914_v23 = vrot.slane %v4913_v58, 4  ;;  %v4990_v21 = vadd.f32 %v4989_v31, %v4955_v44 }
 0x2a3   : > { %v4915_v50 = vadd.f32 %v4914_v23, %v4913_v58  ;;  %v4991_v39 = vrot.slane %v4990_v21, 4 }
 0x2a5   : > { %v4916_v30 = vrot.slane %v4915_v50, 2  ;;  %v4992_v25 = vadd.f32 %v4991_v39, %v4990_v21 }
 0x2a7   : > { %v4917_v40 = vadd.f32 %v4916_v30, %v4915_v50  ;;  %v4993_v45 = vrot.slane %v4992_v25, 2 }
 0x2a9   : > { %v4918_v12 = vrot.slane %v4917_v40, 1  ;;  %v4994_v17 = vadd.f32 %v4993_v45, %v4992_v25 }
 0x2ab   : > { %v4995_v11 = vrot.slane %v4994_v17, 1  ;;  %v4919_v15 = vadd.f32 %v4918_v12, %v4917_v40 }
 0x2ad   : > { %v4996_v6 = vadd.f32 %v4995_v11, %v4994_v17 }
 0x2af   : > { %v4998_v34 = vsel %vm4997_vm14, %v4919_v15, %v4996_v6 }
 0x2b0   : > { %v5000_v41 = vsel %vm577_vm1, %v4998_v34, 0.0 }
 0x2b1   : > { %5001 = vst [vmem:[%s289_s18] sm:$0xff] %v5000_v41 }
 0x2b2 PF: > { %s18_s24 = sadd.s32 1, %s6800_s24  }
 0x2b3   : > { %p15_p4 = scmp.ge.s32.totalorder %s18_s24, 4  }
 0x2b5   :  { %17 = sbr.rel (!%p15_p4) target bundleno = 1 (0x1), region = 94 }

</bundles_post_ra>
